<compile_context>
chip_gen: v7x
topology: tpu7x:2x2x1
jax: 0.10.0
libtpu: 0.0.40
codegen_flags: <defaults>
</compile_context>

<pallas_src>
import jax
import jax.numpy as jnp
import numpy as np
from jax.experimental import pallas as pl
from jax.experimental.pallas import tpu as pltpu

C = 64          # fixed by ResBlock (Conv2d(64, 64, 3, 1, 1))
EPS = 1e-5      # nn.InstanceNorm2d default eps


def _make_tunnel_kernel(B, H, W, L):
    WC = W * C
    inv_hw = 1.0 / float(H * W)

    def kernel(x_ref, w1_ref, b1_ref, w2_ref, b2_ref, o_ref,
               state_ref, t_ref, pad_ref, row_ref):
        # x_ref/o_ref : (B, H, WC)            lane-dense activation blocks
        # w*_ref      : (1, 9, C, C) bf16     this layer's conv taps (streamed)
        # b*_ref      : (1, 1, C)    f32
        # state_ref   : (B, H, WC)   f32      residual stream (persists over l)
        # t_ref       : (B, H, WC)   f32      per-conv output staging
        # pad_ref     : (B, W+2, H+2, C) bf16 zero-padded C-last conv input
        # row_ref     : (B, 1, WC)   f32      tiled per-channel IN statistics
        l = pl.program_id(1)

        @pl.when(l == 0)
        def _init():
            state_ref[...] = x_ref[...].astype(jnp.float32)
            # Zero once per batch block; the interior is fully rewritten by every
            # conv, so only the halo has to stay zero.
            pad_ref[...] = jnp.zeros_like(pad_ref)

        def fold_and_tile(s, scale):
            # s: (B, WC).  Fold the W lane-groups into a per-channel (B, C) value,
            # scale it, and tile it back to (B, 1, WC) through row_ref.  Only lane
            # slices are used (no lane-splitting reshape / tile primitives).
            acc = s[:, 0:C]
            for w in range(1, W):
                acc = acc + s[:, w * C:(w + 1) * C]
            acc = acc * scale
            for w in range(W):
                row_ref[:, 0, w * C:(w + 1) * C] = acc

        def inorm_relu(v):
            # v: (B, H, WC) f32.  InstanceNorm2d (affine=False): per-image,
            # per-channel normalization over the spatial axis with two-pass
            # (centered) biased variance, then ReLU.  All ops are lane-dense.
            fold_and_tile(jnp.sum(v, axis=1), inv_hw)          # row_ref <- mean
            cen = v - row_ref[...]
            fold_and_tile(jnp.sum(cen * cen, axis=1), inv_hw)  # row_ref <- var
            inv = jax.lax.rsqrt(row_ref[...] + EPS)
            return jnp.maximum(cen * inv, 0.0)

        def conv3x3(v, w_ref, b_ref):
            # v: (B, H, WC) f32, already normalized + ReLU'd.
            # Writes conv(v) + bias into t_ref (lane-dense layout).
            vb = v.astype(jnp.bfloat16)
            # Lane-dense -> padded C-last buffer: pad[b, w+1, h+1, c] = v[b, h, w*C+c]
            for w in range(W):
                pad_ref[:, w + 1, 1:H + 1, :] = vb[:, :, w * C:(w + 1) * C]
            # 9 accumulating MXU matmuls straight from shifted pad views
            # (no im2col store-then-reload buffer), f32 accumulation.
            acc = None
            for kh in range(3):
                for kw in range(3):
                    tap = pad_ref[:, kw:kw + W, kh:kh + H, :].reshape(B * W * H, C)
                    part = jnp.dot(tap, w_ref[0, kh * 3 + kw],
                                   preferred_element_type=jnp.float32)
                    acc = part if acc is None else acc + part
            acc = (acc + b_ref[0]).reshape(B, W, H, C)   # rows ordered (b, w, h)
            # Back to the lane-dense layout: t[b, h, w*C+c] = out(b, h, w, c)
            for w in range(W):
                t_ref[:, :, w * C:(w + 1) * C] = acc[:, w, :, :]

        # ResBlock l: t1 = conv1(relu(IN(state))); t2 = conv2(relu(IN(t1))); state += t2
        conv3x3(inorm_relu(state_ref[...]), w1_ref, b1_ref)   # -> t_ref
        conv3x3(inorm_relu(t_ref[...]), w2_ref, b2_ref)       # -> t_ref
        state_ref[...] = state_ref[...] + t_ref[...]

        @pl.when(l == pl.num_programs(1) - 1)
        def _finalize():
            o_ref[...] = state_ref[...].astype(o_ref.dtype)

    return kernel


def tunnel_forward(x_nchw, w1, b1, w2, b2):
    """Tunnel forward.
    x_nchw: (N, 64, H, W) f32 (PyTorch layout)
    w1, w2: (L, 3, 3, 64, 64) HWIO conv weights; b1, b2: (L, 64) biases."""
    N, Cin, H, W = x_nchw.shape
    assert Cin == C, "ResBlock is fixed to 64 channels"
    L = w1.shape[0]
    WC = W * C

    def _lane(n):                      # 64->128 lane padding of C-last buffers
        return ((n + 127) // 128) * 128

    def footprint(Bb):
        xblk = Bb * H * WC * 4                                   # one x/o block
        wblk = 9 * C * _lane(C) * 2                              # one layer, bf16
        bblk = 8 * _lane(C) * 4
        state = Bb * H * WC * 4
        tbuf = Bb * H * WC * 4
        pad = Bb * (W + 2) * (((H + 2) + 15) // 16) * 16 * _lane(C) * 2
        row = Bb * 8 * WC * 4
        live = 3 * Bb * H * WC * 4                               # f32 value live-ranges
        return (2 * 2 * xblk                                     # x + out, double-buffered
                + 2 * 2 * wblk + 2 * 2 * bblk                    # streamed weights/biases, dbl-buffered
                + state + tbuf + pad + row + live)

    # Batch block: largest divisor of N that keeps >=2 parallel grid steps
    # (so both v7x TensorCores get work) and fits a conservative VMEM budget.
    budget = 40 * 1024 * 1024
    B = 1
    for cand in range(N, 0, -1):
        if N % cand:
            continue
        if N >= 2 and N // cand < 2:
            continue
        if footprint(cand) <= budget:
            B = cand
            break

    x = jnp.transpose(x_nchw, (0, 2, 3, 1)).reshape(N, H, WC)    # lane-dense
    w1m = w1.reshape(L, 9, C, C).astype(jnp.bfloat16)            # tap-major weights
    w2m = w2.reshape(L, 9, C, C).astype(jnp.bfloat16)
    b1r = b1.reshape(L, 1, C).astype(jnp.float32)
    b2r = b2.reshape(L, 1, C).astype(jnp.float32)

    vmem_limit = int(min(max(footprint(B) + (8 << 20), 16 << 20), 56 << 20))

    out = pl.pallas_call(
        _make_tunnel_kernel(B, H, W, L),
        out_shape=jax.ShapeDtypeStruct((N, H, WC), x.dtype),
        grid_spec=pltpu.PrefetchScalarGridSpec(
            num_scalar_prefetch=0,
            grid=(N // B, L),
            in_specs=[
                pl.BlockSpec((B, H, WC), lambda n, l: (n, 0, 0)),
                # Per-layer weights/biases streamed (double-buffered) by the pipeline.
                pl.BlockSpec((1, 9, C, C), lambda n, l: (l, 0, 0, 0)),
                pl.BlockSpec((1, 1, C), lambda n, l: (l, 0, 0)),
                pl.BlockSpec((1, 9, C, C), lambda n, l: (l, 0, 0, 0)),
                pl.BlockSpec((1, 1, C), lambda n, l: (l, 0, 0)),
            ],
            out_specs=pl.BlockSpec((B, H, WC), lambda n, l: (n, 0, 0)),
            scratch_shapes=[
                pltpu.VMEM((B, H, WC), jnp.float32),              # residual state
                pltpu.VMEM((B, H, WC), jnp.float32),              # conv output staging
                pltpu.VMEM((B, W + 2, H + 2, C), jnp.bfloat16),   # zero-padded conv input
                pltpu.VMEM((B, 1, WC), jnp.float32),              # tiled IN statistics
            ],
        ),
        compiler_params=pltpu.CompilerParams(
            dimension_semantics=("parallel", "arbitrary"),
            vmem_limit_bytes=vmem_limit),
    )(x, w1m, b1r, w2m, b2r)
    return jnp.transpose(out.reshape(N, H, W, C), (0, 3, 1, 2))   # back to NCHW


def _ref_tunnel(x_nchw, w1, b1, w2, b2):
    # Pure-JAX f32 reference (NHWC conv) for correctness checking.
    x = jnp.transpose(x_nchw, (0, 2, 3, 1))
    L = w1.shape[0]

    def inorm_relu(v):
        mean = v.mean(axis=(1, 2), keepdims=True)
        var = ((v - mean) ** 2).mean(axis=(1, 2), keepdims=True)
        return jnp.maximum((v - mean) * jax.lax.rsqrt(var + EPS), 0.0)

    def conv(v, w, b):
        y = jax.lax.conv_general_dilated(
            v, w, (1, 1), "SAME",
            dimension_numbers=("NHWC", "HWIO", "NHWC"),
            precision=jax.lax.Precision.HIGHEST)
        return y + b.reshape(1, 1, 1, C)

    for i in range(L):
        t = conv(inorm_relu(x), w1[i], b1[i])
        t = conv(inorm_relu(t), w2[i], b2[i])
        x = x + t
    return jnp.transpose(x, (0, 3, 1, 2))


if __name__ == "__main__":
    N, H, W, L = 2, 16, 16, 4      # Tunnel(len=4) at a small spatial size
    key = jax.random.PRNGKey(0)
    kx, k1, k2, k3, k4 = jax.random.split(key, 5)

    x = jax.random.normal(kx, (N, C, H, W), jnp.float32)   # NCHW, like PyTorch

    # Deterministic Conv2d-style init: uniform(-1/sqrt(fan_in), 1/sqrt(fan_in)).
    bound = 1.0 / (9 * C) ** 0.5
    w1 = jax.random.uniform(k1, (L, 3, 3, C, C), jnp.float32, -bound, bound)
    b1 = jax.random.uniform(k2, (L, C), jnp.float32, -bound, bound)
    w2 = jax.random.uniform(k3, (L, 3, 3, C, C), jnp.float32, -bound, bound)
    b2 = jax.random.uniform(k4, (L, C), jnp.float32, -bound, bound)

    out = jax.block_until_ready(jax.jit(tunnel_forward)(x, w1, b1, w2, b2))
    assert out.shape == (N, C, H, W)

    ref = jax.block_until_ready(_ref_tunnel(x, w1, b1, w2, b2))
    # Tolerance accounts for bf16 MXU operands (f32 accumulation, f32 norm/residual).
    np.testing.assert_allclose(np.asarray(out), np.asarray(ref),
                               atol=5e-2, rtol=5e-2)
    print("KERNEL_OK")
</pallas_src>

<mosaic_0001>
module attributes {stable_mosaic.version = 11 : i64} {
  func.func @kernel(%arg0: i32, %arg1: i32, %arg2: memref<1x16x1024xf32, #tpu.memory_space<vmem>>, %arg3: memref<1x9x64x64xbf16, #tpu.memory_space<vmem>>, %arg4: memref<1x1x64xf32, #tpu.memory_space<vmem>>, %arg5: memref<1x9x64x64xbf16, #tpu.memory_space<vmem>>, %arg6: memref<1x1x64xf32, #tpu.memory_space<vmem>>, %arg7: memref<1x16x1024xf32, #tpu.memory_space<vmem>>, %arg8: memref<1x16x1024xf32, #tpu.memory_space<vmem>>, %arg9: memref<1x16x1024xf32, #tpu.memory_space<vmem>>, %arg10: memref<1x18x18x64xbf16, #tpu.memory_space<vmem>>, %arg11: memref<1x1x1024xf32, #tpu.memory_space<vmem>>) attributes {dimension_semantics = [#tpu.dimension_semantics<parallel>, #tpu.dimension_semantics<arbitrary>], iteration_bounds = array<i64: 2, 4>, scalar_prefetch = 0 : i64, scratch_operands = 4 : i64, tpu.core_type = #tpu.core_type<tc>, window_params = [{transform_indices = @transform_0, window_bounds = array<i64: 1, 16, 1024>}, {transform_indices = @transform_1, window_bounds = array<i64: 1, 9, 64, 64>}, {transform_indices = @transform_2, window_bounds = array<i64: 1, 1, 64>}, {transform_indices = @transform_3, window_bounds = array<i64: 1, 9, 64, 64>}, {transform_indices = @transform_4, window_bounds = array<i64: 1, 1, 64>}, {transform_indices = @transform_5, window_bounds = array<i64: 1, 16, 1024>}]} {
    %c0_i32 = arith.constant 0 : i32
    %0 = arith.cmpi eq, %arg1, %c0_i32 : i32
    %1 = arith.extui %0 : i1 to i32
    %c0_i32_0 = arith.constant 0 : i32
    %2 = arith.cmpi ne, %1, %c0_i32_0 : i32
    scf.if %2 {
      %c0_592 = arith.constant 0 : index
      %c0_593 = arith.constant 0 : index
      %c0_594 = arith.constant 0 : index
      %706 = vector.load %arg2[%c0_592, %c0_593, %c0_594] : memref<1x16x1024xf32, #tpu.memory_space<vmem>>, vector<1x16x1024xf32>
      %c0_595 = arith.constant 0 : index
      %c0_596 = arith.constant 0 : index
      %c0_597 = arith.constant 0 : index
      %707 = vector.load %arg8[%c0_595, %c0_596, %c0_597] : memref<1x16x1024xf32, #tpu.memory_space<vmem>>, vector<1x16x1024xf32>
      tpu.vector_store %arg8[%c0_595, %c0_596, %c0_597], %706 {strides = array<i32>} : memref<1x16x1024xf32, #tpu.memory_space<vmem>>, vector<1x16x1024xf32>,
      %cst_598 = arith.constant 0.000000e+00 : bf16
      %708 = vector.broadcast %cst_598 : bf16 to vector<1x18x18x64xbf16>
      %c0_599 = arith.constant 0 : index
      %c0_600 = arith.constant 0 : index
      %c0_601 = arith.constant 0 : index
      %c0_602 = arith.constant 0 : index
      %709 = vector.load %arg10[%c0_599, %c0_600, %c0_601, %c0_602] : memref<1x18x18x64xbf16, #tpu.memory_space<vmem>>, vector<1x18x18x64xbf16>
      tpu.vector_store %arg10[%c0_599, %c0_600, %c0_601, %c0_602], %708 {strides = array<i32>} : memref<1x18x18x64xbf16, #tpu.memory_space<vmem>>, vector<1x18x18x64xbf16>,
    } else {
    }
    %c0 = arith.constant 0 : index
    %c0_1 = arith.constant 0 : index
    %c0_2 = arith.constant 0 : index
    %3 = vector.load %arg8[%c0, %c0_1, %c0_2] : memref<1x16x1024xf32, #tpu.memory_space<vmem>>, vector<1x16x1024xf32>
    %cst = arith.constant dense<0.000000e+00> : vector<1x1024xf32>
    %4 = vector.multi_reduction <add>, %3, %cst [1] : vector<1x16x1024xf32> to vector<1x1024xf32>
    %5 = vector.extract_strided_slice %4 {offsets = [0, 0], sizes = [1, 64], strides = [1, 1]} : vector<1x1024xf32> to vector<1x64xf32>
    %6 = vector.extract_strided_slice %4 {offsets = [0, 64], sizes = [1, 64], strides = [1, 1]} : vector<1x1024xf32> to vector<1x64xf32>
    %7 = arith.addf %5, %6 : vector<1x64xf32>
    %8 = vector.extract_strided_slice %4 {offsets = [0, 128], sizes = [1, 64], strides = [1, 1]} : vector<1x1024xf32> to vector<1x64xf32>
    %9 = arith.addf %7, %8 : vector<1x64xf32>
    %10 = vector.extract_strided_slice %4 {offsets = [0, 192], sizes = [1, 64], strides = [1, 1]} : vector<1x1024xf32> to vector<1x64xf32>
    %11 = arith.addf %9, %10 : vector<1x64xf32>
    %12 = vector.extract_strided_slice %4 {offsets = [0, 256], sizes = [1, 64], strides = [1, 1]} : vector<1x1024xf32> to vector<1x64xf32>
    %13 = arith.addf %11, %12 : vector<1x64xf32>
    %14 = vector.extract_strided_slice %4 {offsets = [0, 320], sizes = [1, 64], strides = [1, 1]} : vector<1x1024xf32> to vector<1x64xf32>
    %15 = arith.addf %13, %14 : vector<1x64xf32>
    %16 = vector.extract_strided_slice %4 {offsets = [0, 384], sizes = [1, 64], strides = [1, 1]} : vector<1x1024xf32> to vector<1x64xf32>
    %17 = arith.addf %15, %16 : vector<1x64xf32>
    %18 = vector.extract_strided_slice %4 {offsets = [0, 448], sizes = [1, 64], strides = [1, 1]} : vector<1x1024xf32> to vector<1x64xf32>
    %19 = arith.addf %17, %18 : vector<1x64xf32>
    %20 = vector.extract_strided_slice %4 {offsets = [0, 512], sizes = [1, 64], strides = [1, 1]} : vector<1x1024xf32> to vector<1x64xf32>
    %21 = arith.addf %19, %20 : vector<1x64xf32>
    %22 = vector.extract_strided_slice %4 {offsets = [0, 576], sizes = [1, 64], strides = [1, 1]} : vector<1x1024xf32> to vector<1x64xf32>
    %23 = arith.addf %21, %22 : vector<1x64xf32>
    %24 = vector.extract_strided_slice %4 {offsets = [0, 640], sizes = [1, 64], strides = [1, 1]} : vector<1x1024xf32> to vector<1x64xf32>
    %25 = arith.addf %23, %24 : vector<1x64xf32>
    %26 = vector.extract_strided_slice %4 {offsets = [0, 704], sizes = [1, 64], strides = [1, 1]} : vector<1x1024xf32> to vector<1x64xf32>
    %27 = arith.addf %25, %26 : vector<1x64xf32>
    %28 = vector.extract_strided_slice %4 {offsets = [0, 768], sizes = [1, 64], strides = [1, 1]} : vector<1x1024xf32> to vector<1x64xf32>
    %29 = arith.addf %27, %28 : vector<1x64xf32>
    %30 = vector.extract_strided_slice %4 {offsets = [0, 832], sizes = [1, 64], strides = [1, 1]} : vector<1x1024xf32> to vector<1x64xf32>
    %31 = arith.addf %29, %30 : vector<1x64xf32>
    %32 = vector.extract_strided_slice %4 {offsets = [0, 896], sizes = [1, 64], strides = [1, 1]} : vector<1x1024xf32> to vector<1x64xf32>
    %33 = arith.addf %31, %32 : vector<1x64xf32>
    %34 = vector.extract_strided_slice %4 {offsets = [0, 960], sizes = [1, 64], strides = [1, 1]} : vector<1x1024xf32> to vector<1x64xf32>
    %35 = arith.addf %33, %34 : vector<1x64xf32>
    %cst_3 = arith.constant 3.906250e-03 : f32
    %36 = vector.broadcast %cst_3 : f32 to vector<1x64xf32>
    %37 = arith.mulf %35, %36 : vector<1x64xf32>
    %c0_4 = arith.constant 0 : index
    %c0_5 = arith.constant 0 : index
    %c0_6 = arith.constant 0 : index
    %38 = vector.load %arg11[%c0_4, %c0_5, %c0_6] : memref<1x1x1024xf32, #tpu.memory_space<vmem>>, vector<1x1x64xf32>
    %39 = vector.shape_cast %38 : vector<1x1x64xf32> to vector<1x64xf32>
    %40 = vector.shape_cast %37 : vector<1x64xf32> to vector<1x1x64xf32>
    tpu.vector_store %arg11[%c0_4, %c0_5, %c0_6], %40 {strides = array<i32>} : memref<1x1x1024xf32, #tpu.memory_space<vmem>>, vector<1x1x64xf32>,
    %c0_7 = arith.constant 0 : index
    %c0_8 = arith.constant 0 : index
    %c64 = arith.constant 64 : index
    %41 = vector.load %arg11[%c0_7, %c0_8, %c64] : memref<1x1x1024xf32, #tpu.memory_space<vmem>>, vector<1x1x64xf32>
    %42 = vector.shape_cast %41 : vector<1x1x64xf32> to vector<1x64xf32>
    %43 = vector.shape_cast %37 : vector<1x64xf32> to vector<1x1x64xf32>
    tpu.vector_store %arg11[%c0_7, %c0_8, %c64], %43 {strides = array<i32>} : memref<1x1x1024xf32, #tpu.memory_space<vmem>>, vector<1x1x64xf32>,
    %c0_9 = arith.constant 0 : index
    %c0_10 = arith.constant 0 : index
    %c128 = arith.constant 128 : index
    %44 = vector.load %arg11[%c0_9, %c0_10, %c128] : memref<1x1x1024xf32, #tpu.memory_space<vmem>>, vector<1x1x64xf32>
    %45 = vector.shape_cast %44 : vector<1x1x64xf32> to vector<1x64xf32>
    %46 = vector.shape_cast %37 : vector<1x64xf32> to vector<1x1x64xf32>
    tpu.vector_store %arg11[%c0_9, %c0_10, %c128], %46 {strides = array<i32>} : memref<1x1x1024xf32, #tpu.memory_space<vmem>>, vector<1x1x64xf32>,
    %c0_11 = arith.constant 0 : index
    %c0_12 = arith.constant 0 : index
    %c192 = arith.constant 192 : index
    %47 = vector.load %arg11[%c0_11, %c0_12, %c192] : memref<1x1x1024xf32, #tpu.memory_space<vmem>>, vector<1x1x64xf32>
    %48 = vector.shape_cast %47 : vector<1x1x64xf32> to vector<1x64xf32>
    %49 = vector.shape_cast %37 : vector<1x64xf32> to vector<1x1x64xf32>
    tpu.vector_store %arg11[%c0_11, %c0_12, %c192], %49 {strides = array<i32>} : memref<1x1x1024xf32, #tpu.memory_space<vmem>>, vector<1x1x64xf32>,
    %c0_13 = arith.constant 0 : index
    %c0_14 = arith.constant 0 : index
    %c256 = arith.constant 256 : index
    %50 = vector.load %arg11[%c0_13, %c0_14, %c256] : memref<1x1x1024xf32, #tpu.memory_space<vmem>>, vector<1x1x64xf32>
    %51 = vector.shape_cast %50 : vector<1x1x64xf32> to vector<1x64xf32>
    %52 = vector.shape_cast %37 : vector<1x64xf32> to vector<1x1x64xf32>
    tpu.vector_store %arg11[%c0_13, %c0_14, %c256], %52 {strides = array<i32>} : memref<1x1x1024xf32, #tpu.memory_space<vmem>>, vector<1x1x64xf32>,
    %c0_15 = arith.constant 0 : index
    %c0_16 = arith.constant 0 : index
    %c320 = arith.constant 320 : index
    %53 = vector.load %arg11[%c0_15, %c0_16, %c320] : memref<1x1x1024xf32, #tpu.memory_space<vmem>>, vector<1x1x64xf32>
    %54 = vector.shape_cast %53 : vector<1x1x64xf32> to vector<1x64xf32>
    %55 = vector.shape_cast %37 : vector<1x64xf32> to vector<1x1x64xf32>
    tpu.vector_store %arg11[%c0_15, %c0_16, %c320], %55 {strides = array<i32>} : memref<1x1x1024xf32, #tpu.memory_space<vmem>>, vector<1x1x64xf32>,
    %c0_17 = arith.constant 0 : index
    %c0_18 = arith.constant 0 : index
    %c384 = arith.constant 384 : index
    %56 = vector.load %arg11[%c0_17, %c0_18, %c384] : memref<1x1x1024xf32, #tpu.memory_space<vmem>>, vector<1x1x64xf32>
    %57 = vector.shape_cast %56 : vector<1x1x64xf32> to vector<1x64xf32>
    %58 = vector.shape_cast %37 : vector<1x64xf32> to vector<1x1x64xf32>
    tpu.vector_store %arg11[%c0_17, %c0_18, %c384], %58 {strides = array<i32>} : memref<1x1x1024xf32, #tpu.memory_space<vmem>>, vector<1x1x64xf32>,
    %c0_19 = arith.constant 0 : index
    %c0_20 = arith.constant 0 : index
    %c448 = arith.constant 448 : index
    %59 = vector.load %arg11[%c0_19, %c0_20, %c448] : memref<1x1x1024xf32, #tpu.memory_space<vmem>>, vector<1x1x64xf32>
    %60 = vector.shape_cast %59 : vector<1x1x64xf32> to vector<1x64xf32>
    %61 = vector.shape_cast %37 : vector<1x64xf32> to vector<1x1x64xf32>
    tpu.vector_store %arg11[%c0_19, %c0_20, %c448], %61 {strides = array<i32>} : memref<1x1x1024xf32, #tpu.memory_space<vmem>>, vector<1x1x64xf32>,
    %c0_21 = arith.constant 0 : index
    %c0_22 = arith.constant 0 : index
    %c512 = arith.constant 512 : index
    %62 = vector.load %arg11[%c0_21, %c0_22, %c512] : memref<1x1x1024xf32, #tpu.memory_space<vmem>>, vector<1x1x64xf32>
    %63 = vector.shape_cast %62 : vector<1x1x64xf32> to vector<1x64xf32>
    %64 = vector.shape_cast %37 : vector<1x64xf32> to vector<1x1x64xf32>
    tpu.vector_store %arg11[%c0_21, %c0_22, %c512], %64 {strides = array<i32>} : memref<1x1x1024xf32, #tpu.memory_space<vmem>>, vector<1x1x64xf32>,
    %c0_23 = arith.constant 0 : index
    %c0_24 = arith.constant 0 : index
    %c576 = arith.constant 576 : index
    %65 = vector.load %arg11[%c0_23, %c0_24, %c576] : memref<1x1x1024xf32, #tpu.memory_space<vmem>>, vector<1x1x64xf32>
    %66 = vector.shape_cast %65 : vector<1x1x64xf32> to vector<1x64xf32>
    %67 = vector.shape_cast %37 : vector<1x64xf32> to vector<1x1x64xf32>
    tpu.vector_store %arg11[%c0_23, %c0_24, %c576], %67 {strides = array<i32>} : memref<1x1x1024xf32, #tpu.memory_space<vmem>>, vector<1x1x64xf32>,
    %c0_25 = arith.constant 0 : index
    %c0_26 = arith.constant 0 : index
    %c640 = arith.constant 640 : index
    %68 = vector.load %arg11[%c0_25, %c0_26, %c640] : memref<1x1x1024xf32, #tpu.memory_space<vmem>>, vector<1x1x64xf32>
    %69 = vector.shape_cast %68 : vector<1x1x64xf32> to vector<1x64xf32>
    %70 = vector.shape_cast %37 : vector<1x64xf32> to vector<1x1x64xf32>
    tpu.vector_store %arg11[%c0_25, %c0_26, %c640], %70 {strides = array<i32>} : memref<1x1x1024xf32, #tpu.memory_space<vmem>>, vector<1x1x64xf32>,
    %c0_27 = arith.constant 0 : index
    %c0_28 = arith.constant 0 : index
    %c704 = arith.constant 704 : index
    %71 = vector.load %arg11[%c0_27, %c0_28, %c704] : memref<1x1x1024xf32, #tpu.memory_space<vmem>>, vector<1x1x64xf32>
    %72 = vector.shape_cast %71 : vector<1x1x64xf32> to vector<1x64xf32>
    %73 = vector.shape_cast %37 : vector<1x64xf32> to vector<1x1x64xf32>
    tpu.vector_store %arg11[%c0_27, %c0_28, %c704], %73 {strides = array<i32>} : memref<1x1x1024xf32, #tpu.memory_space<vmem>>, vector<1x1x64xf32>,
    %c0_29 = arith.constant 0 : index
    %c0_30 = arith.constant 0 : index
    %c768 = arith.constant 768 : index
    %74 = vector.load %arg11[%c0_29, %c0_30, %c768] : memref<1x1x1024xf32, #tpu.memory_space<vmem>>, vector<1x1x64xf32>
    %75 = vector.shape_cast %74 : vector<1x1x64xf32> to vector<1x64xf32>
    %76 = vector.shape_cast %37 : vector<1x64xf32> to vector<1x1x64xf32>
    tpu.vector_store %arg11[%c0_29, %c0_30, %c768], %76 {strides = array<i32>} : memref<1x1x1024xf32, #tpu.memory_space<vmem>>, vector<1x1x64xf32>,
    %c0_31 = arith.constant 0 : index
    %c0_32 = arith.constant 0 : index
    %c832 = arith.constant 832 : index
    %77 = vector.load %arg11[%c0_31, %c0_32, %c832] : memref<1x1x1024xf32, #tpu.memory_space<vmem>>, vector<1x1x64xf32>
    %78 = vector.shape_cast %77 : vector<1x1x64xf32> to vector<1x64xf32>
    %79 = vector.shape_cast %37 : vector<1x64xf32> to vector<1x1x64xf32>
    tpu.vector_store %arg11[%c0_31, %c0_32, %c832], %79 {strides = array<i32>} : memref<1x1x1024xf32, #tpu.memory_space<vmem>>, vector<1x1x64xf32>,
    %c0_33 = arith.constant 0 : index
    %c0_34 = arith.constant 0 : index
    %c896 = arith.constant 896 : index
    %80 = vector.load %arg11[%c0_33, %c0_34, %c896] : memref<1x1x1024xf32, #tpu.memory_space<vmem>>, vector<1x1x64xf32>
    %81 = vector.shape_cast %80 : vector<1x1x64xf32> to vector<1x64xf32>
    %82 = vector.shape_cast %37 : vector<1x64xf32> to vector<1x1x64xf32>
    tpu.vector_store %arg11[%c0_33, %c0_34, %c896], %82 {strides = array<i32>} : memref<1x1x1024xf32, #tpu.memory_space<vmem>>, vector<1x1x64xf32>,
    %c0_35 = arith.constant 0 : index
    %c0_36 = arith.constant 0 : index
    %c960 = arith.constant 960 : index
    %83 = vector.load %arg11[%c0_35, %c0_36, %c960] : memref<1x1x1024xf32, #tpu.memory_space<vmem>>, vector<1x1x64xf32>
    %84 = vector.shape_cast %83 : vector<1x1x64xf32> to vector<1x64xf32>
    %85 = vector.shape_cast %37 : vector<1x64xf32> to vector<1x1x64xf32>
    tpu.vector_store %arg11[%c0_35, %c0_36, %c960], %85 {strides = array<i32>} : memref<1x1x1024xf32, #tpu.memory_space<vmem>>, vector<1x1x64xf32>,
    %c0_37 = arith.constant 0 : index
    %c0_38 = arith.constant 0 : index
    %c0_39 = arith.constant 0 : index
    %86 = vector.load %arg11[%c0_37, %c0_38, %c0_39] : memref<1x1x1024xf32, #tpu.memory_space<vmem>>, vector<1x1x1024xf32>
    %87 = vector.broadcast %86 : vector<1x1x1024xf32> to vector<1x16x1024xf32>
    %88 = arith.subf %3, %87 : vector<1x16x1024xf32>
    %89 = arith.mulf %88, %88 : vector<1x16x1024xf32>
    %cst_40 = arith.constant dense<0.000000e+00> : vector<1x1024xf32>
    %90 = vector.multi_reduction <add>, %89, %cst_40 [1] : vector<1x16x1024xf32> to vector<1x1024xf32>
    %91 = vector.extract_strided_slice %90 {offsets = [0, 0], sizes = [1, 64], strides = [1, 1]} : vector<1x1024xf32> to vector<1x64xf32>
    %92 = vector.extract_strided_slice %90 {offsets = [0, 64], sizes = [1, 64], strides = [1, 1]} : vector<1x1024xf32> to vector<1x64xf32>
    %93 = arith.addf %91, %92 : vector<1x64xf32>
    %94 = vector.extract_strided_slice %90 {offsets = [0, 128], sizes = [1, 64], strides = [1, 1]} : vector<1x1024xf32> to vector<1x64xf32>
    %95 = arith.addf %93, %94 : vector<1x64xf32>
    %96 = vector.extract_strided_slice %90 {offsets = [0, 192], sizes = [1, 64], strides = [1, 1]} : vector<1x1024xf32> to vector<1x64xf32>
    %97 = arith.addf %95, %96 : vector<1x64xf32>
    %98 = vector.extract_strided_slice %90 {offsets = [0, 256], sizes = [1, 64], strides = [1, 1]} : vector<1x1024xf32> to vector<1x64xf32>
    %99 = arith.addf %97, %98 : vector<1x64xf32>
    %100 = vector.extract_strided_slice %90 {offsets = [0, 320], sizes = [1, 64], strides = [1, 1]} : vector<1x1024xf32> to vector<1x64xf32>
    %101 = arith.addf %99, %100 : vector<1x64xf32>
    %102 = vector.extract_strided_slice %90 {offsets = [0, 384], sizes = [1, 64], strides = [1, 1]} : vector<1x1024xf32> to vector<1x64xf32>
    %103 = arith.addf %101, %102 : vector<1x64xf32>
    %104 = vector.extract_strided_slice %90 {offsets = [0, 448], sizes = [1, 64], strides = [1, 1]} : vector<1x1024xf32> to vector<1x64xf32>
    %105 = arith.addf %103, %104 : vector<1x64xf32>
    %106 = vector.extract_strided_slice %90 {offsets = [0, 512], sizes = [1, 64], strides = [1, 1]} : vector<1x1024xf32> to vector<1x64xf32>
    %107 = arith.addf %105, %106 : vector<1x64xf32>
    %108 = vector.extract_strided_slice %90 {offsets = [0, 576], sizes = [1, 64], strides = [1, 1]} : vector<1x1024xf32> to vector<1x64xf32>
    %109 = arith.addf %107, %108 : vector<1x64xf32>
    %110 = vector.extract_strided_slice %90 {offsets = [0, 640], sizes = [1, 64], strides = [1, 1]} : vector<1x1024xf32> to vector<1x64xf32>
    %111 = arith.addf %109, %110 : vector<1x64xf32>
    %112 = vector.extract_strided_slice %90 {offsets = [0, 704], sizes = [1, 64], strides = [1, 1]} : vector<1x1024xf32> to vector<1x64xf32>
    %113 = arith.addf %111, %112 : vector<1x64xf32>
    %114 = vector.extract_strided_slice %90 {offsets = [0, 768], sizes = [1, 64], strides = [1, 1]} : vector<1x1024xf32> to vector<1x64xf32>
    %115 = arith.addf %113, %114 : vector<1x64xf32>
    %116 = vector.extract_strided_slice %90 {offsets = [0, 832], sizes = [1, 64], strides = [1, 1]} : vector<1x1024xf32> to vector<1x64xf32>
    %117 = arith.addf %115, %116 : vector<1x64xf32>
    %118 = vector.extract_strided_slice %90 {offsets = [0, 896], sizes = [1, 64], strides = [1, 1]} : vector<1x1024xf32> to vector<1x64xf32>
    %119 = arith.addf %117, %118 : vector<1x64xf32>
    %120 = vector.extract_strided_slice %90 {offsets = [0, 960], sizes = [1, 64], strides = [1, 1]} : vector<1x1024xf32> to vector<1x64xf32>
    %121 = arith.addf %119, %120 : vector<1x64xf32>
    %cst_41 = arith.constant 3.906250e-03 : f32
    %122 = vector.broadcast %cst_41 : f32 to vector<1x64xf32>
    %123 = arith.mulf %121, %122 : vector<1x64xf32>
    %c0_42 = arith.constant 0 : index
    %c0_43 = arith.constant 0 : index
    %c0_44 = arith.constant 0 : index
    %124 = vector.load %arg11[%c0_42, %c0_43, %c0_44] : memref<1x1x1024xf32, #tpu.memory_space<vmem>>, vector<1x1x64xf32>
    %125 = vector.shape_cast %124 : vector<1x1x64xf32> to vector<1x64xf32>
    %126 = vector.shape_cast %123 : vector<1x64xf32> to vector<1x1x64xf32>
    tpu.vector_store %arg11[%c0_42, %c0_43, %c0_44], %126 {strides = array<i32>} : memref<1x1x1024xf32, #tpu.memory_space<vmem>>, vector<1x1x64xf32>,
    %c0_45 = arith.constant 0 : index
    %c0_46 = arith.constant 0 : index
    %c64_47 = arith.constant 64 : index
    %127 = vector.load %arg11[%c0_45, %c0_46, %c64_47] : memref<1x1x1024xf32, #tpu.memory_space<vmem>>, vector<1x1x64xf32>
    %128 = vector.shape_cast %127 : vector<1x1x64xf32> to vector<1x64xf32>
    %129 = vector.shape_cast %123 : vector<1x64xf32> to vector<1x1x64xf32>
    tpu.vector_store %arg11[%c0_45, %c0_46, %c64_47], %129 {strides = array<i32>} : memref<1x1x1024xf32, #tpu.memory_space<vmem>>, vector<1x1x64xf32>,
    %c0_48 = arith.constant 0 : index
    %c0_49 = arith.constant 0 : index
    %c128_50 = arith.constant 128 : index
    %130 = vector.load %arg11[%c0_48, %c0_49, %c128_50] : memref<1x1x1024xf32, #tpu.memory_space<vmem>>, vector<1x1x64xf32>
    %131 = vector.shape_cast %130 : vector<1x1x64xf32> to vector<1x64xf32>
    %132 = vector.shape_cast %123 : vector<1x64xf32> to vector<1x1x64xf32>
    tpu.vector_store %arg11[%c0_48, %c0_49, %c128_50], %132 {strides = array<i32>} : memref<1x1x1024xf32, #tpu.memory_space<vmem>>, vector<1x1x64xf32>,
    %c0_51 = arith.constant 0 : index
    %c0_52 = arith.constant 0 : index
    %c192_53 = arith.constant 192 : index
    %133 = vector.load %arg11[%c0_51, %c0_52, %c192_53] : memref<1x1x1024xf32, #tpu.memory_space<vmem>>, vector<1x1x64xf32>
    %134 = vector.shape_cast %133 : vector<1x1x64xf32> to vector<1x64xf32>
    %135 = vector.shape_cast %123 : vector<1x64xf32> to vector<1x1x64xf32>
    tpu.vector_store %arg11[%c0_51, %c0_52, %c192_53], %135 {strides = array<i32>} : memref<1x1x1024xf32, #tpu.memory_space<vmem>>, vector<1x1x64xf32>,
    %c0_54 = arith.constant 0 : index
    %c0_55 = arith.constant 0 : index
    %c256_56 = arith.constant 256 : index
    %136 = vector.load %arg11[%c0_54, %c0_55, %c256_56] : memref<1x1x1024xf32, #tpu.memory_space<vmem>>, vector<1x1x64xf32>
    %137 = vector.shape_cast %136 : vector<1x1x64xf32> to vector<1x64xf32>
    %138 = vector.shape_cast %123 : vector<1x64xf32> to vector<1x1x64xf32>
    tpu.vector_store %arg11[%c0_54, %c0_55, %c256_56], %138 {strides = array<i32>} : memref<1x1x1024xf32, #tpu.memory_space<vmem>>, vector<1x1x64xf32>,
    %c0_57 = arith.constant 0 : index
    %c0_58 = arith.constant 0 : index
    %c320_59 = arith.constant 320 : index
    %139 = vector.load %arg11[%c0_57, %c0_58, %c320_59] : memref<1x1x1024xf32, #tpu.memory_space<vmem>>, vector<1x1x64xf32>
    %140 = vector.shape_cast %139 : vector<1x1x64xf32> to vector<1x64xf32>
    %141 = vector.shape_cast %123 : vector<1x64xf32> to vector<1x1x64xf32>
    tpu.vector_store %arg11[%c0_57, %c0_58, %c320_59], %141 {strides = array<i32>} : memref<1x1x1024xf32, #tpu.memory_space<vmem>>, vector<1x1x64xf32>,
    %c0_60 = arith.constant 0 : index
    %c0_61 = arith.constant 0 : index
    %c384_62 = arith.constant 384 : index
    %142 = vector.load %arg11[%c0_60, %c0_61, %c384_62] : memref<1x1x1024xf32, #tpu.memory_space<vmem>>, vector<1x1x64xf32>
    %143 = vector.shape_cast %142 : vector<1x1x64xf32> to vector<1x64xf32>
    %144 = vector.shape_cast %123 : vector<1x64xf32> to vector<1x1x64xf32>
    tpu.vector_store %arg11[%c0_60, %c0_61, %c384_62], %144 {strides = array<i32>} : memref<1x1x1024xf32, #tpu.memory_space<vmem>>, vector<1x1x64xf32>,
    %c0_63 = arith.constant 0 : index
    %c0_64 = arith.constant 0 : index
    %c448_65 = arith.constant 448 : index
    %145 = vector.load %arg11[%c0_63, %c0_64, %c448_65] : memref<1x1x1024xf32, #tpu.memory_space<vmem>>, vector<1x1x64xf32>
    %146 = vector.shape_cast %145 : vector<1x1x64xf32> to vector<1x64xf32>
    %147 = vector.shape_cast %123 : vector<1x64xf32> to vector<1x1x64xf32>
    tpu.vector_store %arg11[%c0_63, %c0_64, %c448_65], %147 {strides = array<i32>} : memref<1x1x1024xf32, #tpu.memory_space<vmem>>, vector<1x1x64xf32>,
    %c0_66 = arith.constant 0 : index
    %c0_67 = arith.constant 0 : index
    %c512_68 = arith.constant 512 : index
    %148 = vector.load %arg11[%c0_66, %c0_67, %c512_68] : memref<1x1x1024xf32, #tpu.memory_space<vmem>>, vector<1x1x64xf32>
    %149 = vector.shape_cast %148 : vector<1x1x64xf32> to vector<1x64xf32>
    %150 = vector.shape_cast %123 : vector<1x64xf32> to vector<1x1x64xf32>
    tpu.vector_store %arg11[%c0_66, %c0_67, %c512_68], %150 {strides = array<i32>} : memref<1x1x1024xf32, #tpu.memory_space<vmem>>, vector<1x1x64xf32>,
    %c0_69 = arith.constant 0 : index
    %c0_70 = arith.constant 0 : index
    %c576_71 = arith.constant 576 : index
    %151 = vector.load %arg11[%c0_69, %c0_70, %c576_71] : memref<1x1x1024xf32, #tpu.memory_space<vmem>>, vector<1x1x64xf32>
    %152 = vector.shape_cast %151 : vector<1x1x64xf32> to vector<1x64xf32>
    %153 = vector.shape_cast %123 : vector<1x64xf32> to vector<1x1x64xf32>
    tpu.vector_store %arg11[%c0_69, %c0_70, %c576_71], %153 {strides = array<i32>} : memref<1x1x1024xf32, #tpu.memory_space<vmem>>, vector<1x1x64xf32>,
    %c0_72 = arith.constant 0 : index
    %c0_73 = arith.constant 0 : index
    %c640_74 = arith.constant 640 : index
    %154 = vector.load %arg11[%c0_72, %c0_73, %c640_74] : memref<1x1x1024xf32, #tpu.memory_space<vmem>>, vector<1x1x64xf32>
    %155 = vector.shape_cast %154 : vector<1x1x64xf32> to vector<1x64xf32>
    %156 = vector.shape_cast %123 : vector<1x64xf32> to vector<1x1x64xf32>
    tpu.vector_store %arg11[%c0_72, %c0_73, %c640_74], %156 {strides = array<i32>} : memref<1x1x1024xf32, #tpu.memory_space<vmem>>, vector<1x1x64xf32>,
    %c0_75 = arith.constant 0 : index
    %c0_76 = arith.constant 0 : index
    %c704_77 = arith.constant 704 : index
    %157 = vector.load %arg11[%c0_75, %c0_76, %c704_77] : memref<1x1x1024xf32, #tpu.memory_space<vmem>>, vector<1x1x64xf32>
    %158 = vector.shape_cast %157 : vector<1x1x64xf32> to vector<1x64xf32>
    %159 = vector.shape_cast %123 : vector<1x64xf32> to vector<1x1x64xf32>
    tpu.vector_store %arg11[%c0_75, %c0_76, %c704_77], %159 {strides = array<i32>} : memref<1x1x1024xf32, #tpu.memory_space<vmem>>, vector<1x1x64xf32>,
    %c0_78 = arith.constant 0 : index
    %c0_79 = arith.constant 0 : index
    %c768_80 = arith.constant 768 : index
    %160 = vector.load %arg11[%c0_78, %c0_79, %c768_80] : memref<1x1x1024xf32, #tpu.memory_space<vmem>>, vector<1x1x64xf32>
    %161 = vector.shape_cast %160 : vector<1x1x64xf32> to vector<1x64xf32>
    %162 = vector.shape_cast %123 : vector<1x64xf32> to vector<1x1x64xf32>
    tpu.vector_store %arg11[%c0_78, %c0_79, %c768_80], %162 {strides = array<i32>} : memref<1x1x1024xf32, #tpu.memory_space<vmem>>, vector<1x1x64xf32>,
    %c0_81 = arith.constant 0 : index
    %c0_82 = arith.constant 0 : index
    %c832_83 = arith.constant 832 : index
    %163 = vector.load %arg11[%c0_81, %c0_82, %c832_83] : memref<1x1x1024xf32, #tpu.memory_space<vmem>>, vector<1x1x64xf32>
    %164 = vector.shape_cast %163 : vector<1x1x64xf32> to vector<1x64xf32>
    %165 = vector.shape_cast %123 : vector<1x64xf32> to vector<1x1x64xf32>
    tpu.vector_store %arg11[%c0_81, %c0_82, %c832_83], %165 {strides = array<i32>} : memref<1x1x1024xf32, #tpu.memory_space<vmem>>, vector<1x1x64xf32>,
    %c0_84 = arith.constant 0 : index
    %c0_85 = arith.constant 0 : index
    %c896_86 = arith.constant 896 : index
    %166 = vector.load %arg11[%c0_84, %c0_85, %c896_86] : memref<1x1x1024xf32, #tpu.memory_space<vmem>>, vector<1x1x64xf32>
    %167 = vector.shape_cast %166 : vector<1x1x64xf32> to vector<1x64xf32>
    %168 = vector.shape_cast %123 : vector<1x64xf32> to vector<1x1x64xf32>
    tpu.vector_store %arg11[%c0_84, %c0_85, %c896_86], %168 {strides = array<i32>} : memref<1x1x1024xf32, #tpu.memory_space<vmem>>, vector<1x1x64xf32>,
    %c0_87 = arith.constant 0 : index
    %c0_88 = arith.constant 0 : index
    %c960_89 = arith.constant 960 : index
    %169 = vector.load %arg11[%c0_87, %c0_88, %c960_89] : memref<1x1x1024xf32, #tpu.memory_space<vmem>>, vector<1x1x64xf32>
    %170 = vector.shape_cast %169 : vector<1x1x64xf32> to vector<1x64xf32>
    %171 = vector.shape_cast %123 : vector<1x64xf32> to vector<1x1x64xf32>
    tpu.vector_store %arg11[%c0_87, %c0_88, %c960_89], %171 {strides = array<i32>} : memref<1x1x1024xf32, #tpu.memory_space<vmem>>, vector<1x1x64xf32>,
    %c0_90 = arith.constant 0 : index
    %c0_91 = arith.constant 0 : index
    %c0_92 = arith.constant 0 : index
    %172 = vector.load %arg11[%c0_90, %c0_91, %c0_92] : memref<1x1x1024xf32, #tpu.memory_space<vmem>>, vector<1x1x1024xf32>
    %cst_93 = arith.constant 9.99999974E-6 : f32
    %173 = vector.broadcast %cst_93 : f32 to vector<1x1x1024xf32>
    %174 = arith.addf %172, %173 : vector<1x1x1024xf32>
    %175 = math.rsqrt %174 : vector<1x1x1024xf32>
    %176 = vector.broadcast %175 : vector<1x1x1024xf32> to vector<1x16x1024xf32>
    %177 = arith.mulf %88, %176 : vector<1x16x1024xf32>
    %cst_94 = arith.constant 0.000000e+00 : f32
    %178 = vector.broadcast %cst_94 : f32 to vector<1x16x1024xf32>
    %179 = arith.maximumf %177, %178 : vector<1x16x1024xf32>
    %180 = arith.truncf %179 : vector<1x16x1024xf32> to vector<1x16x1024xbf16>
    %181 = vector.extract_strided_slice %180 {offsets = [0, 0, 0], sizes = [1, 16, 64], strides = [1, 1, 1]} : vector<1x16x1024xbf16> to vector<1x16x64xbf16>
    %c0_95 = arith.constant 0 : index
    %c1 = arith.constant 1 : index
    %c1_96 = arith.constant 1 : index
    %c0_97 = arith.constant 0 : index
    %182 = vector.load %arg10[%c0_95, %c1, %c1_96, %c0_97] : memref<1x18x18x64xbf16, #tpu.memory_space<vmem>>, vector<1x1x16x64xbf16>
    %183 = vector.shape_cast %182 : vector<1x1x16x64xbf16> to vector<1x16x64xbf16>
    %184 = vector.shape_cast %181 : vector<1x16x64xbf16> to vector<1x1x16x64xbf16>
    tpu.vector_store %arg10[%c0_95, %c1, %c1_96, %c0_97], %184 {strides = array<i32>} : memref<1x18x18x64xbf16, #tpu.memory_space<vmem>>, vector<1x1x16x64xbf16>,
    %185 = vector.extract_strided_slice %180 {offsets = [0, 0, 64], sizes = [1, 16, 64], strides = [1, 1, 1]} : vector<1x16x1024xbf16> to vector<1x16x64xbf16>
    %c0_98 = arith.constant 0 : index
    %c2 = arith.constant 2 : index
    %c1_99 = arith.constant 1 : index
    %c0_100 = arith.constant 0 : index
    %186 = vector.load %arg10[%c0_98, %c2, %c1_99, %c0_100] : memref<1x18x18x64xbf16, #tpu.memory_space<vmem>>, vector<1x1x16x64xbf16>
    %187 = vector.shape_cast %186 : vector<1x1x16x64xbf16> to vector<1x16x64xbf16>
    %188 = vector.shape_cast %185 : vector<1x16x64xbf16> to vector<1x1x16x64xbf16>
    tpu.vector_store %arg10[%c0_98, %c2, %c1_99, %c0_100], %188 {strides = array<i32>} : memref<1x18x18x64xbf16, #tpu.memory_space<vmem>>, vector<1x1x16x64xbf16>,
    %189 = vector.extract_strided_slice %180 {offsets = [0, 0, 128], sizes = [1, 16, 64], strides = [1, 1, 1]} : vector<1x16x1024xbf16> to vector<1x16x64xbf16>
    %c0_101 = arith.constant 0 : index
    %c3 = arith.constant 3 : index
    %c1_102 = arith.constant 1 : index
    %c0_103 = arith.constant 0 : index
    %190 = vector.load %arg10[%c0_101, %c3, %c1_102, %c0_103] : memref<1x18x18x64xbf16, #tpu.memory_space<vmem>>, vector<1x1x16x64xbf16>
    %191 = vector.shape_cast %190 : vector<1x1x16x64xbf16> to vector<1x16x64xbf16>
    %192 = vector.shape_cast %189 : vector<1x16x64xbf16> to vector<1x1x16x64xbf16>
    tpu.vector_store %arg10[%c0_101, %c3, %c1_102, %c0_103], %192 {strides = array<i32>} : memref<1x18x18x64xbf16, #tpu.memory_space<vmem>>, vector<1x1x16x64xbf16>,
    %193 = vector.extract_strided_slice %180 {offsets = [0, 0, 192], sizes = [1, 16, 64], strides = [1, 1, 1]} : vector<1x16x1024xbf16> to vector<1x16x64xbf16>
    %c0_104 = arith.constant 0 : index
    %c4 = arith.constant 4 : index
    %c1_105 = arith.constant 1 : index
    %c0_106 = arith.constant 0 : index
    %194 = vector.load %arg10[%c0_104, %c4, %c1_105, %c0_106] : memref<1x18x18x64xbf16, #tpu.memory_space<vmem>>, vector<1x1x16x64xbf16>
    %195 = vector.shape_cast %194 : vector<1x1x16x64xbf16> to vector<1x16x64xbf16>
    %196 = vector.shape_cast %193 : vector<1x16x64xbf16> to vector<1x1x16x64xbf16>
    tpu.vector_store %arg10[%c0_104, %c4, %c1_105, %c0_106], %196 {strides = array<i32>} : memref<1x18x18x64xbf16, #tpu.memory_space<vmem>>, vector<1x1x16x64xbf16>,
    %197 = vector.extract_strided_slice %180 {offsets = [0, 0, 256], sizes = [1, 16, 64], strides = [1, 1, 1]} : vector<1x16x1024xbf16> to vector<1x16x64xbf16>
    %c0_107 = arith.constant 0 : index
    %c5 = arith.constant 5 : index
    %c1_108 = arith.constant 1 : index
    %c0_109 = arith.constant 0 : index
    %198 = vector.load %arg10[%c0_107, %c5, %c1_108, %c0_109] : memref<1x18x18x64xbf16, #tpu.memory_space<vmem>>, vector<1x1x16x64xbf16>
    %199 = vector.shape_cast %198 : vector<1x1x16x64xbf16> to vector<1x16x64xbf16>
    %200 = vector.shape_cast %197 : vector<1x16x64xbf16> to vector<1x1x16x64xbf16>
    tpu.vector_store %arg10[%c0_107, %c5, %c1_108, %c0_109], %200 {strides = array<i32>} : memref<1x18x18x64xbf16, #tpu.memory_space<vmem>>, vector<1x1x16x64xbf16>,
    %201 = vector.extract_strided_slice %180 {offsets = [0, 0, 320], sizes = [1, 16, 64], strides = [1, 1, 1]} : vector<1x16x1024xbf16> to vector<1x16x64xbf16>
    %c0_110 = arith.constant 0 : index
    %c6 = arith.constant 6 : index
    %c1_111 = arith.constant 1 : index
    %c0_112 = arith.constant 0 : index
    %202 = vector.load %arg10[%c0_110, %c6, %c1_111, %c0_112] : memref<1x18x18x64xbf16, #tpu.memory_space<vmem>>, vector<1x1x16x64xbf16>
    %203 = vector.shape_cast %202 : vector<1x1x16x64xbf16> to vector<1x16x64xbf16>
    %204 = vector.shape_cast %201 : vector<1x16x64xbf16> to vector<1x1x16x64xbf16>
    tpu.vector_store %arg10[%c0_110, %c6, %c1_111, %c0_112], %204 {strides = array<i32>} : memref<1x18x18x64xbf16, #tpu.memory_space<vmem>>, vector<1x1x16x64xbf16>,
    %205 = vector.extract_strided_slice %180 {offsets = [0, 0, 384], sizes = [1, 16, 64], strides = [1, 1, 1]} : vector<1x16x1024xbf16> to vector<1x16x64xbf16>
    %c0_113 = arith.constant 0 : index
    %c7 = arith.constant 7 : index
    %c1_114 = arith.constant 1 : index
    %c0_115 = arith.constant 0 : index
    %206 = vector.load %arg10[%c0_113, %c7, %c1_114, %c0_115] : memref<1x18x18x64xbf16, #tpu.memory_space<vmem>>, vector<1x1x16x64xbf16>
    %207 = vector.shape_cast %206 : vector<1x1x16x64xbf16> to vector<1x16x64xbf16>
    %208 = vector.shape_cast %205 : vector<1x16x64xbf16> to vector<1x1x16x64xbf16>
    tpu.vector_store %arg10[%c0_113, %c7, %c1_114, %c0_115], %208 {strides = array<i32>} : memref<1x18x18x64xbf16, #tpu.memory_space<vmem>>, vector<1x1x16x64xbf16>,
    %209 = vector.extract_strided_slice %180 {offsets = [0, 0, 448], sizes = [1, 16, 64], strides = [1, 1, 1]} : vector<1x16x1024xbf16> to vector<1x16x64xbf16>
    %c0_116 = arith.constant 0 : index
    %c8 = arith.constant 8 : index
    %c1_117 = arith.constant 1 : index
    %c0_118 = arith.constant 0 : index
    %210 = vector.load %arg10[%c0_116, %c8, %c1_117, %c0_118] : memref<1x18x18x64xbf16, #tpu.memory_space<vmem>>, vector<1x1x16x64xbf16>
    %211 = vector.shape_cast %210 : vector<1x1x16x64xbf16> to vector<1x16x64xbf16>
    %212 = vector.shape_cast %209 : vector<1x16x64xbf16> to vector<1x1x16x64xbf16>
    tpu.vector_store %arg10[%c0_116, %c8, %c1_117, %c0_118], %212 {strides = array<i32>} : memref<1x18x18x64xbf16, #tpu.memory_space<vmem>>, vector<1x1x16x64xbf16>,
    %213 = vector.extract_strided_slice %180 {offsets = [0, 0, 512], sizes = [1, 16, 64], strides = [1, 1, 1]} : vector<1x16x1024xbf16> to vector<1x16x64xbf16>
    %c0_119 = arith.constant 0 : index
    %c9 = arith.constant 9 : index
    %c1_120 = arith.constant 1 : index
    %c0_121 = arith.constant 0 : index
    %214 = vector.load %arg10[%c0_119, %c9, %c1_120, %c0_121] : memref<1x18x18x64xbf16, #tpu.memory_space<vmem>>, vector<1x1x16x64xbf16>
    %215 = vector.shape_cast %214 : vector<1x1x16x64xbf16> to vector<1x16x64xbf16>
    %216 = vector.shape_cast %213 : vector<1x16x64xbf16> to vector<1x1x16x64xbf16>
    tpu.vector_store %arg10[%c0_119, %c9, %c1_120, %c0_121], %216 {strides = array<i32>} : memref<1x18x18x64xbf16, #tpu.memory_space<vmem>>, vector<1x1x16x64xbf16>,
    %217 = vector.extract_strided_slice %180 {offsets = [0, 0, 576], sizes = [1, 16, 64], strides = [1, 1, 1]} : vector<1x16x1024xbf16> to vector<1x16x64xbf16>
    %c0_122 = arith.constant 0 : index
    %c10 = arith.constant 10 : index
    %c1_123 = arith.constant 1 : index
    %c0_124 = arith.constant 0 : index
    %218 = vector.load %arg10[%c0_122, %c10, %c1_123, %c0_124] : memref<1x18x18x64xbf16, #tpu.memory_space<vmem>>, vector<1x1x16x64xbf16>
    %219 = vector.shape_cast %218 : vector<1x1x16x64xbf16> to vector<1x16x64xbf16>
    %220 = vector.shape_cast %217 : vector<1x16x64xbf16> to vector<1x1x16x64xbf16>
    tpu.vector_store %arg10[%c0_122, %c10, %c1_123, %c0_124], %220 {strides = array<i32>} : memref<1x18x18x64xbf16, #tpu.memory_space<vmem>>, vector<1x1x16x64xbf16>,
    %221 = vector.extract_strided_slice %180 {offsets = [0, 0, 640], sizes = [1, 16, 64], strides = [1, 1, 1]} : vector<1x16x1024xbf16> to vector<1x16x64xbf16>
    %c0_125 = arith.constant 0 : index
    %c11 = arith.constant 11 : index
    %c1_126 = arith.constant 1 : index
    %c0_127 = arith.constant 0 : index
    %222 = vector.load %arg10[%c0_125, %c11, %c1_126, %c0_127] : memref<1x18x18x64xbf16, #tpu.memory_space<vmem>>, vector<1x1x16x64xbf16>
    %223 = vector.shape_cast %222 : vector<1x1x16x64xbf16> to vector<1x16x64xbf16>
    %224 = vector.shape_cast %221 : vector<1x16x64xbf16> to vector<1x1x16x64xbf16>
    tpu.vector_store %arg10[%c0_125, %c11, %c1_126, %c0_127], %224 {strides = array<i32>} : memref<1x18x18x64xbf16, #tpu.memory_space<vmem>>, vector<1x1x16x64xbf16>,
    %225 = vector.extract_strided_slice %180 {offsets = [0, 0, 704], sizes = [1, 16, 64], strides = [1, 1, 1]} : vector<1x16x1024xbf16> to vector<1x16x64xbf16>
    %c0_128 = arith.constant 0 : index
    %c12 = arith.constant 12 : index
    %c1_129 = arith.constant 1 : index
    %c0_130 = arith.constant 0 : index
    %226 = vector.load %arg10[%c0_128, %c12, %c1_129, %c0_130] : memref<1x18x18x64xbf16, #tpu.memory_space<vmem>>, vector<1x1x16x64xbf16>
    %227 = vector.shape_cast %226 : vector<1x1x16x64xbf16> to vector<1x16x64xbf16>
    %228 = vector.shape_cast %225 : vector<1x16x64xbf16> to vector<1x1x16x64xbf16>
    tpu.vector_store %arg10[%c0_128, %c12, %c1_129, %c0_130], %228 {strides = array<i32>} : memref<1x18x18x64xbf16, #tpu.memory_space<vmem>>, vector<1x1x16x64xbf16>,
    %229 = vector.extract_strided_slice %180 {offsets = [0, 0, 768], sizes = [1, 16, 64], strides = [1, 1, 1]} : vector<1x16x1024xbf16> to vector<1x16x64xbf16>
    %c0_131 = arith.constant 0 : index
    %c13 = arith.constant 13 : index
    %c1_132 = arith.constant 1 : index
    %c0_133 = arith.constant 0 : index
    %230 = vector.load %arg10[%c0_131, %c13, %c1_132, %c0_133] : memref<1x18x18x64xbf16, #tpu.memory_space<vmem>>, vector<1x1x16x64xbf16>
    %231 = vector.shape_cast %230 : vector<1x1x16x64xbf16> to vector<1x16x64xbf16>
    %232 = vector.shape_cast %229 : vector<1x16x64xbf16> to vector<1x1x16x64xbf16>
    tpu.vector_store %arg10[%c0_131, %c13, %c1_132, %c0_133], %232 {strides = array<i32>} : memref<1x18x18x64xbf16, #tpu.memory_space<vmem>>, vector<1x1x16x64xbf16>,
    %233 = vector.extract_strided_slice %180 {offsets = [0, 0, 832], sizes = [1, 16, 64], strides = [1, 1, 1]} : vector<1x16x1024xbf16> to vector<1x16x64xbf16>
    %c0_134 = arith.constant 0 : index
    %c14 = arith.constant 14 : index
    %c1_135 = arith.constant 1 : index
    %c0_136 = arith.constant 0 : index
    %234 = vector.load %arg10[%c0_134, %c14, %c1_135, %c0_136] : memref<1x18x18x64xbf16, #tpu.memory_space<vmem>>, vector<1x1x16x64xbf16>
    %235 = vector.shape_cast %234 : vector<1x1x16x64xbf16> to vector<1x16x64xbf16>
    %236 = vector.shape_cast %233 : vector<1x16x64xbf16> to vector<1x1x16x64xbf16>
    tpu.vector_store %arg10[%c0_134, %c14, %c1_135, %c0_136], %236 {strides = array<i32>} : memref<1x18x18x64xbf16, #tpu.memory_space<vmem>>, vector<1x1x16x64xbf16>,
    %237 = vector.extract_strided_slice %180 {offsets = [0, 0, 896], sizes = [1, 16, 64], strides = [1, 1, 1]} : vector<1x16x1024xbf16> to vector<1x16x64xbf16>
    %c0_137 = arith.constant 0 : index
    %c15 = arith.constant 15 : index
    %c1_138 = arith.constant 1 : index
    %c0_139 = arith.constant 0 : index
    %238 = vector.load %arg10[%c0_137, %c15, %c1_138, %c0_139] : memref<1x18x18x64xbf16, #tpu.memory_space<vmem>>, vector<1x1x16x64xbf16>
    %239 = vector.shape_cast %238 : vector<1x1x16x64xbf16> to vector<1x16x64xbf16>
    %240 = vector.shape_cast %237 : vector<1x16x64xbf16> to vector<1x1x16x64xbf16>
    tpu.vector_store %arg10[%c0_137, %c15, %c1_138, %c0_139], %240 {strides = array<i32>} : memref<1x18x18x64xbf16, #tpu.memory_space<vmem>>, vector<1x1x16x64xbf16>,
    %241 = vector.extract_strided_slice %180 {offsets = [0, 0, 960], sizes = [1, 16, 64], strides = [1, 1, 1]} : vector<1x16x1024xbf16> to vector<1x16x64xbf16>
    %c0_140 = arith.constant 0 : index
    %c16 = arith.constant 16 : index
    %c1_141 = arith.constant 1 : index
    %c0_142 = arith.constant 0 : index
    %242 = vector.load %arg10[%c0_140, %c16, %c1_141, %c0_142] : memref<1x18x18x64xbf16, #tpu.memory_space<vmem>>, vector<1x1x16x64xbf16>
    %243 = vector.shape_cast %242 : vector<1x1x16x64xbf16> to vector<1x16x64xbf16>
    %244 = vector.shape_cast %241 : vector<1x16x64xbf16> to vector<1x1x16x64xbf16>
    tpu.vector_store %arg10[%c0_140, %c16, %c1_141, %c0_142], %244 {strides = array<i32>} : memref<1x18x18x64xbf16, #tpu.memory_space<vmem>>, vector<1x1x16x64xbf16>,
    %c0_143 = arith.constant 0 : index
    %c0_144 = arith.constant 0 : index
    %c0_145 = arith.constant 0 : index
    %c0_146 = arith.constant 0 : index
    %245 = vector.load %arg10[%c0_143, %c0_144, %c0_145, %c0_146] : memref<1x18x18x64xbf16, #tpu.memory_space<vmem>>, vector<1x16x16x64xbf16>
    %246 = vector.shape_cast %245 : vector<1x16x16x64xbf16> to vector<256x64xbf16>
    %c0_147 = arith.constant 0 : index
    %c0_148 = arith.constant 0 : index
    %c0_149 = arith.constant 0 : index
    %c0_150 = arith.constant 0 : index
    %247 = vector.load %arg3[%c0_147, %c0_148, %c0_149, %c0_150] : memref<1x9x64x64xbf16, #tpu.memory_space<vmem>>, vector<1x1x64x64xbf16>
    %248 = vector.shape_cast %247 : vector<1x1x64x64xbf16> to vector<64x64xbf16>
    %cst_151 = arith.constant dense<0.000000e+00> : vector<256x64xf32>
    %249 = tpu.matmul %246, %248, %cst_151 {dimension_numbers = #tpu.dot_dimension_numbers<[1], [0], [0], [1], [0, 0, 1, 1], [], []>} : vector<256x64xbf16>, vector<64x64xbf16>, vector<256x64xf32> -> vector<256x64xf32>
    %c0_152 = arith.constant 0 : index
    %c1_153 = arith.constant 1 : index
    %c0_154 = arith.constant 0 : index
    %c0_155 = arith.constant 0 : index
    %250 = vector.load %arg10[%c0_152, %c1_153, %c0_154, %c0_155] : memref<1x18x18x64xbf16, #tpu.memory_space<vmem>>, vector<1x16x16x64xbf16>
    %251 = vector.shape_cast %250 : vector<1x16x16x64xbf16> to vector<256x64xbf16>
    %c0_156 = arith.constant 0 : index
    %c1_157 = arith.constant 1 : index
    %c0_158 = arith.constant 0 : index
    %c0_159 = arith.constant 0 : index
    %252 = vector.load %arg3[%c0_156, %c1_157, %c0_158, %c0_159] : memref<1x9x64x64xbf16, #tpu.memory_space<vmem>>, vector<1x1x64x64xbf16>
    %253 = vector.shape_cast %252 : vector<1x1x64x64xbf16> to vector<64x64xbf16>
    %cst_160 = arith.constant dense<0.000000e+00> : vector<256x64xf32>
    %254 = tpu.matmul %251, %253, %cst_160 {dimension_numbers = #tpu.dot_dimension_numbers<[1], [0], [0], [1], [0, 0, 1, 1], [], []>} : vector<256x64xbf16>, vector<64x64xbf16>, vector<256x64xf32> -> vector<256x64xf32>
    %255 = arith.addf %249, %254 : vector<256x64xf32>
    %c0_161 = arith.constant 0 : index
    %c2_162 = arith.constant 2 : index
    %c0_163 = arith.constant 0 : index
    %c0_164 = arith.constant 0 : index
    %256 = vector.load %arg10[%c0_161, %c2_162, %c0_163, %c0_164] : memref<1x18x18x64xbf16, #tpu.memory_space<vmem>>, vector<1x16x16x64xbf16>
    %257 = vector.shape_cast %256 : vector<1x16x16x64xbf16> to vector<256x64xbf16>
    %c0_165 = arith.constant 0 : index
    %c2_166 = arith.constant 2 : index
    %c0_167 = arith.constant 0 : index
    %c0_168 = arith.constant 0 : index
    %258 = vector.load %arg3[%c0_165, %c2_166, %c0_167, %c0_168] : memref<1x9x64x64xbf16, #tpu.memory_space<vmem>>, vector<1x1x64x64xbf16>
    %259 = vector.shape_cast %258 : vector<1x1x64x64xbf16> to vector<64x64xbf16>
    %cst_169 = arith.constant dense<0.000000e+00> : vector<256x64xf32>
    %260 = tpu.matmul %257, %259, %cst_169 {dimension_numbers = #tpu.dot_dimension_numbers<[1], [0], [0], [1], [0, 0, 1, 1], [], []>} : vector<256x64xbf16>, vector<64x64xbf16>, vector<256x64xf32> -> vector<256x64xf32>
    %261 = arith.addf %255, %260 : vector<256x64xf32>
    %c0_170 = arith.constant 0 : index
    %c0_171 = arith.constant 0 : index
    %c1_172 = arith.constant 1 : index
    %c0_173 = arith.constant 0 : index
    %262 = vector.load %arg10[%c0_170, %c0_171, %c1_172, %c0_173] : memref<1x18x18x64xbf16, #tpu.memory_space<vmem>>, vector<1x16x16x64xbf16>
    %263 = vector.shape_cast %262 : vector<1x16x16x64xbf16> to vector<256x64xbf16>
    %c0_174 = arith.constant 0 : index
    %c3_175 = arith.constant 3 : index
    %c0_176 = arith.constant 0 : index
    %c0_177 = arith.constant 0 : index
    %264 = vector.load %arg3[%c0_174, %c3_175, %c0_176, %c0_177] : memref<1x9x64x64xbf16, #tpu.memory_space<vmem>>, vector<1x1x64x64xbf16>
    %265 = vector.shape_cast %264 : vector<1x1x64x64xbf16> to vector<64x64xbf16>
    %cst_178 = arith.constant dense<0.000000e+00> : vector<256x64xf32>
    %266 = tpu.matmul %263, %265, %cst_178 {dimension_numbers = #tpu.dot_dimension_numbers<[1], [0], [0], [1], [0, 0, 1, 1], [], []>} : vector<256x64xbf16>, vector<64x64xbf16>, vector<256x64xf32> -> vector<256x64xf32>
    %267 = arith.addf %261, %266 : vector<256x64xf32>
    %c0_179 = arith.constant 0 : index
    %c1_180 = arith.constant 1 : index
    %c1_181 = arith.constant 1 : index
    %c0_182 = arith.constant 0 : index
    %268 = vector.load %arg10[%c0_179, %c1_180, %c1_181, %c0_182] : memref<1x18x18x64xbf16, #tpu.memory_space<vmem>>, vector<1x16x16x64xbf16>
    %269 = vector.shape_cast %268 : vector<1x16x16x64xbf16> to vector<256x64xbf16>
    %c0_183 = arith.constant 0 : index
    %c4_184 = arith.constant 4 : index
    %c0_185 = arith.constant 0 : index
    %c0_186 = arith.constant 0 : index
    %270 = vector.load %arg3[%c0_183, %c4_184, %c0_185, %c0_186] : memref<1x9x64x64xbf16, #tpu.memory_space<vmem>>, vector<1x1x64x64xbf16>
    %271 = vector.shape_cast %270 : vector<1x1x64x64xbf16> to vector<64x64xbf16>
    %cst_187 = arith.constant dense<0.000000e+00> : vector<256x64xf32>
    %272 = tpu.matmul %269, %271, %cst_187 {dimension_numbers = #tpu.dot_dimension_numbers<[1], [0], [0], [1], [0, 0, 1, 1], [], []>} : vector<256x64xbf16>, vector<64x64xbf16>, vector<256x64xf32> -> vector<256x64xf32>
    %273 = arith.addf %267, %272 : vector<256x64xf32>
    %c0_188 = arith.constant 0 : index
    %c2_189 = arith.constant 2 : index
    %c1_190 = arith.constant 1 : index
    %c0_191 = arith.constant 0 : index
    %274 = vector.load %arg10[%c0_188, %c2_189, %c1_190, %c0_191] : memref<1x18x18x64xbf16, #tpu.memory_space<vmem>>, vector<1x16x16x64xbf16>
    %275 = vector.shape_cast %274 : vector<1x16x16x64xbf16> to vector<256x64xbf16>
    %c0_192 = arith.constant 0 : index
    %c5_193 = arith.constant 5 : index
    %c0_194 = arith.constant 0 : index
    %c0_195 = arith.constant 0 : index
    %276 = vector.load %arg3[%c0_192, %c5_193, %c0_194, %c0_195] : memref<1x9x64x64xbf16, #tpu.memory_space<vmem>>, vector<1x1x64x64xbf16>
    %277 = vector.shape_cast %276 : vector<1x1x64x64xbf16> to vector<64x64xbf16>
    %cst_196 = arith.constant dense<0.000000e+00> : vector<256x64xf32>
    %278 = tpu.matmul %275, %277, %cst_196 {dimension_numbers = #tpu.dot_dimension_numbers<[1], [0], [0], [1], [0, 0, 1, 1], [], []>} : vector<256x64xbf16>, vector<64x64xbf16>, vector<256x64xf32> -> vector<256x64xf32>
    %279 = arith.addf %273, %278 : vector<256x64xf32>
    %c0_197 = arith.constant 0 : index
    %c0_198 = arith.constant 0 : index
    %c2_199 = arith.constant 2 : index
    %c0_200 = arith.constant 0 : index
    %280 = vector.load %arg10[%c0_197, %c0_198, %c2_199, %c0_200] : memref<1x18x18x64xbf16, #tpu.memory_space<vmem>>, vector<1x16x16x64xbf16>
    %281 = vector.shape_cast %280 : vector<1x16x16x64xbf16> to vector<256x64xbf16>
    %c0_201 = arith.constant 0 : index
    %c6_202 = arith.constant 6 : index
    %c0_203 = arith.constant 0 : index
    %c0_204 = arith.constant 0 : index
    %282 = vector.load %arg3[%c0_201, %c6_202, %c0_203, %c0_204] : memref<1x9x64x64xbf16, #tpu.memory_space<vmem>>, vector<1x1x64x64xbf16>
    %283 = vector.shape_cast %282 : vector<1x1x64x64xbf16> to vector<64x64xbf16>
    %cst_205 = arith.constant dense<0.000000e+00> : vector<256x64xf32>
    %284 = tpu.matmul %281, %283, %cst_205 {dimension_numbers = #tpu.dot_dimension_numbers<[1], [0], [0], [1], [0, 0, 1, 1], [], []>} : vector<256x64xbf16>, vector<64x64xbf16>, vector<256x64xf32> -> vector<256x64xf32>
    %285 = arith.addf %279, %284 : vector<256x64xf32>
    %c0_206 = arith.constant 0 : index
    %c1_207 = arith.constant 1 : index
    %c2_208 = arith.constant 2 : index
    %c0_209 = arith.constant 0 : index
    %286 = vector.load %arg10[%c0_206, %c1_207, %c2_208, %c0_209] : memref<1x18x18x64xbf16, #tpu.memory_space<vmem>>, vector<1x16x16x64xbf16>
    %287 = vector.shape_cast %286 : vector<1x16x16x64xbf16> to vector<256x64xbf16>
    %c0_210 = arith.constant 0 : index
    %c7_211 = arith.constant 7 : index
    %c0_212 = arith.constant 0 : index
    %c0_213 = arith.constant 0 : index
    %288 = vector.load %arg3[%c0_210, %c7_211, %c0_212, %c0_213] : memref<1x9x64x64xbf16, #tpu.memory_space<vmem>>, vector<1x1x64x64xbf16>
    %289 = vector.shape_cast %288 : vector<1x1x64x64xbf16> to vector<64x64xbf16>
    %cst_214 = arith.constant dense<0.000000e+00> : vector<256x64xf32>
    %290 = tpu.matmul %287, %289, %cst_214 {dimension_numbers = #tpu.dot_dimension_numbers<[1], [0], [0], [1], [0, 0, 1, 1], [], []>} : vector<256x64xbf16>, vector<64x64xbf16>, vector<256x64xf32> -> vector<256x64xf32>
    %291 = arith.addf %285, %290 : vector<256x64xf32>
    %c0_215 = arith.constant 0 : index
    %c2_216 = arith.constant 2 : index
    %c2_217 = arith.constant 2 : index
    %c0_218 = arith.constant 0 : index
    %292 = vector.load %arg10[%c0_215, %c2_216, %c2_217, %c0_218] : memref<1x18x18x64xbf16, #tpu.memory_space<vmem>>, vector<1x16x16x64xbf16>
    %293 = vector.shape_cast %292 : vector<1x16x16x64xbf16> to vector<256x64xbf16>
    %c0_219 = arith.constant 0 : index
    %c8_220 = arith.constant 8 : index
    %c0_221 = arith.constant 0 : index
    %c0_222 = arith.constant 0 : index
    %294 = vector.load %arg3[%c0_219, %c8_220, %c0_221, %c0_222] : memref<1x9x64x64xbf16, #tpu.memory_space<vmem>>, vector<1x1x64x64xbf16>
    %295 = vector.shape_cast %294 : vector<1x1x64x64xbf16> to vector<64x64xbf16>
    %cst_223 = arith.constant dense<0.000000e+00> : vector<256x64xf32>
    %296 = tpu.matmul %293, %295, %cst_223 {dimension_numbers = #tpu.dot_dimension_numbers<[1], [0], [0], [1], [0, 0, 1, 1], [], []>} : vector<256x64xbf16>, vector<64x64xbf16>, vector<256x64xf32> -> vector<256x64xf32>
    %297 = arith.addf %291, %296 : vector<256x64xf32>
    %c0_224 = arith.constant 0 : index
    %c0_225 = arith.constant 0 : index
    %c0_226 = arith.constant 0 : index
    %298 = vector.load %arg4[%c0_224, %c0_225, %c0_226] : memref<1x1x64xf32, #tpu.memory_space<vmem>>, vector<1x1x64xf32>
    %299 = vector.shape_cast %298 : vector<1x1x64xf32> to vector<1x64xf32>
    %300 = vector.broadcast %299 : vector<1x64xf32> to vector<256x64xf32>
    %301 = arith.addf %297, %300 : vector<256x64xf32>
    %302 = vector.shape_cast %301 : vector<256x64xf32> to vector<1x16x16x64xf32>
    %303 = vector.extract_strided_slice %302 {offsets = [0, 0, 0, 0], sizes = [1, 1, 16, 64], strides = [1, 1, 1, 1]} : vector<1x16x16x64xf32> to vector<1x1x16x64xf32>
    %304 = vector.shape_cast %303 : vector<1x1x16x64xf32> to vector<1x16x64xf32>
    %c0_227 = arith.constant 0 : index
    %c0_228 = arith.constant 0 : index
    %c0_229 = arith.constant 0 : index
    %305 = vector.load %arg9[%c0_227, %c0_228, %c0_229] : memref<1x16x1024xf32, #tpu.memory_space<vmem>>, vector<1x16x64xf32>
    tpu.vector_store %arg9[%c0_227, %c0_228, %c0_229], %304 {strides = array<i32>} : memref<1x16x1024xf32, #tpu.memory_space<vmem>>, vector<1x16x64xf32>,
    %306 = vector.extract_strided_slice %302 {offsets = [0, 1, 0, 0], sizes = [1, 1, 16, 64], strides = [1, 1, 1, 1]} : vector<1x16x16x64xf32> to vector<1x1x16x64xf32>
    %307 = vector.shape_cast %306 : vector<1x1x16x64xf32> to vector<1x16x64xf32>
    %c0_230 = arith.constant 0 : index
    %c0_231 = arith.constant 0 : index
    %c64_232 = arith.constant 64 : index
    %308 = vector.load %arg9[%c0_230, %c0_231, %c64_232] : memref<1x16x1024xf32, #tpu.memory_space<vmem>>, vector<1x16x64xf32>
    tpu.vector_store %arg9[%c0_230, %c0_231, %c64_232], %307 {strides = array<i32>} : memref<1x16x1024xf32, #tpu.memory_space<vmem>>, vector<1x16x64xf32>,
    %309 = vector.extract_strided_slice %302 {offsets = [0, 2, 0, 0], sizes = [1, 1, 16, 64], strides = [1, 1, 1, 1]} : vector<1x16x16x64xf32> to vector<1x1x16x64xf32>
    %310 = vector.shape_cast %309 : vector<1x1x16x64xf32> to vector<1x16x64xf32>
    %c0_233 = arith.constant 0 : index
    %c0_234 = arith.constant 0 : index
    %c128_235 = arith.constant 128 : index
    %311 = vector.load %arg9[%c0_233, %c0_234, %c128_235] : memref<1x16x1024xf32, #tpu.memory_space<vmem>>, vector<1x16x64xf32>
    tpu.vector_store %arg9[%c0_233, %c0_234, %c128_235], %310 {strides = array<i32>} : memref<1x16x1024xf32, #tpu.memory_space<vmem>>, vector<1x16x64xf32>,
    %312 = vector.extract_strided_slice %302 {offsets = [0, 3, 0, 0], sizes = [1, 1, 16, 64], strides = [1, 1, 1, 1]} : vector<1x16x16x64xf32> to vector<1x1x16x64xf32>
    %313 = vector.shape_cast %312 : vector<1x1x16x64xf32> to vector<1x16x64xf32>
    %c0_236 = arith.constant 0 : index
    %c0_237 = arith.constant 0 : index
    %c192_238 = arith.constant 192 : index
    %314 = vector.load %arg9[%c0_236, %c0_237, %c192_238] : memref<1x16x1024xf32, #tpu.memory_space<vmem>>, vector<1x16x64xf32>
    tpu.vector_store %arg9[%c0_236, %c0_237, %c192_238], %313 {strides = array<i32>} : memref<1x16x1024xf32, #tpu.memory_space<vmem>>, vector<1x16x64xf32>,
    %315 = vector.extract_strided_slice %302 {offsets = [0, 4, 0, 0], sizes = [1, 1, 16, 64], strides = [1, 1, 1, 1]} : vector<1x16x16x64xf32> to vector<1x1x16x64xf32>
    %316 = vector.shape_cast %315 : vector<1x1x16x64xf32> to vector<1x16x64xf32>
    %c0_239 = arith.constant 0 : index
    %c0_240 = arith.constant 0 : index
    %c256_241 = arith.constant 256 : index
    %317 = vector.load %arg9[%c0_239, %c0_240, %c256_241] : memref<1x16x1024xf32, #tpu.memory_space<vmem>>, vector<1x16x64xf32>
    tpu.vector_store %arg9[%c0_239, %c0_240, %c256_241], %316 {strides = array<i32>} : memref<1x16x1024xf32, #tpu.memory_space<vmem>>, vector<1x16x64xf32>,
    %318 = vector.extract_strided_slice %302 {offsets = [0, 5, 0, 0], sizes = [1, 1, 16, 64], strides = [1, 1, 1, 1]} : vector<1x16x16x64xf32> to vector<1x1x16x64xf32>
    %319 = vector.shape_cast %318 : vector<1x1x16x64xf32> to vector<1x16x64xf32>
    %c0_242 = arith.constant 0 : index
    %c0_243 = arith.constant 0 : index
    %c320_244 = arith.constant 320 : index
    %320 = vector.load %arg9[%c0_242, %c0_243, %c320_244] : memref<1x16x1024xf32, #tpu.memory_space<vmem>>, vector<1x16x64xf32>
    tpu.vector_store %arg9[%c0_242, %c0_243, %c320_244], %319 {strides = array<i32>} : memref<1x16x1024xf32, #tpu.memory_space<vmem>>, vector<1x16x64xf32>,
    %321 = vector.extract_strided_slice %302 {offsets = [0, 6, 0, 0], sizes = [1, 1, 16, 64], strides = [1, 1, 1, 1]} : vector<1x16x16x64xf32> to vector<1x1x16x64xf32>
    %322 = vector.shape_cast %321 : vector<1x1x16x64xf32> to vector<1x16x64xf32>
    %c0_245 = arith.constant 0 : index
    %c0_246 = arith.constant 0 : index
    %c384_247 = arith.constant 384 : index
    %323 = vector.load %arg9[%c0_245, %c0_246, %c384_247] : memref<1x16x1024xf32, #tpu.memory_space<vmem>>, vector<1x16x64xf32>
    tpu.vector_store %arg9[%c0_245, %c0_246, %c384_247], %322 {strides = array<i32>} : memref<1x16x1024xf32, #tpu.memory_space<vmem>>, vector<1x16x64xf32>,
    %324 = vector.extract_strided_slice %302 {offsets = [0, 7, 0, 0], sizes = [1, 1, 16, 64], strides = [1, 1, 1, 1]} : vector<1x16x16x64xf32> to vector<1x1x16x64xf32>
    %325 = vector.shape_cast %324 : vector<1x1x16x64xf32> to vector<1x16x64xf32>
    %c0_248 = arith.constant 0 : index
    %c0_249 = arith.constant 0 : index
    %c448_250 = arith.constant 448 : index
    %326 = vector.load %arg9[%c0_248, %c0_249, %c448_250] : memref<1x16x1024xf32, #tpu.memory_space<vmem>>, vector<1x16x64xf32>
    tpu.vector_store %arg9[%c0_248, %c0_249, %c448_250], %325 {strides = array<i32>} : memref<1x16x1024xf32, #tpu.memory_space<vmem>>, vector<1x16x64xf32>,
    %327 = vector.extract_strided_slice %302 {offsets = [0, 8, 0, 0], sizes = [1, 1, 16, 64], strides = [1, 1, 1, 1]} : vector<1x16x16x64xf32> to vector<1x1x16x64xf32>
    %328 = vector.shape_cast %327 : vector<1x1x16x64xf32> to vector<1x16x64xf32>
    %c0_251 = arith.constant 0 : index
    %c0_252 = arith.constant 0 : index
    %c512_253 = arith.constant 512 : index
    %329 = vector.load %arg9[%c0_251, %c0_252, %c512_253] : memref<1x16x1024xf32, #tpu.memory_space<vmem>>, vector<1x16x64xf32>
    tpu.vector_store %arg9[%c0_251, %c0_252, %c512_253], %328 {strides = array<i32>} : memref<1x16x1024xf32, #tpu.memory_space<vmem>>, vector<1x16x64xf32>,
    %330 = vector.extract_strided_slice %302 {offsets = [0, 9, 0, 0], sizes = [1, 1, 16, 64], strides = [1, 1, 1, 1]} : vector<1x16x16x64xf32> to vector<1x1x16x64xf32>
    %331 = vector.shape_cast %330 : vector<1x1x16x64xf32> to vector<1x16x64xf32>
    %c0_254 = arith.constant 0 : index
    %c0_255 = arith.constant 0 : index
    %c576_256 = arith.constant 576 : index
    %332 = vector.load %arg9[%c0_254, %c0_255, %c576_256] : memref<1x16x1024xf32, #tpu.memory_space<vmem>>, vector<1x16x64xf32>
    tpu.vector_store %arg9[%c0_254, %c0_255, %c576_256], %331 {strides = array<i32>} : memref<1x16x1024xf32, #tpu.memory_space<vmem>>, vector<1x16x64xf32>,
    %333 = vector.extract_strided_slice %302 {offsets = [0, 10, 0, 0], sizes = [1, 1, 16, 64], strides = [1, 1, 1, 1]} : vector<1x16x16x64xf32> to vector<1x1x16x64xf32>
    %334 = vector.shape_cast %333 : vector<1x1x16x64xf32> to vector<1x16x64xf32>
    %c0_257 = arith.constant 0 : index
    %c0_258 = arith.constant 0 : index
    %c640_259 = arith.constant 640 : index
    %335 = vector.load %arg9[%c0_257, %c0_258, %c640_259] : memref<1x16x1024xf32, #tpu.memory_space<vmem>>, vector<1x16x64xf32>
    tpu.vector_store %arg9[%c0_257, %c0_258, %c640_259], %334 {strides = array<i32>} : memref<1x16x1024xf32, #tpu.memory_space<vmem>>, vector<1x16x64xf32>,
    %336 = vector.extract_strided_slice %302 {offsets = [0, 11, 0, 0], sizes = [1, 1, 16, 64], strides = [1, 1, 1, 1]} : vector<1x16x16x64xf32> to vector<1x1x16x64xf32>
    %337 = vector.shape_cast %336 : vector<1x1x16x64xf32> to vector<1x16x64xf32>
    %c0_260 = arith.constant 0 : index
    %c0_261 = arith.constant 0 : index
    %c704_262 = arith.constant 704 : index
    %338 = vector.load %arg9[%c0_260, %c0_261, %c704_262] : memref<1x16x1024xf32, #tpu.memory_space<vmem>>, vector<1x16x64xf32>
    tpu.vector_store %arg9[%c0_260, %c0_261, %c704_262], %337 {strides = array<i32>} : memref<1x16x1024xf32, #tpu.memory_space<vmem>>, vector<1x16x64xf32>,
    %339 = vector.extract_strided_slice %302 {offsets = [0, 12, 0, 0], sizes = [1, 1, 16, 64], strides = [1, 1, 1, 1]} : vector<1x16x16x64xf32> to vector<1x1x16x64xf32>
    %340 = vector.shape_cast %339 : vector<1x1x16x64xf32> to vector<1x16x64xf32>
    %c0_263 = arith.constant 0 : index
    %c0_264 = arith.constant 0 : index
    %c768_265 = arith.constant 768 : index
    %341 = vector.load %arg9[%c0_263, %c0_264, %c768_265] : memref<1x16x1024xf32, #tpu.memory_space<vmem>>, vector<1x16x64xf32>
    tpu.vector_store %arg9[%c0_263, %c0_264, %c768_265], %340 {strides = array<i32>} : memref<1x16x1024xf32, #tpu.memory_space<vmem>>, vector<1x16x64xf32>,
    %342 = vector.extract_strided_slice %302 {offsets = [0, 13, 0, 0], sizes = [1, 1, 16, 64], strides = [1, 1, 1, 1]} : vector<1x16x16x64xf32> to vector<1x1x16x64xf32>
    %343 = vector.shape_cast %342 : vector<1x1x16x64xf32> to vector<1x16x64xf32>
    %c0_266 = arith.constant 0 : index
    %c0_267 = arith.constant 0 : index
    %c832_268 = arith.constant 832 : index
    %344 = vector.load %arg9[%c0_266, %c0_267, %c832_268] : memref<1x16x1024xf32, #tpu.memory_space<vmem>>, vector<1x16x64xf32>
    tpu.vector_store %arg9[%c0_266, %c0_267, %c832_268], %343 {strides = array<i32>} : memref<1x16x1024xf32, #tpu.memory_space<vmem>>, vector<1x16x64xf32>,
    %345 = vector.extract_strided_slice %302 {offsets = [0, 14, 0, 0], sizes = [1, 1, 16, 64], strides = [1, 1, 1, 1]} : vector<1x16x16x64xf32> to vector<1x1x16x64xf32>
    %346 = vector.shape_cast %345 : vector<1x1x16x64xf32> to vector<1x16x64xf32>
    %c0_269 = arith.constant 0 : index
    %c0_270 = arith.constant 0 : index
    %c896_271 = arith.constant 896 : index
    %347 = vector.load %arg9[%c0_269, %c0_270, %c896_271] : memref<1x16x1024xf32, #tpu.memory_space<vmem>>, vector<1x16x64xf32>
    tpu.vector_store %arg9[%c0_269, %c0_270, %c896_271], %346 {strides = array<i32>} : memref<1x16x1024xf32, #tpu.memory_space<vmem>>, vector<1x16x64xf32>,
    %348 = vector.extract_strided_slice %302 {offsets = [0, 15, 0, 0], sizes = [1, 1, 16, 64], strides = [1, 1, 1, 1]} : vector<1x16x16x64xf32> to vector<1x1x16x64xf32>
    %349 = vector.shape_cast %348 : vector<1x1x16x64xf32> to vector<1x16x64xf32>
    %c0_272 = arith.constant 0 : index
    %c0_273 = arith.constant 0 : index
    %c960_274 = arith.constant 960 : index
    %350 = vector.load %arg9[%c0_272, %c0_273, %c960_274] : memref<1x16x1024xf32, #tpu.memory_space<vmem>>, vector<1x16x64xf32>
    tpu.vector_store %arg9[%c0_272, %c0_273, %c960_274], %349 {strides = array<i32>} : memref<1x16x1024xf32, #tpu.memory_space<vmem>>, vector<1x16x64xf32>,
    %c0_275 = arith.constant 0 : index
    %c0_276 = arith.constant 0 : index
    %c0_277 = arith.constant 0 : index
    %351 = vector.load %arg9[%c0_275, %c0_276, %c0_277] : memref<1x16x1024xf32, #tpu.memory_space<vmem>>, vector<1x16x1024xf32>
    %cst_278 = arith.constant dense<0.000000e+00> : vector<1x1024xf32>
    %352 = vector.multi_reduction <add>, %351, %cst_278 [1] : vector<1x16x1024xf32> to vector<1x1024xf32>
    %353 = vector.extract_strided_slice %352 {offsets = [0, 0], sizes = [1, 64], strides = [1, 1]} : vector<1x1024xf32> to vector<1x64xf32>
    %354 = vector.extract_strided_slice %352 {offsets = [0, 64], sizes = [1, 64], strides = [1, 1]} : vector<1x1024xf32> to vector<1x64xf32>
    %355 = arith.addf %353, %354 : vector<1x64xf32>
    %356 = vector.extract_strided_slice %352 {offsets = [0, 128], sizes = [1, 64], strides = [1, 1]} : vector<1x1024xf32> to vector<1x64xf32>
    %357 = arith.addf %355, %356 : vector<1x64xf32>
    %358 = vector.extract_strided_slice %352 {offsets = [0, 192], sizes = [1, 64], strides = [1, 1]} : vector<1x1024xf32> to vector<1x64xf32>
    %359 = arith.addf %357, %358 : vector<1x64xf32>
    %360 = vector.extract_strided_slice %352 {offsets = [0, 256], sizes = [1, 64], strides = [1, 1]} : vector<1x1024xf32> to vector<1x64xf32>
    %361 = arith.addf %359, %360 : vector<1x64xf32>
    %362 = vector.extract_strided_slice %352 {offsets = [0, 320], sizes = [1, 64], strides = [1, 1]} : vector<1x1024xf32> to vector<1x64xf32>
    %363 = arith.addf %361, %362 : vector<1x64xf32>
    %364 = vector.extract_strided_slice %352 {offsets = [0, 384], sizes = [1, 64], strides = [1, 1]} : vector<1x1024xf32> to vector<1x64xf32>
    %365 = arith.addf %363, %364 : vector<1x64xf32>
    %366 = vector.extract_strided_slice %352 {offsets = [0, 448], sizes = [1, 64], strides = [1, 1]} : vector<1x1024xf32> to vector<1x64xf32>
    %367 = arith.addf %365, %366 : vector<1x64xf32>
    %368 = vector.extract_strided_slice %352 {offsets = [0, 512], sizes = [1, 64], strides = [1, 1]} : vector<1x1024xf32> to vector<1x64xf32>
    %369 = arith.addf %367, %368 : vector<1x64xf32>
    %370 = vector.extract_strided_slice %352 {offsets = [0, 576], sizes = [1, 64], strides = [1, 1]} : vector<1x1024xf32> to vector<1x64xf32>
    %371 = arith.addf %369, %370 : vector<1x64xf32>
    %372 = vector.extract_strided_slice %352 {offsets = [0, 640], sizes = [1, 64], strides = [1, 1]} : vector<1x1024xf32> to vector<1x64xf32>
    %373 = arith.addf %371, %372 : vector<1x64xf32>
    %374 = vector.extract_strided_slice %352 {offsets = [0, 704], sizes = [1, 64], strides = [1, 1]} : vector<1x1024xf32> to vector<1x64xf32>
    %375 = arith.addf %373, %374 : vector<1x64xf32>
    %376 = vector.extract_strided_slice %352 {offsets = [0, 768], sizes = [1, 64], strides = [1, 1]} : vector<1x1024xf32> to vector<1x64xf32>
    %377 = arith.addf %375, %376 : vector<1x64xf32>
    %378 = vector.extract_strided_slice %352 {offsets = [0, 832], sizes = [1, 64], strides = [1, 1]} : vector<1x1024xf32> to vector<1x64xf32>
    %379 = arith.addf %377, %378 : vector<1x64xf32>
    %380 = vector.extract_strided_slice %352 {offsets = [0, 896], sizes = [1, 64], strides = [1, 1]} : vector<1x1024xf32> to vector<1x64xf32>
    %381 = arith.addf %379, %380 : vector<1x64xf32>
    %382 = vector.extract_strided_slice %352 {offsets = [0, 960], sizes = [1, 64], strides = [1, 1]} : vector<1x1024xf32> to vector<1x64xf32>
    %383 = arith.addf %381, %382 : vector<1x64xf32>
    %cst_279 = arith.constant 3.906250e-03 : f32
    %384 = vector.broadcast %cst_279 : f32 to vector<1x64xf32>
    %385 = arith.mulf %383, %384 : vector<1x64xf32>
    %c0_280 = arith.constant 0 : index
    %c0_281 = arith.constant 0 : index
    %c0_282 = arith.constant 0 : index
    %386 = vector.load %arg11[%c0_280, %c0_281, %c0_282] : memref<1x1x1024xf32, #tpu.memory_space<vmem>>, vector<1x1x64xf32>
    %387 = vector.shape_cast %386 : vector<1x1x64xf32> to vector<1x64xf32>
    %388 = vector.shape_cast %385 : vector<1x64xf32> to vector<1x1x64xf32>
    tpu.vector_store %arg11[%c0_280, %c0_281, %c0_282], %388 {strides = array<i32>} : memref<1x1x1024xf32, #tpu.memory_space<vmem>>, vector<1x1x64xf32>,
    %c0_283 = arith.constant 0 : index
    %c0_284 = arith.constant 0 : index
    %c64_285 = arith.constant 64 : index
    %389 = vector.load %arg11[%c0_283, %c0_284, %c64_285] : memref<1x1x1024xf32, #tpu.memory_space<vmem>>, vector<1x1x64xf32>
    %390 = vector.shape_cast %389 : vector<1x1x64xf32> to vector<1x64xf32>
    %391 = vector.shape_cast %385 : vector<1x64xf32> to vector<1x1x64xf32>
    tpu.vector_store %arg11[%c0_283, %c0_284, %c64_285], %391 {strides = array<i32>} : memref<1x1x1024xf32, #tpu.memory_space<vmem>>, vector<1x1x64xf32>,
    %c0_286 = arith.constant 0 : index
    %c0_287 = arith.constant 0 : index
    %c128_288 = arith.constant 128 : index
    %392 = vector.load %arg11[%c0_286, %c0_287, %c128_288] : memref<1x1x1024xf32, #tpu.memory_space<vmem>>, vector<1x1x64xf32>
    %393 = vector.shape_cast %392 : vector<1x1x64xf32> to vector<1x64xf32>
    %394 = vector.shape_cast %385 : vector<1x64xf32> to vector<1x1x64xf32>
    tpu.vector_store %arg11[%c0_286, %c0_287, %c128_288], %394 {strides = array<i32>} : memref<1x1x1024xf32, #tpu.memory_space<vmem>>, vector<1x1x64xf32>,
    %c0_289 = arith.constant 0 : index
    %c0_290 = arith.constant 0 : index
    %c192_291 = arith.constant 192 : index
    %395 = vector.load %arg11[%c0_289, %c0_290, %c192_291] : memref<1x1x1024xf32, #tpu.memory_space<vmem>>, vector<1x1x64xf32>
    %396 = vector.shape_cast %395 : vector<1x1x64xf32> to vector<1x64xf32>
    %397 = vector.shape_cast %385 : vector<1x64xf32> to vector<1x1x64xf32>
    tpu.vector_store %arg11[%c0_289, %c0_290, %c192_291], %397 {strides = array<i32>} : memref<1x1x1024xf32, #tpu.memory_space<vmem>>, vector<1x1x64xf32>,
    %c0_292 = arith.constant 0 : index
    %c0_293 = arith.constant 0 : index
    %c256_294 = arith.constant 256 : index
    %398 = vector.load %arg11[%c0_292, %c0_293, %c256_294] : memref<1x1x1024xf32, #tpu.memory_space<vmem>>, vector<1x1x64xf32>
    %399 = vector.shape_cast %398 : vector<1x1x64xf32> to vector<1x64xf32>
    %400 = vector.shape_cast %385 : vector<1x64xf32> to vector<1x1x64xf32>
    tpu.vector_store %arg11[%c0_292, %c0_293, %c256_294], %400 {strides = array<i32>} : memref<1x1x1024xf32, #tpu.memory_space<vmem>>, vector<1x1x64xf32>,
    %c0_295 = arith.constant 0 : index
    %c0_296 = arith.constant 0 : index
    %c320_297 = arith.constant 320 : index
    %401 = vector.load %arg11[%c0_295, %c0_296, %c320_297] : memref<1x1x1024xf32, #tpu.memory_space<vmem>>, vector<1x1x64xf32>
    %402 = vector.shape_cast %401 : vector<1x1x64xf32> to vector<1x64xf32>
    %403 = vector.shape_cast %385 : vector<1x64xf32> to vector<1x1x64xf32>
    tpu.vector_store %arg11[%c0_295, %c0_296, %c320_297], %403 {strides = array<i32>} : memref<1x1x1024xf32, #tpu.memory_space<vmem>>, vector<1x1x64xf32>,
    %c0_298 = arith.constant 0 : index
    %c0_299 = arith.constant 0 : index
    %c384_300 = arith.constant 384 : index
    %404 = vector.load %arg11[%c0_298, %c0_299, %c384_300] : memref<1x1x1024xf32, #tpu.memory_space<vmem>>, vector<1x1x64xf32>
    %405 = vector.shape_cast %404 : vector<1x1x64xf32> to vector<1x64xf32>
    %406 = vector.shape_cast %385 : vector<1x64xf32> to vector<1x1x64xf32>
    tpu.vector_store %arg11[%c0_298, %c0_299, %c384_300], %406 {strides = array<i32>} : memref<1x1x1024xf32, #tpu.memory_space<vmem>>, vector<1x1x64xf32>,
    %c0_301 = arith.constant 0 : index
    %c0_302 = arith.constant 0 : index
    %c448_303 = arith.constant 448 : index
    %407 = vector.load %arg11[%c0_301, %c0_302, %c448_303] : memref<1x1x1024xf32, #tpu.memory_space<vmem>>, vector<1x1x64xf32>
    %408 = vector.shape_cast %407 : vector<1x1x64xf32> to vector<1x64xf32>
    %409 = vector.shape_cast %385 : vector<1x64xf32> to vector<1x1x64xf32>
    tpu.vector_store %arg11[%c0_301, %c0_302, %c448_303], %409 {strides = array<i32>} : memref<1x1x1024xf32, #tpu.memory_space<vmem>>, vector<1x1x64xf32>,
    %c0_304 = arith.constant 0 : index
    %c0_305 = arith.constant 0 : index
    %c512_306 = arith.constant 512 : index
    %410 = vector.load %arg11[%c0_304, %c0_305, %c512_306] : memref<1x1x1024xf32, #tpu.memory_space<vmem>>, vector<1x1x64xf32>
    %411 = vector.shape_cast %410 : vector<1x1x64xf32> to vector<1x64xf32>
    %412 = vector.shape_cast %385 : vector<1x64xf32> to vector<1x1x64xf32>
    tpu.vector_store %arg11[%c0_304, %c0_305, %c512_306], %412 {strides = array<i32>} : memref<1x1x1024xf32, #tpu.memory_space<vmem>>, vector<1x1x64xf32>,
    %c0_307 = arith.constant 0 : index
    %c0_308 = arith.constant 0 : index
    %c576_309 = arith.constant 576 : index
    %413 = vector.load %arg11[%c0_307, %c0_308, %c576_309] : memref<1x1x1024xf32, #tpu.memory_space<vmem>>, vector<1x1x64xf32>
    %414 = vector.shape_cast %413 : vector<1x1x64xf32> to vector<1x64xf32>
    %415 = vector.shape_cast %385 : vector<1x64xf32> to vector<1x1x64xf32>
    tpu.vector_store %arg11[%c0_307, %c0_308, %c576_309], %415 {strides = array<i32>} : memref<1x1x1024xf32, #tpu.memory_space<vmem>>, vector<1x1x64xf32>,
    %c0_310 = arith.constant 0 : index
    %c0_311 = arith.constant 0 : index
    %c640_312 = arith.constant 640 : index
    %416 = vector.load %arg11[%c0_310, %c0_311, %c640_312] : memref<1x1x1024xf32, #tpu.memory_space<vmem>>, vector<1x1x64xf32>
    %417 = vector.shape_cast %416 : vector<1x1x64xf32> to vector<1x64xf32>
    %418 = vector.shape_cast %385 : vector<1x64xf32> to vector<1x1x64xf32>
    tpu.vector_store %arg11[%c0_310, %c0_311, %c640_312], %418 {strides = array<i32>} : memref<1x1x1024xf32, #tpu.memory_space<vmem>>, vector<1x1x64xf32>,
    %c0_313 = arith.constant 0 : index
    %c0_314 = arith.constant 0 : index
    %c704_315 = arith.constant 704 : index
    %419 = vector.load %arg11[%c0_313, %c0_314, %c704_315] : memref<1x1x1024xf32, #tpu.memory_space<vmem>>, vector<1x1x64xf32>
    %420 = vector.shape_cast %419 : vector<1x1x64xf32> to vector<1x64xf32>
    %421 = vector.shape_cast %385 : vector<1x64xf32> to vector<1x1x64xf32>
    tpu.vector_store %arg11[%c0_313, %c0_314, %c704_315], %421 {strides = array<i32>} : memref<1x1x1024xf32, #tpu.memory_space<vmem>>, vector<1x1x64xf32>,
    %c0_316 = arith.constant 0 : index
    %c0_317 = arith.constant 0 : index
    %c768_318 = arith.constant 768 : index
    %422 = vector.load %arg11[%c0_316, %c0_317, %c768_318] : memref<1x1x1024xf32, #tpu.memory_space<vmem>>, vector<1x1x64xf32>
    %423 = vector.shape_cast %422 : vector<1x1x64xf32> to vector<1x64xf32>
    %424 = vector.shape_cast %385 : vector<1x64xf32> to vector<1x1x64xf32>
    tpu.vector_store %arg11[%c0_316, %c0_317, %c768_318], %424 {strides = array<i32>} : memref<1x1x1024xf32, #tpu.memory_space<vmem>>, vector<1x1x64xf32>,
    %c0_319 = arith.constant 0 : index
    %c0_320 = arith.constant 0 : index
    %c832_321 = arith.constant 832 : index
    %425 = vector.load %arg11[%c0_319, %c0_320, %c832_321] : memref<1x1x1024xf32, #tpu.memory_space<vmem>>, vector<1x1x64xf32>
    %426 = vector.shape_cast %425 : vector<1x1x64xf32> to vector<1x64xf32>
    %427 = vector.shape_cast %385 : vector<1x64xf32> to vector<1x1x64xf32>
    tpu.vector_store %arg11[%c0_319, %c0_320, %c832_321], %427 {strides = array<i32>} : memref<1x1x1024xf32, #tpu.memory_space<vmem>>, vector<1x1x64xf32>,
    %c0_322 = arith.constant 0 : index
    %c0_323 = arith.constant 0 : index
    %c896_324 = arith.constant 896 : index
    %428 = vector.load %arg11[%c0_322, %c0_323, %c896_324] : memref<1x1x1024xf32, #tpu.memory_space<vmem>>, vector<1x1x64xf32>
    %429 = vector.shape_cast %428 : vector<1x1x64xf32> to vector<1x64xf32>
    %430 = vector.shape_cast %385 : vector<1x64xf32> to vector<1x1x64xf32>
    tpu.vector_store %arg11[%c0_322, %c0_323, %c896_324], %430 {strides = array<i32>} : memref<1x1x1024xf32, #tpu.memory_space<vmem>>, vector<1x1x64xf32>,
    %c0_325 = arith.constant 0 : index
    %c0_326 = arith.constant 0 : index
    %c960_327 = arith.constant 960 : index
    %431 = vector.load %arg11[%c0_325, %c0_326, %c960_327] : memref<1x1x1024xf32, #tpu.memory_space<vmem>>, vector<1x1x64xf32>
    %432 = vector.shape_cast %431 : vector<1x1x64xf32> to vector<1x64xf32>
    %433 = vector.shape_cast %385 : vector<1x64xf32> to vector<1x1x64xf32>
    tpu.vector_store %arg11[%c0_325, %c0_326, %c960_327], %433 {strides = array<i32>} : memref<1x1x1024xf32, #tpu.memory_space<vmem>>, vector<1x1x64xf32>,
    %c0_328 = arith.constant 0 : index
    %c0_329 = arith.constant 0 : index
    %c0_330 = arith.constant 0 : index
    %434 = vector.load %arg11[%c0_328, %c0_329, %c0_330] : memref<1x1x1024xf32, #tpu.memory_space<vmem>>, vector<1x1x1024xf32>
    %435 = vector.broadcast %434 : vector<1x1x1024xf32> to vector<1x16x1024xf32>
    %436 = arith.subf %351, %435 : vector<1x16x1024xf32>
    %437 = arith.mulf %436, %436 : vector<1x16x1024xf32>
    %cst_331 = arith.constant dense<0.000000e+00> : vector<1x1024xf32>
    %438 = vector.multi_reduction <add>, %437, %cst_331 [1] : vector<1x16x1024xf32> to vector<1x1024xf32>
    %439 = vector.extract_strided_slice %438 {offsets = [0, 0], sizes = [1, 64], strides = [1, 1]} : vector<1x1024xf32> to vector<1x64xf32>
    %440 = vector.extract_strided_slice %438 {offsets = [0, 64], sizes = [1, 64], strides = [1, 1]} : vector<1x1024xf32> to vector<1x64xf32>
    %441 = arith.addf %439, %440 : vector<1x64xf32>
    %442 = vector.extract_strided_slice %438 {offsets = [0, 128], sizes = [1, 64], strides = [1, 1]} : vector<1x1024xf32> to vector<1x64xf32>
    %443 = arith.addf %441, %442 : vector<1x64xf32>
    %444 = vector.extract_strided_slice %438 {offsets = [0, 192], sizes = [1, 64], strides = [1, 1]} : vector<1x1024xf32> to vector<1x64xf32>
    %445 = arith.addf %443, %444 : vector<1x64xf32>
    %446 = vector.extract_strided_slice %438 {offsets = [0, 256], sizes = [1, 64], strides = [1, 1]} : vector<1x1024xf32> to vector<1x64xf32>
    %447 = arith.addf %445, %446 : vector<1x64xf32>
    %448 = vector.extract_strided_slice %438 {offsets = [0, 320], sizes = [1, 64], strides = [1, 1]} : vector<1x1024xf32> to vector<1x64xf32>
    %449 = arith.addf %447, %448 : vector<1x64xf32>
    %450 = vector.extract_strided_slice %438 {offsets = [0, 384], sizes = [1, 64], strides = [1, 1]} : vector<1x1024xf32> to vector<1x64xf32>
    %451 = arith.addf %449, %450 : vector<1x64xf32>
    %452 = vector.extract_strided_slice %438 {offsets = [0, 448], sizes = [1, 64], strides = [1, 1]} : vector<1x1024xf32> to vector<1x64xf32>
    %453 = arith.addf %451, %452 : vector<1x64xf32>
    %454 = vector.extract_strided_slice %438 {offsets = [0, 512], sizes = [1, 64], strides = [1, 1]} : vector<1x1024xf32> to vector<1x64xf32>
    %455 = arith.addf %453, %454 : vector<1x64xf32>
    %456 = vector.extract_strided_slice %438 {offsets = [0, 576], sizes = [1, 64], strides = [1, 1]} : vector<1x1024xf32> to vector<1x64xf32>
    %457 = arith.addf %455, %456 : vector<1x64xf32>
    %458 = vector.extract_strided_slice %438 {offsets = [0, 640], sizes = [1, 64], strides = [1, 1]} : vector<1x1024xf32> to vector<1x64xf32>
    %459 = arith.addf %457, %458 : vector<1x64xf32>
    %460 = vector.extract_strided_slice %438 {offsets = [0, 704], sizes = [1, 64], strides = [1, 1]} : vector<1x1024xf32> to vector<1x64xf32>
    %461 = arith.addf %459, %460 : vector<1x64xf32>
    %462 = vector.extract_strided_slice %438 {offsets = [0, 768], sizes = [1, 64], strides = [1, 1]} : vector<1x1024xf32> to vector<1x64xf32>
    %463 = arith.addf %461, %462 : vector<1x64xf32>
    %464 = vector.extract_strided_slice %438 {offsets = [0, 832], sizes = [1, 64], strides = [1, 1]} : vector<1x1024xf32> to vector<1x64xf32>
    %465 = arith.addf %463, %464 : vector<1x64xf32>
    %466 = vector.extract_strided_slice %438 {offsets = [0, 896], sizes = [1, 64], strides = [1, 1]} : vector<1x1024xf32> to vector<1x64xf32>
    %467 = arith.addf %465, %466 : vector<1x64xf32>
    %468 = vector.extract_strided_slice %438 {offsets = [0, 960], sizes = [1, 64], strides = [1, 1]} : vector<1x1024xf32> to vector<1x64xf32>
    %469 = arith.addf %467, %468 : vector<1x64xf32>
    %cst_332 = arith.constant 3.906250e-03 : f32
    %470 = vector.broadcast %cst_332 : f32 to vector<1x64xf32>
    %471 = arith.mulf %469, %470 : vector<1x64xf32>
    %c0_333 = arith.constant 0 : index
    %c0_334 = arith.constant 0 : index
    %c0_335 = arith.constant 0 : index
    %472 = vector.load %arg11[%c0_333, %c0_334, %c0_335] : memref<1x1x1024xf32, #tpu.memory_space<vmem>>, vector<1x1x64xf32>
    %473 = vector.shape_cast %472 : vector<1x1x64xf32> to vector<1x64xf32>
    %474 = vector.shape_cast %471 : vector<1x64xf32> to vector<1x1x64xf32>
    tpu.vector_store %arg11[%c0_333, %c0_334, %c0_335], %474 {strides = array<i32>} : memref<1x1x1024xf32, #tpu.memory_space<vmem>>, vector<1x1x64xf32>,
    %c0_336 = arith.constant 0 : index
    %c0_337 = arith.constant 0 : index
    %c64_338 = arith.constant 64 : index
    %475 = vector.load %arg11[%c0_336, %c0_337, %c64_338] : memref<1x1x1024xf32, #tpu.memory_space<vmem>>, vector<1x1x64xf32>
    %476 = vector.shape_cast %475 : vector<1x1x64xf32> to vector<1x64xf32>
    %477 = vector.shape_cast %471 : vector<1x64xf32> to vector<1x1x64xf32>
    tpu.vector_store %arg11[%c0_336, %c0_337, %c64_338], %477 {strides = array<i32>} : memref<1x1x1024xf32, #tpu.memory_space<vmem>>, vector<1x1x64xf32>,
    %c0_339 = arith.constant 0 : index
    %c0_340 = arith.constant 0 : index
    %c128_341 = arith.constant 128 : index
    %478 = vector.load %arg11[%c0_339, %c0_340, %c128_341] : memref<1x1x1024xf32, #tpu.memory_space<vmem>>, vector<1x1x64xf32>
    %479 = vector.shape_cast %478 : vector<1x1x64xf32> to vector<1x64xf32>
    %480 = vector.shape_cast %471 : vector<1x64xf32> to vector<1x1x64xf32>
    tpu.vector_store %arg11[%c0_339, %c0_340, %c128_341], %480 {strides = array<i32>} : memref<1x1x1024xf32, #tpu.memory_space<vmem>>, vector<1x1x64xf32>,
    %c0_342 = arith.constant 0 : index
    %c0_343 = arith.constant 0 : index
    %c192_344 = arith.constant 192 : index
    %481 = vector.load %arg11[%c0_342, %c0_343, %c192_344] : memref<1x1x1024xf32, #tpu.memory_space<vmem>>, vector<1x1x64xf32>
    %482 = vector.shape_cast %481 : vector<1x1x64xf32> to vector<1x64xf32>
    %483 = vector.shape_cast %471 : vector<1x64xf32> to vector<1x1x64xf32>
    tpu.vector_store %arg11[%c0_342, %c0_343, %c192_344], %483 {strides = array<i32>} : memref<1x1x1024xf32, #tpu.memory_space<vmem>>, vector<1x1x64xf32>,
    %c0_345 = arith.constant 0 : index
    %c0_346 = arith.constant 0 : index
    %c256_347 = arith.constant 256 : index
    %484 = vector.load %arg11[%c0_345, %c0_346, %c256_347] : memref<1x1x1024xf32, #tpu.memory_space<vmem>>, vector<1x1x64xf32>
    %485 = vector.shape_cast %484 : vector<1x1x64xf32> to vector<1x64xf32>
    %486 = vector.shape_cast %471 : vector<1x64xf32> to vector<1x1x64xf32>
    tpu.vector_store %arg11[%c0_345, %c0_346, %c256_347], %486 {strides = array<i32>} : memref<1x1x1024xf32, #tpu.memory_space<vmem>>, vector<1x1x64xf32>,
    %c0_348 = arith.constant 0 : index
    %c0_349 = arith.constant 0 : index
    %c320_350 = arith.constant 320 : index
    %487 = vector.load %arg11[%c0_348, %c0_349, %c320_350] : memref<1x1x1024xf32, #tpu.memory_space<vmem>>, vector<1x1x64xf32>
    %488 = vector.shape_cast %487 : vector<1x1x64xf32> to vector<1x64xf32>
    %489 = vector.shape_cast %471 : vector<1x64xf32> to vector<1x1x64xf32>
    tpu.vector_store %arg11[%c0_348, %c0_349, %c320_350], %489 {strides = array<i32>} : memref<1x1x1024xf32, #tpu.memory_space<vmem>>, vector<1x1x64xf32>,
    %c0_351 = arith.constant 0 : index
    %c0_352 = arith.constant 0 : index
    %c384_353 = arith.constant 384 : index
    %490 = vector.load %arg11[%c0_351, %c0_352, %c384_353] : memref<1x1x1024xf32, #tpu.memory_space<vmem>>, vector<1x1x64xf32>
    %491 = vector.shape_cast %490 : vector<1x1x64xf32> to vector<1x64xf32>
    %492 = vector.shape_cast %471 : vector<1x64xf32> to vector<1x1x64xf32>
    tpu.vector_store %arg11[%c0_351, %c0_352, %c384_353], %492 {strides = array<i32>} : memref<1x1x1024xf32, #tpu.memory_space<vmem>>, vector<1x1x64xf32>,
    %c0_354 = arith.constant 0 : index
    %c0_355 = arith.constant 0 : index
    %c448_356 = arith.constant 448 : index
    %493 = vector.load %arg11[%c0_354, %c0_355, %c448_356] : memref<1x1x1024xf32, #tpu.memory_space<vmem>>, vector<1x1x64xf32>
    %494 = vector.shape_cast %493 : vector<1x1x64xf32> to vector<1x64xf32>
    %495 = vector.shape_cast %471 : vector<1x64xf32> to vector<1x1x64xf32>
    tpu.vector_store %arg11[%c0_354, %c0_355, %c448_356], %495 {strides = array<i32>} : memref<1x1x1024xf32, #tpu.memory_space<vmem>>, vector<1x1x64xf32>,
    %c0_357 = arith.constant 0 : index
    %c0_358 = arith.constant 0 : index
    %c512_359 = arith.constant 512 : index
    %496 = vector.load %arg11[%c0_357, %c0_358, %c512_359] : memref<1x1x1024xf32, #tpu.memory_space<vmem>>, vector<1x1x64xf32>
    %497 = vector.shape_cast %496 : vector<1x1x64xf32> to vector<1x64xf32>
    %498 = vector.shape_cast %471 : vector<1x64xf32> to vector<1x1x64xf32>
    tpu.vector_store %arg11[%c0_357, %c0_358, %c512_359], %498 {strides = array<i32>} : memref<1x1x1024xf32, #tpu.memory_space<vmem>>, vector<1x1x64xf32>,
    %c0_360 = arith.constant 0 : index
    %c0_361 = arith.constant 0 : index
    %c576_362 = arith.constant 576 : index
    %499 = vector.load %arg11[%c0_360, %c0_361, %c576_362] : memref<1x1x1024xf32, #tpu.memory_space<vmem>>, vector<1x1x64xf32>
    %500 = vector.shape_cast %499 : vector<1x1x64xf32> to vector<1x64xf32>
    %501 = vector.shape_cast %471 : vector<1x64xf32> to vector<1x1x64xf32>
    tpu.vector_store %arg11[%c0_360, %c0_361, %c576_362], %501 {strides = array<i32>} : memref<1x1x1024xf32, #tpu.memory_space<vmem>>, vector<1x1x64xf32>,
    %c0_363 = arith.constant 0 : index
    %c0_364 = arith.constant 0 : index
    %c640_365 = arith.constant 640 : index
    %502 = vector.load %arg11[%c0_363, %c0_364, %c640_365] : memref<1x1x1024xf32, #tpu.memory_space<vmem>>, vector<1x1x64xf32>
    %503 = vector.shape_cast %502 : vector<1x1x64xf32> to vector<1x64xf32>
    %504 = vector.shape_cast %471 : vector<1x64xf32> to vector<1x1x64xf32>
    tpu.vector_store %arg11[%c0_363, %c0_364, %c640_365], %504 {strides = array<i32>} : memref<1x1x1024xf32, #tpu.memory_space<vmem>>, vector<1x1x64xf32>,
    %c0_366 = arith.constant 0 : index
    %c0_367 = arith.constant 0 : index
    %c704_368 = arith.constant 704 : index
    %505 = vector.load %arg11[%c0_366, %c0_367, %c704_368] : memref<1x1x1024xf32, #tpu.memory_space<vmem>>, vector<1x1x64xf32>
    %506 = vector.shape_cast %505 : vector<1x1x64xf32> to vector<1x64xf32>
    %507 = vector.shape_cast %471 : vector<1x64xf32> to vector<1x1x64xf32>
    tpu.vector_store %arg11[%c0_366, %c0_367, %c704_368], %507 {strides = array<i32>} : memref<1x1x1024xf32, #tpu.memory_space<vmem>>, vector<1x1x64xf32>,
    %c0_369 = arith.constant 0 : index
    %c0_370 = arith.constant 0 : index
    %c768_371 = arith.constant 768 : index
    %508 = vector.load %arg11[%c0_369, %c0_370, %c768_371] : memref<1x1x1024xf32, #tpu.memory_space<vmem>>, vector<1x1x64xf32>
    %509 = vector.shape_cast %508 : vector<1x1x64xf32> to vector<1x64xf32>
    %510 = vector.shape_cast %471 : vector<1x64xf32> to vector<1x1x64xf32>
    tpu.vector_store %arg11[%c0_369, %c0_370, %c768_371], %510 {strides = array<i32>} : memref<1x1x1024xf32, #tpu.memory_space<vmem>>, vector<1x1x64xf32>,
    %c0_372 = arith.constant 0 : index
    %c0_373 = arith.constant 0 : index
    %c832_374 = arith.constant 832 : index
    %511 = vector.load %arg11[%c0_372, %c0_373, %c832_374] : memref<1x1x1024xf32, #tpu.memory_space<vmem>>, vector<1x1x64xf32>
    %512 = vector.shape_cast %511 : vector<1x1x64xf32> to vector<1x64xf32>
    %513 = vector.shape_cast %471 : vector<1x64xf32> to vector<1x1x64xf32>
    tpu.vector_store %arg11[%c0_372, %c0_373, %c832_374], %513 {strides = array<i32>} : memref<1x1x1024xf32, #tpu.memory_space<vmem>>, vector<1x1x64xf32>,
    %c0_375 = arith.constant 0 : index
    %c0_376 = arith.constant 0 : index
    %c896_377 = arith.constant 896 : index
    %514 = vector.load %arg11[%c0_375, %c0_376, %c896_377] : memref<1x1x1024xf32, #tpu.memory_space<vmem>>, vector<1x1x64xf32>
    %515 = vector.shape_cast %514 : vector<1x1x64xf32> to vector<1x64xf32>
    %516 = vector.shape_cast %471 : vector<1x64xf32> to vector<1x1x64xf32>
    tpu.vector_store %arg11[%c0_375, %c0_376, %c896_377], %516 {strides = array<i32>} : memref<1x1x1024xf32, #tpu.memory_space<vmem>>, vector<1x1x64xf32>,
    %c0_378 = arith.constant 0 : index
    %c0_379 = arith.constant 0 : index
    %c960_380 = arith.constant 960 : index
    %517 = vector.load %arg11[%c0_378, %c0_379, %c960_380] : memref<1x1x1024xf32, #tpu.memory_space<vmem>>, vector<1x1x64xf32>
    %518 = vector.shape_cast %517 : vector<1x1x64xf32> to vector<1x64xf32>
    %519 = vector.shape_cast %471 : vector<1x64xf32> to vector<1x1x64xf32>
    tpu.vector_store %arg11[%c0_378, %c0_379, %c960_380], %519 {strides = array<i32>} : memref<1x1x1024xf32, #tpu.memory_space<vmem>>, vector<1x1x64xf32>,
    %c0_381 = arith.constant 0 : index
    %c0_382 = arith.constant 0 : index
    %c0_383 = arith.constant 0 : index
    %520 = vector.load %arg11[%c0_381, %c0_382, %c0_383] : memref<1x1x1024xf32, #tpu.memory_space<vmem>>, vector<1x1x1024xf32>
    %cst_384 = arith.constant 9.99999974E-6 : f32
    %521 = vector.broadcast %cst_384 : f32 to vector<1x1x1024xf32>
    %522 = arith.addf %520, %521 : vector<1x1x1024xf32>
    %523 = math.rsqrt %522 : vector<1x1x1024xf32>
    %524 = vector.broadcast %523 : vector<1x1x1024xf32> to vector<1x16x1024xf32>
    %525 = arith.mulf %436, %524 : vector<1x16x1024xf32>
    %cst_385 = arith.constant 0.000000e+00 : f32
    %526 = vector.broadcast %cst_385 : f32 to vector<1x16x1024xf32>
    %527 = arith.maximumf %525, %526 : vector<1x16x1024xf32>
    %528 = arith.truncf %527 : vector<1x16x1024xf32> to vector<1x16x1024xbf16>
    %529 = vector.extract_strided_slice %528 {offsets = [0, 0, 0], sizes = [1, 16, 64], strides = [1, 1, 1]} : vector<1x16x1024xbf16> to vector<1x16x64xbf16>
    %c0_386 = arith.constant 0 : index
    %c1_387 = arith.constant 1 : index
    %c1_388 = arith.constant 1 : index
    %c0_389 = arith.constant 0 : index
    %530 = vector.load %arg10[%c0_386, %c1_387, %c1_388, %c0_389] : memref<1x18x18x64xbf16, #tpu.memory_space<vmem>>, vector<1x1x16x64xbf16>
    %531 = vector.shape_cast %530 : vector<1x1x16x64xbf16> to vector<1x16x64xbf16>
    %532 = vector.shape_cast %529 : vector<1x16x64xbf16> to vector<1x1x16x64xbf16>
    tpu.vector_store %arg10[%c0_386, %c1_387, %c1_388, %c0_389], %532 {strides = array<i32>} : memref<1x18x18x64xbf16, #tpu.memory_space<vmem>>, vector<1x1x16x64xbf16>,
    %533 = vector.extract_strided_slice %528 {offsets = [0, 0, 64], sizes = [1, 16, 64], strides = [1, 1, 1]} : vector<1x16x1024xbf16> to vector<1x16x64xbf16>
    %c0_390 = arith.constant 0 : index
    %c2_391 = arith.constant 2 : index
    %c1_392 = arith.constant 1 : index
    %c0_393 = arith.constant 0 : index
    %534 = vector.load %arg10[%c0_390, %c2_391, %c1_392, %c0_393] : memref<1x18x18x64xbf16, #tpu.memory_space<vmem>>, vector<1x1x16x64xbf16>
    %535 = vector.shape_cast %534 : vector<1x1x16x64xbf16> to vector<1x16x64xbf16>
    %536 = vector.shape_cast %533 : vector<1x16x64xbf16> to vector<1x1x16x64xbf16>
    tpu.vector_store %arg10[%c0_390, %c2_391, %c1_392, %c0_393], %536 {strides = array<i32>} : memref<1x18x18x64xbf16, #tpu.memory_space<vmem>>, vector<1x1x16x64xbf16>,
    %537 = vector.extract_strided_slice %528 {offsets = [0, 0, 128], sizes = [1, 16, 64], strides = [1, 1, 1]} : vector<1x16x1024xbf16> to vector<1x16x64xbf16>
    %c0_394 = arith.constant 0 : index
    %c3_395 = arith.constant 3 : index
    %c1_396 = arith.constant 1 : index
    %c0_397 = arith.constant 0 : index
    %538 = vector.load %arg10[%c0_394, %c3_395, %c1_396, %c0_397] : memref<1x18x18x64xbf16, #tpu.memory_space<vmem>>, vector<1x1x16x64xbf16>
    %539 = vector.shape_cast %538 : vector<1x1x16x64xbf16> to vector<1x16x64xbf16>
    %540 = vector.shape_cast %537 : vector<1x16x64xbf16> to vector<1x1x16x64xbf16>
    tpu.vector_store %arg10[%c0_394, %c3_395, %c1_396, %c0_397], %540 {strides = array<i32>} : memref<1x18x18x64xbf16, #tpu.memory_space<vmem>>, vector<1x1x16x64xbf16>,
    %541 = vector.extract_strided_slice %528 {offsets = [0, 0, 192], sizes = [1, 16, 64], strides = [1, 1, 1]} : vector<1x16x1024xbf16> to vector<1x16x64xbf16>
    %c0_398 = arith.constant 0 : index
    %c4_399 = arith.constant 4 : index
    %c1_400 = arith.constant 1 : index
    %c0_401 = arith.constant 0 : index
    %542 = vector.load %arg10[%c0_398, %c4_399, %c1_400, %c0_401] : memref<1x18x18x64xbf16, #tpu.memory_space<vmem>>, vector<1x1x16x64xbf16>
    %543 = vector.shape_cast %542 : vector<1x1x16x64xbf16> to vector<1x16x64xbf16>
    %544 = vector.shape_cast %541 : vector<1x16x64xbf16> to vector<1x1x16x64xbf16>
    tpu.vector_store %arg10[%c0_398, %c4_399, %c1_400, %c0_401], %544 {strides = array<i32>} : memref<1x18x18x64xbf16, #tpu.memory_space<vmem>>, vector<1x1x16x64xbf16>,
    %545 = vector.extract_strided_slice %528 {offsets = [0, 0, 256], sizes = [1, 16, 64], strides = [1, 1, 1]} : vector<1x16x1024xbf16> to vector<1x16x64xbf16>
    %c0_402 = arith.constant 0 : index
    %c5_403 = arith.constant 5 : index
    %c1_404 = arith.constant 1 : index
    %c0_405 = arith.constant 0 : index
    %546 = vector.load %arg10[%c0_402, %c5_403, %c1_404, %c0_405] : memref<1x18x18x64xbf16, #tpu.memory_space<vmem>>, vector<1x1x16x64xbf16>
    %547 = vector.shape_cast %546 : vector<1x1x16x64xbf16> to vector<1x16x64xbf16>
    %548 = vector.shape_cast %545 : vector<1x16x64xbf16> to vector<1x1x16x64xbf16>
    tpu.vector_store %arg10[%c0_402, %c5_403, %c1_404, %c0_405], %548 {strides = array<i32>} : memref<1x18x18x64xbf16, #tpu.memory_space<vmem>>, vector<1x1x16x64xbf16>,
    %549 = vector.extract_strided_slice %528 {offsets = [0, 0, 320], sizes = [1, 16, 64], strides = [1, 1, 1]} : vector<1x16x1024xbf16> to vector<1x16x64xbf16>
    %c0_406 = arith.constant 0 : index
    %c6_407 = arith.constant 6 : index
    %c1_408 = arith.constant 1 : index
    %c0_409 = arith.constant 0 : index
    %550 = vector.load %arg10[%c0_406, %c6_407, %c1_408, %c0_409] : memref<1x18x18x64xbf16, #tpu.memory_space<vmem>>, vector<1x1x16x64xbf16>
    %551 = vector.shape_cast %550 : vector<1x1x16x64xbf16> to vector<1x16x64xbf16>
    %552 = vector.shape_cast %549 : vector<1x16x64xbf16> to vector<1x1x16x64xbf16>
    tpu.vector_store %arg10[%c0_406, %c6_407, %c1_408, %c0_409], %552 {strides = array<i32>} : memref<1x18x18x64xbf16, #tpu.memory_space<vmem>>, vector<1x1x16x64xbf16>,
    %553 = vector.extract_strided_slice %528 {offsets = [0, 0, 384], sizes = [1, 16, 64], strides = [1, 1, 1]} : vector<1x16x1024xbf16> to vector<1x16x64xbf16>
    %c0_410 = arith.constant 0 : index
    %c7_411 = arith.constant 7 : index
    %c1_412 = arith.constant 1 : index
    %c0_413 = arith.constant 0 : index
    %554 = vector.load %arg10[%c0_410, %c7_411, %c1_412, %c0_413] : memref<1x18x18x64xbf16, #tpu.memory_space<vmem>>, vector<1x1x16x64xbf16>
    %555 = vector.shape_cast %554 : vector<1x1x16x64xbf16> to vector<1x16x64xbf16>
    %556 = vector.shape_cast %553 : vector<1x16x64xbf16> to vector<1x1x16x64xbf16>
    tpu.vector_store %arg10[%c0_410, %c7_411, %c1_412, %c0_413], %556 {strides = array<i32>} : memref<1x18x18x64xbf16, #tpu.memory_space<vmem>>, vector<1x1x16x64xbf16>,
    %557 = vector.extract_strided_slice %528 {offsets = [0, 0, 448], sizes = [1, 16, 64], strides = [1, 1, 1]} : vector<1x16x1024xbf16> to vector<1x16x64xbf16>
    %c0_414 = arith.constant 0 : index
    %c8_415 = arith.constant 8 : index
    %c1_416 = arith.constant 1 : index
    %c0_417 = arith.constant 0 : index
    %558 = vector.load %arg10[%c0_414, %c8_415, %c1_416, %c0_417] : memref<1x18x18x64xbf16, #tpu.memory_space<vmem>>, vector<1x1x16x64xbf16>
    %559 = vector.shape_cast %558 : vector<1x1x16x64xbf16> to vector<1x16x64xbf16>
    %560 = vector.shape_cast %557 : vector<1x16x64xbf16> to vector<1x1x16x64xbf16>
    tpu.vector_store %arg10[%c0_414, %c8_415, %c1_416, %c0_417], %560 {strides = array<i32>} : memref<1x18x18x64xbf16, #tpu.memory_space<vmem>>, vector<1x1x16x64xbf16>,
    %561 = vector.extract_strided_slice %528 {offsets = [0, 0, 512], sizes = [1, 16, 64], strides = [1, 1, 1]} : vector<1x16x1024xbf16> to vector<1x16x64xbf16>
    %c0_418 = arith.constant 0 : index
    %c9_419 = arith.constant 9 : index
    %c1_420 = arith.constant 1 : index
    %c0_421 = arith.constant 0 : index
    %562 = vector.load %arg10[%c0_418, %c9_419, %c1_420, %c0_421] : memref<1x18x18x64xbf16, #tpu.memory_space<vmem>>, vector<1x1x16x64xbf16>
    %563 = vector.shape_cast %562 : vector<1x1x16x64xbf16> to vector<1x16x64xbf16>
    %564 = vector.shape_cast %561 : vector<1x16x64xbf16> to vector<1x1x16x64xbf16>
    tpu.vector_store %arg10[%c0_418, %c9_419, %c1_420, %c0_421], %564 {strides = array<i32>} : memref<1x18x18x64xbf16, #tpu.memory_space<vmem>>, vector<1x1x16x64xbf16>,
    %565 = vector.extract_strided_slice %528 {offsets = [0, 0, 576], sizes = [1, 16, 64], strides = [1, 1, 1]} : vector<1x16x1024xbf16> to vector<1x16x64xbf16>
    %c0_422 = arith.constant 0 : index
    %c10_423 = arith.constant 10 : index
    %c1_424 = arith.constant 1 : index
    %c0_425 = arith.constant 0 : index
    %566 = vector.load %arg10[%c0_422, %c10_423, %c1_424, %c0_425] : memref<1x18x18x64xbf16, #tpu.memory_space<vmem>>, vector<1x1x16x64xbf16>
    %567 = vector.shape_cast %566 : vector<1x1x16x64xbf16> to vector<1x16x64xbf16>
    %568 = vector.shape_cast %565 : vector<1x16x64xbf16> to vector<1x1x16x64xbf16>
    tpu.vector_store %arg10[%c0_422, %c10_423, %c1_424, %c0_425], %568 {strides = array<i32>} : memref<1x18x18x64xbf16, #tpu.memory_space<vmem>>, vector<1x1x16x64xbf16>,
    %569 = vector.extract_strided_slice %528 {offsets = [0, 0, 640], sizes = [1, 16, 64], strides = [1, 1, 1]} : vector<1x16x1024xbf16> to vector<1x16x64xbf16>
    %c0_426 = arith.constant 0 : index
    %c11_427 = arith.constant 11 : index
    %c1_428 = arith.constant 1 : index
    %c0_429 = arith.constant 0 : index
    %570 = vector.load %arg10[%c0_426, %c11_427, %c1_428, %c0_429] : memref<1x18x18x64xbf16, #tpu.memory_space<vmem>>, vector<1x1x16x64xbf16>
    %571 = vector.shape_cast %570 : vector<1x1x16x64xbf16> to vector<1x16x64xbf16>
    %572 = vector.shape_cast %569 : vector<1x16x64xbf16> to vector<1x1x16x64xbf16>
    tpu.vector_store %arg10[%c0_426, %c11_427, %c1_428, %c0_429], %572 {strides = array<i32>} : memref<1x18x18x64xbf16, #tpu.memory_space<vmem>>, vector<1x1x16x64xbf16>,
    %573 = vector.extract_strided_slice %528 {offsets = [0, 0, 704], sizes = [1, 16, 64], strides = [1, 1, 1]} : vector<1x16x1024xbf16> to vector<1x16x64xbf16>
    %c0_430 = arith.constant 0 : index
    %c12_431 = arith.constant 12 : index
    %c1_432 = arith.constant 1 : index
    %c0_433 = arith.constant 0 : index
    %574 = vector.load %arg10[%c0_430, %c12_431, %c1_432, %c0_433] : memref<1x18x18x64xbf16, #tpu.memory_space<vmem>>, vector<1x1x16x64xbf16>
    %575 = vector.shape_cast %574 : vector<1x1x16x64xbf16> to vector<1x16x64xbf16>
    %576 = vector.shape_cast %573 : vector<1x16x64xbf16> to vector<1x1x16x64xbf16>
    tpu.vector_store %arg10[%c0_430, %c12_431, %c1_432, %c0_433], %576 {strides = array<i32>} : memref<1x18x18x64xbf16, #tpu.memory_space<vmem>>, vector<1x1x16x64xbf16>,
    %577 = vector.extract_strided_slice %528 {offsets = [0, 0, 768], sizes = [1, 16, 64], strides = [1, 1, 1]} : vector<1x16x1024xbf16> to vector<1x16x64xbf16>
    %c0_434 = arith.constant 0 : index
    %c13_435 = arith.constant 13 : index
    %c1_436 = arith.constant 1 : index
    %c0_437 = arith.constant 0 : index
    %578 = vector.load %arg10[%c0_434, %c13_435, %c1_436, %c0_437] : memref<1x18x18x64xbf16, #tpu.memory_space<vmem>>, vector<1x1x16x64xbf16>
    %579 = vector.shape_cast %578 : vector<1x1x16x64xbf16> to vector<1x16x64xbf16>
    %580 = vector.shape_cast %577 : vector<1x16x64xbf16> to vector<1x1x16x64xbf16>
    tpu.vector_store %arg10[%c0_434, %c13_435, %c1_436, %c0_437], %580 {strides = array<i32>} : memref<1x18x18x64xbf16, #tpu.memory_space<vmem>>, vector<1x1x16x64xbf16>,
    %581 = vector.extract_strided_slice %528 {offsets = [0, 0, 832], sizes = [1, 16, 64], strides = [1, 1, 1]} : vector<1x16x1024xbf16> to vector<1x16x64xbf16>
    %c0_438 = arith.constant 0 : index
    %c14_439 = arith.constant 14 : index
    %c1_440 = arith.constant 1 : index
    %c0_441 = arith.constant 0 : index
    %582 = vector.load %arg10[%c0_438, %c14_439, %c1_440, %c0_441] : memref<1x18x18x64xbf16, #tpu.memory_space<vmem>>, vector<1x1x16x64xbf16>
    %583 = vector.shape_cast %582 : vector<1x1x16x64xbf16> to vector<1x16x64xbf16>
    %584 = vector.shape_cast %581 : vector<1x16x64xbf16> to vector<1x1x16x64xbf16>
    tpu.vector_store %arg10[%c0_438, %c14_439, %c1_440, %c0_441], %584 {strides = array<i32>} : memref<1x18x18x64xbf16, #tpu.memory_space<vmem>>, vector<1x1x16x64xbf16>,
    %585 = vector.extract_strided_slice %528 {offsets = [0, 0, 896], sizes = [1, 16, 64], strides = [1, 1, 1]} : vector<1x16x1024xbf16> to vector<1x16x64xbf16>
    %c0_442 = arith.constant 0 : index
    %c15_443 = arith.constant 15 : index
    %c1_444 = arith.constant 1 : index
    %c0_445 = arith.constant 0 : index
    %586 = vector.load %arg10[%c0_442, %c15_443, %c1_444, %c0_445] : memref<1x18x18x64xbf16, #tpu.memory_space<vmem>>, vector<1x1x16x64xbf16>
    %587 = vector.shape_cast %586 : vector<1x1x16x64xbf16> to vector<1x16x64xbf16>
    %588 = vector.shape_cast %585 : vector<1x16x64xbf16> to vector<1x1x16x64xbf16>
    tpu.vector_store %arg10[%c0_442, %c15_443, %c1_444, %c0_445], %588 {strides = array<i32>} : memref<1x18x18x64xbf16, #tpu.memory_space<vmem>>, vector<1x1x16x64xbf16>,
    %589 = vector.extract_strided_slice %528 {offsets = [0, 0, 960], sizes = [1, 16, 64], strides = [1, 1, 1]} : vector<1x16x1024xbf16> to vector<1x16x64xbf16>
    %c0_446 = arith.constant 0 : index
    %c16_447 = arith.constant 16 : index
    %c1_448 = arith.constant 1 : index
    %c0_449 = arith.constant 0 : index
    %590 = vector.load %arg10[%c0_446, %c16_447, %c1_448, %c0_449] : memref<1x18x18x64xbf16, #tpu.memory_space<vmem>>, vector<1x1x16x64xbf16>
    %591 = vector.shape_cast %590 : vector<1x1x16x64xbf16> to vector<1x16x64xbf16>
    %592 = vector.shape_cast %589 : vector<1x16x64xbf16> to vector<1x1x16x64xbf16>
    tpu.vector_store %arg10[%c0_446, %c16_447, %c1_448, %c0_449], %592 {strides = array<i32>} : memref<1x18x18x64xbf16, #tpu.memory_space<vmem>>, vector<1x1x16x64xbf16>,
    %c0_450 = arith.constant 0 : index
    %c0_451 = arith.constant 0 : index
    %c0_452 = arith.constant 0 : index
    %c0_453 = arith.constant 0 : index
    %593 = vector.load %arg10[%c0_450, %c0_451, %c0_452, %c0_453] : memref<1x18x18x64xbf16, #tpu.memory_space<vmem>>, vector<1x16x16x64xbf16>
    %594 = vector.shape_cast %593 : vector<1x16x16x64xbf16> to vector<256x64xbf16>
    %c0_454 = arith.constant 0 : index
    %c0_455 = arith.constant 0 : index
    %c0_456 = arith.constant 0 : index
    %c0_457 = arith.constant 0 : index
    %595 = vector.load %arg5[%c0_454, %c0_455, %c0_456, %c0_457] : memref<1x9x64x64xbf16, #tpu.memory_space<vmem>>, vector<1x1x64x64xbf16>
    %596 = vector.shape_cast %595 : vector<1x1x64x64xbf16> to vector<64x64xbf16>
    %cst_458 = arith.constant dense<0.000000e+00> : vector<256x64xf32>
    %597 = tpu.matmul %594, %596, %cst_458 {dimension_numbers = #tpu.dot_dimension_numbers<[1], [0], [0], [1], [0, 0, 1, 1], [], []>} : vector<256x64xbf16>, vector<64x64xbf16>, vector<256x64xf32> -> vector<256x64xf32>
    %c0_459 = arith.constant 0 : index
    %c1_460 = arith.constant 1 : index
    %c0_461 = arith.constant 0 : index
    %c0_462 = arith.constant 0 : index
    %598 = vector.load %arg10[%c0_459, %c1_460, %c0_461, %c0_462] : memref<1x18x18x64xbf16, #tpu.memory_space<vmem>>, vector<1x16x16x64xbf16>
    %599 = vector.shape_cast %598 : vector<1x16x16x64xbf16> to vector<256x64xbf16>
    %c0_463 = arith.constant 0 : index
    %c1_464 = arith.constant 1 : index
    %c0_465 = arith.constant 0 : index
    %c0_466 = arith.constant 0 : index
    %600 = vector.load %arg5[%c0_463, %c1_464, %c0_465, %c0_466] : memref<1x9x64x64xbf16, #tpu.memory_space<vmem>>, vector<1x1x64x64xbf16>
    %601 = vector.shape_cast %600 : vector<1x1x64x64xbf16> to vector<64x64xbf16>
    %cst_467 = arith.constant dense<0.000000e+00> : vector<256x64xf32>
    %602 = tpu.matmul %599, %601, %cst_467 {dimension_numbers = #tpu.dot_dimension_numbers<[1], [0], [0], [1], [0, 0, 1, 1], [], []>} : vector<256x64xbf16>, vector<64x64xbf16>, vector<256x64xf32> -> vector<256x64xf32>
    %603 = arith.addf %597, %602 : vector<256x64xf32>
    %c0_468 = arith.constant 0 : index
    %c2_469 = arith.constant 2 : index
    %c0_470 = arith.constant 0 : index
    %c0_471 = arith.constant 0 : index
    %604 = vector.load %arg10[%c0_468, %c2_469, %c0_470, %c0_471] : memref<1x18x18x64xbf16, #tpu.memory_space<vmem>>, vector<1x16x16x64xbf16>
    %605 = vector.shape_cast %604 : vector<1x16x16x64xbf16> to vector<256x64xbf16>
    %c0_472 = arith.constant 0 : index
    %c2_473 = arith.constant 2 : index
    %c0_474 = arith.constant 0 : index
    %c0_475 = arith.constant 0 : index
    %606 = vector.load %arg5[%c0_472, %c2_473, %c0_474, %c0_475] : memref<1x9x64x64xbf16, #tpu.memory_space<vmem>>, vector<1x1x64x64xbf16>
    %607 = vector.shape_cast %606 : vector<1x1x64x64xbf16> to vector<64x64xbf16>
    %cst_476 = arith.constant dense<0.000000e+00> : vector<256x64xf32>
    %608 = tpu.matmul %605, %607, %cst_476 {dimension_numbers = #tpu.dot_dimension_numbers<[1], [0], [0], [1], [0, 0, 1, 1], [], []>} : vector<256x64xbf16>, vector<64x64xbf16>, vector<256x64xf32> -> vector<256x64xf32>
    %609 = arith.addf %603, %608 : vector<256x64xf32>
    %c0_477 = arith.constant 0 : index
    %c0_478 = arith.constant 0 : index
    %c1_479 = arith.constant 1 : index
    %c0_480 = arith.constant 0 : index
    %610 = vector.load %arg10[%c0_477, %c0_478, %c1_479, %c0_480] : memref<1x18x18x64xbf16, #tpu.memory_space<vmem>>, vector<1x16x16x64xbf16>
    %611 = vector.shape_cast %610 : vector<1x16x16x64xbf16> to vector<256x64xbf16>
    %c0_481 = arith.constant 0 : index
    %c3_482 = arith.constant 3 : index
    %c0_483 = arith.constant 0 : index
    %c0_484 = arith.constant 0 : index
    %612 = vector.load %arg5[%c0_481, %c3_482, %c0_483, %c0_484] : memref<1x9x64x64xbf16, #tpu.memory_space<vmem>>, vector<1x1x64x64xbf16>
    %613 = vector.shape_cast %612 : vector<1x1x64x64xbf16> to vector<64x64xbf16>
    %cst_485 = arith.constant dense<0.000000e+00> : vector<256x64xf32>
    %614 = tpu.matmul %611, %613, %cst_485 {dimension_numbers = #tpu.dot_dimension_numbers<[1], [0], [0], [1], [0, 0, 1, 1], [], []>} : vector<256x64xbf16>, vector<64x64xbf16>, vector<256x64xf32> -> vector<256x64xf32>
    %615 = arith.addf %609, %614 : vector<256x64xf32>
    %c0_486 = arith.constant 0 : index
    %c1_487 = arith.constant 1 : index
    %c1_488 = arith.constant 1 : index
    %c0_489 = arith.constant 0 : index
    %616 = vector.load %arg10[%c0_486, %c1_487, %c1_488, %c0_489] : memref<1x18x18x64xbf16, #tpu.memory_space<vmem>>, vector<1x16x16x64xbf16>
    %617 = vector.shape_cast %616 : vector<1x16x16x64xbf16> to vector<256x64xbf16>
    %c0_490 = arith.constant 0 : index
    %c4_491 = arith.constant 4 : index
    %c0_492 = arith.constant 0 : index
    %c0_493 = arith.constant 0 : index
    %618 = vector.load %arg5[%c0_490, %c4_491, %c0_492, %c0_493] : memref<1x9x64x64xbf16, #tpu.memory_space<vmem>>, vector<1x1x64x64xbf16>
    %619 = vector.shape_cast %618 : vector<1x1x64x64xbf16> to vector<64x64xbf16>
    %cst_494 = arith.constant dense<0.000000e+00> : vector<256x64xf32>
    %620 = tpu.matmul %617, %619, %cst_494 {dimension_numbers = #tpu.dot_dimension_numbers<[1], [0], [0], [1], [0, 0, 1, 1], [], []>} : vector<256x64xbf16>, vector<64x64xbf16>, vector<256x64xf32> -> vector<256x64xf32>
    %621 = arith.addf %615, %620 : vector<256x64xf32>
    %c0_495 = arith.constant 0 : index
    %c2_496 = arith.constant 2 : index
    %c1_497 = arith.constant 1 : index
    %c0_498 = arith.constant 0 : index
    %622 = vector.load %arg10[%c0_495, %c2_496, %c1_497, %c0_498] : memref<1x18x18x64xbf16, #tpu.memory_space<vmem>>, vector<1x16x16x64xbf16>
    %623 = vector.shape_cast %622 : vector<1x16x16x64xbf16> to vector<256x64xbf16>
    %c0_499 = arith.constant 0 : index
    %c5_500 = arith.constant 5 : index
    %c0_501 = arith.constant 0 : index
    %c0_502 = arith.constant 0 : index
    %624 = vector.load %arg5[%c0_499, %c5_500, %c0_501, %c0_502] : memref<1x9x64x64xbf16, #tpu.memory_space<vmem>>, vector<1x1x64x64xbf16>
    %625 = vector.shape_cast %624 : vector<1x1x64x64xbf16> to vector<64x64xbf16>
    %cst_503 = arith.constant dense<0.000000e+00> : vector<256x64xf32>
    %626 = tpu.matmul %623, %625, %cst_503 {dimension_numbers = #tpu.dot_dimension_numbers<[1], [0], [0], [1], [0, 0, 1, 1], [], []>} : vector<256x64xbf16>, vector<64x64xbf16>, vector<256x64xf32> -> vector<256x64xf32>
    %627 = arith.addf %621, %626 : vector<256x64xf32>
    %c0_504 = arith.constant 0 : index
    %c0_505 = arith.constant 0 : index
    %c2_506 = arith.constant 2 : index
    %c0_507 = arith.constant 0 : index
    %628 = vector.load %arg10[%c0_504, %c0_505, %c2_506, %c0_507] : memref<1x18x18x64xbf16, #tpu.memory_space<vmem>>, vector<1x16x16x64xbf16>
    %629 = vector.shape_cast %628 : vector<1x16x16x64xbf16> to vector<256x64xbf16>
    %c0_508 = arith.constant 0 : index
    %c6_509 = arith.constant 6 : index
    %c0_510 = arith.constant 0 : index
    %c0_511 = arith.constant 0 : index
    %630 = vector.load %arg5[%c0_508, %c6_509, %c0_510, %c0_511] : memref<1x9x64x64xbf16, #tpu.memory_space<vmem>>, vector<1x1x64x64xbf16>
    %631 = vector.shape_cast %630 : vector<1x1x64x64xbf16> to vector<64x64xbf16>
    %cst_512 = arith.constant dense<0.000000e+00> : vector<256x64xf32>
    %632 = tpu.matmul %629, %631, %cst_512 {dimension_numbers = #tpu.dot_dimension_numbers<[1], [0], [0], [1], [0, 0, 1, 1], [], []>} : vector<256x64xbf16>, vector<64x64xbf16>, vector<256x64xf32> -> vector<256x64xf32>
    %633 = arith.addf %627, %632 : vector<256x64xf32>
    %c0_513 = arith.constant 0 : index
    %c1_514 = arith.constant 1 : index
    %c2_515 = arith.constant 2 : index
    %c0_516 = arith.constant 0 : index
    %634 = vector.load %arg10[%c0_513, %c1_514, %c2_515, %c0_516] : memref<1x18x18x64xbf16, #tpu.memory_space<vmem>>, vector<1x16x16x64xbf16>
    %635 = vector.shape_cast %634 : vector<1x16x16x64xbf16> to vector<256x64xbf16>
    %c0_517 = arith.constant 0 : index
    %c7_518 = arith.constant 7 : index
    %c0_519 = arith.constant 0 : index
    %c0_520 = arith.constant 0 : index
    %636 = vector.load %arg5[%c0_517, %c7_518, %c0_519, %c0_520] : memref<1x9x64x64xbf16, #tpu.memory_space<vmem>>, vector<1x1x64x64xbf16>
    %637 = vector.shape_cast %636 : vector<1x1x64x64xbf16> to vector<64x64xbf16>
    %cst_521 = arith.constant dense<0.000000e+00> : vector<256x64xf32>
    %638 = tpu.matmul %635, %637, %cst_521 {dimension_numbers = #tpu.dot_dimension_numbers<[1], [0], [0], [1], [0, 0, 1, 1], [], []>} : vector<256x64xbf16>, vector<64x64xbf16>, vector<256x64xf32> -> vector<256x64xf32>
    %639 = arith.addf %633, %638 : vector<256x64xf32>
    %c0_522 = arith.constant 0 : index
    %c2_523 = arith.constant 2 : index
    %c2_524 = arith.constant 2 : index
    %c0_525 = arith.constant 0 : index
    %640 = vector.load %arg10[%c0_522, %c2_523, %c2_524, %c0_525] : memref<1x18x18x64xbf16, #tpu.memory_space<vmem>>, vector<1x16x16x64xbf16>
    %641 = vector.shape_cast %640 : vector<1x16x16x64xbf16> to vector<256x64xbf16>
    %c0_526 = arith.constant 0 : index
    %c8_527 = arith.constant 8 : index
    %c0_528 = arith.constant 0 : index
    %c0_529 = arith.constant 0 : index
    %642 = vector.load %arg5[%c0_526, %c8_527, %c0_528, %c0_529] : memref<1x9x64x64xbf16, #tpu.memory_space<vmem>>, vector<1x1x64x64xbf16>
    %643 = vector.shape_cast %642 : vector<1x1x64x64xbf16> to vector<64x64xbf16>
    %cst_530 = arith.constant dense<0.000000e+00> : vector<256x64xf32>
    %644 = tpu.matmul %641, %643, %cst_530 {dimension_numbers = #tpu.dot_dimension_numbers<[1], [0], [0], [1], [0, 0, 1, 1], [], []>} : vector<256x64xbf16>, vector<64x64xbf16>, vector<256x64xf32> -> vector<256x64xf32>
    %645 = arith.addf %639, %644 : vector<256x64xf32>
    %c0_531 = arith.constant 0 : index
    %c0_532 = arith.constant 0 : index
    %c0_533 = arith.constant 0 : index
    %646 = vector.load %arg6[%c0_531, %c0_532, %c0_533] : memref<1x1x64xf32, #tpu.memory_space<vmem>>, vector<1x1x64xf32>
    %647 = vector.shape_cast %646 : vector<1x1x64xf32> to vector<1x64xf32>
    %648 = vector.broadcast %647 : vector<1x64xf32> to vector<256x64xf32>
    %649 = arith.addf %645, %648 : vector<256x64xf32>
    %650 = vector.shape_cast %649 : vector<256x64xf32> to vector<1x16x16x64xf32>
    %651 = vector.extract_strided_slice %650 {offsets = [0, 0, 0, 0], sizes = [1, 1, 16, 64], strides = [1, 1, 1, 1]} : vector<1x16x16x64xf32> to vector<1x1x16x64xf32>
    %652 = vector.shape_cast %651 : vector<1x1x16x64xf32> to vector<1x16x64xf32>
    %c0_534 = arith.constant 0 : index
    %c0_535 = arith.constant 0 : index
    %c0_536 = arith.constant 0 : index
    %653 = vector.load %arg9[%c0_534, %c0_535, %c0_536] : memref<1x16x1024xf32, #tpu.memory_space<vmem>>, vector<1x16x64xf32>
    tpu.vector_store %arg9[%c0_534, %c0_535, %c0_536], %652 {strides = array<i32>} : memref<1x16x1024xf32, #tpu.memory_space<vmem>>, vector<1x16x64xf32>,
    %654 = vector.extract_strided_slice %650 {offsets = [0, 1, 0, 0], sizes = [1, 1, 16, 64], strides = [1, 1, 1, 1]} : vector<1x16x16x64xf32> to vector<1x1x16x64xf32>
    %655 = vector.shape_cast %654 : vector<1x1x16x64xf32> to vector<1x16x64xf32>
    %c0_537 = arith.constant 0 : index
    %c0_538 = arith.constant 0 : index
    %c64_539 = arith.constant 64 : index
    %656 = vector.load %arg9[%c0_537, %c0_538, %c64_539] : memref<1x16x1024xf32, #tpu.memory_space<vmem>>, vector<1x16x64xf32>
    tpu.vector_store %arg9[%c0_537, %c0_538, %c64_539], %655 {strides = array<i32>} : memref<1x16x1024xf32, #tpu.memory_space<vmem>>, vector<1x16x64xf32>,
    %657 = vector.extract_strided_slice %650 {offsets = [0, 2, 0, 0], sizes = [1, 1, 16, 64], strides = [1, 1, 1, 1]} : vector<1x16x16x64xf32> to vector<1x1x16x64xf32>
    %658 = vector.shape_cast %657 : vector<1x1x16x64xf32> to vector<1x16x64xf32>
    %c0_540 = arith.constant 0 : index
    %c0_541 = arith.constant 0 : index
    %c128_542 = arith.constant 128 : index
    %659 = vector.load %arg9[%c0_540, %c0_541, %c128_542] : memref<1x16x1024xf32, #tpu.memory_space<vmem>>, vector<1x16x64xf32>
    tpu.vector_store %arg9[%c0_540, %c0_541, %c128_542], %658 {strides = array<i32>} : memref<1x16x1024xf32, #tpu.memory_space<vmem>>, vector<1x16x64xf32>,
    %660 = vector.extract_strided_slice %650 {offsets = [0, 3, 0, 0], sizes = [1, 1, 16, 64], strides = [1, 1, 1, 1]} : vector<1x16x16x64xf32> to vector<1x1x16x64xf32>
    %661 = vector.shape_cast %660 : vector<1x1x16x64xf32> to vector<1x16x64xf32>
    %c0_543 = arith.constant 0 : index
    %c0_544 = arith.constant 0 : index
    %c192_545 = arith.constant 192 : index
    %662 = vector.load %arg9[%c0_543, %c0_544, %c192_545] : memref<1x16x1024xf32, #tpu.memory_space<vmem>>, vector<1x16x64xf32>
    tpu.vector_store %arg9[%c0_543, %c0_544, %c192_545], %661 {strides = array<i32>} : memref<1x16x1024xf32, #tpu.memory_space<vmem>>, vector<1x16x64xf32>,
    %663 = vector.extract_strided_slice %650 {offsets = [0, 4, 0, 0], sizes = [1, 1, 16, 64], strides = [1, 1, 1, 1]} : vector<1x16x16x64xf32> to vector<1x1x16x64xf32>
    %664 = vector.shape_cast %663 : vector<1x1x16x64xf32> to vector<1x16x64xf32>
    %c0_546 = arith.constant 0 : index
    %c0_547 = arith.constant 0 : index
    %c256_548 = arith.constant 256 : index
    %665 = vector.load %arg9[%c0_546, %c0_547, %c256_548] : memref<1x16x1024xf32, #tpu.memory_space<vmem>>, vector<1x16x64xf32>
    tpu.vector_store %arg9[%c0_546, %c0_547, %c256_548], %664 {strides = array<i32>} : memref<1x16x1024xf32, #tpu.memory_space<vmem>>, vector<1x16x64xf32>,
    %666 = vector.extract_strided_slice %650 {offsets = [0, 5, 0, 0], sizes = [1, 1, 16, 64], strides = [1, 1, 1, 1]} : vector<1x16x16x64xf32> to vector<1x1x16x64xf32>
    %667 = vector.shape_cast %666 : vector<1x1x16x64xf32> to vector<1x16x64xf32>
    %c0_549 = arith.constant 0 : index
    %c0_550 = arith.constant 0 : index
    %c320_551 = arith.constant 320 : index
    %668 = vector.load %arg9[%c0_549, %c0_550, %c320_551] : memref<1x16x1024xf32, #tpu.memory_space<vmem>>, vector<1x16x64xf32>
    tpu.vector_store %arg9[%c0_549, %c0_550, %c320_551], %667 {strides = array<i32>} : memref<1x16x1024xf32, #tpu.memory_space<vmem>>, vector<1x16x64xf32>,
    %669 = vector.extract_strided_slice %650 {offsets = [0, 6, 0, 0], sizes = [1, 1, 16, 64], strides = [1, 1, 1, 1]} : vector<1x16x16x64xf32> to vector<1x1x16x64xf32>
    %670 = vector.shape_cast %669 : vector<1x1x16x64xf32> to vector<1x16x64xf32>
    %c0_552 = arith.constant 0 : index
    %c0_553 = arith.constant 0 : index
    %c384_554 = arith.constant 384 : index
    %671 = vector.load %arg9[%c0_552, %c0_553, %c384_554] : memref<1x16x1024xf32, #tpu.memory_space<vmem>>, vector<1x16x64xf32>
    tpu.vector_store %arg9[%c0_552, %c0_553, %c384_554], %670 {strides = array<i32>} : memref<1x16x1024xf32, #tpu.memory_space<vmem>>, vector<1x16x64xf32>,
    %672 = vector.extract_strided_slice %650 {offsets = [0, 7, 0, 0], sizes = [1, 1, 16, 64], strides = [1, 1, 1, 1]} : vector<1x16x16x64xf32> to vector<1x1x16x64xf32>
    %673 = vector.shape_cast %672 : vector<1x1x16x64xf32> to vector<1x16x64xf32>
    %c0_555 = arith.constant 0 : index
    %c0_556 = arith.constant 0 : index
    %c448_557 = arith.constant 448 : index
    %674 = vector.load %arg9[%c0_555, %c0_556, %c448_557] : memref<1x16x1024xf32, #tpu.memory_space<vmem>>, vector<1x16x64xf32>
    tpu.vector_store %arg9[%c0_555, %c0_556, %c448_557], %673 {strides = array<i32>} : memref<1x16x1024xf32, #tpu.memory_space<vmem>>, vector<1x16x64xf32>,
    %675 = vector.extract_strided_slice %650 {offsets = [0, 8, 0, 0], sizes = [1, 1, 16, 64], strides = [1, 1, 1, 1]} : vector<1x16x16x64xf32> to vector<1x1x16x64xf32>
    %676 = vector.shape_cast %675 : vector<1x1x16x64xf32> to vector<1x16x64xf32>
    %c0_558 = arith.constant 0 : index
    %c0_559 = arith.constant 0 : index
    %c512_560 = arith.constant 512 : index
    %677 = vector.load %arg9[%c0_558, %c0_559, %c512_560] : memref<1x16x1024xf32, #tpu.memory_space<vmem>>, vector<1x16x64xf32>
    tpu.vector_store %arg9[%c0_558, %c0_559, %c512_560], %676 {strides = array<i32>} : memref<1x16x1024xf32, #tpu.memory_space<vmem>>, vector<1x16x64xf32>,
    %678 = vector.extract_strided_slice %650 {offsets = [0, 9, 0, 0], sizes = [1, 1, 16, 64], strides = [1, 1, 1, 1]} : vector<1x16x16x64xf32> to vector<1x1x16x64xf32>
    %679 = vector.shape_cast %678 : vector<1x1x16x64xf32> to vector<1x16x64xf32>
    %c0_561 = arith.constant 0 : index
    %c0_562 = arith.constant 0 : index
    %c576_563 = arith.constant 576 : index
    %680 = vector.load %arg9[%c0_561, %c0_562, %c576_563] : memref<1x16x1024xf32, #tpu.memory_space<vmem>>, vector<1x16x64xf32>
    tpu.vector_store %arg9[%c0_561, %c0_562, %c576_563], %679 {strides = array<i32>} : memref<1x16x1024xf32, #tpu.memory_space<vmem>>, vector<1x16x64xf32>,
    %681 = vector.extract_strided_slice %650 {offsets = [0, 10, 0, 0], sizes = [1, 1, 16, 64], strides = [1, 1, 1, 1]} : vector<1x16x16x64xf32> to vector<1x1x16x64xf32>
    %682 = vector.shape_cast %681 : vector<1x1x16x64xf32> to vector<1x16x64xf32>
    %c0_564 = arith.constant 0 : index
    %c0_565 = arith.constant 0 : index
    %c640_566 = arith.constant 640 : index
    %683 = vector.load %arg9[%c0_564, %c0_565, %c640_566] : memref<1x16x1024xf32, #tpu.memory_space<vmem>>, vector<1x16x64xf32>
    tpu.vector_store %arg9[%c0_564, %c0_565, %c640_566], %682 {strides = array<i32>} : memref<1x16x1024xf32, #tpu.memory_space<vmem>>, vector<1x16x64xf32>,
    %684 = vector.extract_strided_slice %650 {offsets = [0, 11, 0, 0], sizes = [1, 1, 16, 64], strides = [1, 1, 1, 1]} : vector<1x16x16x64xf32> to vector<1x1x16x64xf32>
    %685 = vector.shape_cast %684 : vector<1x1x16x64xf32> to vector<1x16x64xf32>
    %c0_567 = arith.constant 0 : index
    %c0_568 = arith.constant 0 : index
    %c704_569 = arith.constant 704 : index
    %686 = vector.load %arg9[%c0_567, %c0_568, %c704_569] : memref<1x16x1024xf32, #tpu.memory_space<vmem>>, vector<1x16x64xf32>
    tpu.vector_store %arg9[%c0_567, %c0_568, %c704_569], %685 {strides = array<i32>} : memref<1x16x1024xf32, #tpu.memory_space<vmem>>, vector<1x16x64xf32>,
    %687 = vector.extract_strided_slice %650 {offsets = [0, 12, 0, 0], sizes = [1, 1, 16, 64], strides = [1, 1, 1, 1]} : vector<1x16x16x64xf32> to vector<1x1x16x64xf32>
    %688 = vector.shape_cast %687 : vector<1x1x16x64xf32> to vector<1x16x64xf32>
    %c0_570 = arith.constant 0 : index
    %c0_571 = arith.constant 0 : index
    %c768_572 = arith.constant 768 : index
    %689 = vector.load %arg9[%c0_570, %c0_571, %c768_572] : memref<1x16x1024xf32, #tpu.memory_space<vmem>>, vector<1x16x64xf32>
    tpu.vector_store %arg9[%c0_570, %c0_571, %c768_572], %688 {strides = array<i32>} : memref<1x16x1024xf32, #tpu.memory_space<vmem>>, vector<1x16x64xf32>,
    %690 = vector.extract_strided_slice %650 {offsets = [0, 13, 0, 0], sizes = [1, 1, 16, 64], strides = [1, 1, 1, 1]} : vector<1x16x16x64xf32> to vector<1x1x16x64xf32>
    %691 = vector.shape_cast %690 : vector<1x1x16x64xf32> to vector<1x16x64xf32>
    %c0_573 = arith.constant 0 : index
    %c0_574 = arith.constant 0 : index
    %c832_575 = arith.constant 832 : index
    %692 = vector.load %arg9[%c0_573, %c0_574, %c832_575] : memref<1x16x1024xf32, #tpu.memory_space<vmem>>, vector<1x16x64xf32>
    tpu.vector_store %arg9[%c0_573, %c0_574, %c832_575], %691 {strides = array<i32>} : memref<1x16x1024xf32, #tpu.memory_space<vmem>>, vector<1x16x64xf32>,
    %693 = vector.extract_strided_slice %650 {offsets = [0, 14, 0, 0], sizes = [1, 1, 16, 64], strides = [1, 1, 1, 1]} : vector<1x16x16x64xf32> to vector<1x1x16x64xf32>
    %694 = vector.shape_cast %693 : vector<1x1x16x64xf32> to vector<1x16x64xf32>
    %c0_576 = arith.constant 0 : index
    %c0_577 = arith.constant 0 : index
    %c896_578 = arith.constant 896 : index
    %695 = vector.load %arg9[%c0_576, %c0_577, %c896_578] : memref<1x16x1024xf32, #tpu.memory_space<vmem>>, vector<1x16x64xf32>
    tpu.vector_store %arg9[%c0_576, %c0_577, %c896_578], %694 {strides = array<i32>} : memref<1x16x1024xf32, #tpu.memory_space<vmem>>, vector<1x16x64xf32>,
    %696 = vector.extract_strided_slice %650 {offsets = [0, 15, 0, 0], sizes = [1, 1, 16, 64], strides = [1, 1, 1, 1]} : vector<1x16x16x64xf32> to vector<1x1x16x64xf32>
    %697 = vector.shape_cast %696 : vector<1x1x16x64xf32> to vector<1x16x64xf32>
    %c0_579 = arith.constant 0 : index
    %c0_580 = arith.constant 0 : index
    %c960_581 = arith.constant 960 : index
    %698 = vector.load %arg9[%c0_579, %c0_580, %c960_581] : memref<1x16x1024xf32, #tpu.memory_space<vmem>>, vector<1x16x64xf32>
    tpu.vector_store %arg9[%c0_579, %c0_580, %c960_581], %697 {strides = array<i32>} : memref<1x16x1024xf32, #tpu.memory_space<vmem>>, vector<1x16x64xf32>,
    %c0_582 = arith.constant 0 : index
    %c0_583 = arith.constant 0 : index
    %c0_584 = arith.constant 0 : index
    %699 = vector.load %arg8[%c0_582, %c0_583, %c0_584] : memref<1x16x1024xf32, #tpu.memory_space<vmem>>, vector<1x16x1024xf32>
    %c0_585 = arith.constant 0 : index
    %c0_586 = arith.constant 0 : index
    %c0_587 = arith.constant 0 : index
    %700 = vector.load %arg9[%c0_585, %c0_586, %c0_587] : memref<1x16x1024xf32, #tpu.memory_space<vmem>>, vector<1x16x1024xf32>
    %701 = arith.addf %699, %700 : vector<1x16x1024xf32>
    %c0_588 = arith.constant 0 : index
    %c0_589 = arith.constant 0 : index
    %c0_590 = arith.constant 0 : index
    %702 = vector.load %arg8[%c0_588, %c0_589, %c0_590] : memref<1x16x1024xf32, #tpu.memory_space<vmem>>, vector<1x16x1024xf32>
    tpu.vector_store %arg8[%c0_588, %c0_589, %c0_590], %701 {strides = array<i32>} : memref<1x16x1024xf32, #tpu.memory_space<vmem>>, vector<1x16x1024xf32>,
    %c3_i32 = arith.constant 3 : i32
    %703 = arith.cmpi eq, %arg1, %c3_i32 : i32
    %704 = arith.extui %703 : i1 to i32
    %c0_i32_591 = arith.constant 0 : i32
    %705 = arith.cmpi ne, %704, %c0_i32_591 : i32
    scf.if %705 {
      %c0_592 = arith.constant 0 : index
      %c0_593 = arith.constant 0 : index
      %c0_594 = arith.constant 0 : index
      %706 = vector.load %arg8[%c0_592, %c0_593, %c0_594] : memref<1x16x1024xf32, #tpu.memory_space<vmem>>, vector<1x16x1024xf32>
      %c0_595 = arith.constant 0 : index
      %c0_596 = arith.constant 0 : index
      %c0_597 = arith.constant 0 : index
      %707 = vector.load %arg7[%c0_595, %c0_596, %c0_597] : memref<1x16x1024xf32, #tpu.memory_space<vmem>>, vector<1x16x1024xf32>
      tpu.vector_store %arg7[%c0_595, %c0_596, %c0_597], %706 {strides = array<i32>} : memref<1x16x1024xf32, #tpu.memory_space<vmem>>, vector<1x16x1024xf32>,
    } else {
    }
    return
  }
  func.func @transform_0(%arg0: i32, %arg1: i32) -> (i32, i32, i32) {
    %c0_i32 = arith.constant 0 : i32
    %c0_i32_0 = arith.constant 0 : i32
    %c0_i32_1 = arith.constant 0 : i32
    return %arg0, %c0_i32, %c0_i32_0 : i32, i32, i32
  }
  func.func @transform_1(%arg0: i32, %arg1: i32) -> (i32, i32, i32, i32) {
    %c0_i32 = arith.constant 0 : i32
    %c0_i32_0 = arith.constant 0 : i32
    %c0_i32_1 = arith.constant 0 : i32
    %c0_i32_2 = arith.constant 0 : i32
    return %arg1, %c0_i32, %c0_i32_0, %c0_i32_1 : i32, i32, i32, i32
  }
  func.func @transform_2(%arg0: i32, %arg1: i32) -> (i32, i32, i32) {
    %c0_i32 = arith.constant 0 : i32
    %c0_i32_0 = arith.constant 0 : i32
    %c0_i32_1 = arith.constant 0 : i32
    return %arg1, %c0_i32, %c0_i32_0 : i32, i32, i32
  }
  func.func @transform_3(%arg0: i32, %arg1: i32) -> (i32, i32, i32, i32) {
    %c0_i32 = arith.constant 0 : i32
    %c0_i32_0 = arith.constant 0 : i32
    %c0_i32_1 = arith.constant 0 : i32
    %c0_i32_2 = arith.constant 0 : i32
    return %arg1, %c0_i32, %c0_i32_0, %c0_i32_1 : i32, i32, i32, i32
  }
  func.func @transform_4(%arg0: i32, %arg1: i32) -> (i32, i32, i32) {
    %c0_i32 = arith.constant 0 : i32
    %c0_i32_0 = arith.constant 0 : i32
    %c0_i32_1 = arith.constant 0 : i32
    return %arg1, %c0_i32, %c0_i32_0 : i32, i32, i32
  }
  func.func @transform_5(%arg0: i32, %arg1: i32) -> (i32, i32, i32) {
    %c0_i32 = arith.constant 0 : i32
    %c0_i32_0 = arith.constant 0 : i32
    %c0_i32_1 = arith.constant 0 : i32
    return %arg0, %c0_i32, %c0_i32_0 : i32, i32, i32
  }
}

</mosaic_0001>

<bundles_post_ra>
// kernel: tunnel_forward.1
= control target key start
LH: loop header
LB: loop body
LE: loop exit
PB: predicated region body
PF: predicated region fallthrough
CT: control target
= control target key end

     0   :  { %s15298_s18 = smov 0   ;;  %s15300_s19 = smov 0   ;;  %s18342_s0 = inlined_call_operand.vmem [shape: f32[2,16,1024], index: 0, kind: input, shape index: {}]   ;;  %s18343_s1 = inlined_call_operand.vmem [shape: bf16[4,9,64,64], index: 1, kind: input, shape index: {}]   ;;  %s18344_s2 = inlined_call_operand.vmem [shape: f32[4,1,64], index: 2, kind: input, shape index: {}]   ;;  %s18345_s3 = inlined_call_operand.vmem [shape: bf16[4,9,64,64], index: 3, kind: input, shape index: {}]   ;;  %s18346_s4 = inlined_call_operand.vmem [shape: f32[4,1,64], index: 4, kind: input, shape index: {}]   ;;  %s18347_s5 = inlined_call_operand.vmem [shape: f32[2,16,1024], index: 5, kind: output, shape index: {}]  }
   0x1   :  { %s15302_s20 = smov 0   ;;  %s15304_s21 = smov 0  }
   0x2   :  { %s15306_s22 = smov 0  }
   0x3 LB: > { %s24_s23 = sadd.s32 1, %s15255_s20  ;;  %s27_s24 = sadd.s32 1, %s15259_s21  ;;  %s15263_s22 = sphi %s15306_s22, %s15_s22   ;;  %s15259_s21 = sphi %s15304_s21, %s18365_s21   ;;  %s15255_s20 = sphi %s15302_s20, %s18364_s20   ;;  %s15251_s19 = sphi %s15300_s19, %s18363_s19   ;;  %s15247_s18 = sphi %s15298_s18, %s18362_s18  }
   0x4   : > { %p25_p0 = scmp.ge.s32.totalorder %s24_s23, 4  ;;  %p12286_p1 = scmp.ge.s32.totalorder %s15263_s22, 1 }
   0x5   : > { %p235_p2 = scmp.lt.s32.totalorder %s15263_s22, 9 }
   0x6   : > { %s18367_s23 = smov (%p25_p0, %s24_s23), 0  ;;  %s18369_s24 = smov (!%p25_p0, %s27_s24), %s15259_s21 }
   0x7   : > { %p236_p3 = pnand %p12286_p1, %p235_p2  ;;  %p29_p4 = scmp.ge.s32.totalorder %s18369_s24, 2 }
   0x8   : > { %p279_p5 = scmp.lt.s32.totalorder (!%p236_p3), %s15251_s19, 1  ;;  %p284_p6 = scmp.lt.s32.totalorder (!%p236_p3), %s15247_s18, 3 }
   0x9   : > { %s18371_s24 = smov (%p29_p4, %s18369_s24), 0  ;;  %239 = sbr.rel (%p236_p3) target bundleno = 3337 (0xd09), region = 40 }
   0xa   : > { %p12293_p7 = scmp.ne.s32.totalorder (!%p236_p3), %s15247_s18, 0 }
  0x10   : > { %s18373_s19 = smov (!%p279_p5, %s15251_s19), 1  ;;  %309 = sbr.rel (%p12293_p7) target bundleno = 55 (0x37), region = 44 }
  0x11   : > { %s15332_s25 = scalar_select %p284_p6, %s15247_s18, 3 }
  0x12   : > { %s13203_s26 = sshll.u32 %s18373_s19, 7  ;;  %vm342_vm0 = vcmask (!%p12293_p7), 519168   ;;  %vm345_vm1 = vcmask (!%p12293_p7), 516096   ;;  %v15265_v6 = vmov (!%p12293_p7), 0  }
  0x13   : > { %s15337_s29 = scalar_lea.vmem %s18342_s0, %s13203_s26  ;;  %s14829_s30 = smul.u32 288, %s15332_s25  ;;  %343 = vst.msk [vmem:[#allocation4] sm:$0xf] (!%p12293_p7), %vm342_vm0, %v15265_v6  ;;  %344 = vst.msk [vmem:[#allocation4 + $0x4] sm:$0xf] (!%p12293_p7), %vm342_vm0, %v15265_v6 }
  0x14   : > { %s291_s8 = scalar_lea.vmem %s18344_s2, %s15332_s25  ;;  %s299_s11 = scalar_lea.vmem %s18346_s4, %s15332_s25  ;;  %v310_v0 = vld [vmem:[%s15337_s29] sm:$0xff] (!%p12293_p7)  ;;  %v311_v1 = vld [vmem:[%s15337_s29 + $0x8] sm:$0xff] (!%p12293_p7)  ;;  %v312_v2 = vld [vmem:[%s15337_s29 + $0x10] sm:$0xff] (!%p12293_p7)  ;;  %347 = vst.msk [vmem:[#allocation4 + $0xc] sm:$0xf] (!%p12293_p7), %vm342_vm0, %v15265_v6 }
  0x15   : > { %s15351_s14 = scalar_lea.vmem %s18343_s1, %s14829_s30  ;;  %s15356_s17 = scalar_lea.vmem %s18345_s3, %s14829_s30  ;;  %326 = vst [vmem:[#allocation2] sm:$0xff] (!%p12293_p7), %v310_v0  ;;  %327 = vst [vmem:[#allocation2 + $0x8] sm:$0xff] (!%p12293_p7), %v311_v1  ;;  %v313_v3 = vld [vmem:[%s15337_s29 + $0x18] sm:$0xff] (!%p12293_p7)  ;;  %v314_v4 = vld [vmem:[%s15337_s29 + $0x20] sm:$0xff] (!%p12293_p7) }
  0x16   : > { %s15361_s28 = scalar_lea.vmem %s18347_s5, %s13203_s26  ;;  %328 = vst [vmem:[#allocation2 + $0x10] sm:$0xff] (!%p12293_p7), %v312_v2  ;;  %v315_v5 = vld [vmem:[%s15337_s29 + $0x28] sm:$0xff] (!%p12293_p7)  ;;  %348 = vst.msk [vmem:[#allocation4 + $0x10] sm:$0xf] (!%p12293_p7), %vm342_vm0, %v15265_v6  ;;  %v316_v7 = vld [vmem:[%s15337_s29 + $0x30] sm:$0xff] (!%p12293_p7) }
  0x17   : > { %350 = vst.msk [vmem:[#allocation4 + $0x18] sm:$0xf] %vm342_vm0, %v15265_v6  ;;  %351 = vst.msk [vmem:[#allocation4 + $0x1c] sm:$0xf] %vm342_vm0, %v15265_v6  ;;  %v317_v8 = vld [vmem:[%s15337_s29 + $0x38] sm:$0xff]  ;;  %v318_v9 = vld [vmem:[%s15337_s29 + $0x40] sm:$0xff] }
  0x18   : > { %353 = vst.msk [vmem:[#allocation4 + $0x24] sm:$0xf] %vm342_vm0, %v15265_v6  ;;  %354 = vst.msk [vmem:[#allocation4 + $0x28] sm:$0xf] %vm342_vm0, %v15265_v6  ;;  %v319_v10 = vld [vmem:[%s15337_s29 + $0x48] sm:$0xff]  ;;  %v320_v11 = vld [vmem:[%s15337_s29 + $0x50] sm:$0xff] }
  0x19   : > { %356 = vst.msk [vmem:[#allocation4 + $0x30] sm:$0xf] %vm342_vm0, %v15265_v6  ;;  %357 = vst.msk [vmem:[#allocation4 + $0x34] sm:$0xf] %vm342_vm0, %v15265_v6  ;;  %v321_v12 = vld [vmem:[%s15337_s29 + $0x58] sm:$0xff]  ;;  %v322_v13 = vld [vmem:[%s15337_s29 + $0x60] sm:$0xff] }
  0x1a   : > { %359 = vst.msk [vmem:[#allocation4 + $0x3c] sm:$0xf] %vm342_vm0, %v15265_v6  ;;  %360 = vst.msk [vmem:[#allocation4 + $0x40] sm:$0xf] %vm342_vm0, %v15265_v6  ;;  %v323_v14 = vld [vmem:[%s15337_s29 + $0x68] sm:$0xff]  ;;  %v324_v15 = vld [vmem:[%s15337_s29 + $0x70] sm:$0xff] }
  0x1b   : > { %362 = vst.msk [vmem:[#allocation4 + $0x48] sm:$0xf] %vm342_vm0, %v15265_v6  ;;  %363 = vst.msk [vmem:[#allocation4 + $0x4c] sm:$0xf] %vm342_vm0, %v15265_v6  ;;  %v325_v16 = vld [vmem:[%s15337_s29 + $0x78] sm:$0xff] }
  0x1c   : > { %365 = vst.msk [vmem:[#allocation4 + $0x54] sm:$0xf] %vm342_vm0, %v15265_v6  ;;  %366 = vst.msk [vmem:[#allocation4 + $0x58] sm:$0xf] %vm342_vm0, %v15265_v6 }
  0x1d   : > { %368 = vst.msk [vmem:[#allocation4 + $0x60] sm:$0xf] %vm342_vm0, %v15265_v6  ;;  %369 = vst.msk [vmem:[#allocation4 + $0x64] sm:$0xf] %vm342_vm0, %v15265_v6 }
  0x1e   : > { %371 = vst.msk [vmem:[#allocation4 + $0x6c] sm:$0xf] %vm342_vm0, %v15265_v6  ;;  %372 = vst.msk [vmem:[#allocation4 + $0x70] sm:$0xf] %vm342_vm0, %v15265_v6 }
  0x1f   : > { %374 = vst.msk [vmem:[#allocation4 + $0x78] sm:$0xf] %vm342_vm0, %v15265_v6  ;;  %375 = vst.msk [vmem:[#allocation4 + $0x7c] sm:$0xf] %vm342_vm0, %v15265_v6 }
  0x20   : > { %377 = vst.msk [vmem:[#allocation4 + $0x84] sm:$0xf] %vm342_vm0, %v15265_v6  ;;  %378 = vst.msk [vmem:[#allocation4 + $0x88] sm:$0xf] %vm342_vm0, %v15265_v6 }
  0x21   : > { %380 = vst.msk [vmem:[#allocation4 + $0x90] sm:$0xf] %vm342_vm0, %v15265_v6  ;;  %381 = vst.msk [vmem:[#allocation4 + $0x94] sm:$0xf] %vm342_vm0, %v15265_v6 }
  0x22   : > { %383 = vst.msk [vmem:[#allocation4 + $0x9c] sm:$0xf] %vm342_vm0, %v15265_v6  ;;  %384 = vst.msk [vmem:[#allocation4 + $0xa0] sm:$0xf] %vm342_vm0, %v15265_v6 }
  0x23   : > { %386 = vst.msk [vmem:[#allocation4 + $0xa8] sm:$0xf] %vm342_vm0, %v15265_v6  ;;  %387 = vst.msk [vmem:[#allocation4 + $0xac] sm:$0xf] %vm342_vm0, %v15265_v6 }
  0x24   : > { %389 = vst.msk [vmem:[#allocation4 + $0xb4] sm:$0xf] %vm342_vm0, %v15265_v6  ;;  %390 = vst.msk [vmem:[#allocation4 + $0xb8] sm:$0xf] %vm342_vm0, %v15265_v6 }
  0x25   : > { %392 = vst.msk [vmem:[#allocation4 + $0xc0] sm:$0xf] %vm342_vm0, %v15265_v6  ;;  %393 = vst.msk [vmem:[#allocation4 + $0xc4] sm:$0xf] %vm342_vm0, %v15265_v6 }
  0x26   : > { %395 = vst.msk [vmem:[#allocation4 + $0xcc] sm:$0xf] %vm342_vm0, %v15265_v6  ;;  %396 = vst.msk [vmem:[#allocation4 + $0xd0] sm:$0xf] %vm342_vm0, %v15265_v6 }
  0x27   : > { %346 = vst.msk [vmem:[#allocation4 + $0x8] sm:$0x1] %vm345_vm1, %v15265_v6  ;;  %349 = vst.msk [vmem:[#allocation4 + $0x14] sm:$0x1] %vm345_vm1, %v15265_v6 }
  0x28   : > { %352 = vst.msk [vmem:[#allocation4 + $0x20] sm:$0x1] %vm345_vm1, %v15265_v6  ;;  %355 = vst.msk [vmem:[#allocation4 + $0x2c] sm:$0x1] %vm345_vm1, %v15265_v6 }
  0x29   : > { %358 = vst.msk [vmem:[#allocation4 + $0x38] sm:$0x1] %vm345_vm1, %v15265_v6  ;;  %361 = vst.msk [vmem:[#allocation4 + $0x44] sm:$0x1] %vm345_vm1, %v15265_v6 }
  0x2a   : > { %364 = vst.msk [vmem:[#allocation4 + $0x50] sm:$0x1] %vm345_vm1, %v15265_v6  ;;  %367 = vst.msk [vmem:[#allocation4 + $0x5c] sm:$0x1] %vm345_vm1, %v15265_v6 }
  0x2b   : > { %370 = vst.msk [vmem:[#allocation4 + $0x68] sm:$0x1] %vm345_vm1, %v15265_v6  ;;  %373 = vst.msk [vmem:[#allocation4 + $0x74] sm:$0x1] %vm345_vm1, %v15265_v6 }
  0x2c   : > { %376 = vst.msk [vmem:[#allocation4 + $0x80] sm:$0x1] %vm345_vm1, %v15265_v6  ;;  %379 = vst.msk [vmem:[#allocation4 + $0x8c] sm:$0x1] %vm345_vm1, %v15265_v6 }
  0x2d   : > { %382 = vst.msk [vmem:[#allocation4 + $0x98] sm:$0x1] %vm345_vm1, %v15265_v6  ;;  %385 = vst.msk [vmem:[#allocation4 + $0xa4] sm:$0x1] %vm345_vm1, %v15265_v6 }
  0x2e   : > { %388 = vst.msk [vmem:[#allocation4 + $0xb0] sm:$0x1] %vm345_vm1, %v15265_v6  ;;  %391 = vst.msk [vmem:[#allocation4 + $0xbc] sm:$0x1] %vm345_vm1, %v15265_v6 }
  0x2f   : > { %394 = vst.msk [vmem:[#allocation4 + $0xc8] sm:$0x1] %vm345_vm1, %v15265_v6  ;;  %397 = vst.msk [vmem:[#allocation4 + $0xd4] sm:$0x1] %vm345_vm1, %v15265_v6 }
  0x30   : > { %329 = vst [vmem:[#allocation2 + $0x18] sm:$0xff] %v313_v3  ;;  %330 = vst [vmem:[#allocation2 + $0x20] sm:$0xff] %v314_v4 }
  0x31   : > { %331 = vst [vmem:[#allocation2 + $0x28] sm:$0xff] %v315_v5  ;;  %332 = vst [vmem:[#allocation2 + $0x30] sm:$0xff] %v316_v7 }
  0x32   : > { %333 = vst [vmem:[#allocation2 + $0x38] sm:$0xff] %v317_v8  ;;  %334 = vst [vmem:[#allocation2 + $0x40] sm:$0xff] %v318_v9 }
  0x33   : > { %335 = vst [vmem:[#allocation2 + $0x48] sm:$0xff] %v319_v10  ;;  %336 = vst [vmem:[#allocation2 + $0x50] sm:$0xff] %v320_v11 }
  0x34   : > { %337 = vst [vmem:[#allocation2 + $0x58] sm:$0xff] %v321_v12  ;;  %338 = vst [vmem:[#allocation2 + $0x60] sm:$0xff] %v322_v13 }
  0x35   : > { %339 = vst [vmem:[#allocation2 + $0x68] sm:$0xff] %v323_v14  ;;  %340 = vst [vmem:[#allocation2 + $0x70] sm:$0xff] %v324_v15 }
  0x36   : > { %341 = vst [vmem:[#allocation2 + $0x78] sm:$0xff] %v325_v16 }
  0x37 PF: > { %v15448_v24 = vld [vmem:[#allocation2 + $0x18] sm:$0xff]  ;;  %v15458_v30 = vld [vmem:[#allocation2 + $0x20] sm:$0xff]  ;;  %s15266_s26 = smov 64   ;;  %vm884_vm6 = vcmask 519168   ;;  %vm885_vm7 = vsmask.f32 7938 }
  0x38   : > { %v15464_v33 = vld [vmem:[#allocation2 + $0x28] sm:$0xff]  ;;  %v15468_v35 = vld [vmem:[#allocation2 + $0x30] sm:$0xff]  ;;  %vm860_vm8 = vsmask.f32 256  ;;  %vm861_vm9 = vsmask.f32 4368  ;;  %vm15716_vm10 = vmand %vm884_vm6, %vm885_vm7 }
  0x39   : > { %v15436_v18 = vld [vmem:[#allocation2 + $0x40] sm:$0xff]  ;;  %v15472_v41 = vld [vmem:[#allocation2 + $0x38] sm:$0xff]  ;;  %vm15727_vm11 = vmor %vm860_vm8, %vm861_vm9  ;;  %vm1449_vm12 = vcmask 523264   ;;  %vm892_vm13 = vcmask 516096   ;;  %vm2406_vm15 = vsmask.f32 3328 }
  0x3a   : > { %v15442_v21 = vld [vmem:[#allocation2 + $0x48] sm:$0xff]  ;;  %v15446_v23 = vld [vmem:[#allocation2 + $0x50] sm:$0xff]  ;;  %vm15801_vm14 = vmand %vm892_vm13, %vm860_vm8  ;;  %vm2407_vm0 = vsmask.f32 7440  ;;  %vm6169_vm8 = vcmask 1048064   ;;  %p13200_p8 = scmp.ne.s32.totalorder %s15247_s18, 3 }
  0x3b   : > { %v15450_v25 = vld [vmem:[#allocation2 + $0x58] sm:$0xff]  ;;  %v15460_v31 = vld [vmem:[#allocation2 + $0x60] sm:$0xff]  ;;  %vm15971_vm1 = vmor %vm2406_vm15, %vm2407_vm0 }
  0x3c   : > { %v15434_v17 = vld [vmem:[#allocation2] sm:$0xff]  ;;  %v15438_v19 = vld [vmem:[#allocation2 + $0x8] sm:$0xff]  ;;  %v435_v29 = vadd.f32 %v15450_v25, %v15448_v24  ;;  %v442_v32 = vadd.f32 %v15460_v31, %v15458_v30  ;;  %v15470_v40 = vld [vmem:[#allocation2 + $0x70] sm:$0xff] }
  0x3d   : > { %v414_v20 = vadd.f32 %v15436_v18, %v15434_v17  ;;  %v15444_v22 = vld [vmem:[#allocation2 + $0x10] sm:$0xff]  ;;  %v421_v27 = vadd.f32 %v15442_v21, %v15438_v19  ;;  %v15466_v34 = vld [vmem:[#allocation2 + $0x68] sm:$0xff]  ;;  %v15474_v42 = vld [vmem:[#allocation2 + $0x78] sm:$0xff]  ;;  %v456_v45 = vadd.f32 %v15470_v40, %v15468_v35 }
  0x3e   : > { %v428_v28 = vadd.f32 %v15446_v23, %v15444_v22  ;;  %v436_v39 = vrot.slane %v435_v29, 4  ;;  %v443_v43 = vrot.slane %v442_v32, 4  ;;  %v449_v44 = vadd.f32 %v15466_v34, %v15464_v33 }
  0x3f   : > { %v415_v26 = vrot.slane %v414_v20, 4  ;;  %v422_v37 = vrot.slane %v421_v27, 4  ;;  %v463_v46 = vadd.f32 %v15474_v42, %v15472_v41  ;;  %v457_v53 = vrot.slane %v456_v45, 4 }
  0x40   : > { %v429_v38 = vrot.slane %v428_v28, 4  ;;  %v437_v50 = vadd.f32 %v436_v39, %v435_v29  ;;  %v444_v51 = vadd.f32 %v443_v43, %v442_v32  ;;  %v450_v52 = vrot.slane %v449_v44, 4 }
  0x41   : > { %v416_v36 = vadd.f32 %v415_v26, %v414_v20  ;;  %v423_v48 = vadd.f32 %v422_v37, %v421_v27  ;;  %v464_v54 = vrot.slane %v463_v46, 4  ;;  %v458_v61 = vadd.f32 %v457_v53, %v456_v45 }
  0x42   : > { %v430_v49 = vadd.f32 %v429_v38, %v428_v28  ;;  %v438_v58 = vrot.slane %v437_v50, 2  ;;  %v445_v59 = vrot.slane %v444_v51, 2  ;;  %v451_v60 = vadd.f32 %v450_v52, %v449_v44 }
  0x43   : > { %v417_v47 = vrot.slane %v416_v36, 2  ;;  %v424_v56 = vrot.slane %v423_v48, 2  ;;  %v465_v62 = vadd.f32 %v464_v54, %v463_v46  ;;  %v459_v5 = vrot.slane %v458_v61, 2 }
  0x44   : > { %v431_v57 = vrot.slane %v430_v49, 2  ;;  %v439_v2 = vadd.f32 %v438_v58, %v437_v50  ;;  %v446_v3 = vadd.f32 %v445_v59, %v444_v51  ;;  %v452_v4 = vrot.slane %v451_v60, 2 }
  0x45   : > { %v418_v55 = vadd.f32 %v417_v47, %v416_v36  ;;  %v425_v0 = vadd.f32 %v424_v56, %v423_v48  ;;  %v466_v6 = vrot.slane %v465_v62, 2  ;;  %v460_v13 = vadd.f32 %v459_v5, %v458_v61 }
  0x46   : > { %v432_v1 = vadd.f32 %v431_v57, %v430_v49  ;;  %v440_v10 = vrot.slane %v439_v2, 1  ;;  %v447_v11 = vrot.slane %v446_v3, 1  ;;  %v453_v12 = vadd.f32 %v452_v4, %v451_v60 }
  0x47   : > { %v419_v63 = vrot.slane %v418_v55, 1  ;;  %v426_v8 = vrot.slane %v425_v0, 1  ;;  %v467_v14 = vadd.f32 %v466_v6, %v465_v62  ;;  %v461_v26 = vrot.slane %v460_v13, 1 }
  0x48   : > { %v433_v9 = vrot.slane %v432_v1, 1  ;;  %v454_v20 = vrot.slane %v453_v12, 1  ;;  %v441_v28 = vadd.f32 %v440_v10, %v439_v2  ;;  %v448_v29 = vadd.f32 %v447_v11, %v446_v3 }
  0x49   : > { %v420_v7 = vadd.f32 %v419_v63, %v418_v55  ;;  %v427_v15 = vadd.f32 %v426_v8, %v425_v0  ;;  %v468_v27 = vrot.slane %v467_v14, 1  ;;  %v462_v36 = vadd.f32 %v461_v26, %v460_v13 }
  0x4a   : > { %v434_v16 = vadd.f32 %v433_v9, %v432_v1  ;;  %v455_v32 = vadd.f32 %v454_v20, %v453_v12  ;;  %v518_v57 = vlaneseq  ;;  %v15267_v59 = vmov 1966171168  }
  0x4b   : > { %471 = vrot.lane.b32.xlu0 %v420_v7, %s15266_s26  ;;  %v469_v37 = vadd.f32 %v468_v27, %v467_v14  ;;  %v525_v60 = vunpack.c.l.s4 %v15267_v59 }
  0x4c   : > { %483 = vrot.lane.b32.xlu1 %v434_v16, %s15266_s26  ;;  %v528_v63 = vshrl.u32 %v518_v57, 7  ;;  %vm15492_vm2 = vcmp.lt.s32.totalorder %v518_v57, 64  ;;  %vm541_vm3 = vcmp.ge.s32.totalorder %v518_v57, 64  ;;  %vm542_vm4 = vcmp.lt.s32.totalorder %v518_v57, 128 }
  0x4d   : > { %v526_v1 = vunpack.c.0.s8 %v525_v60  ;;  %vm15515_vm5 = vmand %vm541_vm3, %vm542_vm4  ;;  %vm4687_vm3 = vcmask 1042432   ;;  %vm4688_vm4 = vcmask 1046532  }
  0x4e   : > { %v15535_v12 = vsub.s32 0, %v528_v63  ;;  %v15537_v13 = vsub.s32 2, %v528_v63  ;;  %v15539_v14 = vsub.s32 1, %v528_v63  ;;  %v15545_v20 = vsub.s32 4, %v528_v63  ;;  %vm16582_vm7 = vmor %vm4687_vm3, %vm4688_vm4 }
  0x4f   : > { %477 = vrot.lane.b32.xlu0 %v427_v15, %s15266_s26  ;;  %v15490_v5 = vsub.s32 %v526_v1, %v528_v63  ;;  %v15547_v26 = vsub.s32 7, %v528_v63  ;;  %v15549_v27 = vsub.s32 6, %v528_v63 }
  0x50   : > { %489 = vrot.lane.b32.xlu1 %v441_v28, %s15266_s26 }
  0x53   : > { %495 = vrot.lane.b32.xlu0 %v448_v29, %s15266_s26 }
  0x54   : > { %501 = vrot.lane.b32.xlu1 %v455_v32, %s15266_s26 }
  0x57   : > { %507 = vrot.lane.b32.xlu0 %v462_v36, %s15266_s26 }
  0x58   : > { %513 = vrot.lane.b32.xlu1 %v469_v37, %s15266_s26 }
  0xbd   : > { %v472_v38 = vpop.permute.xlu0 %471 }
  0xbe   : > { %v474_v39 = vadd.f32 %v472_v38, %v420_v7  ;;  %v484_v45 = vpop.permute.xlu1 %483 }
  0xc0   : > { %v475_v43 = vadd.f32 %v474_v39, %v427_v15  ;;  %v15541_v15 = vsub.s32 3, %v528_v63 }
  0xc1   : > { %v478_v44 = vpop.permute.xlu0 %477 }
  0xc2   : > { %v480_v46 = vadd.f32 %v478_v44, %v475_v43  ;;  %v490_v49 = vpop.permute.xlu1 %489 }
  0xc4   : > { %v481_v47 = vadd.f32 %v480_v46, %v434_v16  ;;  %v15543_v16 = vsub.s32 5, %v528_v63 }
  0xc5   : > { %v496_v52 = vpop.permute.xlu0 %495 }
  0xc6   : > { %v486_v48 = vadd.f32 %v484_v45, %v481_v47  ;;  %v502_v55 = vpop.permute.xlu1 %501 }
  0xc8   : > { %v487_v50 = vadd.f32 %v486_v48, %v441_v28 }
  0xc9   : > { %v508_v61 = vpop.permute.xlu0 %507 }
  0xca   : > { %v492_v51 = vadd.f32 %v490_v49, %v487_v50  ;;  %v514_v2 = vpop.permute.xlu1 %513 }
  0xcc   : > { %v493_v53 = vadd.f32 %v492_v51, %v448_v29 }
  0xce   : > { %v498_v54 = vadd.f32 %v496_v52, %v493_v53 }
  0xd0   : > { %v499_v56 = vadd.f32 %v498_v54, %v455_v32 }
  0xd2   : > { %v504_v58 = vadd.f32 %v502_v55, %v499_v56 }
  0xd4   : > { %v505_v62 = vadd.f32 %v504_v58, %v462_v36 }
  0xd6   : > { %v510_v0 = vadd.f32 %v508_v61, %v505_v62 }
  0xd8   : > { %v511_v3 = vadd.f32 %v510_v0, %v469_v37 }
  0xda   : > { %v516_v4 = vadd.f32 %v514_v2, %v511_v3 }
  0xdc   : > { %v517_v7 = vmul.f32 0.00390625, %v516_v4 }
  0xde   : > { %522 = vst.msk [vmem:[#allocation5] sm:$0x1] %vm15492_vm2, %v517_v7  ;;  %545 = vst.msk [vmem:[#allocation5 + $0x1] sm:$0x1] %vm15492_vm2, %v517_v7  ;;  %v530_v8 = vrot.slane %v517_v7, %v15490_v5 }
  0xdf   : > { %547 = vst.msk [vmem:[#allocation5 + $0x2] sm:$0x1] %vm15492_vm2, %v517_v7  ;;  %549 = vst.msk [vmem:[#allocation5 + $0x3] sm:$0x1] %vm15492_vm2, %v517_v7 }
  0xe0   : > { %551 = vst.msk [vmem:[#allocation5 + $0x4] sm:$0x1] %vm15492_vm2, %v517_v7  ;;  %553 = vst.msk [vmem:[#allocation5 + $0x5] sm:$0x1] %vm15492_vm2, %v517_v7  ;;  %v537_v9 = vrot.slane %v530_v8, %v15490_v5 }
  0xe1   : > { %555 = vst.msk [vmem:[#allocation5 + $0x6] sm:$0x1] %vm15492_vm2, %v517_v7  ;;  %557 = vst.msk [vmem:[#allocation5 + $0x7] sm:$0x1] %vm15492_vm2, %v517_v7 }
  0xe2   : > { %538 = vrot.lane.b32.xlu0 %v537_v9, %s15266_s26 }
 0x154   : > { %v539_v11 = vpop.permute.xlu0 %538 }
 0x155   : > { %544 = vst.msk [vmem:[#allocation5] sm:$0x1] %vm15515_vm5, %v539_v11  ;;  %546 = vst.msk [vmem:[#allocation5 + $0x1] sm:$0x1] %vm15515_vm5, %v539_v11 }
 0x156   : > { %548 = vst.msk [vmem:[#allocation5 + $0x2] sm:$0x1] %vm15515_vm5, %v539_v11  ;;  %550 = vst.msk [vmem:[#allocation5 + $0x3] sm:$0x1] %vm15515_vm5, %v539_v11 }
 0x157   : > { %552 = vst.msk [vmem:[#allocation5 + $0x4] sm:$0x1] %vm15515_vm5, %v539_v11  ;;  %554 = vst.msk [vmem:[#allocation5 + $0x5] sm:$0x1] %vm15515_vm5, %v539_v11 }
 0x158   : > { %556 = vst.msk [vmem:[#allocation5 + $0x6] sm:$0x1] %vm15515_vm5, %v539_v11  ;;  %558 = vst.msk [vmem:[#allocation5 + $0x7] sm:$0x1] %vm15515_vm5, %v539_v11 }
 0x15f   : > { %v559_v28 = vld [vmem:[#allocation5] sm:$0xff] }
 0x160   : > { %v564_v29 = vrot.slane %v559_v28, %v15535_v12  ;;  %v572_v32 = vrot.slane %v559_v28, %v15537_v13  ;;  %v568_v36 = vrot.slane %v559_v28, %v15539_v14  ;;  %v576_v37 = vrot.slane %v559_v28, %v15541_v15 }
 0x161   : > { %v584_v38 = vrot.slane %v559_v28, %v15543_v16  ;;  %v580_v39 = vrot.slane %v559_v28, %v15545_v20  ;;  %v592_v43 = vrot.slane %v559_v28, %v15547_v26  ;;  %v588_v44 = vrot.slane %v559_v28, %v15549_v27 }
 0x162   : > { %v15560_v45 = vsub.f32 %v15438_v19, %v568_v36  ;;  %v15563_v46 = vsub.f32 %v15442_v21, %v568_v36  ;;  %v15566_v47 = vsub.f32 %v15434_v17, %v564_v29  ;;  %v15569_v48 = vsub.f32 %v15444_v22, %v572_v32 }
 0x163   : > { %v15572_v49 = vsub.f32 %v15436_v18, %v564_v29  ;;  %v15575_v50 = vsub.f32 %v15446_v23, %v572_v32  ;;  %v15578_v51 = vsub.f32 %v15448_v24, %v576_v37  ;;  %v15581_v19 = vsub.f32 %v15450_v25, %v576_v37 }
 0x164   : > { %v618_v21 = vmul.f32 %v15560_v45, %v15560_v45  ;;  %v626_v17 = vmul.f32 %v15563_v46, %v15563_v46  ;;  %v617_v22 = vmul.f32 %v15566_v47, %v15566_v47  ;;  %v619_v18 = vmul.f32 %v15569_v48, %v15569_v48 }
 0x165   : > { %v625_v23 = vmul.f32 %v15572_v49, %v15572_v49  ;;  %v620_v24 = vmul.f32 %v15578_v51, %v15578_v51  ;;  %v628_v25 = vmul.f32 %v15581_v19, %v15581_v19  ;;  %v627_v52 = vmul.f32 %v15575_v50, %v15575_v50 }
 0x166   : > { %v640_v53 = vadd.f32 %v626_v17, %v618_v21  ;;  %v15600_v54 = vsub.f32 %v15464_v33, %v584_v38  ;;  %v15603_v55 = vsub.f32 %v15466_v34, %v584_v38  ;;  %v15606_v56 = vsub.f32 %v15458_v30, %v580_v39 }
 0x167   : > { %v633_v57 = vadd.f32 %v625_v23, %v617_v22  ;;  %v654_v58 = vadd.f32 %v628_v25, %v620_v24  ;;  %v647_v59 = vadd.f32 %v627_v52, %v619_v18  ;;  %v15609_v60 = vsub.f32 %v15460_v31, %v580_v39 }
 0x168   : > { %v641_v61 = vrot.slane %v640_v53, 4  ;;  %v622_v62 = vmul.f32 %v15600_v54, %v15600_v54  ;;  %v630_v33 = vmul.f32 %v15603_v55, %v15603_v55  ;;  %v621_v34 = vmul.f32 %v15606_v56, %v15606_v56 }
 0x169   : > { %v634_v63 = vrot.slane %v633_v57, 4  ;;  %v655_v0 = vrot.slane %v654_v58, 4  ;;  %v648_v30 = vrot.slane %v647_v59, 4  ;;  %v629_v1 = vmul.f32 %v15609_v60, %v15609_v60 }
 0x16a   : > { %v642_v2 = vadd.f32 %v641_v61, %v640_v53  ;;  %v668_v3 = vadd.f32 %v630_v33, %v622_v62  ;;  %v15620_v31 = vsub.f32 %v15472_v41, %v592_v43  ;;  %v15623_v4 = vsub.f32 %v15474_v42, %v592_v43 }
 0x16b   : > { %v635_v7 = vadd.f32 %v634_v63, %v633_v57  ;;  %v656_v8 = vadd.f32 %v655_v0, %v654_v58  ;;  %v649_v9 = vadd.f32 %v648_v30, %v647_v59  ;;  %v661_v11 = vadd.f32 %v629_v1, %v621_v34 }
 0x16c   : > { %v643_v28 = vrot.slane %v642_v2, 2  ;;  %v669_v29 = vrot.slane %v668_v3, 4  ;;  %v624_v32 = vmul.f32 %v15620_v31, %v15620_v31  ;;  %v632_v36 = vmul.f32 %v15623_v4, %v15623_v4 }
 0x16d   : > { %v636_v37 = vrot.slane %v635_v7, 2  ;;  %v657_v38 = vrot.slane %v656_v8, 2  ;;  %v650_v39 = vrot.slane %v649_v9, 2  ;;  %v662_v41 = vrot.slane %v661_v11, 4 }
 0x16e   : > { %v644_v21 = vadd.f32 %v643_v28, %v642_v2  ;;  %v670_v17 = vadd.f32 %v669_v29, %v668_v3  ;;  %v682_v42 = vadd.f32 %v632_v36, %v624_v32  ;;  %v15630_v43 = vsub.f32 %v15468_v35, %v588_v44 }
 0x16f   : > { %v637_v22 = vadd.f32 %v636_v37, %v635_v7  ;;  %v658_v18 = vadd.f32 %v657_v38, %v656_v8  ;;  %v651_v23 = vadd.f32 %v650_v39, %v649_v9  ;;  %v663_v24 = vadd.f32 %v662_v41, %v661_v11 }
 0x170   : > { %v645_v25 = vrot.slane %v644_v21, 1  ;;  %v671_v52 = vrot.slane %v670_v17, 2  ;;  %v683_v53 = vrot.slane %v682_v42, 4  ;;  %v15633_v57 = vsub.f32 %v15470_v40, %v588_v44 }
 0x171   : > { %v638_v58 = vrot.slane %v637_v22, 1  ;;  %v659_v59 = vrot.slane %v658_v18, 1  ;;  %v664_v61 = vrot.slane %v663_v24, 2  ;;  %v623_v35 = vmul.f32 %v15630_v43, %v15630_v43 }
 0x172   : > { %v646_v62 = vadd.f32 %v645_v25, %v644_v21  ;;  %v672_v33 = vadd.f32 %v671_v52, %v670_v17  ;;  %v684_v34 = vadd.f32 %v683_v53, %v682_v42  ;;  %v652_v0 = vrot.slane %v651_v23, 1 }
 0x173   : > { %v639_v63 = vadd.f32 %v638_v58, %v637_v22  ;;  %v665_v30 = vadd.f32 %v664_v61, %v663_v24  ;;  %v631_v2 = vmul.f32 %v15633_v57, %v15633_v57  ;;  %v660_v40 = vadd.f32 %v659_v59, %v658_v18 }
 0x174   : > { %696 = vrot.lane.b32.xlu0 %v646_v62, %s15266_s26  ;;  %v685_v1 = vrot.slane %v684_v34, 2  ;;  %v673_v44 = vrot.slane %v672_v33, 1  ;;  %v653_v8 = vadd.f32 %v652_v0, %v651_v23 }
 0x175   : > { %690 = vrot.lane.b32.xlu1 %v639_v63, %s15266_s26  ;;  %v675_v7 = vadd.f32 %v631_v2, %v623_v35  ;;  %v666_v9 = vrot.slane %v665_v30, 1 }
 0x176   : > { %v686_v3 = vadd.f32 %v685_v1, %v684_v34  ;;  %v674_v28 = vadd.f32 %v673_v44, %v672_v33 }
 0x177   : > { %v676_v11 = vrot.slane %v675_v7, 4  ;;  %v667_v36 = vadd.f32 %v666_v9, %v665_v30  ;;  %v14874_v9 = vld [vmem:[%s15351_s14 + $0x20] sm:$0xff]  }
 0x178   : > { %708 = vrot.lane.b32.xlu0 %v660_v40, %s15266_s26  ;;  %v687_v29 = vrot.slane %v686_v3, 1  ;;  %13597 = vmatprep.subr.bf16.mxu0 %v14874_v9 }
 0x179   : > { %702 = vrot.lane.b32.xlu1 %v653_v8, %s15266_s26  ;;  %v677_v32 = vadd.f32 %v676_v11, %v675_v7  ;;  %v14875_v11 = vld [vmem:[%s15351_s14 + $0x28] sm:$0xff]   ;;  %13598 = vmatpush3.bf16.msra.mxu0 %v14874_v9 }
 0x17a   : > { %v688_v38 = vadd.f32 %v687_v29, %v686_v3  ;;  %13599 = vmatprep.subr.bf16.mxu0 %v14875_v11 }
 0x17b   : > { %v678_v37 = vrot.slane %v677_v32, 2 }
 0x17c   : > { %720 = vrot.lane.b32.xlu0 %v674_v28, %s15266_s26 }
 0x17d   : > { %714 = vrot.lane.b32.xlu1 %v667_v36, %s15266_s26  ;;  %v679_v39 = vadd.f32 %v678_v37, %v677_v32  ;;  %13600 = vmatpush3.bf16.msra.mxu0 %v14875_v11 }
 0x17f   : > { %v680_v41 = vrot.slane %v679_v39, 1 }
 0x180   : > { %732 = vrot.lane.b32.xlu0 %v688_v38, %s15266_s26 }
 0x181   : > { %v681_v21 = vadd.f32 %v680_v41, %v679_v39 }
 0x183   : > { %726 = vrot.lane.b32.xlu1 %v681_v21, %s15266_s26 }
 0x1e6   : > { %v697_v18 = vpop.permute.xlu0 %696 }
 0x1e7   : > { %v691_v17 = vpop.permute.xlu1 %690 }
 0x1e8   : > { %v693_v42 = vadd.f32 %v691_v17, %v639_v63 }
 0x1ea   : > { %v694_v22 = vadd.f32 %v693_v42, %v646_v62  ;;  %v709_v58 = vpop.permute.xlu0 %708 }
 0x1eb   : > { %v703_v25 = vpop.permute.xlu1 %702 }
 0x1ec   : > { %v699_v23 = vadd.f32 %v697_v18, %v694_v22 }
 0x1ee   : > { %v700_v24 = vadd.f32 %v699_v23, %v653_v8  ;;  %v721_v0 = vpop.permute.xlu0 %720 }
 0x1ef   : > { %v715_v33 = vpop.permute.xlu1 %714 }
 0x1f0   : > { %v705_v52 = vadd.f32 %v703_v25, %v700_v24 }
 0x1f2   : > { %v706_v53 = vadd.f32 %v705_v52, %v660_v40  ;;  %v733_v62 = vpop.permute.xlu0 %732  ;;  %v14876_v52 = vld [vmem:[%s15351_s14 + $0x30] sm:$0xff]  }
 0x1f3   : > { %13601 = vmatprep.subr.bf16.mxu0 %v14876_v52 }
 0x1f4   : > { %v711_v59 = vadd.f32 %v709_v58, %v706_v53  ;;  %13602 = vmatpush3.bf16.msra.mxu0 %v14876_v52 }
 0x1f5   : > { %v727_v2 = vpop.permute.xlu1 %726 }
 0x1f6   : > { %v712_v61 = vadd.f32 %v711_v59, %v667_v36 }
 0x1f8   : > { %v717_v34 = vadd.f32 %v715_v33, %v712_v61 }
 0x1fa   : > { %v718_v35 = vadd.f32 %v717_v34, %v674_v28 }
 0x1fc   : > { %v723_v30 = vadd.f32 %v721_v0, %v718_v35 }
 0x1fe   : > { %v724_v1 = vadd.f32 %v723_v30, %v681_v21 }
 0x200   : > { %v729_v44 = vadd.f32 %v727_v2, %v724_v1 }
 0x202   : > { %v730_v63 = vadd.f32 %v729_v44, %v688_v38 }
 0x204   : > { %v735_v3 = vadd.f32 %v733_v62, %v730_v63 }
 0x206   : > { %v736_v7 = vmul.f32 0.00390625, %v735_v3 }
 0x208   : > { %737 = vst.msk [vmem:[#allocation5] sm:$0x1] %vm15492_vm2, %v736_v7  ;;  %757 = vst.msk [vmem:[#allocation5 + $0x1] sm:$0x1] %vm15492_vm2, %v736_v7  ;;  %v745_v40 = vrot.slane %v736_v7, %v15490_v5 }
 0x209   : > { %759 = vst.msk [vmem:[#allocation5 + $0x2] sm:$0x1] %vm15492_vm2, %v736_v7  ;;  %761 = vst.msk [vmem:[#allocation5 + $0x3] sm:$0x1] %vm15492_vm2, %v736_v7 }
 0x20a   : > { %763 = vst.msk [vmem:[#allocation5 + $0x4] sm:$0x1] %vm15492_vm2, %v736_v7  ;;  %765 = vst.msk [vmem:[#allocation5 + $0x5] sm:$0x1] %vm15492_vm2, %v736_v7  ;;  %v752_v8 = vrot.slane %v745_v40, %v15490_v5 }
 0x20b   : > { %767 = vst.msk [vmem:[#allocation5 + $0x6] sm:$0x1] %vm15492_vm2, %v736_v7  ;;  %769 = vst.msk [vmem:[#allocation5 + $0x7] sm:$0x1] %vm15492_vm2, %v736_v7 }
 0x20c   : > { %753 = vrot.lane.b32.xlu1 %v752_v8, %s15266_s26 }
 0x27e   : > { %v754_v28 = vpop.permute.xlu1 %753 }
 0x27f   : > { %756 = vst.msk [vmem:[#allocation5] sm:$0x1] %vm15515_vm5, %v754_v28  ;;  %758 = vst.msk [vmem:[#allocation5 + $0x1] sm:$0x1] %vm15515_vm5, %v754_v28 }
 0x280   : > { %760 = vst.msk [vmem:[#allocation5 + $0x2] sm:$0x1] %vm15515_vm5, %v754_v28  ;;  %762 = vst.msk [vmem:[#allocation5 + $0x3] sm:$0x1] %vm15515_vm5, %v754_v28 }
 0x281   : > { %764 = vst.msk [vmem:[#allocation5 + $0x4] sm:$0x1] %vm15515_vm5, %v754_v28  ;;  %766 = vst.msk [vmem:[#allocation5 + $0x5] sm:$0x1] %vm15515_vm5, %v754_v28 }
 0x282   : > { %768 = vst.msk [vmem:[#allocation5 + $0x6] sm:$0x1] %vm15515_vm5, %v754_v28  ;;  %770 = vst.msk [vmem:[#allocation5 + $0x7] sm:$0x1] %vm15515_vm5, %v754_v28 }
 0x289   : > { %v771_v29 = vld [vmem:[#allocation5] sm:$0xff] }
 0x28a   : > { %v772_v32 = vadd.f32 1e-05, %v771_v29 }
 0x28c   : > { %15041 = vrsqrt.f32 %v772_v32 }
 0x296   : > { %v15042_v36 = vpop.eup %15041 }
 0x297   : > { %v778_v37 = vrot.slane %v15042_v36, %v15535_v12  ;;  %v782_v38 = vrot.slane %v15042_v36, %v15539_v14  ;;  %v786_v39 = vrot.slane %v15042_v36, %v15537_v13  ;;  %v790_v41 = vrot.slane %v15042_v36, %v15541_v15 }
 0x298   : > { %v15689_v21 = vrot.slane %v15042_v36, %v15545_v20  ;;  %v15692_v17 = vrot.slane %v15042_v36, %v15543_v16  ;;  %v15695_v42 = vrot.slane %v15042_v36, %v15549_v27  ;;  %v15698_v22 = vrot.slane %v15042_v36, %v15547_v26 }
 0x299   : > { %v815_v18 = vmul.f32 %v778_v37, %v15566_v47  ;;  %v823_v23 = vmul.f32 %v778_v37, %v15572_v49  ;;  %v816_v24 = vmul.f32 %v782_v38, %v15560_v45  ;;  %v824_v25 = vmul.f32 %v782_v38, %v15563_v46 }
 0x29a   : > { %v817_v53 = vmul.f32 %v786_v39, %v15569_v48  ;;  %v825_v58 = vmul.f32 %v786_v39, %v15575_v50  ;;  %v818_v59 = vmul.f32 %v790_v41, %v15578_v51  ;;  %v826_v61 = vmul.f32 %v790_v41, %v15581_v19  ;;  %v14877_v50 = vld [vmem:[%s15351_s14 + $0x38] sm:$0xff]   ;;  %v15723_v39 = vld [vmem:[%s15351_s14] sm:$0xff]   ;;  %v887_v41 = vld [vmem:[#allocation4 + $0xc] sm:$0xf] }
 0x29b   : > { %v831_v33 = vmax.f32 %v815_v18, 0.0  ;;  %v839_v34 = vmax.f32 %v823_v23, 0.0  ;;  %v832_v35 = vmax.f32 %v816_v24, 0.0  ;;  %v840_v47 = vmax.f32 %v824_v25, 0.0  ;;  %13603 = vmatprep.subr.bf16.mxu0 %v14877_v50 }
 0x29c   : > { %v833_v49 = vmax.f32 %v817_v53, 0.0  ;;  %v841_v0 = vmax.f32 %v825_v58, 0.0  ;;  %v834_v45 = vmax.f32 %v818_v59, 0.0  ;;  %v842_v30 = vmax.f32 %v826_v61, 0.0  ;;  %13604 = vmatpush3.bf16.msra.mxu0 %v14877_v50  ;;  %v940_v61 = vld [vmem:[#allocation4 + $0x24] sm:$0xf] }
 0x29d   : > { %v13205_v46 = vpack.c.bf16 %v831_v33, %v831_v33  ;;  %v13206_v1 = vpack.c.bf16 %v839_v34, %v839_v34  ;;  %v13207_v48 = vpack.c.bf16 %v832_v35, %v832_v35  ;;  %v13208_v2 = vpack.c.bf16 %v840_v47, %v840_v47  ;;  %13637 = vmatprep.subr.bf16.mxu0 %v15723_v39 }
 0x29e   : > { %v13209_v44 = vpack.c.bf16 %v833_v49, %v833_v49  ;;  %v13210_v51 = vpack.c.bf16 %v841_v0, %v841_v0  ;;  %v15710_v63 = vpack.c.bf16 %v834_v45, %v834_v45  ;;  %v15712_v19 = vpack.c.bf16 %v842_v30, %v842_v30  ;;  %v990_v49 = vld [vmem:[#allocation4 + $0x3c] sm:$0xf] }
 0x29f   : > { %v864_v62 = vshrl.u32 %v13205_v46, 16  ;;  %v867_v3 = vshll.u32 %v13205_v46, 16  ;;  %v872_v7 = vshrl.u32 %v13206_v1, 16  ;;  %v875_v40 = vshll.u32 %v13206_v1, 16 }
 0x2a0   : > { %v920_v8 = vshrl.u32 %v13207_v48, 16  ;;  %v923_v9 = vshll.u32 %v13207_v48, 16  ;;  %v928_v11 = vshrl.u32 %v13208_v2, 16  ;;  %v931_v28 = vshll.u32 %v13208_v2, 16 }
 0x2a1   : > { %v866_v29 = vrot.slane %v864_v62, 7  ;;  %v15720_v36 = vrot.slane %v872_v7, 7  ;;  %v970_v37 = vshrl.u32 %v13209_v44, 16  ;;  %v973_v38 = vshll.u32 %v13209_v44, 16 }
 0x2a2   : > { %v922_v23 = vrot.slane %v920_v8, 7  ;;  %v15731_v24 = vrot.slane %v928_v11, 7  ;;  %v978_v25 = vshrl.u32 %v13210_v51, 16  ;;  %v981_v52 = vshll.u32 %v13210_v51, 16 }
 0x2a3   : > { %v869_v53 = vor.u32 %v867_v3, %v866_v29  ;;  %v870_v58 = vrot.slane %v866_v29, 4  ;;  %v877_v59 = vor.u32 %v875_v40, %v15720_v36  ;;  %v972_v33 = vrot.slane %v970_v37, 7 }
 0x2a4   : > { %v925_v34 = vor.u32 %v923_v9, %v922_v23  ;;  %v926_v35 = vrot.slane %v922_v23, 4  ;;  %v933_v47 = vor.u32 %v931_v28, %v15731_v24  ;;  %v15736_v0 = vrot.slane %v978_v25, 7 }
 0x2a5   : > { %897 = vrot.lane.b32.xlu0 %v869_v53, %s15266_s26  ;;  %v888_v45 = vsel %vm15716_vm10, %v869_v53, %v887_v41  ;;  %v878_v30 = vsel %vm15727_vm11, %v870_v58, %v877_v59  ;;  %v975_v46 = vor.u32 %v973_v38, %v972_v33  ;;  %v976_v1 = vrot.slane %v972_v33, 4 }
 0x2a6   : > { %889 = vst [vmem:[#allocation4 + $0xc] sm:$0xf] %v888_v45  ;;  %899 = vrot.lane.b32.xlu1 %v878_v30, %s15266_s26  ;;  %891 = vst.msk [vmem:[#allocation4 + $0x10] sm:$0xf] %vm884_vm6, %v878_v30  ;;  %v941_v48 = vsel %vm15716_vm10, %v925_v34, %v940_v61  ;;  %v934_v2 = vsel %vm15727_vm11, %v926_v35, %v933_v47  ;;  %v983_v50 = vor.u32 %v981_v52, %v15736_v0 }
 0x2a7   : > { %v1020_v44 = vshrl.u32 %v15710_v63, 16  ;;  %942 = vst [vmem:[#allocation4 + $0x24] sm:$0xf] %v941_v48  ;;  %943 = vst.msk [vmem:[#allocation4 + $0x28] sm:$0xf] %vm884_vm6, %v934_v2  ;;  %v991_v51 = vsel %vm15716_vm10, %v975_v46, %v990_v49  ;;  %v1023_v62 = vshll.u32 %v15710_v63, 16  ;;  %v819_v9 = vmul.f32 %v15689_v21, %v15606_v56 }
 0x2a8   : > { %v1028_v3 = vshrl.u32 %v15712_v19, 16  ;;  %v1031_v7 = vshll.u32 %v15712_v19, 16  ;;  %992 = vst [vmem:[#allocation4 + $0x3c] sm:$0xf] %v991_v51  ;;  %v984_v40 = vsel %vm15727_vm11, %v976_v1, %v983_v50  ;;  %v827_v11 = vmul.f32 %v15689_v21, %v15609_v60  ;;  %v1040_v63 = vld [vmem:[#allocation4 + $0x54] sm:$0xf] }
 0x2a9   : > { %v1022_v8 = vrot.slane %v1020_v44, 7  ;;  %947 = vrot.lane.b32.xlu0 %v925_v34, %s15266_s26  ;;  %993 = vst.msk [vmem:[#allocation4 + $0x40] sm:$0xf] %vm884_vm6, %v984_v40  ;;  %v820_v19 = vmul.f32 %v15692_v17, %v15600_v54  ;;  %v828_v29 = vmul.f32 %v15692_v17, %v15603_v55  ;;  %v821_v37 = vmul.f32 %v15695_v42, %v15630_v43 }
 0x2aa   : > { %v15765_v28 = vrot.slane %v1028_v3, 7  ;;  %949 = vrot.lane.b32.xlu1 %v934_v2, %s15266_s26  ;;  %v835_v21 = vmax.f32 %v819_v9, 0.0  ;;  %v843_v38 = vmax.f32 %v827_v11, 0.0  ;;  %v829_v43 = vmul.f32 %v15695_v42, %v15633_v57  ;;  %v1090_v57 = vld [vmem:[#allocation4 + $0x6c] sm:$0xf] }
 0x2ab   : > { %v1025_v56 = vor.u32 %v1023_v62, %v1022_v8  ;;  %v1026_v60 = vrot.slane %v1022_v8, 4  ;;  %v836_v23 = vmax.f32 %v820_v19, 0.0  ;;  %v844_v25 = vmax.f32 %v828_v29, 0.0  ;;  %v1140_v2 = vld [vmem:[#allocation4 + $0x84] sm:$0xf] }
 0x2ac   : > { %v1033_v41 = vor.u32 %v1031_v7, %v15765_v28  ;;  %v837_v52 = vmax.f32 %v821_v37, 0.0  ;;  %v13213_v53 = vpack.c.bf16 %v835_v21, %v835_v21  ;;  %v13214_v55 = vpack.c.bf16 %v843_v38, %v843_v38 }
 0x2ad   : > { %v1041_v54 = vsel %vm15716_vm10, %v1025_v56, %v1040_v63  ;;  %997 = vrot.lane.b32.xlu0 %v975_v46, %s15266_s26  ;;  %v14873_v17 = vld [vmem:[#allocation4 + $0xc] sm:$0xff]   ;;  %v13215_v59 = vpack.c.bf16 %v836_v23, %v836_v23  ;;  %v13216_v61 = vpack.c.bf16 %v844_v25, %v844_v25  ;;  %v845_v3 = vmax.f32 %v829_v43, 0.0  ;;  %v1190_v63 = vld [vmem:[#allocation4 + $0x9c] sm:$0xf]  ;;  %v994_v25 = vld [vmem:[#allocation4 + $0x44] sm:$0x1] }
 0x2ae   : > { %1042 = vst [vmem:[#allocation4 + $0x54] sm:$0xf] %v1041_v54  ;;  %v1034_v58 = vsel %vm15727_vm11, %v1026_v60, %v1033_v41  ;;  %v13217_v33 = vpack.c.bf16 %v837_v52, %v837_v52  ;;  %999 = vrot.lane.b32.xlu1 %v984_v40, %s15266_s26  ;;  %v1070_v34 = vshrl.u32 %v13213_v53, 16  ;;  %v1073_v35 = vshll.u32 %v13213_v53, 16  ;;  %13605 = vmatprep.mubr.msk.bf16.mxu0 %vm1449_vm12, %v14873_v17  ;;  %v894_v60 = vld [vmem:[#allocation4 + $0x14] sm:$0x1] }
 0x2af   : > { %1043 = vst.msk [vmem:[#allocation4 + $0x58] sm:$0xf] %vm884_vm6, %v1034_v58  ;;  %v1078_v47 = vshrl.u32 %v13214_v55, 16  ;;  %v1081_v49 = vshll.u32 %v13214_v55, 16  ;;  %v1120_v42 = vshrl.u32 %v13215_v59, 16  ;;  %v1123_v45 = vshll.u32 %v13215_v59, 16 }
 0x2b0   : > { %v1128_v30 = vshrl.u32 %v13216_v61, 16  ;;  %v1131_v46 = vshll.u32 %v13216_v61, 16  ;;  %v1072_v1 = vrot.slane %v1070_v34, 7  ;;  %v1170_v50 = vshrl.u32 %v13217_v33, 16  ;;  %v944_v23 = vld [vmem:[#allocation4 + $0x2c] sm:$0x1] }
 0x2b1   : > { %v15785_v48 = vrot.slane %v1078_v47, 7  ;;  %v1173_v44 = vshll.u32 %v13217_v33, 16  ;;  %1047 = vrot.lane.b32.xlu0 %v1025_v56, %s15266_s26  ;;  %v1122_v51 = vrot.slane %v1120_v42, 7  ;;  %v822_v7 = vmul.f32 %v15698_v22, %v15620_v31  ;;  %v1044_v17 = vld [vmem:[#allocation4 + $0x5c] sm:$0x1] }
 0x2b2   : > { %v15788_v62 = vrot.slane %v1128_v30, 7  ;;  %1049 = vrot.lane.b32.xlu1 %v1034_v58, %s15266_s26  ;;  %v1075_v40 = vor.u32 %v1073_v35, %v1072_v1  ;;  %v1076_v8 = vrot.slane %v1072_v1, 4  ;;  %v1172_v11 = vrot.slane %v1170_v50, 7  ;;  %v1094_v34 = vld [vmem:[#allocation4 + $0x74] sm:$0x1] }
 0x2b3   : > { %v1083_v9 = vor.u32 %v1081_v49, %v15785_v48  ;;  %v1125_v19 = vor.u32 %v1123_v45, %v1122_v51  ;;  %v1126_v29 = vrot.slane %v1122_v51, 4  ;;  %v13218_v56 = vpack.c.bf16 %v845_v3, %v845_v3 }
 0x2b4   : > { %v1133_v37 = vor.u32 %v1131_v46, %v15788_v62  ;;  %v1091_v21 = vsel %vm15716_vm10, %v1075_v40, %v1090_v57  ;;  %v1175_v38 = vor.u32 %v1173_v44, %v1172_v11  ;;  %v1176_v41 = vrot.slane %v1172_v11, 4 }
 0x2b5   : > { %v1084_v31 = vsel %vm15727_vm11, %v1076_v8, %v1083_v9  ;;  %1092 = vst [vmem:[#allocation4 + $0x6c] sm:$0xf] %v1091_v21  ;;  %1097 = vrot.lane.b32.xlu0 %v1075_v40, %s15266_s26  ;;  %v1141_v54 = vsel %vm15716_vm10, %v1125_v19, %v1140_v2  ;;  %v1178_v55 = vshrl.u32 %v13218_v56, 16  ;;  %v1181_v43 = vshll.u32 %v13218_v56, 16  ;;  %v1194_v2 = vld [vmem:[#allocation4 + $0xa4] sm:$0x1] }
 0x2b6   : > { %1093 = vst.msk [vmem:[#allocation4 + $0x70] sm:$0xf] %vm884_vm6, %v1084_v31  ;;  %v1134_v53 = vsel %vm15727_vm11, %v1126_v29, %v1133_v37  ;;  %1099 = vrot.lane.b32.xlu1 %v1084_v31, %s15266_s26  ;;  %1142 = vst [vmem:[#allocation4 + $0x84] sm:$0xf] %v1141_v54  ;;  %v1191_v58 = vsel %vm15716_vm10, %v1175_v38, %v1190_v63  ;;  %v838_v59 = vmax.f32 %v822_v7, 0.0  ;;  %v879_v33 = vrot.slane %v15720_v36, 4 }
 0x2b7   : > { %1143 = vst.msk [vmem:[#allocation4 + $0x88] sm:$0xf] %vm884_vm6, %v1134_v53  ;;  %v830_v61 = vmul.f32 %v15698_v22, %v15623_v4  ;;  %1192 = vst [vmem:[#allocation4 + $0x9c] sm:$0xf] %v1191_v58  ;;  %v1180_v35 = vrot.slane %v1178_v55, 7  ;;  %v935_v47 = vrot.slane %v15731_v24, 4 }
 0x2b8   : > { %v985_v49 = vrot.slane %v15736_v0, 4  ;;  %v1035_v57 = vrot.slane %v15765_v28, 4  ;;  %v13219_v42 = vpack.c.bf16 %v838_v59, %v838_v59  ;;  %v895_v30 = vsel %vm15801_vm14, %v879_v33, %v894_v60  ;;  %v1144_v0 = vld [vmem:[#allocation4 + $0x8c] sm:$0x1]  ;;  %v1240_v8 = vld [vmem:[#allocation4 + $0xb4] sm:$0xf] }
 0x2b9   : > { %v846_v45 = vmax.f32 %v830_v61, 0.0  ;;  %v1085_v46 = vrot.slane %v15785_v48, 4  ;;  %1147 = vrot.lane.b32.xlu0 %v1125_v19, %s15266_s26  ;;  %v1183_v4 = vor.u32 %v1181_v43, %v1180_v35  ;;  %896 = vst [vmem:[#allocation4 + $0x14] sm:$0x1] %v895_v30  ;;  %v945_v22 = vsel %vm15801_vm14, %v935_v47, %v944_v23  ;;  %v1244_v37 = vld [vmem:[#allocation4 + $0xbc] sm:$0x1] }
 0x2ba   : > { %v995_v36 = vsel %vm15801_vm14, %v985_v49, %v994_v25  ;;  %v1045_v24 = vsel %vm15801_vm14, %v1035_v57, %v1044_v17  ;;  %1149 = vrot.lane.b32.xlu1 %v1134_v53, %s15266_s26  ;;  %v1220_v28 = vshrl.u32 %v13219_v42, 16  ;;  %946 = vst [vmem:[#allocation4 + $0x2c] sm:$0x1] %v945_v22  ;;  %v1135_v44 = vrot.slane %v15788_v62, 4  ;;  %v957_v53 = vld [vmem:[#allocation4 + $0x30] sm:$0xf] }
 0x2bb   : > { %v13220_v1 = vpack.c.bf16 %v846_v45, %v846_v45  ;;  %996 = vst [vmem:[#allocation4 + $0x44] sm:$0x1] %v995_v36  ;;  %1046 = vst [vmem:[#allocation4 + $0x5c] sm:$0x1] %v1045_v24  ;;  %v1095_v48 = vsel %vm15801_vm14, %v1085_v46, %v1094_v34  ;;  %v1184_v50 = vsel %vm15727_vm11, %v1176_v41, %v1183_v4  ;;  %v1185_v51 = vrot.slane %v1180_v35, 4  ;;  %v14888_v30 = vld [vmem:[%s15351_s14 + $0x10] sm:$0xff]  }
 0x2bc   : > { %1096 = vst [vmem:[#allocation4 + $0x74] sm:$0x1] %v1095_v48  ;;  %1193 = vst.msk [vmem:[#allocation4 + $0xa0] sm:$0xf] %vm884_vm6, %v1184_v50  ;;  %v1222_v3 = vrot.slane %v1220_v28, 7  ;;  %v1223_v7 = vshll.u32 %v13219_v42, 16  ;;  %v1145_v9 = vsel %vm15801_vm14, %v1135_v44, %v1144_v0 }
 0x2bd   : > { %v1228_v40 = vshrl.u32 %v13220_v1, 16  ;;  %1197 = vrot.lane.b32.xlu0 %v1175_v38, %s15266_s26  ;;  %v1195_v11 = vsel %vm15801_vm14, %v1185_v51, %v1194_v2  ;;  %v1231_v29 = vshll.u32 %v13220_v1, 16  ;;  %1146 = vst [vmem:[#allocation4 + $0x8c] sm:$0x1] %v1145_v9  ;;  %v907_v41 = vld [vmem:[#allocation4 + $0x18] sm:$0xf] }
 0x2be   : > { %1199 = vrot.lane.b32.xlu1 %v1184_v50, %s15266_s26  ;;  %v1225_v63 = vor.u32 %v1223_v7, %v1222_v3  ;;  %v1226_v19 = vrot.slane %v1222_v3, 4  ;;  %1196 = vst [vmem:[#allocation4 + $0xa4] sm:$0x1] %v1195_v11  ;;  %v1007_v58 = vld [vmem:[#allocation4 + $0x48] sm:$0xf]  ;;  %v14893_v36 = vld [vmem:[%s15351_s14 + $0x18] sm:$0xff]  }
 0x2bf   : > { %v1230_v62 = vrot.slane %v1228_v40, 7  ;;  %v1057_v61 = vld [vmem:[#allocation4 + $0x60] sm:$0xf]  ;;  %v1157_v22 = vld [vmem:[#allocation4 + $0x90] sm:$0xf]  ;;  %v14885_v9 = vld [vmem:[#allocation4 + $0x54] sm:$0xff]  }
 0x2c0   : > { %v1241_v56 = vsel %vm15716_vm10, %v1225_v63, %v1240_v8  ;;  %v14882_v28 = vld [vmem:[#allocation4 + $0x3c] sm:$0xff]  }
 0x2c1   : > { %v1233_v60 = vor.u32 %v1231_v29, %v1230_v62  ;;  %v1235_v21 = vrot.slane %v1230_v62, 4  ;;  %1242 = vst [vmem:[#allocation4 + $0xb4] sm:$0xf] %v1241_v56  ;;  %1247 = vrot.lane.b32.xlu0 %v1225_v63, %s15266_s26  ;;  %v15887_v50 = vld [vmem:[%s15351_s14 + $0x40] sm:$0xff]   ;;  %v1011_v56 = vld [vmem:[#allocation4 + $0x50] sm:$0x1] }
 0x2c2   : > { %v1257_v3 = vld [vmem:[#allocation4 + $0xc0] sm:$0xf] }
 0x2c3   : > { %v1234_v31 = vsel %vm15727_vm11, %v1226_v19, %v1233_v60  ;;  %v1245_v38 = vsel %vm15801_vm14, %v1235_v21, %v1244_v37  ;;  %v911_v62 = vld [vmem:[#allocation4 + $0x20] sm:$0x1]  ;;  %v961_v37 = vld [vmem:[#allocation4 + $0x38] sm:$0x1] }
 0x2c4   : > { %1243 = vst.msk [vmem:[#allocation4 + $0xb8] sm:$0xf] %vm884_vm6, %v1234_v31  ;;  %1249 = vrot.lane.b32.xlu1 %v1234_v31, %s15266_s26  ;;  %1246 = vst [vmem:[#allocation4 + $0xbc] sm:$0x1] %v1245_v38  ;;  %v14887_v38 = vld [vmem:[#allocation4 + $0x6c] sm:$0xff]  }
 0x2c5   : > { %901 = vrot.lane.b32.xlu0 %v879_v33, %s15266_s26  ;;  %v14883_v33 = vld [vmem:[%s15351_s14 + $0x8] sm:$0xff]  }
 0x2c8   : > { %951 = vrot.lane.b32.xlu1 %v935_v47, %s15266_s26 }
 0x2c9   : > { %1001 = vrot.lane.b32.xlu0 %v985_v49, %s15266_s26  ;;  %v14880_v49 = vld [vmem:[#allocation4 + $0x24] sm:$0xff]  }
 0x2cc   : > { %1051 = vrot.lane.b32.xlu1 %v1035_v57, %s15266_s26 }
 0x2cd   : > { %1101 = vrot.lane.b32.xlu0 %v1085_v46, %s15266_s26  ;;  %v1107_v46 = vld [vmem:[#allocation4 + $0x78] sm:$0xf] }
 0x2d0   : > { %1151 = vrot.lane.b32.xlu1 %v1135_v44, %s15266_s26  ;;  %v1207_v44 = vld [vmem:[#allocation4 + $0xa8] sm:$0xf] }
 0x2d1   : > { %1201 = vrot.lane.b32.xlu0 %v1185_v51, %s15266_s26 }
 0x2d4   : > { %1251 = vrot.lane.b32.xlu1 %v1235_v21, %s15266_s26 }
 0x317   : > { %v898_v23 = vpop.permute.xlu0 %897 }
 0x318   : > { %v908_v25 = vsel %vm15716_vm10, %v898_v23, %v907_v41  ;;  %v900_v54 = vpop.permute.xlu1 %899 }
 0x319   : > { %909 = vst [vmem:[#allocation4 + $0x18] sm:$0xf] %v908_v25  ;;  %910 = vst.msk [vmem:[#allocation4 + $0x1c] sm:$0xf] %vm884_vm6, %v900_v54  ;;  %v1061_v25 = vld [vmem:[#allocation4 + $0x68] sm:$0x1] }
 0x31b   : > { %v948_v55 = vpop.permute.xlu0 %947 }
 0x31c   : > { %v958_v43 = vsel %vm15716_vm10, %v948_v55, %v957_v53  ;;  %v950_v17 = vpop.permute.xlu1 %949  ;;  %v1111_v55 = vld [vmem:[#allocation4 + $0x80] sm:$0x1] }
 0x31d   : > { %959 = vst [vmem:[#allocation4 + $0x30] sm:$0xf] %v958_v43  ;;  %960 = vst.msk [vmem:[#allocation4 + $0x34] sm:$0xf] %vm884_vm6, %v950_v17 }
 0x31f   : > { %v998_v59 = vpop.permute.xlu0 %997 }
 0x320   : > { %v1008_v34 = vsel %vm15716_vm10, %v998_v59, %v1007_v58  ;;  %v1000_v35 = vpop.permute.xlu1 %999  ;;  %v14879_v47 = vld [vmem:[#allocation4 + $0x18] sm:$0xff]  }
 0x321   : > { %1009 = vst [vmem:[#allocation4 + $0x48] sm:$0xf] %v1008_v34  ;;  %1010 = vst.msk [vmem:[#allocation4 + $0x4c] sm:$0xf] %vm884_vm6, %v1000_v35  ;;  %13606 = vmatmul.mubr.msk.bf16.vlgmr.msra.gmra.mrb[0].mxu0 %vm1449_vm12, %v14879_v47  ;;  %v1161_v58 = vld [vmem:[#allocation4 + $0x98] sm:$0x1] }
 0x322   : > { %13638 = vmatpush3.bf16.msra.mxu0 %v15723_v39  ;;  %13609 = vmatprep.mubr.msk.bf16.mxu0 %vm1449_vm12, %v14880_v49  ;;  %v1211_v34 = vld [vmem:[#allocation4 + $0xb0] sm:$0x1]  ;;  %v14890_v35 = vld [vmem:[#allocation4 + $0x84] sm:$0xff]   ;;  %v6747_v18 = vld [vmem:[#allocation4 + $0x18] sm:$0xf] }
 0x323   : > { %v1048_v57 = vpop.permute.xlu0 %1047  ;;  %13639 = vmatprep.subr.bf16.mxu0 %v14883_v33 }
 0x324   : > { %v1058_v42 = vsel %vm15716_vm10, %v1048_v57, %v1057_v61  ;;  %v1050_v45 = vpop.permute.xlu1 %1049  ;;  %v14881_v0 = vld [vmem:[#allocation4 + $0x30] sm:$0xff]   ;;  %v1261_v57 = vld [vmem:[#allocation4 + $0xc8] sm:$0x1] }
 0x325   : > { %1059 = vst [vmem:[#allocation4 + $0x60] sm:$0xf] %v1058_v42  ;;  %1060 = vst.msk [vmem:[#allocation4 + $0x64] sm:$0xf] %vm884_vm6, %v1050_v45 }
 0x326   : > { %13640 = vmatpush3.bf16.msra.mxu0 %v14883_v33 }
 0x327   : > { %v1098_v4 = vpop.permute.xlu0 %1097  ;;  %13641 = vmatprep.subr.bf16.mxu0 %v14888_v30 }
 0x328   : > { %v1108_v39 = vsel %vm15716_vm10, %v1098_v4, %v1107_v46  ;;  %v1100_v24 = vpop.permute.xlu1 %1099  ;;  %v14884_v8 = vld [vmem:[#allocation4 + $0x48] sm:$0xff]   ;;  %v14892_v4 = vld [vmem:[#allocation4 + $0x9c] sm:$0xff]  }
 0x329   : > { %1109 = vst [vmem:[#allocation4 + $0x78] sm:$0xf] %v1108_v39  ;;  %1110 = vst.msk [vmem:[#allocation4 + $0x7c] sm:$0xf] %vm884_vm6, %v1100_v24  ;;  %13610 = vmatmul.mubr.msk.bf16.gmra.mrb[4].mxu0 %vm1449_vm12, %v14881_v0  ;;  %v14897_v39 = vld [vmem:[#allocation4] sm:$0xff]   ;;  %v14899_v0 = vld [vmem:[#allocation4 + $0xc] sm:$0xff]  }
 0x32a   : > { %13613 = vmatprep.mubr.msk.bf16.mxu0 %vm1449_vm12, %v14882_v28  ;;  %13642 = vmatpush3.bf16.msra.mxu0 %v14888_v30  ;;  %v14903_v28 = vld [vmem:[%s15351_s14 + $0x48] sm:$0xff]  }
 0x32b   : > { %v1148_v1 = vpop.permute.xlu0 %1147  ;;  %13643 = vmatprep.subr.bf16.mxu0 %v14893_v36 }
 0x32c   : > { %v1158_v48 = vsel %vm15716_vm10, %v1148_v1, %v1157_v22  ;;  %v1150_v2 = vpop.permute.xlu1 %1149  ;;  %v14886_v21 = vld [vmem:[#allocation4 + $0x60] sm:$0xff]   ;;  %v14900_v1 = vld [vmem:[#allocation4 + $0x18] sm:$0xff]  }
 0x32d   : > { %1159 = vst [vmem:[#allocation4 + $0x90] sm:$0xf] %v1158_v48  ;;  %1160 = vst.msk [vmem:[#allocation4 + $0x94] sm:$0xf] %vm884_vm6, %v1150_v2  ;;  %v14908_v48 = vld [vmem:[%s15351_s14 + $0x50] sm:$0xff]   ;;  %v14901_v2 = vld [vmem:[#allocation4 + $0x24] sm:$0xff]  }
 0x32e   : > { %13644 = vmatpush3.bf16.msra.mxu0 %v14893_v36  ;;  %v14895_v36 = vld [vmem:[#allocation4 + $0xb4] sm:$0xff]  }
 0x32f   : > { %v1198_v51 = vpop.permute.xlu0 %1197  ;;  %13677 = vmatprep.subr.bf16.mxu0 %v15887_v50 }
 0x330   : > { %v1208_v7 = vsel %vm15716_vm10, %v1198_v51, %v1207_v44  ;;  %v1200_v40 = vpop.permute.xlu1 %1199  ;;  %v14889_v61 = vld [vmem:[#allocation4 + $0x78] sm:$0xff]   ;;  %v14902_v51 = vld [vmem:[#allocation4 + $0x30] sm:$0xff]  }
 0x331   : > { %1209 = vst [vmem:[#allocation4 + $0xa8] sm:$0xf] %v1208_v7  ;;  %1210 = vst.msk [vmem:[#allocation4 + $0xac] sm:$0xf] %vm884_vm6, %v1200_v40  ;;  %13614 = vmatmul.mubr.msk.bf16.gmra.mrb[8].mxu0 %vm1449_vm12, %v14884_v8  ;;  %v14913_v44 = vld [vmem:[%s15351_s14 + $0x58] sm:$0xff]   ;;  %v14907_v8 = vld [vmem:[#allocation4 + $0x60] sm:$0xff]  }
 0x332   : > { %13617 = vmatprep.mubr.msk.bf16.mxu0 %vm1449_vm12, %v14885_v9  ;;  %v14904_v7 = vld [vmem:[#allocation4 + $0x3c] sm:$0xff]   ;;  %v14906_v40 = vld [vmem:[#allocation4 + $0x54] sm:$0xff]   ;;  %v14909_v9 = vld [vmem:[#allocation4 + $0x6c] sm:$0xff]  }
 0x333   : > { %v1248_v11 = vpop.permute.xlu0 %1247 }
 0x334   : > { %v1258_v63 = vsel %vm15716_vm10, %v1248_v11, %v1257_v3  ;;  %v14891_v46 = vld [vmem:[#allocation4 + $0x90] sm:$0xff]   ;;  %v14918_v3 = vld [vmem:[%s15351_s14 + $0x60] sm:$0xff]   ;;  %v14910_v11 = vld [vmem:[#allocation4 + $0x78] sm:$0xff]  }
 0x335   : > { %1259 = vst [vmem:[#allocation4 + $0xc0] sm:$0xf] %v1258_v63  ;;  %v14911_v63 = vld [vmem:[#allocation4 + $0x84] sm:$0xff]  }
 0x336   : > { %v1250_v19 = vpop.permute.xlu1 %1249 }
 0x337   : > { %1260 = vst.msk [vmem:[#allocation4 + $0xc4] sm:$0xf] %vm884_vm6, %v1250_v19  ;;  %v902_v29 = vpop.permute.xlu0 %901  ;;  %v14912_v19 = vld [vmem:[#allocation4 + $0x90] sm:$0xff]  }
 0x338   : > { %v912_v60 = vsel %vm15801_vm14, %v902_v29, %v911_v62  ;;  %v14894_v22 = vld [vmem:[#allocation4 + $0xa8] sm:$0xff]   ;;  %v14914_v62 = vld [vmem:[#allocation4 + $0x9c] sm:$0xff]  }
 0x339   : > { %913 = vst [vmem:[#allocation4 + $0x20] sm:$0x1] %v912_v60  ;;  %13618 = vmatmul.mubr.msk.bf16.gmra.mrb[12].mxu0 %vm1449_vm12, %v14886_v21  ;;  %v14915_v29 = vld [vmem:[#allocation4 + $0xa8] sm:$0xff]  }
 0x33a   : > { %v952_v31 = vpop.permute.xlu1 %951  ;;  %13621 = vmatprep.mubr.msk.bf16.mxu0 %vm1449_vm12, %v14887_v38  ;;  %v14919_v60 = vld [vmem:[#allocation4 + $0x24] sm:$0xff]   ;;  %v14928_v38 = vld [vmem:[%s15351_s14 + $0x70] sm:$0xff]  }
 0x33b   : > { %v962_v41 = vsel %vm15801_vm14, %v952_v31, %v961_v37  ;;  %v1002_v23 = vpop.permute.xlu0 %1001  ;;  %v14916_v37 = vld [vmem:[#allocation4 + $0xb4] sm:$0xff]   ;;  %v14923_v21 = vld [vmem:[%s15351_s14 + $0x68] sm:$0xff]  }
 0x33c   : > { %963 = vst [vmem:[#allocation4 + $0x38] sm:$0x1] %v962_v41  ;;  %v1012_v54 = vsel %vm15801_vm14, %v1002_v23, %v1011_v56  ;;  %v14917_v56 = vld [vmem:[#allocation4 + $0x18] sm:$0xff]   ;;  %v14920_v31 = vld [vmem:[#allocation4 + $0x30] sm:$0xff]  }
 0x33d   : > { %1013 = vst [vmem:[#allocation4 + $0x50] sm:$0x1] %v1012_v54  ;;  %v14921_v41 = vld [vmem:[#allocation4 + $0x3c] sm:$0xff]  }
 0x33e   : > { %v1052_v53 = vpop.permute.xlu1 %1051  ;;  %v14896_v24 = vld [vmem:[#allocation4 + $0xc0] sm:$0xff]   ;;  %v14933_v23 = vld [vmem:[%s15351_s14 + $0x78] sm:$0xff]  }
 0x33f   : > { %v1062_v43 = vsel %vm15801_vm14, %v1052_v53, %v1061_v25  ;;  %v1102_v17 = vpop.permute.xlu0 %1101  ;;  %v14922_v25 = vld [vmem:[#allocation4 + $0x48] sm:$0xff]   ;;  %v15954_v54 = vld [vmem:[%s15351_s14 + $0x80] sm:$0xff]   ;;  %v14924_v53 = vld [vmem:[#allocation4 + $0x54] sm:$0xff]  }
 0x340   : > { %1063 = vst [vmem:[#allocation4 + $0x68] sm:$0x1] %v1062_v43  ;;  %v1112_v59 = vsel %vm15801_vm14, %v1102_v17, %v1111_v55  ;;  %v14925_v55 = vld [vmem:[#allocation4 + $0x60] sm:$0xff]   ;;  %v2361_v43 = vld [vmem:[#allocation4 + $0xc] sm:$0xf] }
 0x341   : > { %1113 = vst [vmem:[#allocation4 + $0x80] sm:$0x1] %v1112_v59  ;;  %13622 = vmatmul.mubr.msk.bf16.gmra.mrb[16].mxu0 %vm1449_vm12, %v14889_v61  ;;  %v2362_v17 = vld [vmem:[#allocation4 + $0x10] sm:$0xf]  ;;  %v14927_v59 = vld [vmem:[#allocation4 + $0x78] sm:$0xff]  }
 0x342   : > { %v1152_v33 = vpop.permute.xlu1 %1151  ;;  %13625 = vmatprep.mubr.msk.bf16.mxu0 %vm1449_vm12, %v14890_v35  ;;  %v2367_v61 = vld [vmem:[#allocation4 + $0x24] sm:$0xf]  ;;  %v2437_v35 = vshll.u32 %v2361_v43, 16 }
 0x343   : > { %v1162_v47 = vsel %vm15801_vm14, %v1152_v33, %v1161_v58  ;;  %v1202_v49 = vpop.permute.xlu0 %1201  ;;  %v14926_v58 = vld [vmem:[#allocation4 + $0x6c] sm:$0xff]   ;;  %v2368_v33 = vld [vmem:[#allocation4 + $0x28] sm:$0xf] }
 0x344   : > { %1163 = vst [vmem:[#allocation4 + $0x98] sm:$0x1] %v1162_v47  ;;  %v1212_v42 = vsel %vm15801_vm14, %v1202_v49, %v1211_v34  ;;  %v2434_v34 = vshrl.u32 %v2361_v43, 16  ;;  %v2443_v47 = vshll.u32 %v2362_v17, 16  ;;  %v2447_v49 = vshrl.u32 %v2362_v17, 16 }
 0x345   : > { %1213 = vst [vmem:[#allocation4 + $0xb0] sm:$0x1] %v1212_v42  ;;  %v2485_v42 = vshll.u32 %v2367_v61, 16  ;;  %v2375_v43 = vld [vmem:[#allocation4 + $0x44] sm:$0x1] }
 0x346   : > { %v1252_v45 = vpop.permute.xlu1 %1251  ;;  %v6847_v32 = vld [vmem:[#allocation4 + $0x50] sm:$0x1] }
 0x347   : > { %v1262_v30 = vsel %vm15801_vm14, %v1252_v45, %v1261_v57  ;;  %v2482_v57 = vshrl.u32 %v2367_v61, 16  ;;  %v2491_v45 = vshll.u32 %v2368_v33, 16 }
 0x348   : > { %1263 = vst [vmem:[#allocation4 + $0xc8] sm:$0x1] %v1262_v30  ;;  %v2495_v30 = vshrl.u32 %v2368_v33, 16 }
 0x349   : > { %13626 = vmatmul.mubr.msk.bf16.gmra.mrb[20].mxu0 %vm1449_vm12, %v14891_v46  ;;  %v2436_v46 = vrot.slane %v2434_v34, 4 }
 0x34a   : > { %13629 = vmatprep.mubr.msk.bf16.mxu0 %vm1449_vm12, %v14892_v4  ;;  %v2439_v4 = vrot.slane %v2437_v35, 5  ;;  %v2379_v35 = vld [vmem:[#allocation4 + $0x54] sm:$0xf] }
 0x351   : > { %13630 = vmatmul.mubr.msk.bf16.gmra.mrb[24].mxu0 %vm1449_vm12, %v14894_v22  ;;  %v15961_v22 = vrot.slane %v2443_v47, 5  ;;  %v14932_v47 = vld [vmem:[#allocation4 + $0xa8] sm:$0xff]  }
 0x352   : > { %13633 = vmatprep.mubr.msk.bf16.mxu0 %vm1449_vm12, %v14895_v36  ;;  %v2449_v36 = vrot.slane %v2447_v49, 4  ;;  %v2360_v49 = vld [vmem:[#allocation4 + $0x8] sm:$0x1] }
 0x359   : > { %13634 = vmatmul.mubr.msk.bf16.gmra.mrb[28].mxu0 %vm1449_vm12, %v14896_v24  ;;  %v14929_v24 = vld [vmem:[#allocation4 + $0x84] sm:$0xff]  }
 0x35a   : > { %13645 = vmatprep.mubr.msk.bf16.mxu0 %vm1449_vm12, %v14897_v39  ;;  %v2373_v39 = vld [vmem:[#allocation4 + $0x3c] sm:$0xf] }
 0x361   : > { %13646 = vmatmul.mubr.msk.bf16.vlgmr.msra.gmra.mrb[0].mxu0 %vm1449_vm12, %v14899_v0  ;;  %v2363_v0 = vld [vmem:[#allocation4 + $0x14] sm:$0x1] }
 0x362   : > { %13678 = vmatpush3.bf16.msra.mxu0 %v15887_v50  ;;  %13649 = vmatprep.mubr.msk.bf16.mxu0 %vm1449_vm12, %v14900_v1  ;;  %v14905_v50 = vld [vmem:[#allocation4 + $0x48] sm:$0xff]   ;;  %v2487_v1 = vrot.slane %v2485_v42, 5 }
 0x363   : > { %13679 = vmatprep.subr.bf16.mxu0 %v14903_v28 }
 0x366   : > { %13680 = vmatpush3.bf16.msra.mxu0 %v14903_v28  ;;  %v2484_v28 = vrot.slane %v2482_v57, 4 }
 0x367   : > { %13681 = vmatprep.subr.bf16.mxu0 %v14908_v48 }
 0x369   : > { %13650 = vmatmul.mubr.msk.bf16.gmra.mrb[4].mxu0 %vm1449_vm12, %v14901_v2  ;;  %v14930_v2 = vld [vmem:[#allocation4 + $0x90] sm:$0xff]  }
 0x36a   : > { %13653 = vmatprep.mubr.msk.bf16.mxu0 %vm1449_vm12, %v14902_v51  ;;  %13682 = vmatpush3.bf16.msra.mxu0 %v14908_v48  ;;  %v15963_v48 = vrot.slane %v2491_v45, 5  ;;  %v2359_v51 = vld [vmem:[#allocation4 + $0x4] sm:$0xf] }
 0x36b   : > { %13683 = vmatprep.subr.bf16.mxu0 %v14913_v44 }
 0x36e   : > { %13684 = vmatpush3.bf16.msra.mxu0 %v14913_v44  ;;  %v2358_v44 = vld [vmem:[#allocation4] sm:$0xf] }
 0x36f   : > { %13717 = vmatprep.subr.bf16.mxu0 %v14918_v3 }
 0x371   : > { %13654 = vmatmul.mubr.msk.bf16.gmra.mrb[8].mxu0 %vm1449_vm12, %v14904_v7  ;;  %v2440_v7 = vor.u32 %v2439_v4, %v2436_v46 }
 0x372   : > { %13657 = vmatprep.mubr.msk.bf16.mxu0 %vm1449_vm12, %v14905_v50  ;;  %v2450_v50 = vor.u32 %v2449_v36, %v15961_v22  ;;  %v2380_v36 = vld [vmem:[#allocation4 + $0x58] sm:$0xf] }
 0x379   : > { %13658 = vmatmul.mubr.msk.bf16.gmra.mrb[12].mxu0 %vm1449_vm12, %v14906_v40  ;;  %v2369_v40 = vld [vmem:[#allocation4 + $0x2c] sm:$0x1] }
 0x37a   : > { %13661 = vmatprep.mubr.msk.bf16.mxu0 %vm1449_vm12, %v14907_v8  ;;  %v2530_v8 = vshrl.u32 %v2373_v39, 16 }
 0x381   : > { %13662 = vmatmul.mubr.msk.bf16.gmra.mrb[16].mxu0 %vm1449_vm12, %v14909_v9  ;;  %v2533_v9 = vshll.u32 %v2373_v39, 16  ;;  %v2364_v39 = vld [vmem:[#allocation4 + $0x18] sm:$0xf] }
 0x382   : > { %13665 = vmatprep.mubr.msk.bf16.mxu0 %vm1449_vm12, %v14910_v11  ;;  %v2453_v11 = vshll.u32 %v2363_v0, 16 }
 0x389   : > { %13666 = vmatmul.mubr.msk.bf16.gmra.mrb[20].mxu0 %vm1449_vm12, %v14911_v63  ;;  %v2410_v63 = vshrl.u32 %v2358_v44, 16 }
 0x38a   : > { %13669 = vmatprep.mubr.msk.bf16.mxu0 %vm1449_vm12, %v14912_v19  ;;  %v2413_v19 = vshll.u32 %v2358_v44, 16 }
 0x38c   : > { %v2415_v61 = vrot.slane %v2413_v19, 5  ;;  %v2591_v19 = vshrl.u32 %v2380_v36, 16 }
 0x391   : > { %13670 = vmatmul.mubr.msk.bf16.gmra.mrb[24].mxu0 %vm1449_vm12, %v14914_v62  ;;  %v2419_v62 = vshll.u32 %v2359_v51, 16 }
 0x392   : > { %13673 = vmatprep.mubr.msk.bf16.mxu0 %vm1449_vm12, %v14915_v29  ;;  %v2423_v29 = vshrl.u32 %v2359_v51, 16  ;;  %v2429_v51 = vshll.u32 %v2360_v49, 16  ;;  %v2366_v49 = vld [vmem:[#allocation4 + $0x20] sm:$0x1] }
 0x393   : > { %v15975_v33 = vrot.slane %v2419_v62, 5  ;;  %v2385_v62 = vld [vmem:[#allocation4 + $0x6c] sm:$0xf] }
 0x394   : > { %v2425_v34 = vrot.slane %v2423_v29, 4 }
 0x396   : > { %v2426_v44 = vor.u32 %v2425_v34, %v15975_v33  ;;  %v2593_v34 = vrot.slane %v2591_v19, 4  ;;  %v2387_v19 = vld [vmem:[#allocation4 + $0x74] sm:$0x1] }
 0x399   : > { %13674 = vmatmul.mubr.msk.bf16.gmra.mrb[28].mxu0 %vm1449_vm12, %v14916_v37  ;;  %v2374_v37 = vld [vmem:[#allocation4 + $0x40] sm:$0xf] }
 0x39a   : > { %13685 = vmatprep.mubr.msk.bf16.mxu0 %vm1449_vm12, %v14917_v56  ;;  %v2488_v56 = vor.u32 %v2487_v1, %v2484_v28  ;;  %v2539_v17 = vshll.u32 %v2374_v37, 16  ;;  %v2549_v28 = vshll.u32 %v2375_v43, 16  ;;  %v2578_v1 = vshrl.u32 %v2379_v35, 16 }
 0x39c   : > { %v2489_v57 = vrot.slane %v2488_v56, 4 }
 0x3a1   : > { %13686 = vmatmul.mubr.msk.bf16.vlgmr.msra.gmra.mrb[0].mxu0 %vm1449_vm12, %v14919_v60 }
 0x3a2   : > { %13718 = vmatpush3.bf16.msra.mxu0 %v14918_v3  ;;  %13689 = vmatprep.mubr.msk.bf16.mxu0 %vm1449_vm12, %v14920_v31  ;;  %v2497_v3 = vrot.slane %v2495_v30, 4  ;;  %v2441_v31 = vrot.slane %v2440_v7, 4 }
 0x3a3   : > { %13719 = vmatprep.subr.bf16.mxu0 %v14923_v21 }
 0x3a4   : > { %v2498_v60 = vor.u32 %v2497_v3, %v15963_v48  ;;  %v2446_v45 = vsel %vm15971_vm1, %v2441_v31, %v15961_v22  ;;  %v2365_v3 = vld [vmem:[#allocation4 + $0x1c] sm:$0xf]  ;;  %v2581_v22 = vshll.u32 %v2379_v35, 16  ;;  %v14934_v31 = vld [vmem:[#allocation4 + $0xb4] sm:$0xff]  }
 0x3a5   : > { %v2467_v29 = vshll.u32 %v2365_v3, 16 }
 0x3a6   : > { %13720 = vmatpush3.bf16.msra.mxu0 %v14923_v21  ;;  %v2501_v21 = vshll.u32 %v2369_v40, 16  ;;  %v2499_v42 = vrot.slane %v2498_v60, 4  ;;  %v2381_v60 = vld [vmem:[#allocation4 + $0x5c] sm:$0x1] }
 0x3a7   : > { %13721 = vmatprep.subr.bf16.mxu0 %v14928_v38  ;;  %v2597_v35 = vshll.u32 %v2381_v60, 16 }
 0x3a8   : > { %v2503_v46 = vrot.slane %v2501_v21, 5  ;;  %v2580_v21 = vrot.slane %v2578_v1, 4 }
 0x3a9   : > { %13690 = vmatmul.mubr.msk.bf16.gmra.mrb[4].mxu0 %vm1449_vm12, %v14921_v41  ;;  %v2532_v41 = vrot.slane %v2530_v8, 4  ;;  %v2587_v8 = vshll.u32 %v2380_v36, 16 }
 0x3aa   : > { %13693 = vmatprep.mubr.msk.bf16.mxu0 %vm1449_vm12, %v14922_v25  ;;  %13722 = vmatpush3.bf16.msra.mxu0 %v14928_v38  ;;  %v2451_v38 = vrot.slane %v2450_v50, 4  ;;  %v14931_v25 = vld [vmem:[#allocation4 + $0x9c] sm:$0xff]   ;;  %v2494_v50 = vsel %vm15971_vm1, %v2489_v57, %v15963_v48  ;;  %v2504_v40 = vsel %vm15971_vm1, %v2499_v42, %v2503_v46  ;;  %v2431_v48 = vrot.slane %v2429_v51, 5 }
 0x3ab   : > { %13723 = vmatprep.subr.bf16.mxu0 %v14933_v23  ;;  %v15997_v43 = vrot.slane %v2587_v8, 5  ;;  %v16001_v57 = vrot.slane %v2467_v29, 5  ;;  %v2391_v8 = vld [vmem:[#allocation4 + $0x84] sm:$0xf] }
 0x3ae   : > { %13724 = vmatpush3.bf16.msra.mxu0 %v14933_v23  ;;  %v2535_v23 = vrot.slane %v2533_v9, 5  ;;  %v2458_v9 = vshrl.u32 %v2364_v39, 16 }
 0x3af   : > { %13757 = vmatprep.subr.bf16.mxu0 %v15954_v54 }
 0x3b0   : > { %v2536_v4 = vor.u32 %v2535_v23, %v2532_v41  ;;  %v2427_v41 = vrot.slane %v2426_v44, 4  ;;  %v2583_v23 = vrot.slane %v2581_v22, 5  ;;  %v2477_v22 = vshll.u32 %v2366_v49, 16 }
 0x3b1   : > { %13694 = vmatmul.mubr.msk.bf16.gmra.mrb[8].mxu0 %vm1449_vm12, %v14924_v53 }
 0x3b2   : > { %13697 = vmatprep.mubr.msk.bf16.mxu0 %vm1449_vm12, %v14925_v55  ;;  %v2455_v55 = vrot.slane %v2453_v11, 5  ;;  %v2461_v11 = vshll.u32 %v2364_v39, 16  ;;  %v2432_v36 = vsel %vm15971_vm1, %v2427_v41, %v2431_v48  ;;  %v2479_v41 = vrot.slane %v2477_v22, 5 }
 0x3b4   : > { %v2456_v30 = vsel %vm15971_vm1, %v2451_v38, %v2455_v55  ;;  %v2551_v55 = vrot.slane %v2549_v28, 5  ;;  %v2371_v28 = vld [vmem:[#allocation4 + $0x34] sm:$0xf] }
 0x3b5   : > { %v15987_v7 = vcombine.low %v2446_v45, %v2456_v30  ;;  %v16003_v45 = vcombine.low %v2494_v50, %v2504_v40  ;;  %v2370_v30 = vld [vmem:[#allocation4 + $0x30] sm:$0xf]  ;;  %v2594_v40 = vor.u32 %v2593_v34, %v15997_v43  ;;  %v2519_v29 = vshrl.u32 %v2371_v28, 16 }
 0x3b6   : > { %v2506_v50 = vshrl.u32 %v2370_v30, 16 }
 0x3b7   : > { %v2595_v48 = vrot.slane %v2594_v40, 4 }
 0x3b8   : > { %v2508_v34 = vrot.slane %v2506_v50, 4 }
 0x3b9   : > { %13698 = vmatmul.mubr.msk.bf16.gmra.mrb[12].mxu0 %vm1449_vm12, %v14926_v58  ;;  %v2543_v58 = vshrl.u32 %v2374_v37, 16  ;;  %v2471_v37 = vshrl.u32 %v2365_v3, 16  ;;  %v14936_v3 = vld [vmem:[#allocation4 + $0xcc] sm:$0xff]  }
 0x3ba   : > { %13701 = vmatprep.mubr.msk.bf16.mxu0 %vm1449_vm12, %v14927_v59  ;;  %v2412_v59 = vrot.slane %v2410_v63, 4  ;;  %v15994_v63 = vrot.slane %v2536_v4, 4 }
 0x3bb   : > { %v2545_v0 = vrot.slane %v2543_v58, 4  ;;  %v2629_v58 = vshll.u32 %v2385_v62, 16  ;;  %v2473_v42 = vrot.slane %v2471_v37, 4 }
 0x3c1   : > { %13702 = vmatmul.mubr.msk.bf16.gmra.mrb[16].mxu0 %vm1449_vm12, %v14929_v24  ;;  %v15984_v24 = vrot.slane %v2539_v17, 5  ;;  %v2626_v17 = vshrl.u32 %v2385_v62, 16  ;;  %v2515_v62 = vshll.u32 %v2371_v28, 16 }
 0x3c2   : > { %13705 = vmatprep.mubr.msk.bf16.mxu0 %vm1449_vm12, %v14930_v2  ;;  %v2416_v2 = vor.u32 %v2415_v61, %v2412_v59  ;;  %v2460_v59 = vrot.slane %v2458_v9, 4  ;;  %v2463_v61 = vrot.slane %v2461_v11, 5 }
 0x3c3   : > { %v2546_v56 = vor.u32 %v2545_v0, %v15984_v24  ;;  %v2542_v46 = vsel %vm15971_vm1, %v15994_v63, %v15984_v24  ;;  %v2584_v0 = vor.u32 %v2583_v23, %v2580_v21  ;;  %v2628_v1 = vrot.slane %v2626_v17, 4 }
 0x3c4   : > { %v2417_v38 = vrot.slane %v2416_v2, 4  ;;  %v2631_v2 = vrot.slane %v2629_v58, 5  ;;  %v2599_v24 = vrot.slane %v2597_v35, 5  ;;  %v2464_v11 = vor.u32 %v2463_v61, %v2460_v59  ;;  %v2372_v61 = vld [vmem:[#allocation4 + $0x38] sm:$0x1] }
 0x3c5   : > { %v2547_v39 = vrot.slane %v2546_v56, 4  ;;  %v2509_v63 = vshll.u32 %v2370_v30, 16  ;;  %v2585_v56 = vrot.slane %v2584_v0, 4  ;;  %v2645_v23 = vshll.u32 %v2387_v19, 16  ;;  %v2377_v30 = vld [vmem:[#allocation4 + $0x4c] sm:$0xf] }
 0x3c6   : > { %v2422_v4 = vsel %vm15971_vm1, %v2417_v38, %v15975_v33  ;;  %v2474_v33 = vor.u32 %v2473_v42, %v16001_v57  ;;  %v2632_v60 = vor.u32 %v2631_v2, %v2628_v1  ;;  %v2674_v38 = vshrl.u32 %v2391_v8, 16  ;;  %v2376_v42 = vld [vmem:[#allocation4 + $0x48] sm:$0xf] }
 0x3c7   : > { %v12442_v9 = vcombine.low %v2422_v4, %v2432_v36  ;;  %v2552_v37 = vsel %vm15971_vm1, %v2547_v39, %v2551_v55  ;;  %v2677_v17 = vshll.u32 %v2391_v8, 16  ;;  %v2465_v58 = vrot.slane %v2464_v11, 4  ;;  %v14938_v11 = vld [vmem:[%s15351_s14 + $0x88] sm:$0xff]  }
 0x3c8   : > { %v2475_v59 = vrot.slane %v2474_v33, 4  ;;  %v2511_v55 = vrot.slane %v2509_v63, 5  ;;  %v16022_v35 = vrot.slane %v2515_v62, 5  ;;  %v16024_v49 = vcombine.low %v2542_v46, %v2552_v37 }
 0x3c9   : > { %13706 = vmatmul.mubr.msk.bf16.gmra.mrb[20].mxu0 %vm1449_vm12, %v14931_v25  ;;  %v14935_v25 = vld [vmem:[#allocation4 + $0xc0] sm:$0xff]   ;;  %v2590_v4 = vsel %vm15971_vm1, %v2585_v56, %v15997_v43  ;;  %v16029_v36 = vrot.slane %v2632_v60, 4  ;;  %v16032_v0 = vrot.slane %v2674_v38, 4  ;;  %v2525_v2 = vshll.u32 %v2372_v61, 16  ;;  %v2378_v38 = vld [vmem:[#allocation4 + $0x50] sm:$0x1] }
 0x3ca   : > { %13709 = vmatprep.mubr.msk.bf16.mxu0 %vm1449_vm12, %v14932_v47  ;;  %v2386_v47 = vld [vmem:[#allocation4 + $0x70] sm:$0xf]  ;;  %v2480_v1 = vsel %vm15971_vm1, %v2475_v59, %v2479_v41  ;;  %v2600_v46 = vsel %vm15971_vm1, %v2595_v48, %v2599_v24  ;;  %v2557_v22 = vshll.u32 %v2376_v42, 16  ;;  %v2563_v43 = vshll.u32 %v2377_v30, 16 }
 0x3cb   : > { %v2635_v44 = vshll.u32 %v2386_v47, 16  ;;  %v2639_v51 = vshrl.u32 %v2386_v47, 16  ;;  %v2521_v47 = vrot.slane %v2519_v29, 4  ;;  %v2567_v50 = vshrl.u32 %v2377_v30, 16  ;;  %v2397_v29 = vld [vmem:[#allocation4 + $0x9c] sm:$0xf] }
 0x3cc   : > { %v2470_v40 = vsel %vm15971_vm1, %v2465_v58, %v16001_v57  ;;  %v2512_v8 = vor.u32 %v2511_v55, %v2508_v34  ;;  %v2679_v33 = vrot.slane %v2677_v17, 5  ;;  %v16045_v62 = vrot.slane %v2645_v23, 5  ;;  %v2382_v58 = vld [vmem:[#allocation4 + $0x60] sm:$0xf]  ;;  %v14939_v59 = vld [vmem:[%s15351_s14 + $0x90] sm:$0xff]  }
 0x3cd   : > { %v16018_v21 = vrot.slane %v2635_v44, 5  ;;  %v2393_v44 = vld [vmem:[#allocation4 + $0x8c] sm:$0x1]  ;;  %v12444_v63 = vcombine.low %v2470_v40, %v2480_v1  ;;  %v2527_v37 = vrot.slane %v2525_v2, 5  ;;  %v16049_v56 = vcombine.low %v2590_v4, %v2600_v46  ;;  %v2383_v34 = vld [vmem:[#allocation4 + $0x64] sm:$0xf] }
 0x3ce   : > { %v2693_v24 = vshll.u32 %v2393_v44, 16  ;;  %v2559_v48 = vrot.slane %v2557_v22, 5  ;;  %v16055_v23 = vrot.slane %v2563_v43, 5  ;;  %v2513_v17 = vrot.slane %v2512_v8, 4  ;;  %v2399_v46 = vld [vmem:[#allocation4 + $0xa4] sm:$0x1] }
 0x3cf   : > { %v2638_v61 = vsel %vm15971_vm1, %v16029_v36, %v16018_v21  ;;  %v2725_v30 = vshll.u32 %v2397_v29, 16  ;;  %v2615_v22 = vshrl.u32 %v2383_v34, 16  ;;  %v14940_v43 = vld [vmem:[%s15351_s14 + $0x98] sm:$0xff]  }
 0x3d0   : > { %v2518_v44 = vsel %vm15971_vm1, %v2513_v17, %v16022_v35  ;;  %v16087_v17 = vld [vmem:[%s15351_s14 + $0xa0] sm:$0xff]  }
 0x3d1   : > { %13710 = vmatmul.mubr.msk.bf16.gmra.mrb[24].mxu0 %vm1449_vm12, %v14934_v31  ;;  %v2641_v31 = vrot.slane %v2639_v51, 4 }
 0x3d2   : > { %13713 = vmatprep.mubr.msk.bf16.mxu0 %vm1449_vm12, %v14935_v25  ;;  %v2392_v25 = vld [vmem:[#allocation4 + $0x88] sm:$0xf] }
 0x3d3   : > { %v2642_v39 = vor.u32 %v2641_v31, %v16018_v21  ;;  %v2683_v28 = vshll.u32 %v2392_v25, 16  ;;  %v2687_v51 = vshrl.u32 %v2392_v25, 16  ;;  %v2398_v31 = vld [vmem:[#allocation4 + $0xa0] sm:$0xf]  ;;  %v2569_v25 = vrot.slane %v2567_v50, 4 }
 0x3d4   : > { %v2735_v1 = vshrl.u32 %v2398_v31, 16 }
 0x3d5   : > { %v16043_v19 = vrot.slane %v2642_v39, 4  ;;  %v16051_v57 = vrot.slane %v2683_v28, 5  ;;  %v2689_v60 = vrot.slane %v2687_v51, 4  ;;  %v2573_v39 = vshll.u32 %v2378_v38, 16 }
 0x3d6   : > { %v2731_v28 = vshll.u32 %v2398_v31, 16  ;;  %v2570_v36 = vor.u32 %v2569_v25, %v16055_v23  ;;  %v2605_v51 = vshll.u32 %v2382_v58, 16  ;;  %v2388_v25 = vld [vmem:[#allocation4 + $0x78] sm:$0xf] }
 0x3d7   : > { %v2648_v55 = vsel %vm15971_vm1, %v16043_v19, %v16045_v62  ;;  %v2690_v2 = vor.u32 %v2689_v60, %v16051_v57  ;;  %v2737_v19 = vrot.slane %v2735_v1, 4  ;;  %v2741_v62 = vshll.u32 %v2399_v46, 16 }
 0x3d8   : > { %v2607_v38 = vrot.slane %v2605_v51, 5 }
 0x3d9   : > { %13714 = vmatmul.mubr.msk.bf16.gmra.mrb[28].mxu0 %vm1449_vm12, %v14936_v3  ;;  %v2554_v3 = vshrl.u32 %v2376_v42, 16  ;;  %v2722_v42 = vshrl.u32 %v2397_v29, 16  ;;  %v2571_v29 = vrot.slane %v2570_v36, 4  ;;  %v2691_v31 = vrot.slane %v2690_v2, 4  ;;  %v2405_v2 = vld [vmem:[#allocation4 + $0xbc] sm:$0x1] }
 0x3da   : > { %13725 = vmatprep.mubr.msk.bf16.mxu0 %vm1449_vm12, %v12442_v9  ;;  %v2522_v9 = vor.u32 %v2521_v47, %v16022_v35  ;;  %v16067_v47 = vrot.slane %v2693_v24, 5  ;;  %v2404_v35 = vld [vmem:[#allocation4 + $0xb8] sm:$0xf] }
 0x3db   : > { %v2556_v41 = vrot.slane %v2554_v3, 4  ;;  %v2611_v3 = vshll.u32 %v2383_v34, 16  ;;  %v2724_v8 = vrot.slane %v2722_v42, 4 }
 0x3dd   : > { %v2560_v21 = vor.u32 %v2559_v48, %v2556_v41  ;;  %v16082_v41 = vrot.slane %v2611_v3, 5  ;;  %v2617_v48 = vrot.slane %v2615_v22, 4  ;;  %v2783_v3 = vshrl.u32 %v2404_v35, 16 }
 0x3df   : > { %v2561_v24 = vrot.slane %v2560_v21, 4  ;;  %v2618_v21 = vor.u32 %v2617_v48, %v16082_v41 }
 0x3e1   : > { %13726 = vmatmul.mubr.msk.bf16.vlgmr.msra.gmra.mrb[0].mxu0 %vm1449_vm12, %v15987_v7  ;;  %v2523_v7 = vrot.slane %v2522_v9, 4  ;;  %v2727_v9 = vrot.slane %v2725_v30, 5 }
 0x3e2   : > { %13758 = vmatpush3.bf16.msra.mxu0 %v15954_v54  ;;  %13729 = vmatprep.mubr.msk.bf16.mxu0 %vm1449_vm12, %v12444_v63  ;;  %v2680_v54 = vor.u32 %v2679_v33, %v16032_v0  ;;  %v2602_v0 = vshrl.u32 %v2382_v58, 16  ;;  %v2575_v33 = vrot.slane %v2573_v39, 5  ;;  %v16079_v63 = vrot.slane %v2731_v28, 5 }
 0x3e3   : > { %13759 = vmatprep.subr.bf16.mxu0 %v14938_v11  ;;  %v2528_v4 = vsel %vm15971_vm1, %v2523_v7, %v2527_v37  ;;  %v2384_v37 = vld [vmem:[#allocation4 + $0x68] sm:$0x1]  ;;  %v2389_v7 = vld [vmem:[#allocation4 + $0x7c] sm:$0xf]  ;;  %v2650_v39 = vshrl.u32 %v2388_v25, 16  ;;  %v2653_v28 = vshll.u32 %v2388_v25, 16 }
 0x3e4   : > { %v12446_v50 = vcombine.low %v2518_v44, %v2528_v4  ;;  %v2681_v40 = vrot.slane %v2680_v54, 4  ;;  %v2604_v60 = vrot.slane %v2602_v0, 4  ;;  %v2728_v54 = vor.u32 %v2727_v9, %v2724_v8  ;;  %v2390_v8 = vld [vmem:[#allocation4 + $0x80] sm:$0x1] }
 0x3e5   : > { %v2621_v30 = vshll.u32 %v2384_v37, 16  ;;  %v2738_v4 = vor.u32 %v2737_v19, %v16079_v63  ;;  %v2659_v36 = vshll.u32 %v2389_v7, 16  ;;  %v2663_v0 = vshrl.u32 %v2389_v7, 16  ;;  %v2394_v37 = vld [vmem:[#allocation4 + $0x90] sm:$0xf] }
 0x3e6   : > { %13760 = vmatpush3.bf16.msra.mxu0 %v14938_v11  ;;  %v2403_v11 = vld [vmem:[#allocation4 + $0xb4] sm:$0xf]  ;;  %v2686_v58 = vsel %vm15971_vm1, %v2681_v40, %v16051_v57  ;;  %v2696_v57 = vsel %vm15971_vm1, %v2691_v31, %v16067_v47  ;;  %v2608_v1 = vor.u32 %v2607_v38, %v2604_v60  ;;  %v16107_v47 = vrot.slane %v2728_v54, 4  ;;  %v3116_v40 = vld [vmem:[#allocation4 + $0x10] sm:$0xf] }
 0x3e7   : > { %13761 = vmatprep.subr.bf16.mxu0 %v14939_v59  ;;  %v2770_v34 = vshrl.u32 %v2403_v11, 16  ;;  %v2773_v42 = vshll.u32 %v2403_v11, 16  ;;  %v2623_v22 = vrot.slane %v2621_v30, 5  ;;  %v2652_v9 = vrot.slane %v2650_v39, 4  ;;  %v2395_v60 = vld [vmem:[#allocation4 + $0x94] sm:$0xf] }
 0x3e8   : > { %v2655_v11 = vrot.slane %v2653_v28, 5  ;;  %v2789_v38 = vshll.u32 %v2405_v2, 16  ;;  %v2669_v7 = vshll.u32 %v2390_v8, 16  ;;  %v3173_v30 = vshll.u32 %v3116_v40, 16 }
 0x3e9   : > { %13730 = vmatmul.mubr.msk.bf16.gmra.mrb[4].mxu0 %vm1449_vm12, %v16003_v45  ;;  %v16084_v45 = vcombine.low %v2638_v61, %v2648_v55  ;;  %v2779_v61 = vshll.u32 %v2404_v35, 16  ;;  %v2566_v55 = vsel %vm15971_vm1, %v2561_v24, %v16055_v23  ;;  %v2772_v44 = vrot.slane %v2770_v34, 4  ;;  %v3115_v23 = vld [vmem:[#allocation4 + $0xc] sm:$0xf] }
 0x3ea   : > { %13733 = vmatprep.mubr.msk.bf16.mxu0 %vm1449_vm12, %v12446_v50  ;;  %13762 = vmatpush3.bf16.msra.mxu0 %v14939_v59  ;;  %v2576_v59 = vsel %vm15971_vm1, %v2571_v29, %v2575_v33  ;;  %v2775_v51 = vrot.slane %v2773_v42, 5  ;;  %v16105_v50 = vcombine.low %v2686_v58, %v2696_v57  ;;  %v16112_v33 = vrot.slane %v2738_v4, 4 }
 0x3eb   : > { %13763 = vmatprep.subr.bf16.mxu0 %v14940_v43  ;;  %v12448_v46 = vcombine.low %v2566_v55, %v2576_v59  ;;  %v16114_v19 = vrot.slane %v2779_v61, 5  ;;  %v2609_v35 = vrot.slane %v2608_v1, 4  ;;  %v2619_v24 = vrot.slane %v2618_v21, 4 }
 0x3ec   : > { %v2665_v29 = vrot.slane %v2663_v0, 4  ;;  %v2776_v31 = vor.u32 %v2775_v51, %v2772_v44  ;;  %v3164_v48 = vshrl.u32 %v3115_v23, 16  ;;  %v2734_v58 = vsel %vm15971_vm1, %v16107_v47, %v16079_v63  ;;  %v3121_v0 = vld [vmem:[#allocation4 + $0x24] sm:$0xf]  ;;  %v3122_v51 = vld [vmem:[#allocation4 + $0x28] sm:$0xf] }
 0x3ed   : > { %v2624_v25 = vsel %vm15971_vm1, %v2619_v24, %v2623_v22  ;;  %v3167_v54 = vshll.u32 %v3115_v23, 16  ;;  %v2656_v34 = vor.u32 %v2655_v11, %v2652_v9  ;;  %v2698_v42 = vshrl.u32 %v2394_v37, 16  ;;  %v2396_v23 = vld [vmem:[#allocation4 + $0x98] sm:$0x1]  ;;  %v3119_v47 = vld [vmem:[#allocation4 + $0x1c] sm:$0xf] }
 0x3ee   : > { %13764 = vmatpush3.bf16.msra.mxu0 %v14940_v43  ;;  %v16109_v43 = vrot.slane %v2741_v62, 5  ;;  %v2785_v62 = vrot.slane %v2783_v3, 4  ;;  %v2701_v59 = vshll.u32 %v2394_v37, 16  ;;  %v2614_v4 = vsel %vm15971_vm1, %v2609_v35, %v16082_v41 }
 0x3ef   : > { %13797 = vmatprep.subr.bf16.mxu0 %v16087_v17  ;;  %v2707_v55 = vshll.u32 %v2395_v60, 16  ;;  %v2711_v39 = vshrl.u32 %v2395_v60, 16  ;;  %v12450_v28 = vcombine.low %v2614_v4, %v2624_v25  ;;  %v16132_v1 = vrot.slane %v2776_v31, 4 }
 0x3f0   : > { %v2744_v57 = vsel %vm15971_vm1, %v16112_v33, %v16109_v43  ;;  %v2786_v21 = vor.u32 %v2785_v62, %v16114_v19  ;;  %v2671_v41 = vrot.slane %v2669_v7, 5  ;;  %v16139_v2 = vrot.slane %v2789_v38, 5 }
 0x3f1   : > { %13734 = vmatmul.mubr.msk.bf16.gmra.mrb[8].mxu0 %vm1449_vm12, %v16024_v49  ;;  %v16116_v49 = vrot.slane %v2659_v36, 5  ;;  %v16135_v36 = vld [vmem:[#allocation4 + $0x14] sm:$0x1]  ;;  %v3177_v44 = vshrl.u32 %v3116_v40, 16  ;;  %v2657_v3 = vrot.slane %v2656_v34, 4  ;;  %v2700_v22 = vrot.slane %v2698_v42, 4 }
 0x3f2   : > { %13737 = vmatprep.mubr.msk.bf16.mxu0 %vm1449_vm12, %v12448_v46  ;;  %v3166_v46 = vrot.slane %v3164_v48, 4  ;;  %v2703_v8 = vrot.slane %v2701_v59, 5  ;;  %v3169_v9 = vrot.slane %v3167_v54, 5  ;;  %v2709_v35 = vrot.slane %v2707_v55, 5 }
 0x3f3   : > { %v2666_v61 = vor.u32 %v2665_v29, %v16116_v49  ;;  %v2713_v24 = vrot.slane %v2711_v39, 4  ;;  %v2400_v29 = vld [vmem:[#allocation4 + $0xa8] sm:$0xf]  ;;  %v16142_v37 = vrot.slane %v3173_v30, 5  ;;  %v2782_v40 = vsel %vm15971_vm1, %v16132_v1, %v16114_v19  ;;  %v3127_v30 = vld [vmem:[#allocation4 + $0x3c] sm:$0xf] }
 0x3f4   : > { %v2787_v60 = vrot.slane %v2786_v21, 4  ;;  %v3212_v31 = vshrl.u32 %v3121_v0, 16  ;;  %v3215_v62 = vshll.u32 %v3121_v0, 16  ;;  %v2717_v48 = vshll.u32 %v2396_v23, 16  ;;  %v3128_v39 = vld [vmem:[#allocation4 + $0x40] sm:$0xf] }
 0x3f5   : > { %v2667_v11 = vrot.slane %v2666_v61, 4  ;;  %v3179_v25 = vrot.slane %v3177_v44, 4  ;;  %v3183_v7 = vshll.u32 %v16135_v36, 16  ;;  %v2662_v54 = vsel %vm15971_vm1, %v2657_v3, %v16116_v49  ;;  %v2402_v23 = vld [vmem:[#allocation4 + $0xb0] sm:$0x1] }
 0x3f6   : > { %v2704_v34 = vor.u32 %v2703_v8, %v2700_v22  ;;  %v2746_v42 = vshrl.u32 %v2400_v29, 16  ;;  %v3221_v59 = vshll.u32 %v3122_v51, 16  ;;  %v2714_v4 = vor.u32 %v2713_v24, %v2709_v35 }
 0x3f7   : > { %v2672_v38 = vsel %vm15971_vm1, %v2667_v11, %v2671_v41  ;;  %v2749_v19 = vshll.u32 %v2400_v29, 16  ;;  %v3214_v1 = vrot.slane %v3212_v31, 4  ;;  %v3217_v21 = vrot.slane %v3215_v62, 5  ;;  %v3123_v62 = vld [vmem:[#allocation4 + $0x2c] sm:$0x1] }
 0x3f8   : > { %v3225_v0 = vshrl.u32 %v3122_v51, 16  ;;  %v2719_v36 = vrot.slane %v2717_v48, 5  ;;  %v3170_v41 = vor.u32 %v3169_v9, %v3166_v46  ;;  %v3260_v44 = vshrl.u32 %v3127_v30, 16 }
 0x3f9   : > { %13738 = vmatmul.mubr.msk.bf16.gmra.mrb[12].mxu0 %vm1449_vm12, %v16049_v56  ;;  %v2401_v56 = vld [vmem:[#allocation4 + $0xac] sm:$0xf]  ;;  %v3263_v49 = vshll.u32 %v3127_v30, 16  ;;  %v2705_v3 = vrot.slane %v2704_v34, 4  ;;  %v2748_v22 = vrot.slane %v2746_v42, 4  ;;  %v3269_v8 = vshll.u32 %v3128_v39, 16 }
 0x3fa   : > { %13741 = vmatprep.mubr.msk.bf16.mxu0 %vm1449_vm12, %v12450_v28  ;;  %v2755_v61 = vshll.u32 %v2401_v56, 16  ;;  %v2759_v55 = vshrl.u32 %v2401_v56, 16  ;;  %v12452_v28 = vcombine.low %v2662_v54, %v2672_v38  ;;  %v3273_v11 = vshrl.u32 %v3128_v39, 16  ;;  %v3133_v39 = vld [vmem:[#allocation4 + $0x54] sm:$0xf] }
 0x3fb   : > { %v2715_v24 = vrot.slane %v2714_v4, 4  ;;  %v2751_v29 = vrot.slane %v2749_v19, 5  ;;  %v3180_v51 = vor.u32 %v3179_v25, %v16142_v37  ;;  %v3218_v38 = vor.u32 %v3217_v21, %v3214_v1 }
 0x3fc   : > { %v2757_v56 = vrot.slane %v2755_v61, 5  ;;  %v2761_v31 = vrot.slane %v2759_v55, 4  ;;  %v3227_v46 = vrot.slane %v3225_v0, 4  ;;  %v2765_v48 = vshll.u32 %v2402_v23, 16 }
 0x3fd   : > { %v2720_v9 = vsel %vm15971_vm1, %v2715_v24, %v2719_v36  ;;  %v2792_v54 = vsel %vm15971_vm1, %v2787_v60, %v16139_v2  ;;  %v16165_v34 = vrot.slane %v3170_v41, 4  ;;  %v3231_v42 = vshll.u32 %v3123_v62, 16  ;;  %v3129_v41 = vld [vmem:[#allocation4 + $0x44] sm:$0x1] }
 0x3fe   : > { %v3262_v30 = vrot.slane %v3260_v44, 4  ;;  %v3265_v4 = vrot.slane %v3263_v49, 5  ;;  %v16167_v19 = vrot.slane %v3269_v8, 5  ;;  %v2710_v25 = vsel %vm15971_vm1, %v2705_v3, %v2709_v35  ;;  %v3118_v44 = vld [vmem:[#allocation4 + $0x18] sm:$0xf] }
 0x3ff   : > { %v2762_v61 = vor.u32 %v2761_v31, %v2757_v56  ;;  %v3275_v55 = vrot.slane %v3273_v11, 4  ;;  %v16171_v1 = vrot.slane %v3180_v51, 4  ;;  %v16173_v21 = vrot.slane %v3218_v38, 4  ;;  %v3134_v49 = vld [vmem:[#allocation4 + $0x58] sm:$0xf] }
 0x400   : > { %v12455_v35 = vcombine.low %v2734_v58, %v2744_v57  ;;  %v2767_v60 = vrot.slane %v2765_v48, 5  ;;  %v16188_v0 = vcombine.low %v2782_v40, %v2792_v54  ;;  %v3185_v36 = vrot.slane %v3183_v7, 5  ;;  %v3139_v31 = vld [vmem:[#allocation4 + $0x6c] sm:$0xf]  ;;  %v3135_v54 = vld [vmem:[#allocation4 + $0x5c] sm:$0x1] }
 0x401   : > { %13742 = vmatmul.mubr.msk.bf16.gmra.mrb[16].mxu0 %vm1449_vm12, %v16084_v45  ;;  %v16158_v45 = vrot.slane %v3221_v59, 5  ;;  %v2752_v59 = vor.u32 %v2751_v29, %v2748_v22  ;;  %v3233_v43 = vrot.slane %v3231_v42, 5  ;;  %v3266_v33 = vor.u32 %v3265_v4, %v3262_v30  ;;  %v3140_v4 = vld [vmem:[#allocation4 + $0x70] sm:$0xf] }
 0x402   : > { %13745 = vmatprep.mubr.msk.bf16.mxu0 %vm1449_vm12, %v12452_v28  ;;  %v12454_v28 = vcombine.low %v2710_v25, %v2720_v9  ;;  %v3308_v3 = vshrl.u32 %v3133_v39, 16  ;;  %v2763_v63 = vrot.slane %v2762_v61, 4  ;;  %v3276_v58 = vor.u32 %v3275_v55, %v16167_v19  ;;  %v3120_v61 = vld [vmem:[#allocation4 + $0x20] sm:$0x1] }
 0x403   : > { %v3228_v2 = vor.u32 %v3227_v46, %v16158_v45  ;;  %v2753_v23 = vrot.slane %v2752_v59, 4  ;;  %v3311_v57 = vshll.u32 %v3133_v39, 16  ;;  %v3186_v40 = vsel %vm15971_vm1, %v16171_v1, %v3185_v36 }
 0x404   : > { %v3279_v22 = vshll.u32 %v3129_v41, 16  ;;  %v2768_v8 = vsel %vm15971_vm1, %v2763_v63, %v2767_v60  ;;  %v3188_v11 = vshrl.u32 %v3118_v44, 16  ;;  %v3191_v24 = vshll.u32 %v3118_v44, 16  ;;  %v3125_v41 = vld [vmem:[#allocation4 + $0x34] sm:$0xf] }
 0x405   : > { %v3229_v7 = vrot.slane %v3228_v2, 4  ;;  %v3317_v29 = vshll.u32 %v3134_v49, 16  ;;  %v3197_v62 = vshll.u32 %v3119_v47, 16  ;;  %v3201_v51 = vshrl.u32 %v3119_v47, 16  ;;  %v3124_v2 = vld [vmem:[#allocation4 + $0x30] sm:$0xf] }
 0x406   : > { %v3267_v38 = vrot.slane %v3266_v33, 4  ;;  %v3310_v46 = vrot.slane %v3308_v3, 4  ;;  %v2758_v9 = vsel %vm15971_vm1, %v2753_v23, %v2757_v56  ;;  %v3277_v48 = vrot.slane %v3276_v58, 4 }
 0x407   : > { %v12456_v42 = vcombine.low %v2758_v9, %v2768_v8  ;;  %v3234_v30 = vsel %vm15971_vm1, %v3229_v7, %v3233_v43  ;;  %v3356_v25 = vshrl.u32 %v3139_v31, 16  ;;  %v3359_v59 = vshll.u32 %v3139_v31, 16  ;;  %v3146_v9 = vld [vmem:[#allocation4 + $0x88] sm:$0xf] }
 0x408   : > { %v3190_v55 = vrot.slane %v3188_v11, 4  ;;  %v3193_v39 = vrot.slane %v3191_v24, 5  ;;  %v16210_v1 = vrot.slane %v3317_v29, 5  ;;  %v16213_v56 = vrot.slane %v3197_v62, 5  ;;  %v3145_v29 = vld [vmem:[#allocation4 + $0x84] sm:$0xf] }
 0x409   : > { %13746 = vmatmul.mubr.msk.bf16.gmra.mrb[20].mxu0 %vm1449_vm12, %v16105_v50  ;;  %v3176_v50 = vsel %vm15971_vm1, %v16165_v34, %v16142_v37  ;;  %v3224_v37 = vsel %vm15971_vm1, %v16173_v21, %v16158_v45  ;;  %v3313_v34 = vrot.slane %v3311_v57, 5  ;;  %v3321_v45 = vshrl.u32 %v3134_v49, 16 }
 0x40a   : > { %13749 = vmatprep.mubr.msk.bf16.mxu0 %vm1449_vm12, %v12454_v28  ;;  %v3281_v28 = vrot.slane %v3279_v22, 5  ;;  %v3203_v21 = vrot.slane %v3201_v51, 4  ;;  %v3272_v60 = vsel %vm15971_vm1, %v3267_v38, %v16167_v19  ;;  %v3327_v36 = vshll.u32 %v3135_v54, 16  ;;  %v3141_v22 = vld [vmem:[#allocation4 + $0x74] sm:$0x1] }
 0x40b   : > { %v3314_v44 = vor.u32 %v3313_v34, %v3310_v46  ;;  %v3323_v43 = vrot.slane %v3321_v45, 4  ;;  %v3365_v33 = vshll.u32 %v3140_v4, 16  ;;  %v3207_v49 = vshll.u32 %v3120_v61, 16  ;;  %v3126_v54 = vld [vmem:[#allocation4 + $0x38] sm:$0x1] }
 0x40c   : > { %v3358_v3 = vrot.slane %v3356_v25, 4  ;;  %v3361_v23 = vrot.slane %v3359_v59, 5  ;;  %v3369_v63 = vshrl.u32 %v3140_v4, 16  ;;  %v12486_v47 = vcombine.low %v3176_v50, %v3186_v40  ;;  %v3130_v61 = vld [vmem:[#allocation4 + $0x48] sm:$0xf] }
 0x40d   : > { %v3194_v58 = vor.u32 %v3193_v39, %v3190_v55  ;;  %v16220_v57 = vcombine.low %v3224_v37, %v3234_v30  ;;  %v3236_v7 = vshrl.u32 %v3124_v2, 16  ;;  %v3204_v19 = vor.u32 %v3203_v21, %v16213_v56  ;;  %v3131_v55 = vld [vmem:[#allocation4 + $0x4c] sm:$0xf] }
 0x40e   : > { %v3239_v8 = vshll.u32 %v3124_v2, 16  ;;  %v3245_v11 = vshll.u32 %v3125_v41, 16  ;;  %v3249_v24 = vshrl.u32 %v3125_v41, 16  ;;  %v16225_v62 = vrot.slane %v3314_v44, 4 }
 0x40f   : > { %v3324_v51 = vor.u32 %v3323_v43, %v16210_v1  ;;  %v16228_v38 = vrot.slane %v3327_v36, 5  ;;  %v3209_v50 = vrot.slane %v3207_v49, 5  ;;  %v3362_v40 = vor.u32 %v3361_v23, %v3358_v3 }
 0x410   : > { %v16230_v37 = vrot.slane %v3365_v33, 5  ;;  %v3371_v46 = vrot.slane %v3369_v63, 4  ;;  %v3238_v34 = vrot.slane %v3236_v7, 4  ;;  %v3375_v45 = vshll.u32 %v3141_v22, 16  ;;  %v3147_v22 = vld [vmem:[#allocation4 + $0x8c] sm:$0x1] }
 0x411   : > { %13750 = vmatmul.mubr.msk.bf16.gmra.mrb[24].mxu0 %vm1449_vm12, %v12455_v35  ;;  %v3282_v35 = vsel %vm15971_vm1, %v3277_v48, %v3281_v28  ;;  %v3195_v48 = vrot.slane %v3194_v58, 4  ;;  %v3205_v30 = vrot.slane %v3204_v19, 4  ;;  %v3241_v4 = vrot.slane %v3239_v8, 5  ;;  %v14942_v58 = vld [vmem:[%s15351_s14 + $0xa8] sm:$0xff]  }
 0x412   : > { %13753 = vmatprep.mubr.msk.bf16.mxu0 %vm1449_vm12, %v12456_v42  ;;  %v16223_v31 = vcombine.low %v3272_v60, %v3282_v35  ;;  %v3404_v42 = vshrl.u32 %v3145_v29, 16  ;;  %v16235_v25 = vrot.slane %v3245_v11, 5  ;;  %v3251_v59 = vrot.slane %v3249_v24, 4 }
 0x413   : > { %v3320_v39 = vsel %vm15971_vm1, %v16225_v62, %v16210_v1  ;;  %v3407_v28 = vshll.u32 %v3145_v29, 16  ;;  %v3413_v21 = vshll.u32 %v3146_v9, 16  ;;  %v3210_v2 = vsel %vm15971_vm1, %v3205_v30, %v3209_v50  ;;  %v3152_v50 = vld [vmem:[#allocation4 + $0xa0] sm:$0xf] }
 0x414   : > { %v3255_v60 = vshll.u32 %v3126_v54, 16  ;;  %v16245_v36 = vrot.slane %v3362_v40, 4  ;;  %v3372_v41 = vor.u32 %v3371_v46, %v16230_v37  ;;  %v3200_v35 = vsel %vm15971_vm1, %v3195_v48, %v16213_v56  ;;  %v3132_v40 = vld [vmem:[#allocation4 + $0x50] sm:$0x1] }
 0x415   : > { %v3284_v44 = vshrl.u32 %v3130_v61, 16  ;;  %v3287_v43 = vshll.u32 %v3130_v61, 16  ;;  %v3417_v33 = vshrl.u32 %v3146_v9, 16  ;;  %v3242_v49 = vor.u32 %v3241_v4, %v3238_v34  ;;  %v3136_v4 = vld [vmem:[#allocation4 + $0x60] sm:$0xf]  ;;  %v14943_v61 = vld [vmem:[%s15351_s14 + $0xb0] sm:$0xff]  }
 0x416   : > { %v3252_v3 = vor.u32 %v3251_v59, %v16235_v25  ;;  %v3293_v23 = vshll.u32 %v3131_v55, 16  ;;  %v3297_v63 = vshrl.u32 %v3131_v55, 16  ;;  %v16253_v7 = vrot.slane %v3375_v45, 5  ;;  %v3137_v59 = vld [vmem:[#allocation4 + $0x64] sm:$0xf] }
 0x417   : > { %v3406_v19 = vrot.slane %v3404_v42, 4  ;;  %v3409_v8 = vrot.slane %v3407_v28, 5  ;;  %v3257_v11 = vrot.slane %v3255_v60, 5  ;;  %v3368_v24 = vsel %vm15971_vm1, %v16245_v36, %v16230_v37  ;;  %v3872_v36 = vld [vmem:[#allocation4 + $0x24] sm:$0xf] }
 0x418   : > { %v16263_v29 = vrot.slane %v3413_v21, 5  ;;  %v3286_v46 = vrot.slane %v3284_v44, 4  ;;  %v3289_v9 = vrot.slane %v3287_v43, 5  ;;  %v16266_v48 = vrot.slane %v3372_v41, 4 }
 0x419   : > { %13754 = vmatmul.mubr.msk.bf16.gmra.mrb[28].mxu0 %vm1449_vm12, %v16188_v0  ;;  %v16241_v0 = vrot.slane %v3324_v51, 4  ;;  %v3151_v51 = vld [vmem:[#allocation4 + $0x9c] sm:$0xf]  ;;  %v3419_v54 = vrot.slane %v3417_v33, 4  ;;  %v3243_v34 = vrot.slane %v3242_v49, 4  ;;  %v3253_v45 = vrot.slane %v3252_v3, 4 }
 0x41a   : > { %13765 = vmatprep.mubr.msk.bf16.mxu0 %vm1449_vm12, %v12486_v47  ;;  %v12487_v47 = vcombine.low %v3200_v35, %v3210_v2  ;;  %v16271_v42 = vrot.slane %v3293_v23, 5  ;;  %v3299_v30 = vrot.slane %v3297_v63, 4  ;;  %v3410_v55 = vor.u32 %v3409_v8, %v3406_v19 }
 0x41b   : > { %v3330_v56 = vsel %vm15971_vm1, %v16241_v0, %v16228_v38  ;;  %v3423_v28 = vshll.u32 %v3147_v22, 16  ;;  %v3452_v21 = vshrl.u32 %v3151_v51, 16  ;;  %v3455_v2 = vshll.u32 %v3151_v51, 16  ;;  %v14944_v51 = vld [vmem:[%s15351_s14 + $0xb8] sm:$0xff]   ;;  %v3144_v38 = vld [vmem:[#allocation4 + $0x80] sm:$0x1] }
 0x41c   : > { %v3258_v60 = vsel %vm15971_vm1, %v3253_v45, %v3257_v11  ;;  %v3461_v41 = vshll.u32 %v3152_v50, 16  ;;  %v3465_v35 = vshrl.u32 %v3152_v50, 16  ;;  %v3332_v44 = vshrl.u32 %v3136_v4, 16  ;;  %v3157_v50 = vld [vmem:[#allocation4 + $0xb4] sm:$0xf] }
 0x41d   : > { %v3335_v43 = vshll.u32 %v3136_v4, 16  ;;  %v3420_v33 = vor.u32 %v3419_v54, %v16263_v29  ;;  %v3248_v49 = vsel %vm15971_vm1, %v3243_v34, %v16235_v25  ;;  %v3300_v3 = vor.u32 %v3299_v30, %v16271_v42  ;;  %v3138_v34 = vld [vmem:[#allocation4 + $0x68] sm:$0x1] }
 0x41e   : > { %v3341_v23 = vshll.u32 %v3137_v59, 16  ;;  %v3345_v63 = vshrl.u32 %v3137_v59, 16  ;;  %v12489_v22 = vcombine.low %v3248_v49, %v3258_v60  ;;  %v3378_v19 = vsel %vm15971_vm1, %v16266_v48, %v16253_v7 }
 0x41f   : > { %v3411_v8 = vrot.slane %v3410_v55, 4  ;;  %v3425_v11 = vrot.slane %v3423_v28, 5  ;;  %v3457_v25 = vrot.slane %v3455_v2, 5  ;;  %v3334_v45 = vrot.slane %v3332_v44, 4  ;;  %v3142_v55 = vld [vmem:[#allocation4 + $0x78] sm:$0xf] }
 0x420   : > { %v3337_v30 = vrot.slane %v3335_v43, 5  ;;  %v3421_v4 = vrot.slane %v3420_v33, 4  ;;  %v3301_v7 = vrot.slane %v3300_v3, 4  ;;  %v16291_v48 = vrot.slane %v3341_v23, 5 }
 0x421   : > { %13766 = vmatmul.mubr.msk.bf16.vlgmr.msra.gmra.mrb[0].mxu0 %vm1449_vm12, %v12487_v47  ;;  %v3153_v47 = vld [vmem:[#allocation4 + $0xa4] sm:$0x1]  ;;  %v3347_v59 = vrot.slane %v3345_v63, 4  ;;  %v3467_v28 = vrot.slane %v3465_v35, 4  ;;  %v3416_v2 = vsel %vm15971_vm1, %v3411_v8, %v16263_v29  ;;  %v3351_v44 = vshll.u32 %v3138_v34, 16 }
 0x422   : > { %13798 = vmatpush3.bf16.msra.mxu0 %v16087_v17  ;;  %13769 = vmatprep.mubr.msk.bf16.mxu0 %vm1449_vm12, %v16220_v57  ;;  %v3303_v17 = vshll.u32 %v3132_v40, 16  ;;  %v3290_v57 = vor.u32 %v3289_v9, %v3286_v46  ;;  %v3454_v46 = vrot.slane %v3452_v21, 4  ;;  %v16286_v9 = vrot.slane %v3461_v41, 5  ;;  %v3143_v21 = vld [vmem:[#allocation4 + $0x7c] sm:$0xf] }
 0x423   : > { %13799 = vmatprep.subr.bf16.mxu0 %v14942_v58  ;;  %v3471_v60 = vshll.u32 %v3153_v47, 16  ;;  %v3503_v41 = vshll.u32 %v3157_v50, 16  ;;  %v3338_v35 = vor.u32 %v3337_v30, %v3334_v45  ;;  %v3380_v49 = vshrl.u32 %v3142_v55, 16  ;;  %v3148_v34 = vld [vmem:[#allocation4 + $0x90] sm:$0xf] }
 0x424   : > { %v3305_v40 = vrot.slane %v3303_v17, 5  ;;  %v3291_v54 = vrot.slane %v3290_v57, 4  ;;  %v3500_v17 = vshrl.u32 %v3157_v50, 16  ;;  %v16297_v57 = vld [vmem:[%s15351_s14 + $0xc0] sm:$0xff]   ;;  %v3458_v43 = vor.u32 %v3457_v25, %v3454_v46  ;;  %v3159_v25 = vld [vmem:[#allocation4 + $0xbc] sm:$0x1] }
 0x425   : > { %v3426_v29 = vsel %vm15971_vm1, %v3421_v4, %v3425_v11  ;;  %v3348_v3 = vor.u32 %v3347_v59, %v16291_v48  ;;  %v3383_v23 = vshll.u32 %v3142_v55, 16  ;;  %v3389_v63 = vshll.u32 %v3143_v21, 16 }
 0x426   : > { %13800 = vmatpush3.bf16.msra.mxu0 %v14942_v58  ;;  %v3158_v58 = vld [vmem:[#allocation4 + $0xb8] sm:$0xf]  ;;  %v3393_v47 = vshrl.u32 %v3143_v21, 16  ;;  %v3502_v8 = vrot.slane %v3500_v17, 4  ;;  %v3505_v50 = vrot.slane %v3503_v41, 5  ;;  %v3353_v11 = vrot.slane %v3351_v44, 5 }
 0x427   : > { %13801 = vmatprep.subr.bf16.mxu0 %v14943_v61  ;;  %v3509_v33 = vshll.u32 %v3158_v58, 16  ;;  %v16323_v46 = vrot.slane %v3471_v60, 5  ;;  %v3382_v0 = vrot.slane %v3380_v49, 4  ;;  %v3468_v1 = vor.u32 %v3467_v28, %v16286_v9  ;;  %v3873_v21 = vld [vmem:[#allocation4 + $0x28] sm:$0xf] }
 0x428   : > { %v3349_v62 = vrot.slane %v3348_v3, 4  ;;  %v3395_v37 = vrot.slane %v3393_v47, 4  ;;  %v3506_v45 = vor.u32 %v3505_v50, %v3502_v8  ;;  %v3399_v59 = vshll.u32 %v3144_v38, 16  ;;  %v3154_v50 = vld [vmem:[#allocation4 + $0xa8] sm:$0xf] }
 0x429   : > { %13770 = vmatmul.mubr.msk.bf16.gmra.mrb[4].mxu0 %vm1449_vm12, %v12489_v22  ;;  %v16332_v30 = vrot.slane %v3509_v33, 5  ;;  %v3428_v55 = vshrl.u32 %v3148_v34, 16  ;;  %v3431_v28 = vshll.u32 %v3148_v34, 16  ;;  %v16339_v60 = vrot.slane %v3468_v1, 4  ;;  %v3155_v34 = vld [vmem:[#allocation4 + $0xac] sm:$0xf] }
 0x42a   : > { %13773 = vmatprep.mubr.msk.bf16.mxu0 %vm1449_vm12, %v16223_v31  ;;  %13802 = vmatpush3.bf16.msra.mxu0 %v14943_v61  ;;  %v3306_v31 = vsel %vm15971_vm1, %v3301_v7, %v3305_v40  ;;  %v3296_v61 = vsel %vm15971_vm1, %v3291_v54, %v16271_v42  ;;  %v3513_v40 = vshrl.u32 %v3158_v58, 16  ;;  %v12492_v42 = vcombine.low %v3320_v39, %v3330_v56 }
 0x42b   : > { %13803 = vmatprep.subr.bf16.mxu0 %v14944_v51  ;;  %v12491_v22 = vcombine.low %v3296_v61, %v3306_v31  ;;  %v3339_v58 = vrot.slane %v3338_v35, 4  ;;  %v16326_v54 = vcombine.low %v3416_v2, %v3426_v29  ;;  %v3385_v39 = vrot.slane %v3383_v23, 5 }
 0x42c   : > { %v3391_v56 = vrot.slane %v3389_v63, 5  ;;  %v3515_v4 = vrot.slane %v3513_v40, 4  ;;  %v3354_v7 = vsel %vm15971_vm1, %v3349_v62, %v3353_v11  ;;  %v3519_v17 = vshll.u32 %v3159_v25, 16 }
 0x42d   : > { %v3344_v2 = vsel %vm15971_vm1, %v3339_v58, %v16291_v48  ;;  %v3942_v41 = vshrl.u32 %v3872_v36, 16  ;;  %v3386_v31 = vor.u32 %v3385_v39, %v3382_v0  ;;  %v3507_v35 = vrot.slane %v3506_v45, 4  ;;  %v3150_v48 = vld [vmem:[#allocation4 + $0x98] sm:$0x1]  ;;  %v3878_v39 = vld [vmem:[#allocation4 + $0x3c] sm:$0xf] }
 0x42e   : > { %13804 = vmatpush3.bf16.msra.mxu0 %v14944_v51  ;;  %v12494_v51 = vcombine.low %v3368_v24, %v3378_v19  ;;  %v3149_v24 = vld [vmem:[#allocation4 + $0x94] sm:$0xf]  ;;  %v16330_v19 = vrot.slane %v3458_v43, 4  ;;  %v3396_v44 = vor.u32 %v3395_v37, %v3391_v56  ;;  %v12493_v61 = vcombine.low %v3344_v2, %v3354_v7 }
 0x42f   : > { %13837 = vmatprep.subr.bf16.mxu0 %v16297_v57  ;;  %v3437_v43 = vshll.u32 %v3149_v24, 16  ;;  %v3441_v33 = vshrl.u32 %v3149_v24, 16  ;;  %v3945_v49 = vshll.u32 %v3872_v36, 16  ;;  %v3951_v29 = vshll.u32 %v3873_v21, 16 }
 0x430   : > { %v3401_v3 = vrot.slane %v3399_v59, 5  ;;  %v3430_v23 = vrot.slane %v3428_v55, 4  ;;  %v3433_v63 = vrot.slane %v3431_v28, 5  ;;  %v3516_v47 = vor.u32 %v3515_v4, %v16332_v30  ;;  %v3879_v59 = vld [vmem:[#allocation4 + $0x40] sm:$0xf] }
 0x431   : > { %13774 = vmatmul.mubr.msk.bf16.gmra.mrb[8].mxu0 %vm1449_vm12, %v12491_v22  ;;  %v3464_v22 = vsel %vm15971_vm1, %v16330_v19, %v16286_v9  ;;  %v3474_v8 = vsel %vm15971_vm1, %v16339_v60, %v16323_v46  ;;  %v3521_v40 = vrot.slane %v3519_v17, 5  ;;  %v3944_v11 = vrot.slane %v3942_v41, 4  ;;  %v3156_v60 = vld [vmem:[#allocation4 + $0xb0] sm:$0x1] }
 0x432   : > { %13777 = vmatprep.mubr.msk.bf16.mxu0 %vm1449_vm12, %v12492_v42  ;;  %v3874_v42 = vld [vmem:[#allocation4 + $0x2c] sm:$0x1]  ;;  %v3387_v25 = vrot.slane %v3386_v31, 4  ;;  %v3397_v58 = vrot.slane %v3396_v44, 4  ;;  %v16352_v38 = vrot.slane %v3437_v43, 5  ;;  %v3443_v0 = vrot.slane %v3441_v33, 4 }
 0x433   : > { %v3512_v9 = vsel %vm15971_vm1, %v3507_v35, %v16332_v30  ;;  %v3947_v1 = vrot.slane %v3945_v49, 5  ;;  %v16357_v62 = vrot.slane %v3951_v29, 5  ;;  %v3955_v46 = vshrl.u32 %v3873_v21, 16 }
 0x434   : > { %v3402_v37 = vsel %vm15971_vm1, %v3397_v58, %v3401_v3  ;;  %v3434_v36 = vor.u32 %v3433_v63, %v3430_v23  ;;  %v3517_v24 = vrot.slane %v3516_v47, 4  ;;  %v3476_v19 = vshrl.u32 %v3154_v50, 16  ;;  %v3160_v63 = vld [vmem:[#allocation4 + $0xc0] sm:$0xf] }
 0x435   : > { %v3479_v45 = vshll.u32 %v3154_v50, 16  ;;  %v3485_v4 = vshll.u32 %v3155_v34, 16  ;;  %v3489_v7 = vshrl.u32 %v3155_v34, 16  ;;  %v3392_v55 = vsel %vm15971_vm1, %v3387_v25, %v3391_v56  ;;  %v3870_v34 = vld [vmem:[#allocation4 + $0x1c] sm:$0xf] }
 0x436   : > { %v3444_v30 = vor.u32 %v3443_v0, %v16352_v38  ;;  %v3961_v28 = vshll.u32 %v3874_v42, 16  ;;  %v3990_v2 = vshrl.u32 %v3878_v39, 16  ;;  %v12495_v21 = vcombine.low %v3392_v55, %v3402_v37  ;;  %v3161_v42 = vld [vmem:[#allocation4 + $0xc4] sm:$0xf] }
 0x437   : > { %v3948_v17 = vor.u32 %v3947_v1, %v3944_v11  ;;  %v16364_v41 = vrot.slane %v3955_v46, 4  ;;  %v3993_v31 = vshll.u32 %v3878_v39, 16  ;;  %v3435_v44 = vrot.slane %v3434_v36, 4  ;;  %v3869_v11 = vld [vmem:[#allocation4 + $0x18] sm:$0xf] }
 0x438   : > { %v3522_v33 = vsel %vm15971_vm1, %v3517_v24, %v3521_v40  ;;  %v3478_v35 = vrot.slane %v3476_v19, 4  ;;  %v3481_v56 = vrot.slane %v3479_v45, 5  ;;  %v16369_v49 = vrot.slane %v3485_v4, 5  ;;  %v3880_v37 = vld [vmem:[#allocation4 + $0x44] sm:$0x1] }
 0x439   : > { %13778 = vmatmul.mubr.msk.bf16.gmra.mrb[12].mxu0 %vm1449_vm12, %v12493_v61  ;;  %v3999_v61 = vshll.u32 %v3879_v59, 16  ;;  %v3491_v29 = vrot.slane %v3489_v7, 4  ;;  %v3445_v3 = vrot.slane %v3444_v30, 4  ;;  %v3495_v23 = vshll.u32 %v3156_v60, 16  ;;  %v16389_v36 = vld [vmem:[#allocation4 + $0x54] sm:$0xf] }
 0x43a   : > { %13781 = vmatprep.mubr.msk.bf16.mxu0 %vm1449_vm12, %v12494_v51  ;;  %v3447_v51 = vshll.u32 %v3150_v48, 16  ;;  %v16373_v47 = vrot.slane %v3961_v28, 5  ;;  %v16375_v48 = vrot.slane %v3990_v2, 4  ;;  %v12498_v50 = vcombine.low %v3464_v22, %v3474_v8 }
 0x43b   : > { %v16377_v40 = vcombine.low %v3512_v9, %v3522_v33  ;;  %v16379_v25 = vrot.slane %v3948_v17, 4  ;;  %v4003_v58 = vshrl.u32 %v3879_v59, 16  ;;  %v3440_v0 = vsel %vm15971_vm1, %v3435_v44, %v16352_v38  ;;  %v3162_v17 = vld [vmem:[#allocation4 + $0xc8] sm:$0x1]  ;;  %v3871_v33 = vld [vmem:[#allocation4 + $0x20] sm:$0x1] }
 0x43c   : > { %v3449_v43 = vrot.slane %v3447_v51, 5  ;;  %v3958_v1 = vor.u32 %v16364_v41, %v16357_v62  ;;  %v3995_v46 = vrot.slane %v3993_v31, 5  ;;  %v3482_v22 = vor.u32 %v3481_v56, %v3478_v35 }
 0x43d   : > { %v3492_v8 = vor.u32 %v3491_v29, %v16369_v49  ;;  %v3524_v9 = vshrl.u32 %v3160_v63, 16  ;;  %v3527_v39 = vshll.u32 %v3160_v63, 16  ;;  %v3497_v51 = vrot.slane %v3495_v23, 5  ;;  %v3875_v63 = vld [vmem:[#allocation4 + $0x30] sm:$0xf] }
 0x43e   : > { %v3533_v24 = vshll.u32 %v3161_v42, 16  ;;  %v3537_v19 = vshrl.u32 %v3161_v42, 16  ;;  %v3918_v38 = vshrl.u32 %v3869_v11, 16  ;;  %v3921_v4 = vshll.u32 %v3869_v11, 16 }
 0x43f   : > { %v3927_v7 = vshll.u32 %v3870_v34, 16  ;;  %v3931_v59 = vshrl.u32 %v3870_v34, 16  ;;  %v16391_v55 = vrot.slane %v3999_v61, 5  ;;  %v4005_v30 = vrot.slane %v4003_v58, 4 }
 0x440   : > { %v4009_v28 = vshll.u32 %v3880_v37, 16  ;;  %v4038_v2 = vshrl.u32 %v16389_v36, 16  ;;  %v3493_v60 = vrot.slane %v3492_v8, 4  ;;  %v3526_v41 = vrot.slane %v3524_v9, 4  ;;  %v3885_v9 = vld [vmem:[#allocation4 + $0x58] sm:$0xf] }
 0x441   : > { %13782 = vmatmul.mubr.msk.bf16.gmra.mrb[16].mxu0 %vm1449_vm12, %v12495_v21  ;;  %v3483_v21 = vrot.slane %v3482_v22, 4  ;;  %v3529_v31 = vrot.slane %v3527_v39, 5  ;;  %v16396_v44 = vrot.slane %v3533_v24, 5  ;;  %v3920_v35 = vrot.slane %v3918_v38, 4 }
 0x442   : > { %13785 = vmatprep.mubr.msk.bf16.mxu0 %vm1449_vm12, %v16326_v54  ;;  %v3450_v54 = vsel %vm15971_vm1, %v3445_v3, %v3449_v43  ;;  %v3539_v43 = vrot.slane %v3537_v19, 4  ;;  %v3954_v61 = vsel %vm15971_vm1, %v16379_v25, %v16357_v62  ;;  %v3498_v56 = vsel %vm15971_vm1, %v3493_v60, %v3497_v51 }
 0x443   : > { %v12497_v45 = vcombine.low %v3440_v0, %v3450_v54  ;;  %v3923_v29 = vrot.slane %v3921_v4, 5  ;;  %v3929_v3 = vrot.slane %v3927_v7, 5  ;;  %v3933_v23 = vrot.slane %v3931_v59, 4 }
 0x444   : > { %v3543_v42 = vshll.u32 %v3162_v17, 16  ;;  %v3959_v11 = vrot.slane %v3958_v1, 4  ;;  %v3996_v58 = vor.u32 %v3995_v46, %v16375_v48  ;;  %v4006_v0 = vor.u32 %v4005_v30, %v16391_v55  ;;  %v3877_v30 = vld [vmem:[#allocation4 + $0x38] sm:$0x1] }
 0x445   : > { %v3488_v54 = vsel %vm15971_vm1, %v3483_v21, %v16369_v49  ;;  %v3530_v34 = vor.u32 %v3529_v31, %v3526_v41  ;;  %v3937_v22 = vshll.u32 %v3871_v33, 16  ;;  %v16409_v8 = vrot.slane %v4009_v28, 5 }
 0x446   : > { %v12499_v39 = vcombine.low %v3488_v54, %v3498_v56  ;;  %v3540_v37 = vor.u32 %v3539_v43, %v16396_v44  ;;  %v3966_v51 = vshrl.u32 %v3875_v63, 16  ;;  %v3969_v24 = vshll.u32 %v3875_v63, 16  ;;  %v3881_v56 = vld [vmem:[#allocation4 + $0x48] sm:$0xf] }
 0x447   : > { %v3924_v1 = vor.u32 %v3923_v29, %v3920_v35  ;;  %v3934_v19 = vor.u32 %v3933_v23, %v3929_v3  ;;  %v3545_v46 = vrot.slane %v3543_v42, 5  ;;  %v4041_v4 = vshll.u32 %v16389_v36, 16  ;;  %v3882_v36 = vld [vmem:[#allocation4 + $0x4c] sm:$0xf] }
 0x448   : > { %v4047_v49 = vshll.u32 %v3885_v9, 16  ;;  %v3939_v7 = vrot.slane %v3937_v22, 5  ;;  %v3964_v59 = vsel %vm15971_vm1, %v3959_v11, %v16373_v47  ;;  %v16419_v28 = vrot.slane %v3996_v58, 4  ;;  %v3890_v58 = vld [vmem:[#allocation4 + $0x6c] sm:$0xf] }
 0x449   : > { %13786 = vmatmul.mubr.msk.bf16.gmra.mrb[20].mxu0 %vm1449_vm12, %v12497_v45  ;;  %v16412_v45 = vrot.slane %v4038_v2, 4  ;;  %v4051_v21 = vshrl.u32 %v3885_v9, 16  ;;  %v3531_v60 = vrot.slane %v3530_v34, 4  ;;  %v3541_v2 = vrot.slane %v3540_v37, 4 }
 0x44a   : > { %13789 = vmatprep.mubr.msk.bf16.mxu0 %vm1449_vm12, %v12498_v50  ;;  %v3876_v50 = vld [vmem:[#allocation4 + $0x34] sm:$0xf]  ;;  %v3968_v17 = vrot.slane %v3966_v51, 4  ;;  %v3971_v41 = vrot.slane %v3969_v24, 5  ;;  %v3925_v31 = vrot.slane %v3924_v1, 4  ;;  %v3935_v43 = vrot.slane %v3934_v19, 4 }
 0x44b   : > { %v3975_v38 = vshll.u32 %v3876_v50, 16  ;;  %v3979_v48 = vshrl.u32 %v3876_v50, 16  ;;  %v3546_v47 = vsel %vm15971_vm1, %v3541_v2, %v3545_v46  ;;  %v16425_v29 = vrot.slane %v4006_v0, 4  ;;  %v3886_v24 = vld [vmem:[#allocation4 + $0x5c] sm:$0x1] }
 0x44c   : > { %v4043_v23 = vrot.slane %v4041_v4, 5  ;;  %v16427_v63 = vrot.slane %v4047_v49, 5  ;;  %v3985_v42 = vshll.u32 %v3877_v30, 16  ;;  %v4023_v11 = vshll.u32 %v3882_v36, 16  ;;  %v3888_v30 = vld [vmem:[#allocation4 + $0x64] sm:$0xf] }
 0x44d   : > { %v3977_v33 = vrot.slane %v3975_v38, 5  ;;  %v3981_v35 = vrot.slane %v3979_v48, 4  ;;  %v4027_v50 = vshrl.u32 %v3882_v36, 16  ;;  %v3536_v54 = vsel %vm15971_vm1, %v3531_v60, %v16396_v44  ;;  %v3883_v48 = vld [vmem:[#allocation4 + $0x50] sm:$0x1] }
 0x44e   : > { %v3972_v34 = vor.u32 %v3971_v41, %v3968_v17  ;;  %v4014_v22 = vshrl.u32 %v3881_v56, 16  ;;  %v4017_v9 = vshll.u32 %v3881_v56, 16  ;;  %v12501_v0 = vcombine.low %v3536_v54, %v3546_v47  ;;  %v3887_v44 = vld [vmem:[#allocation4 + $0x60] sm:$0xf] }
 0x44f   : > { %v3930_v37 = vsel %vm15971_vm1, %v3925_v31, %v3929_v3  ;;  %v3982_v51 = vor.u32 %v3981_v35, %v3977_v33  ;;  %v4053_v1 = vrot.slane %v4051_v21, 4  ;;  %v12531_v38 = vcombine.low %v3954_v61, %v3964_v59 }
 0x450   : > { %v4086_v46 = vshrl.u32 %v3890_v58, 16  ;;  %v4089_v4 = vshll.u32 %v3890_v58, 16  ;;  %v3987_v49 = vrot.slane %v3985_v42, 5  ;;  %v4029_v3 = vrot.slane %v4027_v50, 4  ;;  %v3889_v58 = vld [vmem:[#allocation4 + $0x68] sm:$0x1] }
 0x451   : > { %13790 = vmatmul.mubr.msk.bf16.gmra.mrb[24].mxu0 %vm1449_vm12, %v12499_v39  ;;  %v3891_v39 = vld [vmem:[#allocation4 + $0x70] sm:$0xf]  ;;  %v3973_v21 = vrot.slane %v3972_v34, 4  ;;  %v4016_v2 = vrot.slane %v4014_v22, 4  ;;  %v4019_v17 = vrot.slane %v4017_v9, 5  ;;  %v3983_v62 = vrot.slane %v3982_v51, 4 }
 0x452   : > { %13793 = vmatprep.mubr.msk.bf16.mxu0 %vm1449_vm12, %v16377_v40  ;;  %v3940_v40 = vsel %vm15971_vm1, %v3935_v43, %v3939_v7  ;;  %v16442_v7 = vrot.slane %v4023_v11, 5  ;;  %v4095_v60 = vshll.u32 %v3891_v39, 16  ;;  %v4099_v41 = vshrl.u32 %v3891_v39, 16 }
 0x453   : > { %v12530_v19 = vcombine.low %v3930_v37, %v3940_v40  ;;  %v4033_v25 = vshll.u32 %v3883_v48, 16  ;;  %v4062_v61 = vshrl.u32 %v3887_v44, 16  ;;  %v4065_v59 = vshll.u32 %v3887_v44, 16  ;;  %v3893_v48 = vld [vmem:[#allocation4 + $0x78] sm:$0xf] }
 0x454   : > { %v4044_v36 = vor.u32 %v4043_v23, %v16412_v45  ;;  %v4054_v31 = vor.u32 %v4053_v1, %v16427_v63  ;;  %v4057_v43 = vshll.u32 %v3886_v24, 16  ;;  %v4071_v35 = vshll.u32 %v3888_v30, 16  ;;  %v14946_v23 = vld [vmem:[%s15351_s14 + $0xc8] sm:$0xff]   ;;  %v3894_v44 = vld [vmem:[#allocation4 + $0x7c] sm:$0xf] }
 0x455   : > { %v3988_v56 = vsel %vm15971_vm1, %v3983_v62, %v3987_v49  ;;  %v4030_v47 = vor.u32 %v4029_v3, %v16442_v7  ;;  %v4075_v40 = vshrl.u32 %v3888_v30, 16  ;;  %v4088_v42 = vrot.slane %v4086_v46, 4  ;;  %v3892_v49 = vld [vmem:[#allocation4 + $0x74] sm:$0x1] }
 0x456   : > { %v3978_v11 = vsel %vm15971_vm1, %v3973_v21, %v3977_v33  ;;  %v4020_v50 = vor.u32 %v4019_v17, %v4016_v2  ;;  %v4091_v54 = vrot.slane %v4089_v4, 5  ;;  %v16452_v34 = vrot.slane %v4095_v60, 5  ;;  %v14947_v30 = vld [vmem:[%s15351_s14 + $0xd0] sm:$0xff]   ;;  %v3896_v17 = vld [vmem:[#allocation4 + $0x84] sm:$0xf] }
 0x457   : > { %v4035_v45 = vrot.slane %v4033_v25, 5  ;;  %v4064_v22 = vrot.slane %v4062_v61, 4  ;;  %v4067_v9 = vrot.slane %v4065_v59, 5  ;;  %v4101_v39 = vrot.slane %v4099_v41, 4 }
 0x458   : > { %v4045_v37 = vrot.slane %v4044_v36, 4  ;;  %v16455_v51 = vrot.slane %v4071_v35, 5  ;;  %v4002_v33 = vsel %vm15971_vm1, %v16419_v28, %v16391_v55  ;;  %v4012_v24 = vsel %vm15971_vm1, %v16425_v29, %v16409_v8 }
 0x459   : > { %13794 = vmatmul.mubr.msk.bf16.gmra.mrb[28].mxu0 %vm1449_vm12, %v12501_v0  ;;  %v12532_v0 = vcombine.low %v3978_v11, %v3988_v56  ;;  %v4031_v1 = vrot.slane %v4030_v47, 4  ;;  %v4055_v46 = vrot.slane %v4054_v31, 4  ;;  %v4081_v4 = vshll.u32 %v3889_v58, 16 }
 0x45a   : > { %13805 = vmatprep.mubr.msk.bf16.mxu0 %vm1449_vm12, %v12530_v19  ;;  %v4077_v19 = vrot.slane %v4075_v40, 4  ;;  %v4092_v3 = vor.u32 %v4091_v54, %v4088_v42  ;;  %v4059_v28 = vrot.slane %v4057_v43, 5  ;;  %v4068_v8 = vor.u32 %v4067_v9, %v4064_v22  ;;  %v3897_v40 = vld [vmem:[#allocation4 + $0x88] sm:$0xf]  ;;  %v3895_v9 = vld [vmem:[#allocation4 + $0x80] sm:$0x1] }
 0x45b   : > { %v4036_v55 = vsel %vm15971_vm1, %v4031_v1, %v4035_v45  ;;  %v4102_v29 = vor.u32 %v4101_v39, %v16452_v34  ;;  %v4110_v60 = vshrl.u32 %v3893_v48, 16  ;;  %v4113_v21 = vshll.u32 %v3893_v48, 16  ;;  %v16495_v48 = vld [vmem:[%s15351_s14 + $0xe0] sm:$0xff]  }
 0x45c   : > { %v4119_v2 = vshll.u32 %v3894_v44, 16  ;;  %v12533_v41 = vcombine.low %v4002_v33, %v4012_v24  ;;  %v4050_v62 = vsel %vm15971_vm1, %v4045_v37, %v16427_v63  ;;  %v4078_v25 = vor.u32 %v4077_v19, %v16455_v51  ;;  %v14948_v63 = vld [vmem:[%s15351_s14 + $0xd8] sm:$0xff]   ;;  %v3903_v19 = vld [vmem:[#allocation4 + $0xa0] sm:$0xf] }
 0x45d   : > { %v4105_v61 = vshll.u32 %v3892_v49, 16  ;;  %v4060_v36 = vsel %vm15971_vm1, %v4055_v46, %v4059_v28  ;;  %v4083_v31 = vrot.slane %v4081_v4, 5  ;;  %v4093_v43 = vrot.slane %v4092_v3, 4  ;;  %v3899_v49 = vld [vmem:[#allocation4 + $0x90] sm:$0xf] }
 0x45e   : > { %v4069_v56 = vrot.slane %v4068_v8, 4  ;;  %v4103_v47 = vrot.slane %v4102_v29, 4  ;;  %v4134_v42 = vshrl.u32 %v3896_v17, 16  ;;  %v4112_v11 = vrot.slane %v4110_v60, 4 }
 0x45f   : > { %v16482_v58 = vrot.slane %v4119_v2, 5  ;;  %v4137_v45 = vshll.u32 %v3896_v17, 16  ;;  %v4107_v22 = vrot.slane %v4105_v61, 5  ;;  %v4143_v39 = vshll.u32 %v3897_v40, 16 }
 0x460   : > { %v12535_v37 = vcombine.low %v4050_v62, %v4060_v36  ;;  %v4074_v33 = vsel %vm15971_vm1, %v4069_v56, %v16455_v51  ;;  %v4098_v1 = vsel %vm15971_vm1, %v4093_v43, %v16452_v34  ;;  %v4136_v4 = vrot.slane %v4134_v42, 4  ;;  %v3900_v51 = vld [vmem:[#allocation4 + $0x94] sm:$0xf]  ;;  %v3905_v56 = vld [vmem:[#allocation4 + $0xa8] sm:$0xf] }
 0x461   : > { %13806 = vmatmul.mubr.msk.bf16.vlgmr.msra.gmra.mrb[0].mxu0 %vm1449_vm12, %v12531_v38  ;;  %v4021_v38 = vrot.slane %v4020_v50, 4  ;;  %v4115_v50 = vrot.slane %v4113_v21, 5  ;;  %v4129_v3 = vshll.u32 %v3895_v9, 16  ;;  %v4139_v28 = vrot.slane %v4137_v45, 5  ;;  %v3901_v42 = vld [vmem:[#allocation4 + $0x98] sm:$0x1] }
 0x462   : > { %13838 = vmatpush3.bf16.msra.mxu0 %v16297_v57  ;;  %13809 = vmatprep.mubr.msk.bf16.mxu0 %vm1449_vm12, %v12532_v0  ;;  %v4123_v57 = vshrl.u32 %v3894_v44, 16  ;;  %v4147_v0 = vshrl.u32 %v3897_v40, 16  ;;  %v4108_v44 = vsel %vm15971_vm1, %v4103_v47, %v4107_v22  ;;  %v4191_v60 = vshll.u32 %v3903_v19, 16  ;;  %v3908_v22 = vld [vmem:[#allocation4 + $0xb4] sm:$0xf] }
 0x463   : > { %13839 = vmatprep.subr.bf16.mxu0 %v14946_v23  ;;  %v4026_v59 = vsel %vm15971_vm1, %v4021_v38, %v16442_v7  ;;  %v4079_v7 = vrot.slane %v4078_v25, 4  ;;  %v4116_v38 = vor.u32 %v4115_v50, %v4112_v11  ;;  %v4195_v21 = vshrl.u32 %v3903_v19, 16  ;;  %v3906_v50 = vld [vmem:[#allocation4 + $0xac] sm:$0xf] }
 0x464   : > { %v12534_v35 = vcombine.low %v4026_v59, %v4036_v55  ;;  %v4125_v54 = vrot.slane %v4123_v57, 4  ;;  %v3898_v55 = vld [vmem:[#allocation4 + $0x8c] sm:$0x1]  ;;  %v4149_v34 = vrot.slane %v4147_v0, 4  ;;  %v4158_v2 = vshrl.u32 %v3899_v49, 16 }
 0x465   : > { %v4084_v24 = vsel %vm15971_vm1, %v4079_v7, %v4083_v31  ;;  %v4161_v57 = vshll.u32 %v3899_v49, 16  ;;  %v4167_v17 = vshll.u32 %v3900_v51, 16  ;;  %v12537_v25 = vcombine.low %v4098_v1, %v4108_v44  ;;  %v3909_v44 = vld [vmem:[#allocation4 + $0xb8] sm:$0xf] }
 0x466   : > { %13840 = vmatpush3.bf16.msra.mxu0 %v14946_v23  ;;  %v3902_v23 = vld [vmem:[#allocation4 + $0x9c] sm:$0xf]  ;;  %v4126_v46 = vor.u32 %v4125_v54, %v16482_v58  ;;  %v12536_v62 = vcombine.low %v4074_v33, %v4084_v24  ;;  %v4117_v61 = vrot.slane %v4116_v38, 4  ;;  %v4153_v59 = vshll.u32 %v3898_v55, 16  ;;  %v3904_v55 = vld [vmem:[#allocation4 + $0xa4] sm:$0x1] }
 0x467   : > { %13841 = vmatprep.subr.bf16.mxu0 %v14947_v30  ;;  %v4182_v8 = vshrl.u32 %v3902_v23, 16  ;;  %v4185_v29 = vshll.u32 %v3902_v23, 16  ;;  %v4131_v31 = vrot.slane %v4129_v3, 5  ;;  %v4140_v47 = vor.u32 %v4139_v28, %v4136_v4 }
 0x468   : > { %v4127_v36 = vrot.slane %v4126_v46, 4  ;;  %v4197_v11 = vrot.slane %v4195_v21, 4  ;;  %v4160_v54 = vrot.slane %v4158_v2, 4  ;;  %v4163_v7 = vrot.slane %v4161_v57, 5 }
 0x469   : > { %13810 = vmatmul.mubr.msk.bf16.gmra.mrb[4].mxu0 %vm1449_vm12, %v12533_v41  ;;  %v4171_v41 = vshrl.u32 %v3900_v51, 16  ;;  %v4184_v43 = vrot.slane %v4182_v8, 4  ;;  %v4169_v45 = vrot.slane %v4167_v17, 5  ;;  %v4122_v9 = vsel %vm15971_vm1, %v4117_v61, %v16482_v58  ;;  %v16521_v61 = vld [vmem:[#allocation4 + $0xb0] sm:$0x1] }
 0x46a   : > { %13813 = vmatprep.mubr.msk.bf16.mxu0 %vm1449_vm12, %v12534_v35  ;;  %13842 = vmatpush3.bf16.msra.mxu0 %v14947_v30  ;;  %v16500_v30 = vrot.slane %v4143_v39, 5  ;;  %v4187_v35 = vrot.slane %v4185_v29, 5  ;;  %v4155_v39 = vrot.slane %v4153_v59, 5  ;;  %v4206_v0 = vshrl.u32 %v3905_v56, 16 }
 0x46b   : > { %13843 = vmatprep.subr.bf16.mxu0 %v14948_v63  ;;  %v4173_v23 = vrot.slane %v4171_v41, 4  ;;  %v4132_v33 = vsel %vm15971_vm1, %v4127_v36, %v4131_v31  ;;  %v4177_v24 = vshll.u32 %v3901_v42, 16  ;;  %v4215_v1 = vshll.u32 %v3906_v50, 16 }
 0x46c   : > { %v4150_v40 = vor.u32 %v4149_v34, %v16500_v30  ;;  %v4219_v19 = vshrl.u32 %v3906_v50, 16  ;;  %v4141_v38 = vrot.slane %v4140_v47, 4  ;;  %v4230_v4 = vshrl.u32 %v3908_v22, 16 }
 0x46d   : > { %v4233_v49 = vshll.u32 %v3908_v22, 16  ;;  %v4164_v51 = vor.u32 %v4163_v7, %v4160_v54  ;;  %v4174_v3 = vor.u32 %v4173_v23, %v4169_v45  ;;  %v4188_v28 = vor.u32 %v4187_v35, %v4184_v43  ;;  %v3911_v35 = vld [vmem:[#allocation4 + $0xc0] sm:$0xf] }
 0x46e   : > { %13844 = vmatpush3.bf16.msra.mxu0 %v14948_v63  ;;  %v16506_v63 = vrot.slane %v4191_v60, 5  ;;  %v4151_v46 = vrot.slane %v4150_v40, 4  ;;  %v12538_v8 = vcombine.low %v4122_v9, %v4132_v33  ;;  %v4208_v29 = vrot.slane %v4206_v0, 4 }
 0x46f   : > { %13877 = vmatprep.subr.bf16.mxu0 %v16495_v48  ;;  %v4239_v34 = vshll.u32 %v3909_v44, 16  ;;  %v4243_v60 = vshrl.u32 %v3909_v44, 16  ;;  %v4179_v21 = vrot.slane %v4177_v24, 5  ;;  %v16515_v57 = vrot.slane %v4215_v1, 5  ;;  %v3914_v24 = vld [vmem:[#allocation4 + $0xcc] sm:$0xf] }
 0x470   : > { %v4198_v58 = vor.u32 %v4197_v11, %v16506_v63  ;;  %v4221_v17 = vrot.slane %v4219_v19, 4  ;;  %v4146_v41 = vsel %vm15971_vm1, %v4141_v38, %v16500_v30  ;;  %v4232_v59 = vrot.slane %v4230_v4, 4  ;;  %v16527_v11 = vld [vmem:[#allocation4 + $0xc4] sm:$0xf]  ;;  %v16537_v1 = vld [vmem:[#allocation4 + $0xd0] sm:$0xf] }
 0x471   : > { %13814 = vmatmul.mubr.msk.bf16.gmra.mrb[8].mxu0 %vm1449_vm12, %v12535_v37  ;;  %v4209_v37 = vshll.u32 %v3905_v56, 16  ;;  %v4156_v36 = vsel %vm15971_vm1, %v4151_v46, %v4155_v39  ;;  %v4165_v31 = vrot.slane %v4164_v51, 4  ;;  %v4189_v43 = vrot.slane %v4188_v28, 4  ;;  %v16545_v51 = vld [vmem:[#allocation4 + $0xbc] sm:$0x1] }
 0x472   : > { %13817 = vmatprep.mubr.msk.bf16.mxu0 %vm1449_vm12, %v12536_v62  ;;  %v4201_v62 = vshll.u32 %v3904_v55, 16  ;;  %v4199_v56 = vrot.slane %v4198_v58, 4  ;;  %v4235_v47 = vrot.slane %v4233_v49, 5  ;;  %v16525_v40 = vrot.slane %v4239_v34, 5  ;;  %v16549_v55 = vld [vmem:[#allocation4 + $0xc8] sm:$0x1] }
 0x473   : > { %v4211_v2 = vrot.slane %v4209_v37, 5  ;;  %v4245_v42 = vrot.slane %v4243_v60, 4  ;;  %v4222_v54 = vor.u32 %v4221_v17, %v16515_v57  ;;  %v4225_v7 = vshll.u32 %v16521_v61, 16 }
 0x474   : > { %v4203_v23 = vrot.slane %v4201_v62, 5  ;;  %v4254_v22 = vshrl.u32 %v3911_v35, 16  ;;  %v4257_v9 = vshll.u32 %v3911_v35, 16  ;;  %v12539_v39 = vcombine.low %v4146_v41, %v4156_v36 }
 0x475   : > { %v4212_v50 = vor.u32 %v4211_v2, %v4208_v29  ;;  %v4170_v0 = vsel %vm15971_vm1, %v4165_v31, %v4169_v45  ;;  %v4263_v37 = vshll.u32 %v16527_v11, 16  ;;  %v4267_v33 = vshrl.u32 %v16527_v11, 16 }
 0x476   : > { %v4194_v44 = vsel %vm15971_vm1, %v4189_v43, %v16506_v63  ;;  %v4204_v38 = vsel %vm15971_vm1, %v4199_v56, %v4203_v23  ;;  %v4236_v46 = vor.u32 %v4235_v47, %v4232_v59  ;;  %v4223_v45 = vrot.slane %v4222_v54, 4 }
 0x477   : > { %v4213_v4 = vrot.slane %v4212_v50, 4  ;;  %v4227_v49 = vrot.slane %v4225_v7, 5  ;;  %v4278_v28 = vshrl.u32 %v3914_v24, 16  ;;  %v4281_v58 = vshll.u32 %v3914_v24, 16 }
 0x478   : > { %v4287_v63 = vshll.u32 %v16537_v1, 16  ;;  %v4256_v29 = vrot.slane %v4254_v22, 4  ;;  %v4259_v34 = vrot.slane %v4257_v9, 5  ;;  %v4265_v60 = vrot.slane %v4263_v37, 5 }
 0x479   : > { %13818 = vmatmul.mubr.msk.bf16.gmra.mrb[12].mxu0 %vm1449_vm12, %v12537_v25  ;;  %v4175_v25 = vrot.slane %v4174_v3, 4  ;;  %v4246_v3 = vor.u32 %v4245_v42, %v16525_v40  ;;  %v4249_v2 = vshll.u32 %v16545_v51, 16  ;;  %v12541_v17 = vcombine.low %v4194_v44, %v4204_v38 }
 0x47a   : > { %13821 = vmatprep.mubr.msk.bf16.mxu0 %vm1449_vm12, %v12538_v8  ;;  %v4291_v8 = vshrl.u32 %v16537_v1, 16  ;;  %v4228_v41 = vsel %vm15971_vm1, %v4223_v45, %v4227_v49  ;;  %v4237_v62 = vrot.slane %v4236_v46, 4  ;;  %v4273_v59 = vshll.u32 %v16549_v55, 16 }
 0x47b   : > { %v4180_v30 = vsel %vm15971_vm1, %v4175_v25, %v4179_v21  ;;  %v4269_v21 = vrot.slane %v4267_v33, 4  ;;  %v4280_v36 = vrot.slane %v4278_v28, 4  ;;  %v4283_v31 = vrot.slane %v4281_v58, 5  ;;  %v15045_v33 = vld [vmem:[#allocation4 + $0x4] sm:$0xf] }
 0x47c   : > { %v12540_v19 = vcombine.low %v4170_v0, %v4180_v30  ;;  %v4289_v25 = vrot.slane %v4287_v63, 5  ;;  %v4293_v43 = vrot.slane %v4291_v8, 4  ;;  %v4218_v35 = vsel %vm15971_vm1, %v4213_v4, %v16515_v57  ;;  %v16560_v30 = vld [vmem:[#allocation4 + $0xd4] sm:$0x1]  ;;  %v15046_v28 = vld [vmem:[#allocation4 + $0x8] sm:$0x1] }
 0x47d   : > { %v4247_v56 = vrot.slane %v4246_v3, 4  ;;  %v4260_v47 = vor.u32 %v4259_v34, %v4256_v29  ;;  %v4270_v42 = vor.u32 %v4269_v21, %v4265_v60  ;;  %v12542_v50 = vcombine.low %v4218_v35, %v4228_v41  ;;  %v15049_v35 = vld [vmem:[#allocation4 + $0x20] sm:$0x1] }
 0x47e   : > { %v4251_v54 = vrot.slane %v4249_v2, 5  ;;  %v4275_v7 = vrot.slane %v4273_v59, 5  ;;  %v4242_v23 = vsel %vm15971_vm1, %v4237_v62, %v16525_v40  ;;  %v4284_v22 = vor.u32 %v4283_v31, %v4280_v36  ;;  %v15047_v2 = vld [vmem:[#allocation4 + $0x10] sm:$0xf]  ;;  %v4624_v59 = vld [vmem:[#allocation4 + $0xc] sm:$0xe] }
 0x47f   : > { %v4294_v9 = vor.u32 %v4293_v43, %v4289_v25  ;;  %v4297_v57 = vshll.u32 %v16560_v30, 16  ;;  %v4261_v0 = vrot.slane %v4260_v47, 4  ;;  %v4271_v37 = vrot.slane %v4270_v42, 4  ;;  %v15048_v36 = vld [vmem:[#allocation4 + $0x1c] sm:$0xf] }
 0x480   : > { %v4692_v24 = vrot.slane %v15045_v33, 5  ;;  %v4285_v46 = vrot.slane %v4284_v22, 4  ;;  %v4695_v58 = vrot.slane %v15046_v28, 5  ;;  %v4706_v31 = vrot.slane %v15048_v36, 5  ;;  %v4625_v43 = vld [vmem:[#allocation4 + $0x18] sm:$0xe] }
 0x481   : > { %13822 = vmatmul.mubr.msk.bf16.gmra.mrb[16].mxu0 %vm1449_vm12, %v12539_v39  ;;  %v4252_v39 = vsel %vm15971_vm1, %v4247_v56, %v4251_v54  ;;  %v4276_v44 = vsel %vm15971_vm1, %v4271_v37, %v4275_v7  ;;  %v4295_v40 = vrot.slane %v4294_v9, 4  ;;  %v4299_v4 = vrot.slane %v4297_v57, 5  ;;  %v15050_v42 = vld [vmem:[#allocation4 + $0x14] sm:$0x1]  ;;  %v15051_v22 = vld [vmem:[#allocation4 + $0x28] sm:$0xf] }
 0x482   : > { %13825 = vmatprep.mubr.msk.bf16.mxu0 %vm1449_vm12, %v12540_v19  ;;  %v4623_v19 = vld [vmem:[#allocation4] sm:$0xe]  ;;  %v12543_v38 = vcombine.low %v4242_v23, %v4252_v39  ;;  %v4266_v45 = vsel %vm15971_vm1, %v4261_v0, %v4265_v60  ;;  %v4694_v3 = vrot.slane %v4692_v24, 4  ;;  %v4290_v8 = vsel %vm15971_vm1, %v4285_v46, %v4289_v25  ;;  %v4626_v33 = vld [vmem:[#allocation4 + $0x24] sm:$0xe] }
 0x483   : > { %v12566_v49 = vrot.slane %v4623_v19, 9  ;;  %v12544_v63 = vcombine.low %v4266_v45, %v4276_v44  ;;  %v4300_v29 = vsel %vm15971_vm1, %v4295_v40, %v4299_v4  ;;  %v4709_v56 = vrot.slane %v15049_v35, 5  ;;  %v14950_v44 = vld [vmem:[%s15351_s14 + $0xe8] sm:$0xff]   ;;  %v4627_v40 = vld [vmem:[#allocation4 + $0x30] sm:$0xe] }
 0x484   : > { %v4696_v21 = vsel %vm16582_vm7, %v4694_v3, %v4695_v58  ;;  %v12545_v41 = vcombine.low %v4290_v8, %v4300_v29  ;;  %v12567_v47 = vrot.slane %v4624_v59, 9  ;;  %v12568_v54 = vrot.slane %v4625_v43, 9  ;;  %v15053_v4 = vld [vmem:[#allocation4 + $0x38] sm:$0x1]  ;;  %v15054_v3 = vld [vmem:[#allocation4 + $0x2c] sm:$0x1] }
 0x485   : > { %v4693_v60 = vsel %vm16582_vm7, %v12566_v49, %v4692_v24  ;;  %v4708_v7 = vrot.slane %v4706_v31, 4  ;;  %v4713_v9 = vrot.slane %v15051_v22, 5  ;;  %v15052_v24 = vld [vmem:[#allocation4 + $0x34] sm:$0xf]  ;;  %v4723_v45 = vrot.slane %v15053_v4, 5  ;;  %v16617_v22 = vld [vmem:[%s15351_s14 + $0x100] sm:$0xff]  }
 0x486   : > { %v12590_v62 = vcombine.low %v4693_v60, %v4696_v21  ;;  %v4707_v37 = vsel %vm16582_vm7, %v12568_v54, %v4706_v31  ;;  %v4720_v19 = vrot.slane %v15052_v24, 5  ;;  %v12569_v49 = vrot.slane %v4626_v33, 9  ;;  %v14951_v8 = vld [vmem:[%s15351_s14 + $0xf0] sm:$0xff]   ;;  %v15055_v60 = vld [vmem:[#allocation4 + $0x40] sm:$0xf]  ;;  %v14952_v31 = vld [vmem:[%s15351_s14 + $0xf8] sm:$0xff]  }
 0x487   : > { %v4710_v57 = vsel %vm16582_vm7, %v4708_v7, %v4709_v56  ;;  %v4715_v46 = vrot.slane %v4713_v9, 4  ;;  %v4716_v28 = vrot.slane %v15054_v3, 5  ;;  %v12570_v58 = vrot.slane %v4627_v40, 9  ;;  %v15056_v59 = vld [vmem:[#allocation4 + $0x4c] sm:$0xf] }
 0x488   : > { %v4727_v21 = vrot.slane %v15055_v60, 5  ;;  %v4734_v36 = vrot.slane %v15056_v59, 5  ;;  %v4629_v35 = vld [vmem:[#allocation4 + $0x48] sm:$0xe]  ;;  %v15057_v56 = vld [vmem:[#allocation4 + $0x50] sm:$0x1] }
 0x489   : > { %13826 = vmatmul.mubr.msk.bf16.gmra.mrb[20].mxu0 %vm1449_vm12, %v12541_v17  ;;  %v4699_v17 = vrot.slane %v15047_v2, 5  ;;  %v4717_v29 = vsel %vm16582_vm7, %v4715_v46, %v4716_v28  ;;  %v12572_v7 = vrot.slane %v4629_v35, 9  ;;  %v4631_v4 = vld [vmem:[#allocation4 + $0x60] sm:$0xe]  ;;  %v15062_v28 = vld [vmem:[#allocation4 + $0x5c] sm:$0x1] }
 0x48a   : > { %13829 = vmatprep.mubr.msk.bf16.mxu0 %vm1449_vm12, %v12542_v50  ;;  %v4702_v50 = vrot.slane %v15050_v42, 5  ;;  %v4729_v43 = vrot.slane %v4727_v21, 4  ;;  %v15063_v60 = vld [vmem:[#allocation4 + $0x70] sm:$0xf]  ;;  %v15064_v59 = vld [vmem:[#allocation4 + $0x7c] sm:$0xf] }
 0x48b   : > { %v4701_v25 = vrot.slane %v4699_v17, 4  ;;  %v4700_v39 = vsel %vm16582_vm7, %v12567_v47, %v4699_v17  ;;  %v4737_v47 = vrot.slane %v15057_v56, 5  ;;  %v4735_v24 = vsel %vm16582_vm7, %v12572_v7, %v4734_v36  ;;  %v15065_v35 = vld [vmem:[#allocation4 + $0x80] sm:$0x1] }
 0x48c   : > { %v4765_v56 = vrot.slane %v15065_v35, 5 }
 0x48d   : > { %v4703_v23 = vsel %vm16582_vm7, %v4701_v25, %v4702_v50  ;;  %v15058_v50 = vld [vmem:[#allocation4 + $0x44] sm:$0x1] }
 0x48e   : > { %v12591_v0 = vcombine.low %v4700_v39, %v4703_v23  ;;  %v4730_v54 = vrot.slane %v15058_v50, 5  ;;  %v4736_v23 = vrot.slane %v4734_v36, 4  ;;  %v4762_v36 = vrot.slane %v15064_v59, 5 }
 0x490   : > { %v4764_v7 = vrot.slane %v4762_v36, 4 }
 0x491   : > { %13830 = vmatmul.mubr.msk.bf16.gmra.mrb[24].mxu0 %vm1449_vm12, %v12543_v38  ;;  %v12592_v38 = vcombine.low %v4707_v37, %v4710_v57  ;;  %v15059_v57 = vld [vmem:[#allocation4 + $0x58] sm:$0xf] }
 0x492   : > { %13833 = vmatprep.mubr.msk.bf16.mxu0 %vm1449_vm12, %v12544_v63  ;;  %v4722_v63 = vrot.slane %v4720_v19, 4  ;;  %v4741_v39 = vrot.slane %v15059_v57, 5 }
 0x494   : > { %v4724_v2 = vsel %vm16582_vm7, %v4722_v63, %v4723_v45  ;;  %v4743_v40 = vrot.slane %v4741_v39, 4  ;;  %v15061_v45 = vld [vmem:[#allocation4 + $0x68] sm:$0x1]  ;;  %v12574_v63 = vrot.slane %v4631_v4, 9  ;;  %v15069_v4 = vld [vmem:[#allocation4 + $0x98] sm:$0x1] }
 0x499   : > { %13834 = vmatmul.mubr.msk.bf16.gmra.mrb[28].mxu0 %vm1449_vm12, %v12545_v41  ;;  %v4721_v41 = vsel %vm16582_vm7, %v12570_v58, %v4720_v19  ;;  %v4630_v19 = vld [vmem:[#allocation4 + $0x54] sm:$0xe]  ;;  %v4744_v58 = vrot.slane %v15062_v28, 5 }
 0x49a   : > { %13845 = vmatprep.mubr.msk.bf16.mxu0 %vm1449_vm12, %v12590_v62  ;;  %v4628_v62 = vld [vmem:[#allocation4 + $0x3c] sm:$0xe]  ;;  %v12594_v25 = vcombine.low %v4721_v41, %v4724_v2  ;;  %v12573_v3 = vrot.slane %v4630_v19, 9  ;;  %v15068_v19 = vld [vmem:[#allocation4 + $0x94] sm:$0xf] }
 0x49b   : > { %v12571_v42 = vrot.slane %v4628_v62, 9  ;;  %v4632_v62 = vld [vmem:[#allocation4 + $0x6c] sm:$0xe] }
 0x49d   : > { %v4728_v37 = vsel %vm16582_vm7, %v12571_v42, %v4727_v21  ;;  %v4755_v21 = vrot.slane %v15063_v60, 5  ;;  %v15066_v42 = vld [vmem:[#allocation4 + $0x74] sm:$0x1] }
 0x49e   : > { %v4758_v50 = vrot.slane %v15066_v42, 5 }
 0x4a1   : > { %13846 = vmatmul.mubr.msk.bf16.vlgmr.msra.gmra.mrb[0].mxu0 %vm1449_vm12, %v12591_v0  ;;  %v4738_v0 = vsel %vm16582_vm7, %v4736_v23, %v4737_v47  ;;  %v12575_v47 = vrot.slane %v4632_v62, 9  ;;  %v15072_v62 = vld [vmem:[#allocation4 + $0xac] sm:$0xf] }
 0x4a2   : > { %13878 = vmatpush3.bf16.msra.mxu0 %v16495_v48  ;;  %13849 = vmatprep.mubr.msk.bf16.mxu0 %vm1449_vm12, %v12592_v38  ;;  %v4714_v48 = vsel %vm16582_vm7, %v12569_v49, %v4713_v9  ;;  %v4731_v9 = vsel %vm16582_vm7, %v4729_v43, %v4730_v54  ;;  %v12596_v46 = vcombine.low %v4735_v24, %v4738_v0  ;;  %v4751_v49 = vrot.slane %v15061_v45, 5  ;;  %v4633_v43 = vld [vmem:[#allocation4 + $0x78] sm:$0xe]  ;;  %v4634_v24 = vld [vmem:[#allocation4 + $0x84] sm:$0xe] }
 0x4a3   : > { %13879 = vmatprep.subr.bf16.mxu0 %v14950_v44  ;;  %v12593_v17 = vcombine.low %v4714_v48, %v4717_v29  ;;  %v12595_v33 = vcombine.low %v4728_v37, %v4731_v9  ;;  %v4745_v29 = vsel %vm16582_vm7, %v4743_v40, %v4744_v58  ;;  %v4742_v48 = vsel %vm16582_vm7, %v12573_v3, %v4741_v39  ;;  %v15067_v9 = vld [vmem:[#allocation4 + $0x88] sm:$0xf]  ;;  %v4635_v40 = vld [vmem:[#allocation4 + $0x90] sm:$0xe]  ;;  %v15070_v3 = vld [vmem:[#allocation4 + $0x8c] sm:$0x1] }
 0x4a4   : > { %v12576_v54 = vrot.slane %v4633_v43, 9  ;;  %v4769_v57 = vrot.slane %v15067_v9, 5  ;;  %v4766_v39 = vsel %vm16582_vm7, %v4764_v7, %v4765_v56  ;;  %v4756_v0 = vsel %vm16582_vm7, %v12575_v47, %v4755_v21  ;;  %v15073_v43 = vld [vmem:[#allocation4 + $0xb0] sm:$0x1]  ;;  %v15074_v47 = vld [vmem:[#allocation4 + $0xa4] sm:$0x1] }
 0x4a5   : > { %v4779_v45 = vrot.slane %v15069_v4, 5  ;;  %v4772_v28 = vrot.slane %v15070_v3, 5  ;;  %v12578_v58 = vrot.slane %v4635_v40, 9  ;;  %v4790_v59 = vrot.slane %v15072_v62, 5  ;;  %v5125_v62 = vld [vmem:[#allocation4 + $0x18] sm:$0xe] }
 0x4a6   : > { %13880 = vmatpush3.bf16.msra.mxu0 %v14950_v44  ;;  %v15060_v44 = vld [vmem:[#allocation4 + $0x64] sm:$0xf]  ;;  %v4793_v35 = vrot.slane %v15073_v43, 5  ;;  %v4786_v42 = vrot.slane %v15074_v47, 5 }
 0x4a7   : > { %13881 = vmatprep.subr.bf16.mxu0 %v14951_v8  ;;  %v4748_v38 = vrot.slane %v15060_v44, 5  ;;  %v4776_v44 = vrot.slane %v15068_v19, 5  ;;  %v4638_v19 = vld [vmem:[#allocation4 + $0xb4] sm:$0xe] }
 0x4a8   : > { %v12581_v4 = vrot.slane %v4638_v19, 9  ;;  %v14954_v19 = vld [vmem:[%s15351_s14 + $0x108] sm:$0xff]  }
 0x4a9   : > { %13850 = vmatmul.mubr.msk.bf16.gmra.mrb[4].mxu0 %vm1449_vm12, %v12593_v17  ;;  %v12597_v17 = vcombine.low %v4742_v48, %v4745_v29  ;;  %v4749_v41 = vsel %vm16582_vm7, %v12574_v63, %v4748_v38  ;;  %v4778_v63 = vrot.slane %v4776_v44, 4  ;;  %v15071_v29 = vld [vmem:[#allocation4 + $0xa0] sm:$0xf] }
 0x4aa   : > { %13853 = vmatprep.mubr.msk.bf16.mxu0 %vm1449_vm12, %v12594_v25  ;;  %13882 = vmatpush3.bf16.msra.mxu0 %v14951_v8  ;;  %v4750_v8 = vrot.slane %v4748_v38, 4  ;;  %v4757_v25 = vrot.slane %v4755_v21, 4  ;;  %v4783_v60 = vrot.slane %v15071_v29, 5  ;;  %v15079_v29 = vld [vmem:[#allocation4 + $0x28] sm:$0xf] }
 0x4ab   : > { %13883 = vmatprep.subr.bf16.mxu0 %v14952_v31  ;;  %v4780_v21 = vsel %vm16582_vm7, %v4778_v63, %v4779_v45  ;;  %v15077_v45 = vld [vmem:[#allocation4 + $0xbc] sm:$0x1] }
 0x4ac   : > { %v4752_v2 = vsel %vm16582_vm7, %v4750_v8, %v4751_v49  ;;  %v4759_v23 = vsel %vm16582_vm7, %v4757_v25, %v4758_v50  ;;  %v12577_v49 = vrot.slane %v4634_v24, 9  ;;  %v4637_v25 = vld [vmem:[#allocation4 + $0xa8] sm:$0xe] }
 0x4ad   : > { %v12599_v37 = vcombine.low %v4756_v0, %v4759_v23  ;;  %v12580_v50 = vrot.slane %v4637_v25, 9  ;;  %v15075_v23 = vld [vmem:[#allocation4 + $0xb8] sm:$0xf]  ;;  %v5126_v25 = vld [vmem:[#allocation4 + $0x24] sm:$0xe] }
 0x4ae   : > { %13884 = vmatpush3.bf16.msra.mxu0 %v14952_v31  ;;  %v12598_v31 = vcombine.low %v4749_v41, %v4752_v2  ;;  %v4770_v2 = vsel %vm16582_vm7, %v12577_v49, %v4769_v57  ;;  %v4636_v41 = vld [vmem:[#allocation4 + $0x9c] sm:$0xe]  ;;  %v4797_v9 = vrot.slane %v15075_v23, 5  ;;  %v4800_v49 = vrot.slane %v15077_v45, 5  ;;  %v15083_v23 = vld [vmem:[#allocation4 + $0x40] sm:$0xf] }
 0x4af   : > { %13917 = vmatprep.subr.bf16.mxu0 %v16617_v22  ;;  %v12579_v56 = vrot.slane %v4636_v41, 9  ;;  %v4791_v24 = vsel %vm16582_vm7, %v12580_v50, %v4790_v59  ;;  %v12628_v47 = vrot.slane %v5126_v25, 9 }
 0x4b1   : > { %13854 = vmatmul.mubr.msk.bf16.gmra.mrb[8].mxu0 %vm1449_vm12, %v12595_v33  ;;  %v4763_v33 = vsel %vm16582_vm7, %v12576_v54, %v4762_v36  ;;  %v4792_v54 = vrot.slane %v4790_v59, 4 }
 0x4b2   : > { %13857 = vmatprep.mubr.msk.bf16.mxu0 %vm1449_vm12, %v12596_v46  ;;  %v12600_v38 = vcombine.low %v4763_v33, %v4766_v39  ;;  %v4771_v46 = vrot.slane %v4769_v57, 4  ;;  %v15076_v39 = vld [vmem:[#allocation4 + $0x10] sm:$0xf] }
 0x4b3   : > { %v4794_v57 = vsel %vm16582_vm7, %v4792_v54, %v4793_v35  ;;  %v5190_v0 = vrot.slane %v15076_v39, 5  ;;  %v12627_v35 = vrot.slane %v5125_v62, 9  ;;  %v15084_v39 = vld [vmem:[#allocation4 + $0x34] sm:$0xf]  ;;  %v5129_v62 = vld [vmem:[#allocation4 + $0x48] sm:$0xe] }
 0x4b4   : > { %v4773_v8 = vsel %vm16582_vm7, %v4771_v46, %v4772_v28  ;;  %v5124_v46 = vld [vmem:[#allocation4 + $0xc] sm:$0xe]  ;;  %v15078_v28 = vld [vmem:[#allocation4 + $0x14] sm:$0x1] }
 0x4b5   : > { %v12601_v48 = vcombine.low %v4770_v2, %v4773_v8  ;;  %v5192_v40 = vrot.slane %v5190_v0, 4  ;;  %v12626_v3 = vrot.slane %v5124_v46, 9  ;;  %v15080_v2 = vld [vmem:[#allocation4 + $0x1c] sm:$0xf] }
 0x4b7   : > { %v5191_v41 = vsel %vm16582_vm7, %v12626_v3, %v5190_v0  ;;  %v5211_v0 = vrot.slane %v15084_v39, 5 }
 0x4b9   : > { %13858 = vmatmul.mubr.msk.bf16.gmra.mrb[12].mxu0 %vm1449_vm12, %v12597_v17  ;;  %v4777_v17 = vsel %vm16582_vm7, %v12578_v58, %v4776_v44  ;;  %v12604_v44 = vcombine.low %v4791_v24, %v4794_v57  ;;  %v5193_v58 = vrot.slane %v15078_v28, 5  ;;  %v5127_v24 = vld [vmem:[#allocation4 + $0x30] sm:$0xe]  ;;  %v15086_v28 = vld [vmem:[#allocation4 + $0x44] sm:$0x1] }
 0x4ba   : > { %13861 = vmatprep.mubr.msk.bf16.mxu0 %vm1449_vm12, %v12598_v31  ;;  %v12602_v36 = vcombine.low %v4777_v17, %v4780_v21  ;;  %v4785_v31 = vrot.slane %v4783_v60, 4  ;;  %v4798_v21 = vsel %vm16582_vm7, %v12581_v4, %v4797_v9  ;;  %v12629_v45 = vrot.slane %v5127_v24, 9 }
 0x4bb   : > { %v5194_v8 = vsel %vm16582_vm7, %v5192_v40, %v5193_v58  ;;  %v5128_v40 = vld [vmem:[#allocation4 + $0x3c] sm:$0xe]  ;;  %v5221_v58 = vrot.slane %v15086_v28, 5  ;;  %v15094_v28 = vld [vmem:[#allocation4 + $0x74] sm:$0x1] }
 0x4bc   : > { %v4787_v7 = vsel %vm16582_vm7, %v4785_v31, %v4786_v42  ;;  %v12650_v59 = vcombine.low %v5191_v41, %v5194_v8  ;;  %v15082_v42 = vld [vmem:[#allocation4 + $0x2c] sm:$0x1]  ;;  %v12630_v3 = vrot.slane %v5128_v40, 9  ;;  %v5132_v40 = vld [vmem:[#allocation4 + $0x6c] sm:$0xe] }
 0x4bd   : > { %v5207_v50 = vrot.slane %v15082_v42, 5 }
 0x4c1   : > { %13862 = vmatmul.mubr.msk.bf16.gmra.mrb[16].mxu0 %vm1449_vm12, %v12599_v37  ;;  %v4784_v37 = vsel %vm16582_vm7, %v12579_v56, %v4783_v60  ;;  %v5204_v60 = vrot.slane %v15079_v29, 5 }
 0x4c2   : > { %13865 = vmatprep.mubr.msk.bf16.mxu0 %vm1449_vm12, %v12600_v38  ;;  %v12603_v33 = vcombine.low %v4784_v37, %v4787_v7  ;;  %v4799_v38 = vrot.slane %v4797_v9, 4  ;;  %v5218_v9 = vrot.slane %v15083_v23, 5 }
 0x4c3   : > { %v5206_v43 = vrot.slane %v5204_v60, 4 }
 0x4c4   : > { %v4801_v63 = vsel %vm16582_vm7, %v4799_v38, %v4800_v49  ;;  %v15085_v38 = vld [vmem:[#allocation4 + $0x38] sm:$0x1]  ;;  %v5220_v4 = vrot.slane %v5218_v9, 4  ;;  %v5213_v49 = vrot.slane %v5211_v0, 4  ;;  %v5219_v41 = vsel %vm16582_vm7, %v12630_v3, %v5218_v9  ;;  %v15091_v9 = vld [vmem:[#allocation4 + $0x70] sm:$0xf] }
 0x4c5   : > { %v12605_v17 = vcombine.low %v4798_v21, %v4801_v63  ;;  %v5208_v7 = vsel %vm16582_vm7, %v5206_v43, %v5207_v50  ;;  %v5214_v46 = vrot.slane %v15085_v38, 5  ;;  %v14955_v63 = vld [vmem:[%s15351_s14 + $0x110] sm:$0xff]   ;;  %v15090_v50 = vld [vmem:[#allocation4 + $0x5c] sm:$0x1]  ;;  %v15093_v38 = vld [vmem:[#allocation4 + $0x68] sm:$0x1] }
 0x4c6   : > { %v5222_v29 = vsel %vm16582_vm7, %v5220_v4, %v5221_v58  ;;  %v5130_v43 = vld [vmem:[#allocation4 + $0x54] sm:$0xe]  ;;  %v12634_v3 = vrot.slane %v5132_v40, 9  ;;  %v5249_v58 = vrot.slane %v15094_v28, 5 }
 0x4c7   : > { %v5215_v8 = vsel %vm16582_vm7, %v5213_v49, %v5214_v46  ;;  %v12632_v42 = vrot.slane %v5130_v43, 9  ;;  %v5242_v46 = vrot.slane %v15093_v38, 5  ;;  %v5136_v38 = vld [vmem:[#allocation4 + $0x9c] sm:$0xe] }
 0x4c9   : > { %13866 = vmatmul.mubr.msk.bf16.gmra.mrb[20].mxu0 %vm1449_vm12, %v12601_v48  ;;  %v5197_v48 = vrot.slane %v15080_v2, 5  ;;  %v15088_v2 = vld [vmem:[#allocation4 + $0x4c] sm:$0xf] }
 0x4ca   : > { %13869 = vmatprep.mubr.msk.bf16.mxu0 %vm1449_vm12, %v12602_v36  ;;  %v15081_v36 = vld [vmem:[#allocation4 + $0x20] sm:$0x1] }
 0x4cb   : > { %v5200_v31 = vrot.slane %v15081_v36, 5  ;;  %v5199_v56 = vrot.slane %v5197_v48, 4  ;;  %v5198_v57 = vsel %vm16582_vm7, %v12627_v35, %v5197_v48  ;;  %v5225_v48 = vrot.slane %v15088_v2, 5 }
 0x4cc   : > { %v12654_v36 = vcombine.low %v5219_v41, %v5222_v29  ;;  %v15095_v29 = vld [vmem:[#allocation4 + $0x88] sm:$0xf]  ;;  %v5133_v41 = vld [vmem:[#allocation4 + $0x78] sm:$0xe] }
 0x4cd   : > { %v5201_v54 = vsel %vm16582_vm7, %v5199_v56, %v5200_v31  ;;  %v15089_v31 = vld [vmem:[#allocation4 + $0x50] sm:$0x1]  ;;  %v12631_v56 = vrot.slane %v5129_v62, 9  ;;  %v12635_v43 = vrot.slane %v5133_v41, 9 }
 0x4ce   : > { %v12651_v37 = vcombine.low %v5198_v57, %v5201_v54  ;;  %v5228_v25 = vrot.slane %v15089_v31, 5  ;;  %v5235_v54 = vrot.slane %v15090_v50, 5  ;;  %v5246_v57 = vrot.slane %v15091_v9, 5  ;;  %v5134_v31 = vld [vmem:[#allocation4 + $0x84] sm:$0xe] }
 0x4cf   : > { %v5226_v39 = vsel %vm16582_vm7, %v12631_v56, %v5225_v48  ;;  %v12636_v56 = vrot.slane %v5134_v31, 9  ;;  %v15105_v41 = vld [vmem:[#allocation4 + $0xb0] sm:$0x1] }
 0x4d0   : > { %v5248_v4 = vrot.slane %v5246_v57, 4 }
 0x4d1   : > { %13870 = vmatmul.mubr.msk.bf16.gmra.mrb[24].mxu0 %vm1449_vm12, %v12603_v33  ;;  %v5205_v33 = vsel %vm16582_vm7, %v12628_v47, %v5204_v60  ;;  %v15087_v60 = vld [vmem:[#allocation4 + $0x58] sm:$0xf]  ;;  %v5227_v47 = vrot.slane %v5225_v48, 4 }
 0x4d2   : > { %13873 = vmatprep.mubr.msk.bf16.mxu0 %vm1449_vm12, %v12604_v44  ;;  %v12652_v44 = vcombine.low %v5205_v33, %v5208_v7  ;;  %v5232_v21 = vrot.slane %v15087_v60, 5  ;;  %v5260_v60 = vrot.slane %v15095_v29, 5 }
 0x4d3   : > { %v5229_v7 = vsel %vm16582_vm7, %v5227_v47, %v5228_v25  ;;  %v15098_v47 = vld [vmem:[#allocation4 + $0x8c] sm:$0x1] }
 0x4d4   : > { %v5234_v35 = vrot.slane %v5232_v21, 4  ;;  %v12655_v33 = vcombine.low %v5226_v39, %v5229_v7  ;;  %v5233_v24 = vsel %vm16582_vm7, %v12632_v42, %v5232_v21  ;;  %v5262_v25 = vrot.slane %v5260_v60, 4  ;;  %v15099_v7 = vld [vmem:[#allocation4 + $0xa0] sm:$0xf] }
 0x4d5   : > { %v5263_v42 = vrot.slane %v15098_v47, 5 }
 0x4d6   : > { %v5236_v23 = vsel %vm16582_vm7, %v5234_v35, %v5235_v54 }
 0x4d7   : > { %v5264_v54 = vsel %vm16582_vm7, %v5262_v25, %v5263_v42 }
 0x4d9   : > { %13874 = vmatmul.mubr.msk.bf16.gmra.mrb[28].mxu0 %vm1449_vm12, %v12605_v17 }
 0x4da   : > { %13885 = vmatprep.mubr.msk.bf16.mxu0 %vm1449_vm12, %v12650_v59  ;;  %v14956_v59 = vld [vmem:[%s15351_s14 + $0x118] sm:$0xff]  }
 0x4e1   : > { %13886 = vmatmul.mubr.msk.bf16.vlgmr.msra.gmra.mrb[0].mxu0 %vm1449_vm12, %v12651_v37 }
 0x4e2   : > { %13918 = vmatpush3.bf16.msra.mxu0 %v16617_v22  ;;  %13889 = vmatprep.mubr.msk.bf16.mxu0 %vm1449_vm12, %v12652_v44  ;;  %v5212_v22 = vsel %vm16582_vm7, %v12629_v45, %v5211_v0  ;;  %v15092_v0 = vld [vmem:[#allocation4 + $0x64] sm:$0xf]  ;;  %v12656_v44 = vcombine.low %v5233_v24, %v5236_v23  ;;  %v5274_v23 = vrot.slane %v15099_v7, 5 }
 0x4e3   : > { %13919 = vmatprep.subr.bf16.mxu0 %v14954_v19  ;;  %v12653_v17 = vcombine.low %v5212_v22, %v5215_v8  ;;  %v5239_v37 = vrot.slane %v15092_v0, 5  ;;  %v5250_v8 = vsel %vm16582_vm7, %v5248_v4, %v5249_v58  ;;  %v15096_v22 = vld [vmem:[#allocation4 + $0x7c] sm:$0xf] }
 0x4e4   : > { %v5253_v2 = vrot.slane %v15096_v22, 5 }
 0x4e5   : > { %v5241_v49 = vrot.slane %v5239_v37, 4 }
 0x4e6   : > { %13920 = vmatpush3.bf16.msra.mxu0 %v14954_v19  ;;  %v5131_v19 = vld [vmem:[#allocation4 + $0x60] sm:$0xe]  ;;  %v5255_v35 = vrot.slane %v5253_v2, 4  ;;  %v5254_v9 = vsel %vm16582_vm7, %v12635_v43, %v5253_v2 }
 0x4e7   : > { %13921 = vmatprep.subr.bf16.mxu0 %v14955_v63  ;;  %v12633_v45 = vrot.slane %v5131_v19, 9  ;;  %v15101_v19 = vld [vmem:[#allocation4 + $0x98] sm:$0x1] }
 0x4e9   : > { %13890 = vmatmul.mubr.msk.bf16.gmra.mrb[4].mxu0 %vm1449_vm12, %v12653_v17  ;;  %v5240_v21 = vsel %vm16582_vm7, %v12633_v45, %v5239_v37  ;;  %v5247_v17 = vsel %vm16582_vm7, %v12634_v3, %v5246_v57  ;;  %v15100_v57 = vld [vmem:[#allocation4 + $0x94] sm:$0xf]  ;;  %v5261_v37 = vsel %vm16582_vm7, %v12636_v56, %v5260_v60  ;;  %v12638_v45 = vrot.slane %v5136_v38, 9  ;;  %v15104_v60 = vld [vmem:[#allocation4 + $0xac] sm:$0xf] }
 0x4ea   : > { %13893 = vmatprep.mubr.msk.bf16.mxu0 %vm1449_vm12, %v12654_v36  ;;  %13922 = vmatpush3.bf16.msra.mxu0 %v14955_v63  ;;  %v5243_v63 = vsel %vm16582_vm7, %v5241_v49, %v5242_v46  ;;  %v12658_v62 = vcombine.low %v5247_v17, %v5250_v8  ;;  %v5267_v39 = vrot.slane %v15100_v57, 5  ;;  %v12660_v24 = vcombine.low %v5261_v37, %v5264_v54  ;;  %v15102_v49 = vld [vmem:[#allocation4 + $0xa4] sm:$0x1]  ;;  %v5139_v57 = vld [vmem:[#allocation4 + $0xc0] sm:$0xe] }
 0x4eb   : > { %13923 = vmatprep.subr.bf16.mxu0 %v14956_v59  ;;  %v12657_v48 = vcombine.low %v5240_v21, %v5243_v63  ;;  %v5276_v46 = vrot.slane %v5274_v23, 4  ;;  %v5277_v3 = vrot.slane %v15102_v49, 5  ;;  %v15103_v63 = vld [vmem:[#allocation4 + $0xb8] sm:$0xf]  ;;  %v5281_v21 = vrot.slane %v15104_v60, 5 }
 0x4ec   : > { %v5269_v4 = vrot.slane %v5267_v39, 4  ;;  %v5288_v8 = vrot.slane %v15103_v63, 5  ;;  %v5275_v2 = vsel %vm16582_vm7, %v12638_v45, %v5274_v23  ;;  %v15107_v54 = vld [vmem:[#allocation4 + $0xc4] sm:$0xf] }
 0x4ed   : > { %v5278_v58 = vsel %vm16582_vm7, %v5276_v46, %v5277_v3  ;;  %v5283_v25 = vrot.slane %v5281_v21, 4  ;;  %v5295_v7 = vrot.slane %v15107_v54, 5  ;;  %v12641_v46 = vrot.slane %v5139_v57, 9  ;;  %v15111_v3 = vld [vmem:[#allocation4 + $0x28] sm:$0xf] }
 0x4ee   : > { %13924 = vmatpush3.bf16.msra.mxu0 %v14956_v59  ;;  %v15097_v59 = vld [vmem:[#allocation4 + $0x80] sm:$0x1]  ;;  %v12662_v17 = vcombine.low %v5275_v2, %v5278_v58  ;;  %v5623_v60 = vld [vmem:[#allocation4 + $0x24] sm:$0xe] }
 0x4ef   : > { %v5256_v36 = vrot.slane %v15097_v59, 5  ;;  %v5138_v59 = vld [vmem:[#allocation4 + $0xb4] sm:$0xe]  ;;  %v5296_v63 = vsel %vm16582_vm7, %v12641_v46, %v5295_v7 }
 0x4f0   : > { %v12640_v43 = vrot.slane %v5138_v59, 9  ;;  %v12687_v59 = vrot.slane %v5623_v60, 9 }
 0x4f1   : > { %13894 = vmatmul.mubr.msk.bf16.gmra.mrb[8].mxu0 %vm1449_vm12, %v12655_v33  ;;  %v5257_v50 = vsel %vm16582_vm7, %v5255_v35, %v5256_v36  ;;  %v5135_v33 = vld [vmem:[#allocation4 + $0x90] sm:$0xe]  ;;  %v5290_v36 = vrot.slane %v5288_v8, 4  ;;  %v15106_v35 = vld [vmem:[#allocation4 + $0xbc] sm:$0x1] }
 0x4f2   : > { %13897 = vmatprep.mubr.msk.bf16.mxu0 %vm1449_vm12, %v12656_v44  ;;  %v12659_v0 = vcombine.low %v5254_v9, %v5257_v50  ;;  %v5270_v44 = vrot.slane %v15101_v19, 5  ;;  %v12637_v40 = vrot.slane %v5135_v33, 9  ;;  %v5291_v56 = vrot.slane %v15106_v35, 5  ;;  %v15109_v33 = vld [vmem:[#allocation4 + $0xc8] sm:$0x1] }
 0x4f3   : > { %v5289_v9 = vsel %vm16582_vm7, %v12640_v43, %v5288_v8  ;;  %v5622_v19 = vld [vmem:[#allocation4 + $0x18] sm:$0xe] }
 0x4f4   : > { %v5271_v28 = vsel %vm16582_vm7, %v5269_v4, %v5270_v44  ;;  %v5268_v29 = vsel %vm16582_vm7, %v12637_v40, %v5267_v39  ;;  %v5292_v42 = vsel %vm16582_vm7, %v5290_v36, %v5291_v56  ;;  %v15108_v39 = vld [vmem:[#allocation4 + $0x1c] sm:$0xf]  ;;  %v15110_v44 = vld [vmem:[#allocation4 + $0x20] sm:$0x1]  ;;  %v5297_v40 = vrot.slane %v5295_v7, 4 }
 0x4f5   : > { %v12661_v22 = vcombine.low %v5268_v29, %v5271_v28  ;;  %v12664_v37 = vcombine.low %v5289_v9, %v5292_v42  ;;  %v5691_v38 = vrot.slane %v15110_v44, 5  ;;  %v12686_v4 = vrot.slane %v5622_v19, 9  ;;  %v15114_v36 = vld [vmem:[#allocation4 + $0x2c] sm:$0x1]  ;;  %v15115_v56 = vld [vmem:[#allocation4 + $0x40] sm:$0xf] }
 0x4f6   : > { %v5695_v28 = vrot.slane %v15111_v3, 5  ;;  %v15116_v9 = vld [vmem:[#allocation4 + $0x4c] sm:$0xf]  ;;  %v15118_v44 = vld [vmem:[#allocation4 + $0x44] sm:$0x1] }
 0x4f7   : > { %v5716_v57 = vrot.slane %v15116_v9, 5 }
 0x4f9   : > { %13898 = vmatmul.mubr.msk.bf16.gmra.mrb[12].mxu0 %vm1449_vm12, %v12657_v48  ;;  %v5137_v48 = vld [vmem:[#allocation4 + $0xa8] sm:$0xe] }
 0x4fa   : > { %13901 = vmatprep.mubr.msk.bf16.mxu0 %vm1449_vm12, %v12658_v62  ;;  %v5284_v62 = vrot.slane %v15105_v41, 5  ;;  %v12639_v31 = vrot.slane %v5137_v48, 9  ;;  %v5697_v48 = vrot.slane %v5695_v28, 4  ;;  %v15113_v41 = vld [vmem:[#allocation4 + $0x38] sm:$0x1] }
 0x4fc   : > { %v5285_v47 = vsel %vm16582_vm7, %v5283_v25, %v5284_v62  ;;  %v5282_v50 = vsel %vm16582_vm7, %v12639_v31, %v5281_v21  ;;  %v15112_v21 = vld [vmem:[#allocation4 + $0x34] sm:$0xf]  ;;  %v5705_v62 = vrot.slane %v15113_v41, 5  ;;  %v5698_v31 = vrot.slane %v15114_v36, 5 }
 0x4fd   : > { %v12663_v23 = vcombine.low %v5282_v50, %v5285_v47  ;;  %v5709_v47 = vrot.slane %v15115_v56, 5  ;;  %v5696_v50 = vsel %vm16582_vm7, %v12687_v59, %v5695_v28 }
 0x4fe   : > { %v5699_v35 = vsel %vm16582_vm7, %v5697_v48, %v5698_v31  ;;  %v15121_v48 = vld [vmem:[#allocation4 + $0x68] sm:$0x1] }
 0x4ff   : > { %v12711_v54 = vcombine.low %v5696_v50, %v5699_v35 }
 0x501   : > { %13902 = vmatmul.mubr.msk.bf16.gmra.mrb[16].mxu0 %vm1449_vm12, %v12659_v0  ;;  %v5688_v0 = vrot.slane %v15108_v39, 5 }
 0x502   : > { %13905 = vmatprep.mubr.msk.bf16.mxu0 %vm1449_vm12, %v12660_v24  ;;  %v5298_v24 = vrot.slane %v15109_v33, 5  ;;  %v15117_v33 = vld [vmem:[#allocation4 + $0x50] sm:$0x1] }
 0x503   : > { %v5690_v45 = vrot.slane %v5688_v0, 4  ;;  %v5689_v29 = vsel %vm16582_vm7, %v12686_v4, %v5688_v0  ;;  %v5711_v0 = vrot.slane %v5709_v47, 4 }
 0x504   : > { %v5299_v49 = vsel %vm16582_vm7, %v5297_v40, %v5298_v24  ;;  %v5719_v24 = vrot.slane %v15117_v33, 5  ;;  %v5718_v40 = vrot.slane %v5716_v57, 4 }
 0x505   : > { %v5692_v58 = vsel %vm16582_vm7, %v5690_v45, %v5691_v38  ;;  %v12665_v8 = vcombine.low %v5296_v63, %v5299_v49  ;;  %v5712_v38 = vrot.slane %v15118_v44, 5  ;;  %v15119_v45 = vld [vmem:[#allocation4 + $0x58] sm:$0xf] }
 0x506   : > { %v12710_v2 = vcombine.low %v5689_v29, %v5692_v58  ;;  %v5723_v49 = vrot.slane %v15119_v45, 5  ;;  %v5720_v3 = vsel %vm16582_vm7, %v5718_v40, %v5719_v24  ;;  %v15120_v29 = vld [vmem:[#allocation4 + $0x64] sm:$0xf]  ;;  %v15126_v24 = vld [vmem:[#allocation4 + $0x74] sm:$0x1] }
 0x507   : > { %v5713_v4 = vsel %vm16582_vm7, %v5711_v0, %v5712_v38  ;;  %v5730_v60 = vrot.slane %v15120_v29, 5  ;;  %v15125_v0 = vld [vmem:[#allocation4 + $0x80] sm:$0x1]  ;;  %v15127_v40 = vld [vmem:[#allocation4 + $0x88] sm:$0xf] }
 0x509   : > { %13906 = vmatmul.mubr.msk.bf16.gmra.mrb[20].mxu0 %vm1449_vm12, %v12661_v22  ;;  %v5702_v22 = vrot.slane %v15112_v21, 5  ;;  %v5732_v31 = vrot.slane %v5730_v60, 4 }
 0x50a   : > { %13909 = vmatprep.mubr.msk.bf16.mxu0 %vm1449_vm12, %v12662_v17  ;;  %v5624_v17 = vld [vmem:[#allocation4 + $0x30] sm:$0xe] }
 0x50b   : > { %v12688_v25 = vrot.slane %v5624_v17, 9  ;;  %v5704_v43 = vrot.slane %v5702_v22, 4  ;;  %v5733_v17 = vrot.slane %v15121_v48, 5 }
 0x50d   : > { %v5706_v42 = vsel %vm16582_vm7, %v5704_v43, %v5705_v62  ;;  %v5703_v7 = vsel %vm16582_vm7, %v12688_v25, %v5702_v22  ;;  %v5725_v22 = vrot.slane %v5723_v49, 4  ;;  %v15122_v62 = vld [vmem:[#allocation4 + $0x5c] sm:$0x1]  ;;  %v15123_v43 = vld [vmem:[#allocation4 + $0x70] sm:$0xf]  ;;  %v5734_v56 = vsel %vm16582_vm7, %v5732_v31, %v5733_v17 }
 0x50e   : > { %v12712_v39 = vcombine.low %v5703_v7, %v5706_v42  ;;  %v5726_v59 = vrot.slane %v15122_v62, 5  ;;  %v5737_v35 = vrot.slane %v15123_v43, 5  ;;  %v15124_v7 = vld [vmem:[#allocation4 + $0x7c] sm:$0xf]  ;;  %v15130_v17 = vld [vmem:[#allocation4 + $0x8c] sm:$0x1] }
 0x50f   : > { %v15131_v31 = vld [vmem:[#allocation4 + $0xa0] sm:$0xf] }
 0x510   : > { %v5727_v25 = vsel %vm16582_vm7, %v5725_v22, %v5726_v59  ;;  %v15129_v22 = vld [vmem:[#allocation4 + $0x98] sm:$0x1] }
 0x511   : > { %13910 = vmatmul.mubr.msk.bf16.gmra.mrb[24].mxu0 %vm1449_vm12, %v12663_v23  ;;  %v5625_v23 = vld [vmem:[#allocation4 + $0x3c] sm:$0xe] }
 0x512   : > { %13913 = vmatprep.mubr.msk.bf16.mxu0 %vm1449_vm12, %v12664_v37  ;;  %v5626_v37 = vld [vmem:[#allocation4 + $0x48] sm:$0xe]  ;;  %v12689_v19 = vrot.slane %v5625_v23, 9  ;;  %v5744_v23 = vrot.slane %v15124_v7, 5 }
 0x513   : > { %v12690_v46 = vrot.slane %v5626_v37, 9  ;;  %v5747_v37 = vrot.slane %v15125_v0, 5  ;;  %v15133_v0 = vld [vmem:[#allocation4 + $0xa4] sm:$0x1] }
 0x514   : > { %v5710_v28 = vsel %vm16582_vm7, %v12689_v19, %v5709_v47  ;;  %v5740_v19 = vrot.slane %v15126_v24, 5  ;;  %v5746_v38 = vrot.slane %v5744_v23, 4 }
 0x515   : > { %v12713_v58 = vcombine.low %v5710_v28, %v5713_v4  ;;  %v5717_v63 = vsel %vm16582_vm7, %v12690_v46, %v5716_v57  ;;  %v5739_v57 = vrot.slane %v5737_v35, 4  ;;  %v5751_v4 = vrot.slane %v15127_v40, 5 }
 0x516   : > { %v12714_v21 = vcombine.low %v5717_v63, %v5720_v3  ;;  %v5748_v45 = vsel %vm16582_vm7, %v5746_v38, %v5747_v37  ;;  %v15128_v63 = vld [vmem:[#allocation4 + $0x94] sm:$0xf]  ;;  %v5768_v37 = vrot.slane %v15133_v0, 5 }
 0x517   : > { %v5741_v46 = vsel %vm16582_vm7, %v5739_v57, %v5740_v19  ;;  %v5775_v57 = vrot.slane %v16521_v61, 5 }
 0x519   : > { %13914 = vmatmul.mubr.msk.bf16.gmra.mrb[28].mxu0 %vm1449_vm12, %v12665_v8  ;;  %v5627_v8 = vld [vmem:[#allocation4 + $0x54] sm:$0xe] }
 0x51a   : > { %13925 = vmatprep.mubr.msk.bf16.mxu0 %vm1449_vm12, %v12710_v2  ;;  %v5628_v2 = vld [vmem:[#allocation4 + $0x60] sm:$0xe]  ;;  %v12691_v41 = vrot.slane %v5627_v8, 9  ;;  %v5758_v8 = vrot.slane %v15128_v63, 5  ;;  %v5789_v63 = vrot.slane %v16549_v55, 5 }
 0x51b   : > { %v12692_v36 = vrot.slane %v5628_v2, 9  ;;  %v5761_v2 = vrot.slane %v15129_v22, 5 }
 0x51c   : > { %v5724_v47 = vsel %vm16582_vm7, %v12691_v41, %v5723_v49  ;;  %v5754_v41 = vrot.slane %v15130_v17, 5  ;;  %v5760_v59 = vrot.slane %v5758_v8, 4 }
 0x51d   : > { %v12715_v42 = vcombine.low %v5724_v47, %v5727_v25  ;;  %v5731_v50 = vsel %vm16582_vm7, %v12692_v36, %v5730_v60  ;;  %v5753_v60 = vrot.slane %v5751_v4, 4  ;;  %v5765_v25 = vrot.slane %v15131_v31, 5 }
 0x51e   : > { %v12716_v9 = vcombine.low %v5731_v50, %v5734_v56  ;;  %v5762_v43 = vsel %vm16582_vm7, %v5760_v59, %v5761_v2  ;;  %v15132_v50 = vld [vmem:[#allocation4 + $0xac] sm:$0xf] }
 0x51f   : > { %v5755_v36 = vsel %vm16582_vm7, %v5753_v60, %v5754_v41  ;;  %v5793_v60 = vrot.slane %v16537_v1, 5  ;;  %v5637_v2 = vld [vmem:[#allocation4 + $0xcc] sm:$0xe] }
 0x520   : > { %v12701_v17 = vrot.slane %v5637_v2, 9 }
 0x521   : > { %13926 = vmatmul.mubr.msk.bf16.vlgmr.msra.gmra.mrb[0].mxu0 %vm1449_vm12, %v12711_v54  ;;  %v5629_v54 = vld [vmem:[#allocation4 + $0x6c] sm:$0xe]  ;;  %v5795_v41 = vrot.slane %v5793_v60, 4 }
 0x522   : > { %13929 = vmatprep.mubr.msk.bf16.mxu0 %vm1449_vm12, %v12712_v39  ;;  %v5630_v39 = vld [vmem:[#allocation4 + $0x78] sm:$0xe]  ;;  %v12693_v33 = vrot.slane %v5629_v54, 9  ;;  %v5772_v54 = vrot.slane %v15132_v50, 5 }
 0x523   : > { %v12694_v44 = vrot.slane %v5630_v39, 9 }
 0x524   : > { %v5738_v49 = vsel %vm16582_vm7, %v12693_v33, %v5737_v35  ;;  %v5774_v24 = vrot.slane %v5772_v54, 4 }
 0x525   : > { %v12717_v3 = vcombine.low %v5738_v49, %v5741_v46  ;;  %v5745_v28 = vsel %vm16582_vm7, %v12694_v44, %v5744_v23  ;;  %v5767_v23 = vrot.slane %v5765_v25, 4  ;;  %v15134_v44 = vld [vmem:[#allocation4 + $0xb8] sm:$0xf]  ;;  %v5786_v49 = vrot.slane %v16527_v11, 5 }
 0x526   : > { %v12718_v29 = vcombine.low %v5745_v28, %v5748_v45  ;;  %v5779_v38 = vrot.slane %v15134_v44, 5  ;;  %v5776_v46 = vsel %vm16582_vm7, %v5774_v24, %v5775_v57  ;;  %v5635_v45 = vld [vmem:[#allocation4 + $0xb4] sm:$0xe] }
 0x527   : > { %v5769_v19 = vsel %vm16582_vm7, %v5767_v23, %v5768_v37  ;;  %v5788_v22 = vrot.slane %v5786_v49, 4 }
 0x528   : > { %v5781_v28 = vrot.slane %v5779_v38, 4 }
 0x529   : > { %13930 = vmatmul.mubr.msk.bf16.gmra.mrb[4].mxu0 %vm1449_vm12, %v12713_v58  ;;  %v5631_v58 = vld [vmem:[#allocation4 + $0x84] sm:$0xe] }
 0x52a   : > { %13933 = vmatprep.mubr.msk.bf16.mxu0 %vm1449_vm12, %v12714_v21  ;;  %v5632_v21 = vld [vmem:[#allocation4 + $0x90] sm:$0xe]  ;;  %v12695_v48 = vrot.slane %v5631_v58, 9  ;;  %v5636_v58 = vld [vmem:[#allocation4 + $0xc0] sm:$0xe] }
 0x52b   : > { %v12696_v62 = vrot.slane %v5632_v21, 9  ;;  %v12700_v21 = vrot.slane %v5636_v58, 9 }
 0x52c   : > { %v5752_v35 = vsel %vm16582_vm7, %v12695_v48, %v5751_v4  ;;  %v5790_v48 = vsel %vm16582_vm7, %v5788_v22, %v5789_v63 }
 0x52d   : > { %v12719_v56 = vcombine.low %v5752_v35, %v5755_v36  ;;  %v5759_v47 = vsel %vm16582_vm7, %v12696_v62, %v5758_v8  ;;  %v12699_v8 = vrot.slane %v5635_v45, 9  ;;  %v5796_v62 = vrot.slane %v16560_v30, 5  ;;  %v16850_v30 = vld [vmem:[%s291_s8] ss:$0 sm:$0xff] }
 0x52e   : > { %v12720_v7 = vcombine.low %v5759_v47, %v5762_v43  ;;  %v5787_v1 = vsel %vm16582_vm7, %v12700_v21, %v5786_v49  ;;  %v5794_v36 = vsel %vm16582_vm7, %v12701_v17, %v5793_v60 }
 0x52f   : > { %v5780_v55 = vsel %vm16582_vm7, %v12699_v8, %v5779_v38  ;;  %v12724_v59 = vcombine.low %v5787_v1, %v5790_v48  ;;  %v5797_v31 = vsel %vm16582_vm7, %v5795_v41, %v5796_v62 }
 0x531   : > { %13934 = vmatmul.mubr.msk.bf16.gmra.mrb[8].mxu0 %vm1449_vm12, %v12715_v42  ;;  %v5633_v42 = vld [vmem:[#allocation4 + $0x9c] sm:$0xe] }
 0x532   : > { %13937 = vmatprep.mubr.msk.bf16.mxu0 %vm1449_vm12, %v12716_v9  ;;  %v5634_v9 = vld [vmem:[#allocation4 + $0xa8] sm:$0xe]  ;;  %v12697_v39 = vrot.slane %v5633_v42, 9 }
 0x533   : > { %v12698_v33 = vrot.slane %v5634_v9, 9 }
 0x534   : > { %v5766_v40 = vsel %vm16582_vm7, %v12697_v39, %v5765_v25  ;;  %v12725_v25 = vcombine.low %v5794_v36, %v5797_v31 }
 0x535   : > { %v12721_v4 = vcombine.low %v5766_v40, %v5769_v19  ;;  %v5773_v61 = vsel %vm16582_vm7, %v12698_v33, %v5772_v54 }
 0x539   : > { %13938 = vmatmul.mubr.msk.bf16.gmra.mrb[12].mxu0 %vm1449_vm12, %v12717_v3  ;;  %v12722_v3 = vcombine.low %v5773_v61, %v5776_v46 }
 0x53a   : > { %13941 = vmatprep.mubr.msk.bf16.mxu0 %vm1449_vm12, %v12718_v29  ;;  %v5782_v29 = vrot.slane %v16545_v51, 5 }
 0x53c   : > { %v5783_v11 = vsel %vm16582_vm7, %v5781_v28, %v5782_v29 }
 0x53d   : > { %v12723_v51 = vcombine.low %v5780_v55, %v5783_v11 }
 0x541   : > { %13942 = vmatmul.mubr.msk.bf16.gmra.mrb[16].mxu0 %vm1449_vm12, %v12719_v56 }
 0x542   : > { %13945 = vmatprep.mubr.msk.bf16.mxu0 %vm1449_vm12, %v12720_v7 }
 0x549   : > { %13946 = vmatmul.mubr.msk.bf16.gmra.mrb[20].mxu0 %vm1449_vm12, %v12721_v4 }
 0x54a   : > { %13949 = vmatprep.mubr.msk.bf16.mxu0 %vm1449_vm12, %v12722_v3 }
 0x551   : > { %13950 = vmatmul.mubr.msk.bf16.gmra.mrb[24].mxu0 %vm1449_vm12, %v12723_v51 }
 0x552   : > { %13953 = vmatprep.mubr.msk.bf16.mxu0 %vm1449_vm12, %v12724_v59 }
 0x559   : > { %13954 = vmatmul.mubr.msk.bf16.gmra.mrb[28].mxu0 %vm1449_vm12, %v12725_v25 }
 0x5f4   : > { %v13927_v43 = vpop.f32.mrb[0].mxu0 }
 0x5f5   : > { %v6129_v35 = vadd.f32 %v13927_v43, %v16850_v30  ;;  %v5961_v56 = vpop.f32.mrb[1].mxu0 }
 0x5f6   : > { %v6127_v47 = vadd.f32 %v16850_v30, %v5961_v56  ;;  %v13928_v42 = vpop.f32.mrb[2].mxu0 }
 0x5f7   : > { %v6130_v50 = vadd.f32 %v13928_v42, %v16850_v30  ;;  %6163 = vrot.lane.b32.xlu0 %v6129_v35, %s15266_s26  ;;  %v5964_v54 = vpop.f32.mrb[3].mxu0 }
 0x5f8   : > { %6159 = vst.msk [vmem:[#allocation3] sm:$0xff] %vm1449_vm12, %v6127_v47  ;;  %v6128_v7 = vadd.f32 %v16850_v30, %v5964_v54 }
 0x5f9   : > { %6165 = vrot.lane.b32.xlu1 %v6130_v50, %s15266_s26 }
 0x5fa   : > { %6160 = vst.msk [vmem:[#allocation3 + $0x40] sm:$0xff] %vm1449_vm12, %v6128_v7 }
 0x5fc   : > { %v13931_v23 = vpop.f32.mrb[4].mxu0 }
 0x5fd   : > { %v6133_v9 = vadd.f32 %v13931_v23, %v16850_v30  ;;  %v5977_v57 = vpop.f32.mrb[5].mxu0 }
 0x5fe   : > { %v6131_v39 = vadd.f32 %v16850_v30, %v5977_v57  ;;  %v13932_v0 = vpop.f32.mrb[6].mxu0 }
 0x5ff   : > { %v6134_v37 = vadd.f32 %v13932_v0, %v16850_v30  ;;  %6176 = vrot.lane.b32.xlu0 %v6133_v9, %s15266_s26  ;;  %v5980_v33 = vpop.f32.mrb[7].mxu0 }
 0x600   : > { %6172 = vst.msk [vmem:[#allocation3 + $0x8] sm:$0xff] %vm1449_vm12, %v6131_v39  ;;  %v6132_v24 = vadd.f32 %v16850_v30, %v5980_v33 }
 0x601   : > { %6178 = vrot.lane.b32.xlu1 %v6134_v37, %s15266_s26 }
 0x602   : > { %6173 = vst.msk [vmem:[#allocation3 + $0x48] sm:$0xff] %vm1449_vm12, %v6132_v24 }
 0x604   : > { %v13935_v19 = vpop.f32.mrb[8].mxu0 }
 0x605   : > { %v6137_v44 = vadd.f32 %v13935_v19, %v16850_v30  ;;  %v5993_v38 = vpop.f32.mrb[9].mxu0 }
 0x606   : > { %v6135_v46 = vadd.f32 %v16850_v30, %v5993_v38  ;;  %v13936_v40 = vpop.f32.mrb[10].mxu0 }
 0x607   : > { %v6138_v4 = vadd.f32 %v13936_v40, %v16850_v30  ;;  %6188 = vrot.lane.b32.xlu0 %v6137_v44, %s15266_s26  ;;  %v5996_v61 = vpop.f32.mrb[11].mxu0 }
 0x608   : > { %6184 = vst.msk [vmem:[#allocation3 + $0x10] sm:$0xff] %vm1449_vm12, %v6135_v46  ;;  %v6136_v45 = vadd.f32 %v16850_v30, %v5996_v61 }
 0x609   : > { %6190 = vrot.lane.b32.xlu1 %v6138_v4, %s15266_s26 }
 0x60a   : > { %6185 = vst.msk [vmem:[#allocation3 + $0x50] sm:$0xff] %vm1449_vm12, %v6136_v45 }
 0x60c   : > { %v13939_v49 = vpop.f32.mrb[12].mxu0 }
 0x60d   : > { %v6141_v3 = vadd.f32 %v13939_v49, %v16850_v30  ;;  %v6009_v28 = vpop.f32.mrb[13].mxu0 }
 0x60e   : > { %v6139_v58 = vadd.f32 %v16850_v30, %v6009_v28  ;;  %v13940_v63 = vpop.f32.mrb[14].mxu0 }
 0x60f   : > { %v6142_v8 = vadd.f32 %v13940_v63, %v16850_v30  ;;  %6200 = vrot.lane.b32.xlu0 %v6141_v3, %s15266_s26  ;;  %v6012_v29 = vpop.f32.mrb[15].mxu0 }
 0x610   : > { %6196 = vst.msk [vmem:[#allocation3 + $0x18] sm:$0xff] %vm1449_vm12, %v6139_v58  ;;  %v6140_v60 = vadd.f32 %v16850_v30, %v6012_v29 }
 0x611   : > { %6202 = vrot.lane.b32.xlu1 %v6142_v8, %s15266_s26 }
 0x612   : > { %6197 = vst.msk [vmem:[#allocation3 + $0x58] sm:$0xff] %vm1449_vm12, %v6140_v60 }
 0x614   : > { %v13943_v21 = vpop.f32.mrb[16].mxu0 }
 0x615   : > { %v6145_v22 = vadd.f32 %v13943_v21, %v16850_v30  ;;  %v6025_v2 = vpop.f32.mrb[17].mxu0 }
 0x616   : > { %v6143_v11 = vadd.f32 %v16850_v30, %v6025_v2  ;;  %v13944_v48 = vpop.f32.mrb[18].mxu0 }
 0x617   : > { %v6146_v55 = vadd.f32 %v13944_v48, %v16850_v30  ;;  %6212 = vrot.lane.b32.xlu0 %v6145_v22, %s15266_s26  ;;  %v6028_v17 = vpop.f32.mrb[19].mxu0 }
 0x618   : > { %6208 = vst.msk [vmem:[#allocation3 + $0x20] sm:$0xff] %vm1449_vm12, %v6143_v11  ;;  %v6144_v41 = vadd.f32 %v16850_v30, %v6028_v17 }
 0x619   : > { %6214 = vrot.lane.b32.xlu1 %v6146_v55, %s15266_s26 }
 0x61a   : > { %6209 = vst.msk [vmem:[#allocation3 + $0x60] sm:$0xff] %vm1449_vm12, %v6144_v41 }
 0x61c   : > { %v13947_v62 = vpop.f32.mrb[20].mxu0 }
 0x61d   : > { %v6149_v51 = vadd.f32 %v13947_v62, %v16850_v30  ;;  %v6041_v1 = vpop.f32.mrb[21].mxu0 }
 0x61e   : > { %v6147_v59 = vadd.f32 %v16850_v30, %v6041_v1  ;;  %v13948_v36 = vpop.f32.mrb[22].mxu0 }
 0x61f   : > { %v6150_v31 = vadd.f32 %v13948_v36, %v16850_v30  ;;  %6224 = vrot.lane.b32.xlu0 %v6149_v51, %s15266_s26  ;;  %v6044_v25 = vpop.f32.mrb[23].mxu0 }
 0x620   : > { %6220 = vst.msk [vmem:[#allocation3 + $0x28] sm:$0xff] %vm1449_vm12, %v6147_v59  ;;  %v6148_v43 = vadd.f32 %v16850_v30, %v6044_v25 }
 0x621   : > { %6226 = vrot.lane.b32.xlu1 %v6150_v31, %s15266_s26 }
 0x622   : > { %6221 = vst.msk [vmem:[#allocation3 + $0x68] sm:$0xff] %vm1449_vm12, %v6148_v43 }
 0x624   : > { %v13951_v35 = vpop.f32.mrb[24].mxu0 }
 0x625   : > { %v6153_v56 = vadd.f32 %v13951_v35, %v16850_v30  ;;  %v6057_v47 = vpop.f32.mrb[25].mxu0 }
 0x626   : > { %v6151_v42 = vadd.f32 %v16850_v30, %v6057_v47  ;;  %v13952_v50 = vpop.f32.mrb[26].mxu0 }
 0x627   : > { %v6154_v54 = vadd.f32 %v13952_v50, %v16850_v30  ;;  %6236 = vrot.lane.b32.xlu0 %v6153_v56, %s15266_s26  ;;  %v6060_v7 = vpop.f32.mrb[27].mxu0 }
 0x628   : > { %6232 = vst.msk [vmem:[#allocation3 + $0x30] sm:$0xff] %vm1449_vm12, %v6151_v42  ;;  %v6152_v23 = vadd.f32 %v16850_v30, %v6060_v7 }
 0x629   : > { %6238 = vrot.lane.b32.xlu1 %v6154_v54, %s15266_s26 }
 0x62a   : > { %6233 = vst.msk [vmem:[#allocation3 + $0x70] sm:$0xff] %vm1449_vm12, %v6152_v23 }
 0x62c   : > { %v13955_v9 = vpop.f32.mrb[28].mxu0 }
 0x62d   : > { %v6157_v57 = vadd.f32 %v13955_v9, %v16850_v30  ;;  %v6073_v39 = vpop.f32.mrb[29].mxu0 }
 0x62e   : > { %v6155_v0 = vadd.f32 %v16850_v30, %v6073_v39  ;;  %v13956_v37 = vpop.f32.mrb[30].mxu0 }
 0x62f   : > { %v6158_v33 = vadd.f32 %v13956_v37, %v16850_v30  ;;  %6248 = vrot.lane.b32.xlu0 %v6157_v57, %s15266_s26  ;;  %v6076_v24 = vpop.f32.mrb[31].mxu0 }
 0x630   : > { %6244 = vst.msk [vmem:[#allocation3 + $0x38] sm:$0xff] %vm1449_vm12, %v6155_v0  ;;  %v6156_v19 = vadd.f32 %v16850_v30, %v6076_v24 }
 0x631   : > { %6250 = vrot.lane.b32.xlu1 %v6158_v33, %s15266_s26 }
 0x632   : > { %6245 = vst.msk [vmem:[#allocation3 + $0x78] sm:$0xff] %vm1449_vm12, %v6156_v19 }
 0x669   : > { %v6164_v44 = vpop.permute.xlu0 %6163 }
 0x66a   : > { %6170 = vst.msk [vmem:[#allocation3] sm:$0xff] %vm6169_vm8, %v6164_v44 }
 0x66b   : > { %v6166_v38 = vpop.permute.xlu1 %6165 }
 0x66c   : > { %6171 = vst.msk [vmem:[#allocation3 + $0x40] sm:$0xff] %vm6169_vm8, %v6166_v38 }
 0x671   : > { %v6177_v46 = vpop.permute.xlu0 %6176  ;;  %v16919_v4 = vld [vmem:[#allocation3] sm:$0xff] }
 0x672   : > { %6182 = vst.msk [vmem:[#allocation3 + $0x8] sm:$0xff] %vm6169_vm8, %v6177_v46 }
 0x673   : > { %v6179_v40 = vpop.permute.xlu1 %6178  ;;  %v16921_v61 = vld [vmem:[#allocation3 + $0x40] sm:$0xff] }
 0x674   : > { %6183 = vst.msk [vmem:[#allocation3 + $0x48] sm:$0xff] %vm6169_vm8, %v6179_v40  ;;  %v6272_v30 = vadd.f32 %v16921_v61, %v16919_v4 }
 0x676   : > { %v6273_v45 = vrot.slane %v6272_v30, 4 }
 0x678   : > { %v6274_v49 = vadd.f32 %v6273_v45, %v6272_v30 }
 0x679   : > { %v6189_v3 = vpop.permute.xlu0 %6188  ;;  %v16927_v63 = vld [vmem:[#allocation3 + $0x8] sm:$0xff] }
 0x67a   : > { %6194 = vst.msk [vmem:[#allocation3 + $0x10] sm:$0xff] %vm6169_vm8, %v6189_v3  ;;  %v6275_v28 = vrot.slane %v6274_v49, 2 }
 0x67b   : > { %v6191_v58 = vpop.permute.xlu1 %6190  ;;  %v16929_v8 = vld [vmem:[#allocation3 + $0x48] sm:$0xff] }
 0x67c   : > { %6195 = vst.msk [vmem:[#allocation3 + $0x50] sm:$0xff] %vm6169_vm8, %v6191_v58  ;;  %v6276_v29 = vadd.f32 %v6275_v28, %v6274_v49  ;;  %v6279_v60 = vadd.f32 %v16929_v8, %v16927_v63 }
 0x67e   : > { %v6277_v21 = vrot.slane %v6276_v29, 1  ;;  %v6280_v22 = vrot.slane %v6279_v60, 4 }
 0x680   : > { %v16934_v2 = vadd.f32 %v6277_v21, %v6276_v29  ;;  %v6281_v11 = vadd.f32 %v6280_v22, %v6279_v60 }
 0x681   : > { %v6201_v48 = vpop.permute.xlu0 %6200  ;;  %v16939_v41 = vld [vmem:[#allocation3 + $0x10] sm:$0xff] }
 0x682   : > { %6206 = vst.msk [vmem:[#allocation3 + $0x18] sm:$0xff] %vm6169_vm8, %v6201_v48  ;;  %6329 = vrot.lane.b32.xlu0 %v16934_v2, %s15266_s26  ;;  %v6282_v55 = vrot.slane %v6281_v11, 2 }
 0x683   : > { %v6203_v17 = vpop.permute.xlu1 %6202  ;;  %v16941_v62 = vld [vmem:[#allocation3 + $0x50] sm:$0xff] }
 0x684   : > { %6207 = vst.msk [vmem:[#allocation3 + $0x58] sm:$0xff] %vm6169_vm8, %v6203_v17  ;;  %v6283_v51 = vadd.f32 %v6282_v55, %v6281_v11  ;;  %v6286_v1 = vadd.f32 %v16941_v62, %v16939_v41 }
 0x686   : > { %v6284_v59 = vrot.slane %v6283_v51, 1  ;;  %v6287_v36 = vrot.slane %v6286_v1, 4 }
 0x688   : > { %v16946_v31 = vadd.f32 %v6284_v59, %v6283_v51  ;;  %v6288_v25 = vadd.f32 %v6287_v36, %v6286_v1 }
 0x689   : > { %v6213_v43 = vpop.permute.xlu0 %6212  ;;  %v16951_v47 = vld [vmem:[#allocation3 + $0x18] sm:$0xff] }
 0x68a   : > { %6218 = vst.msk [vmem:[#allocation3 + $0x20] sm:$0xff] %vm6169_vm8, %v6213_v43  ;;  %6335 = vrot.lane.b32.xlu1 %v16946_v31, %s15266_s26  ;;  %v6289_v35 = vrot.slane %v6288_v25, 2 }
 0x68b   : > { %v6215_v56 = vpop.permute.xlu1 %6214  ;;  %v16953_v42 = vld [vmem:[#allocation3 + $0x58] sm:$0xff] }
 0x68c   : > { %6219 = vst.msk [vmem:[#allocation3 + $0x60] sm:$0xff] %vm6169_vm8, %v6215_v56  ;;  %v6290_v50 = vadd.f32 %v6289_v35, %v6288_v25  ;;  %v6293_v54 = vadd.f32 %v16953_v42, %v16951_v47 }
 0x68e   : > { %v6291_v7 = vrot.slane %v6290_v50, 1  ;;  %v6294_v23 = vrot.slane %v6293_v54, 4 }
 0x690   : > { %v16958_v9 = vadd.f32 %v6291_v7, %v6290_v50  ;;  %v6295_v57 = vadd.f32 %v6294_v23, %v6293_v54 }
 0x691   : > { %v6225_v39 = vpop.permute.xlu0 %6224  ;;  %v16963_v33 = vld [vmem:[#allocation3 + $0x20] sm:$0xff] }
 0x692   : > { %6230 = vst.msk [vmem:[#allocation3 + $0x28] sm:$0xff] %vm6169_vm8, %v6225_v39  ;;  %6341 = vrot.lane.b32.xlu0 %v16958_v9, %s15266_s26  ;;  %v6296_v0 = vrot.slane %v6295_v57, 2 }
 0x693   : > { %v6227_v37 = vpop.permute.xlu1 %6226  ;;  %v16965_v24 = vld [vmem:[#allocation3 + $0x60] sm:$0xff] }
 0x694   : > { %6231 = vst.msk [vmem:[#allocation3 + $0x68] sm:$0xff] %vm6169_vm8, %v6227_v37  ;;  %v6297_v19 = vadd.f32 %v6296_v0, %v6295_v57  ;;  %v6300_v44 = vadd.f32 %v16965_v24, %v16963_v33 }
 0x696   : > { %v6298_v38 = vrot.slane %v6297_v19, 1  ;;  %v6301_v46 = vrot.slane %v6300_v44, 4 }
 0x698   : > { %v6299_v40 = vadd.f32 %v6298_v38, %v6297_v19  ;;  %v6302_v30 = vadd.f32 %v6301_v46, %v6300_v44 }
 0x699   : > { %v6237_v45 = vpop.permute.xlu0 %6236  ;;  %v16972_v28 = vld [vmem:[#allocation3 + $0x28] sm:$0xff] }
 0x69a   : > { %6242 = vst.msk [vmem:[#allocation3 + $0x30] sm:$0xff] %vm6169_vm8, %v6237_v45  ;;  %6347 = vrot.lane.b32.xlu1 %v6299_v40, %s15266_s26  ;;  %v6303_v49 = vrot.slane %v6302_v30, 2 }
 0x69b   : > { %v6239_v3 = vpop.permute.xlu1 %6238  ;;  %v16974_v58 = vld [vmem:[#allocation3 + $0x68] sm:$0xff] }
 0x69c   : > { %6243 = vst.msk [vmem:[#allocation3 + $0x70] sm:$0xff] %vm6169_vm8, %v6239_v3  ;;  %v6304_v29 = vadd.f32 %v6303_v49, %v6302_v30  ;;  %v6307_v60 = vadd.f32 %v16974_v58, %v16972_v28 }
 0x69e   : > { %v6305_v21 = vrot.slane %v6304_v29, 1  ;;  %v6308_v22 = vrot.slane %v6307_v60, 4 }
 0x6a0   : > { %v6306_v11 = vadd.f32 %v6305_v21, %v6304_v29  ;;  %v6309_v48 = vadd.f32 %v6308_v22, %v6307_v60 }
 0x6a1   : > { %v6249_v55 = vpop.permute.xlu0 %6248  ;;  %v16981_v1 = vld [vmem:[#allocation3 + $0x30] sm:$0xff] }
 0x6a2   : > { %6254 = vst.msk [vmem:[#allocation3 + $0x38] sm:$0xff] %vm6169_vm8, %v6249_v55  ;;  %6353 = vrot.lane.b32.xlu0 %v6306_v11, %s15266_s26  ;;  %v6310_v17 = vrot.slane %v6309_v48, 2 }
 0x6a3   : > { %v6251_v51 = vpop.permute.xlu1 %6250  ;;  %v16983_v59 = vld [vmem:[#allocation3 + $0x70] sm:$0xff] }
 0x6a4   : > { %6255 = vst.msk [vmem:[#allocation3 + $0x78] sm:$0xff] %vm6169_vm8, %v6251_v51  ;;  %v6311_v36 = vadd.f32 %v6310_v17, %v6309_v48  ;;  %v6314_v25 = vadd.f32 %v16983_v59, %v16981_v1 }
 0x6a6   : > { %v6312_v43 = vrot.slane %v6311_v36, 1  ;;  %v6315_v35 = vrot.slane %v6314_v25, 4 }
 0x6a8   : > { %v6313_v56 = vadd.f32 %v6312_v43, %v6311_v36  ;;  %v6316_v50 = vadd.f32 %v6315_v35, %v6314_v25 }
 0x6a9   : > { %v16989_v7 = vld [vmem:[#allocation3 + $0x38] sm:$0xff] }
 0x6aa   : > { %6359 = vrot.lane.b32.xlu1 %v6313_v56, %s15266_s26  ;;  %v6317_v54 = vrot.slane %v6316_v50, 2 }
 0x6ab   : > { %v16991_v23 = vld [vmem:[#allocation3 + $0x78] sm:$0xff] }
 0x6ac   : > { %v6318_v57 = vadd.f32 %v6317_v54, %v6316_v50  ;;  %v6321_v39 = vadd.f32 %v16991_v23, %v16989_v7 }
 0x6ae   : > { %v6319_v0 = vrot.slane %v6318_v57, 1  ;;  %v6322_v37 = vrot.slane %v6321_v39, 4 }
 0x6b0   : > { %v6320_v19 = vadd.f32 %v6319_v0, %v6318_v57  ;;  %v6323_v44 = vadd.f32 %v6322_v37, %v6321_v39 }
 0x6b2   : > { %6365 = vrot.lane.b32.xlu0 %v6320_v19, %s15266_s26  ;;  %v6324_v38 = vrot.slane %v6323_v44, 2 }
 0x6b4   : > { %v6325_v46 = vadd.f32 %v6324_v38, %v6323_v44 }
 0x6b6   : > { %v6326_v30 = vrot.slane %v6325_v46, 1 }
 0x6b8   : > { %v6327_v45 = vadd.f32 %v6326_v30, %v6325_v46 }
 0x6ba   : > { %6371 = vrot.lane.b32.xlu1 %v6327_v45, %s15266_s26 }
 0x6f4   : > { %v6330_v49 = vpop.permute.xlu0 %6329 }
 0x6f5   : > { %v6332_v3 = vadd.f32 %v6330_v49, %v16934_v2 }
 0x6f7   : > { %v6333_v60 = vadd.f32 %v6332_v3, %v16946_v31 }
 0x6fc   : > { %v6336_v29 = vpop.permute.xlu1 %6335 }
 0x6fd   : > { %v6338_v21 = vadd.f32 %v6336_v29, %v6333_v60 }
 0x6ff   : > { %v6339_v48 = vadd.f32 %v6338_v21, %v16958_v9 }
 0x704   : > { %v6342_v22 = vpop.permute.xlu0 %6341 }
 0x705   : > { %v6344_v55 = vadd.f32 %v6342_v22, %v6339_v48 }
 0x707   : > { %v6345_v51 = vadd.f32 %v6344_v55, %v6299_v40 }
 0x70c   : > { %v6348_v17 = vpop.permute.xlu1 %6347 }
 0x70d   : > { %v6350_v36 = vadd.f32 %v6348_v17, %v6345_v51 }
 0x70f   : > { %v6351_v43 = vadd.f32 %v6350_v36, %v6306_v11 }
 0x714   : > { %v6354_v25 = vpop.permute.xlu0 %6353 }
 0x715   : > { %v6356_v35 = vadd.f32 %v6354_v25, %v6351_v43 }
 0x717   : > { %v6357_v54 = vadd.f32 %v6356_v35, %v6313_v56 }
 0x71c   : > { %v6360_v50 = vpop.permute.xlu1 %6359 }
 0x71d   : > { %v6362_v57 = vadd.f32 %v6360_v50, %v6357_v54 }
 0x71f   : > { %v6363_v0 = vadd.f32 %v6362_v57, %v6320_v19 }
 0x724   : > { %v6366_v39 = vpop.permute.xlu0 %6365 }
 0x725   : > { %v6368_v2 = vadd.f32 %v6366_v39, %v6363_v0 }
 0x727   : > { %v6369_v37 = vadd.f32 %v6368_v2, %v6327_v45 }
 0x72c   : > { %v6372_v44 = vpop.permute.xlu1 %6371 }
 0x72d   : > { %v6374_v31 = vadd.f32 %v6372_v44, %v6369_v37 }
 0x72f   : > { %v6375_v38 = vmul.f32 0.00390625, %v6374_v31 }
 0x731   : > { %6376 = vst.msk [vmem:[#allocation5] sm:$0x1] %vm15492_vm2, %v6375_v38  ;;  %6396 = vst.msk [vmem:[#allocation5 + $0x1] sm:$0x1] %vm15492_vm2, %v6375_v38  ;;  %v6384_v9 = vrot.slane %v6375_v38, %v15490_v5 }
 0x732   : > { %6398 = vst.msk [vmem:[#allocation5 + $0x2] sm:$0x1] %vm15492_vm2, %v6375_v38  ;;  %6400 = vst.msk [vmem:[#allocation5 + $0x3] sm:$0x1] %vm15492_vm2, %v6375_v38 }
 0x733   : > { %6402 = vst.msk [vmem:[#allocation5 + $0x4] sm:$0x1] %vm15492_vm2, %v6375_v38  ;;  %6404 = vst.msk [vmem:[#allocation5 + $0x5] sm:$0x1] %vm15492_vm2, %v6375_v38  ;;  %v6391_v40 = vrot.slane %v6384_v9, %v15490_v5 }
 0x734   : > { %6406 = vst.msk [vmem:[#allocation5 + $0x6] sm:$0x1] %vm15492_vm2, %v6375_v38  ;;  %6408 = vst.msk [vmem:[#allocation5 + $0x7] sm:$0x1] %vm15492_vm2, %v6375_v38 }
 0x735   : > { %6392 = vrot.lane.b32.xlu0 %v6391_v40, %s15266_s26 }
 0x7a7   : > { %v6393_v11 = vpop.permute.xlu0 %6392 }
 0x7a8   : > { %6395 = vst.msk [vmem:[#allocation5] sm:$0x1] %vm15515_vm5, %v6393_v11  ;;  %6397 = vst.msk [vmem:[#allocation5 + $0x1] sm:$0x1] %vm15515_vm5, %v6393_v11 }
 0x7a9   : > { %6399 = vst.msk [vmem:[#allocation5 + $0x2] sm:$0x1] %vm15515_vm5, %v6393_v11  ;;  %6401 = vst.msk [vmem:[#allocation5 + $0x3] sm:$0x1] %vm15515_vm5, %v6393_v11 }
 0x7aa   : > { %6403 = vst.msk [vmem:[#allocation5 + $0x4] sm:$0x1] %vm15515_vm5, %v6393_v11  ;;  %6405 = vst.msk [vmem:[#allocation5 + $0x5] sm:$0x1] %vm15515_vm5, %v6393_v11 }
 0x7ab   : > { %6407 = vst.msk [vmem:[#allocation5 + $0x6] sm:$0x1] %vm15515_vm5, %v6393_v11  ;;  %6409 = vst.msk [vmem:[#allocation5 + $0x7] sm:$0x1] %vm15515_vm5, %v6393_v11 }
 0x7b2   : > { %v6410_v56 = vld [vmem:[#allocation5] sm:$0xff] }
 0x7b3   : > { %v6419_v19 = vrot.slane %v6410_v56, %v15539_v14  ;;  %v6415_v46 = vrot.slane %v6410_v56, %v15535_v12  ;;  %v6427_v30 = vrot.slane %v6410_v56, %v15541_v15  ;;  %v6423_v45 = vrot.slane %v6410_v56, %v15537_v13 }
 0x7b4   : > { %v6435_v49 = vrot.slane %v6410_v56, %v15543_v16  ;;  %v6431_v3 = vrot.slane %v6410_v56, %v15545_v20  ;;  %v6443_v29 = vrot.slane %v6410_v56, %v15547_v26  ;;  %v6439_v60 = vrot.slane %v6410_v56, %v15549_v27 }
 0x7b5   : > { %v17044_v21 = vsub.f32 %v16927_v63, %v6419_v19  ;;  %v17047_v22 = vsub.f32 %v16929_v8, %v6419_v19  ;;  %v17050_v48 = vsub.f32 %v16919_v4, %v6415_v46  ;;  %v17053_v55 = vsub.f32 %v16921_v61, %v6415_v46 }
 0x7b6   : > { %v17056_v17 = vsub.f32 %v16951_v47, %v6427_v30  ;;  %v17059_v51 = vsub.f32 %v16953_v42, %v6427_v30  ;;  %v17062_v36 = vsub.f32 %v16939_v41, %v6423_v45  ;;  %v17065_v63 = vsub.f32 %v16941_v62, %v6423_v45 }
 0x7b7   : > { %v6469_v8 = vmul.f32 %v17044_v21, %v17044_v21  ;;  %v6477_v4 = vmul.f32 %v17047_v22, %v17047_v22  ;;  %v6468_v61 = vmul.f32 %v17050_v48, %v17050_v48  ;;  %v6476_v47 = vmul.f32 %v17053_v55, %v17053_v55 }
 0x7b8   : > { %v6471_v42 = vmul.f32 %v17056_v17, %v17056_v17  ;;  %v6479_v41 = vmul.f32 %v17059_v51, %v17059_v51  ;;  %v6470_v62 = vmul.f32 %v17062_v36, %v17062_v36  ;;  %v6478_v25 = vmul.f32 %v17065_v63, %v17065_v63 }
 0x7b9   : > { %v6491_v43 = vadd.f32 %v6477_v4, %v6469_v8  ;;  %v6484_v35 = vadd.f32 %v6476_v47, %v6468_v61  ;;  %v17084_v50 = vsub.f32 %v16972_v28, %v6435_v49  ;;  %v17087_v54 = vsub.f32 %v16974_v58, %v6435_v49 }
 0x7ba   : > { %v6505_v57 = vadd.f32 %v6479_v41, %v6471_v42  ;;  %v6498_v39 = vadd.f32 %v6478_v25, %v6470_v62  ;;  %v17090_v0 = vsub.f32 %v16963_v33, %v6431_v3  ;;  %v17093_v2 = vsub.f32 %v16965_v24, %v6431_v3 }
 0x7bb   : > { %v6492_v37 = vrot.slane %v6491_v43, 4  ;;  %v6485_v44 = vrot.slane %v6484_v35, 4  ;;  %v6473_v31 = vmul.f32 %v17084_v50, %v17084_v50  ;;  %v6481_v28 = vmul.f32 %v17087_v54, %v17087_v54 }
 0x7bc   : > { %v6506_v38 = vrot.slane %v6505_v57, 4  ;;  %v6499_v9 = vrot.slane %v6498_v39, 4  ;;  %v6472_v58 = vmul.f32 %v17090_v0, %v17090_v0  ;;  %v6480_v33 = vmul.f32 %v17093_v2, %v17093_v2 }
 0x7bd   : > { %v6493_v40 = vadd.f32 %v6492_v37, %v6491_v43  ;;  %v6486_v11 = vadd.f32 %v6485_v44, %v6484_v35  ;;  %v6519_v24 = vadd.f32 %v6481_v28, %v6473_v31  ;;  %v17104_v56 = vsub.f32 %v16989_v7, %v6443_v29 }
 0x7be   : > { %v6507_v19 = vadd.f32 %v6506_v38, %v6505_v57  ;;  %v6500_v46 = vadd.f32 %v6499_v9, %v6498_v39  ;;  %v6512_v30 = vadd.f32 %v6480_v33, %v6472_v58  ;;  %v17107_v45 = vsub.f32 %v16991_v23, %v6443_v29 }
 0x7bf   : > { %v6494_v49 = vrot.slane %v6493_v40, 2  ;;  %v6487_v3 = vrot.slane %v6486_v11, 2  ;;  %v6520_v8 = vrot.slane %v6519_v24, 4  ;;  %v6475_v4 = vmul.f32 %v17104_v56, %v17104_v56 }
 0x7c0   : > { %v6508_v61 = vrot.slane %v6507_v19, 2  ;;  %v6501_v47 = vrot.slane %v6500_v46, 2  ;;  %v6513_v42 = vrot.slane %v6512_v30, 4  ;;  %v6483_v41 = vmul.f32 %v17107_v45, %v17107_v45 }
 0x7c1   : > { %v6495_v7 = vadd.f32 %v6494_v49, %v6493_v40  ;;  %v6488_v62 = vadd.f32 %v6487_v3, %v6486_v11  ;;  %v6521_v25 = vadd.f32 %v6520_v8, %v6519_v24  ;;  %v17114_v43 = vsub.f32 %v16981_v1, %v6439_v60 }
 0x7c2   : > { %v6509_v23 = vadd.f32 %v6508_v61, %v6507_v19  ;;  %v6502_v29 = vadd.f32 %v6501_v47, %v6500_v46  ;;  %v6514_v35 = vadd.f32 %v6513_v42, %v6512_v30  ;;  %v6533_v57 = vadd.f32 %v6483_v41, %v6475_v4 }
 0x7c3   : > { %v6496_v39 = vrot.slane %v6495_v7, 1  ;;  %v6489_v37 = vrot.slane %v6488_v62, 1  ;;  %v6522_v44 = vrot.slane %v6521_v25, 2  ;;  %v17117_v31 = vsub.f32 %v16983_v59, %v6439_v60 }
 0x7c4   : > { %v6510_v28 = vrot.slane %v6509_v23, 1  ;;  %v6503_v38 = vrot.slane %v6502_v29, 1  ;;  %v6515_v9 = vrot.slane %v6514_v35, 2  ;;  %v6534_v58 = vrot.slane %v6533_v57, 4 }
 0x7c5   : > { %v6497_v33 = vadd.f32 %v6496_v39, %v6495_v7  ;;  %v6490_v40 = vadd.f32 %v6489_v37, %v6488_v62  ;;  %v6523_v11 = vadd.f32 %v6522_v44, %v6521_v25  ;;  %v6474_v1 = vmul.f32 %v17114_v43, %v17114_v43 }
 0x7c6   : > { %v6516_v24 = vadd.f32 %v6515_v9, %v6514_v35  ;;  %v6535_v19 = vadd.f32 %v6534_v58, %v6533_v57  ;;  %v6482_v59 = vmul.f32 %v17117_v31, %v17117_v31  ;;  %v6511_v60 = vadd.f32 %v6510_v28, %v6509_v23 }
 0x7c7   : > { %6547 = vrot.lane.b32.xlu0 %v6497_v33, %s15266_s26  ;;  %6541 = vrot.lane.b32.xlu1 %v6490_v40, %s15266_s26  ;;  %v6504_v30 = vadd.f32 %v6503_v38, %v6502_v29  ;;  %v6524_v49 = vrot.slane %v6523_v11, 1 }
 0x7c8   : > { %v6536_v46 = vrot.slane %v6535_v19, 2  ;;  %v6517_v3 = vrot.slane %v6516_v24, 1  ;;  %v6526_v8 = vadd.f32 %v6482_v59, %v6474_v1 }
 0x7c9   : > { %v6525_v47 = vadd.f32 %v6524_v49, %v6523_v11 }
 0x7ca   : > { %v6537_v4 = vadd.f32 %v6536_v46, %v6535_v19  ;;  %v6527_v61 = vrot.slane %v6526_v8, 4  ;;  %v6518_v42 = vadd.f32 %v6517_v3, %v6516_v24 }
 0x7cb   : > { %6559 = vrot.lane.b32.xlu0 %v6511_v60, %s15266_s26  ;;  %6553 = vrot.lane.b32.xlu1 %v6504_v30, %s15266_s26 }
 0x7cc   : > { %v6538_v41 = vrot.slane %v6537_v4, 1  ;;  %v6528_v7 = vadd.f32 %v6527_v61, %v6526_v8 }
 0x7ce   : > { %v6529_v62 = vrot.slane %v6528_v7, 2  ;;  %v6539_v25 = vadd.f32 %v6538_v41, %v6537_v4 }
 0x7cf   : > { %6571 = vrot.lane.b32.xlu0 %v6525_v47, %s15266_s26  ;;  %6565 = vrot.lane.b32.xlu1 %v6518_v42, %s15266_s26 }
 0x7d0   : > { %v6530_v23 = vadd.f32 %v6529_v62, %v6528_v7  ;;  %v14959_v62 = vld [vmem:[%s15356_s17 + $0x28] sm:$0xff]  }
 0x7d2   : > { %v6531_v29 = vrot.slane %v6530_v23, 1 }
 0x7d3   : > { %6583 = vrot.lane.b32.xlu0 %v6539_v25, %s15266_s26 }
 0x7d4   : > { %v6532_v35 = vadd.f32 %v6531_v29, %v6530_v23 }
 0x7d6   : > { %6577 = vrot.lane.b32.xlu1 %v6532_v35, %s15266_s26 }
 0x839   : > { %v6542_v57 = vpop.permute.xlu1 %6541  ;;  %v6548_v44 = vpop.permute.xlu0 %6547 }
 0x83a   : > { %v6544_v39 = vadd.f32 %v6542_v57, %v6490_v40 }
 0x83c   : > { %v6545_v37 = vadd.f32 %v6544_v39, %v6497_v33 }
 0x83d   : > { %v6554_v9 = vpop.permute.xlu1 %6553  ;;  %v6560_v1 = vpop.permute.xlu0 %6559 }
 0x83e   : > { %v6550_v28 = vadd.f32 %v6548_v44, %v6545_v37 }
 0x840   : > { %v6551_v38 = vadd.f32 %v6550_v28, %v6504_v30 }
 0x841   : > { %v6566_v59 = vpop.permute.xlu1 %6565  ;;  %v6572_v3 = vpop.permute.xlu0 %6571 }
 0x842   : > { %v6556_v58 = vadd.f32 %v6554_v9, %v6551_v38  ;;  %v14960_v38 = vld [vmem:[%s15356_s17 + $0x30] sm:$0xff]  }
 0x844   : > { %v6557_v11 = vadd.f32 %v6556_v58, %v6511_v60 }
 0x845   : > { %v6584_v33 = vpop.permute.xlu0 %6583 }
 0x846   : > { %v6562_v24 = vadd.f32 %v6560_v1, %v6557_v11 }
 0x848   : > { %v6563_v19 = vadd.f32 %v6562_v24, %v6518_v42  ;;  %v6578_v61 = vpop.permute.xlu1 %6577  ;;  %v14958_v42 = vld [vmem:[%s15356_s17 + $0x20] sm:$0xff]  }
 0x849   : > { %13957 = vmatprep.subr.bf16.mxu1 %v14958_v42 }
 0x84a   : > { %v6568_v46 = vadd.f32 %v6566_v59, %v6563_v19  ;;  %13958 = vmatpush3.bf16.msra.mxu1 %v14958_v42 }
 0x84b   : > { %13959 = vmatprep.subr.bf16.mxu1 %v14959_v62 }
 0x84c   : > { %v6569_v49 = vadd.f32 %v6568_v46, %v6525_v47 }
 0x84e   : > { %v6574_v8 = vadd.f32 %v6572_v3, %v6569_v49  ;;  %13960 = vmatpush3.bf16.msra.mxu1 %v14959_v62  ;;  %v17201_v62 = vld [vmem:[%s15356_s17] sm:$0xff]  }
 0x84f   : > { %13961 = vmatprep.subr.bf16.mxu1 %v14960_v38 }
 0x850   : > { %v6575_v4 = vadd.f32 %v6574_v8, %v6532_v35 }
 0x852   : > { %v6580_v41 = vadd.f32 %v6578_v61, %v6575_v4  ;;  %13962 = vmatpush3.bf16.msra.mxu1 %v14960_v38 }
 0x854   : > { %v6581_v40 = vadd.f32 %v6580_v41, %v6539_v25 }
 0x856   : > { %v6586_v7 = vadd.f32 %v6584_v33, %v6581_v40 }
 0x858   : > { %v6587_v30 = vmul.f32 0.00390625, %v6586_v7 }
 0x85a   : > { %6588 = vst.msk [vmem:[#allocation5] sm:$0x1] %vm15492_vm2, %v6587_v30  ;;  %6608 = vst.msk [vmem:[#allocation5 + $0x1] sm:$0x1] %vm15492_vm2, %v6587_v30  ;;  %v6596_v60 = vrot.slane %v6587_v30, %v15490_v5 }
 0x85b   : > { %6610 = vst.msk [vmem:[#allocation5 + $0x2] sm:$0x1] %vm15492_vm2, %v6587_v30  ;;  %6612 = vst.msk [vmem:[#allocation5 + $0x3] sm:$0x1] %vm15492_vm2, %v6587_v30 }
 0x85c   : > { %6614 = vst.msk [vmem:[#allocation5 + $0x4] sm:$0x1] %vm15492_vm2, %v6587_v30  ;;  %6616 = vst.msk [vmem:[#allocation5 + $0x5] sm:$0x1] %vm15492_vm2, %v6587_v30  ;;  %v6603_v47 = vrot.slane %v6596_v60, %v15490_v5 }
 0x85d   : > { %6618 = vst.msk [vmem:[#allocation5 + $0x6] sm:$0x1] %vm15492_vm2, %v6587_v30  ;;  %6620 = vst.msk [vmem:[#allocation5 + $0x7] sm:$0x1] %vm15492_vm2, %v6587_v30 }
 0x85e   : > { %6604 = vrot.lane.b32.xlu1 %v6603_v47, %s15266_s26 }
 0x8d0   : > { %v6605_v25 = vpop.permute.xlu1 %6604 }
 0x8d1   : > { %6607 = vst.msk [vmem:[#allocation5] sm:$0x1] %vm15515_vm5, %v6605_v25  ;;  %6609 = vst.msk [vmem:[#allocation5 + $0x1] sm:$0x1] %vm15515_vm5, %v6605_v25 }
 0x8d2   : > { %6611 = vst.msk [vmem:[#allocation5 + $0x2] sm:$0x1] %vm15515_vm5, %v6605_v25  ;;  %6613 = vst.msk [vmem:[#allocation5 + $0x3] sm:$0x1] %vm15515_vm5, %v6605_v25 }
 0x8d3   : > { %6615 = vst.msk [vmem:[#allocation5 + $0x4] sm:$0x1] %vm15515_vm5, %v6605_v25  ;;  %6617 = vst.msk [vmem:[#allocation5 + $0x5] sm:$0x1] %vm15515_vm5, %v6605_v25 }
 0x8d4   : > { %6619 = vst.msk [vmem:[#allocation5 + $0x6] sm:$0x1] %vm15515_vm5, %v6605_v25  ;;  %6621 = vst.msk [vmem:[#allocation5 + $0x7] sm:$0x1] %vm15515_vm5, %v6605_v25 }
 0x8db   : > { %v6622_v5 = vld [vmem:[#allocation5] sm:$0xff] }
 0x8dc   : > { %v6623_v6 = vadd.f32 1e-05, %v6622_v5 }
 0x8de   : > { %15043 = vrsqrt.f32 %v6623_v6 }
 0x8e8   : > { %v15044_v23 = vpop.eup %15043 }
 0x8e9   : > { %v6629_v29 = vrot.slane %v15044_v23, %v15535_v12  ;;  %v6633_v35 = vrot.slane %v15044_v23, %v15539_v14  ;;  %v6637_v57 = vrot.slane %v15044_v23, %v15537_v13  ;;  %v6641_v39 = vrot.slane %v15044_v23, %v15541_v15 }
 0x8ea   : > { %v17173_v37 = vrot.slane %v15044_v23, %v15545_v20  ;;  %v17176_v44 = vrot.slane %v15044_v23, %v15543_v16  ;;  %v17179_v10 = vrot.slane %v15044_v23, %v15549_v27  ;;  %v17182_v28 = vrot.slane %v15044_v23, %v15547_v26 }
 0x8eb   : > { %v6666_v12 = vmul.f32 %v6629_v29, %v17050_v48  ;;  %v6674_v14 = vmul.f32 %v6629_v29, %v17053_v55  ;;  %v6667_v13 = vmul.f32 %v6633_v35, %v17044_v21  ;;  %v6675_v15 = vmul.f32 %v6633_v35, %v17047_v22 }
 0x8ec   : > { %v6668_v20 = vmul.f32 %v6637_v57, %v17062_v36  ;;  %v6676_v16 = vmul.f32 %v6637_v57, %v17065_v63  ;;  %v6669_v9 = vmul.f32 %v6641_v39, %v17056_v17  ;;  %v6677_v27 = vmul.f32 %v6641_v39, %v17059_v51  ;;  %v14961_v63 = vld [vmem:[%s15356_s17 + $0x38] sm:$0xff]  }
 0x8ed   : > { %v6682_v26 = vmax.f32 %v6666_v12, 0.0  ;;  %v6690_v58 = vmax.f32 %v6674_v14, 0.0  ;;  %v6683_v11 = vmax.f32 %v6667_v13, 0.0  ;;  %v6691_v48 = vmax.f32 %v6675_v15, 0.0  ;;  %13963 = vmatprep.subr.bf16.mxu1 %v14961_v63  ;;  %v6731_v12 = vld [vmem:[#allocation4 + $0xc] sm:$0xf] }
 0x8ee   : > { %v6684_v55 = vmax.f32 %v6668_v20, 0.0  ;;  %v6692_v1 = vmax.f32 %v6676_v16, 0.0  ;;  %v6685_v21 = vmax.f32 %v6669_v9, 0.0  ;;  %v6693_v24 = vmax.f32 %v6677_v27, 0.0  ;;  %13964 = vmatpush3.bf16.msra.mxu1 %v14961_v63  ;;  %v6779_v9 = vld [vmem:[#allocation4 + $0x24] sm:$0xf] }
 0x8ef   : > { %v13221_v22 = vpack.c.bf16 %v6682_v26, %v6682_v26  ;;  %v13222_v19 = vpack.c.bf16 %v6690_v58, %v6690_v58  ;;  %v13223_v36 = vpack.c.bf16 %v6683_v11, %v6683_v11  ;;  %v13224_v59 = vpack.c.bf16 %v6691_v48, %v6691_v48  ;;  %13997 = vmatprep.subr.bf16.mxu1 %v17201_v62  ;;  %v6827_v48 = vld [vmem:[#allocation4 + $0x3c] sm:$0xf] }
 0x8f0   : > { %v13225_v46 = vpack.c.bf16 %v6684_v55, %v6684_v55  ;;  %v13226_v17 = vpack.c.bf16 %v6692_v1, %v6692_v1  ;;  %v17194_v49 = vpack.c.bf16 %v6685_v21, %v6685_v21  ;;  %v17196_v51 = vpack.c.bf16 %v6693_v24, %v6693_v24 }
 0x8f1   : > { %v6712_v3 = vshrl.u32 %v13221_v22, 16  ;;  %v6715_v8 = vshll.u32 %v13221_v22, 16  ;;  %v6720_v4 = vshrl.u32 %v13222_v19, 16  ;;  %v6723_v61 = vshll.u32 %v13222_v19, 16 }
 0x8f2   : > { %v6760_v41 = vshrl.u32 %v13223_v36, 16  ;;  %v6763_v40 = vshll.u32 %v13223_v36, 16  ;;  %v6768_v33 = vshrl.u32 %v13224_v59, 16  ;;  %v6771_v7 = vshll.u32 %v13224_v59, 16 }
 0x8f3   : > { %v6714_v30 = vrot.slane %v6712_v3, 7  ;;  %v17198_v60 = vrot.slane %v6720_v4, 7  ;;  %v6808_v47 = vshrl.u32 %v13225_v46, 16  ;;  %v6811_v42 = vshll.u32 %v13225_v46, 16  ;;  %v6875_v4 = vld [vmem:[#allocation4 + $0x54] sm:$0xf] }
 0x8f4   : > { %v6762_v25 = vrot.slane %v6760_v41, 7  ;;  %v17203_v5 = vrot.slane %v6768_v33, 7  ;;  %v6816_v6 = vshrl.u32 %v13226_v17, 16  ;;  %v6819_v23 = vshll.u32 %v13226_v17, 16 }
 0x8f5   : > { %v6717_v29 = vor.u32 %v6715_v8, %v6714_v30  ;;  %v6718_v35 = vrot.slane %v6714_v30, 4  ;;  %v6725_v57 = vor.u32 %v6723_v61, %v17198_v60  ;;  %v6810_v39 = vrot.slane %v6808_v47, 7 }
 0x8f6   : > { %v6765_v14 = vor.u32 %v6763_v40, %v6762_v25  ;;  %v6766_v13 = vrot.slane %v6762_v25, 4  ;;  %v6773_v15 = vor.u32 %v6771_v7, %v17203_v5  ;;  %v17208_v38 = vrot.slane %v6816_v6, 7 }
 0x8f7   : > { %6738 = vrot.lane.b32.xlu0 %v6717_v29, %s15266_s26  ;;  %v6732_v20 = vsel %vm15716_vm10, %v6717_v29, %v6731_v12  ;;  %v6726_v16 = vsel %vm15727_vm11, %v6718_v35, %v6725_v57  ;;  %v6813_v27 = vor.u32 %v6811_v42, %v6810_v39  ;;  %v6814_v26 = vrot.slane %v6810_v39, 4 }
 0x8f8   : > { %6733 = vst [vmem:[#allocation4 + $0xc] sm:$0xf] %v6732_v20  ;;  %6740 = vrot.lane.b32.xlu1 %v6726_v16, %s15266_s26  ;;  %6734 = vst.msk [vmem:[#allocation4 + $0x10] sm:$0xf] %vm884_vm6, %v6726_v16  ;;  %v6780_v58 = vsel %vm15716_vm10, %v6765_v14, %v6779_v9  ;;  %v6774_v11 = vsel %vm15727_vm11, %v6766_v13, %v6773_v15  ;;  %v6821_v55 = vor.u32 %v6819_v23, %v17208_v38  ;;  %v6923_v20 = vld [vmem:[#allocation4 + $0x6c] sm:$0xf] }
 0x8f9   : > { %v6856_v1 = vshrl.u32 %v17194_v49, 16  ;;  %6781 = vst [vmem:[#allocation4 + $0x24] sm:$0xf] %v6780_v58  ;;  %6782 = vst.msk [vmem:[#allocation4 + $0x28] sm:$0xf] %vm884_vm6, %v6774_v11  ;;  %v6828_v21 = vsel %vm15716_vm10, %v6813_v27, %v6827_v48  ;;  %v6859_v24 = vshll.u32 %v17194_v49, 16  ;;  %v6670_v63 = vmul.f32 %v17173_v37, %v17090_v0 }
 0x8fa   : > { %v6864_v22 = vshrl.u32 %v17196_v51, 16  ;;  %v6867_v19 = vshll.u32 %v17196_v51, 16  ;;  %6829 = vst [vmem:[#allocation4 + $0x3c] sm:$0xf] %v6828_v21  ;;  %v6822_v36 = vsel %vm15727_vm11, %v6814_v26, %v6821_v55  ;;  %v6678_v46 = vmul.f32 %v17173_v37, %v17093_v2  ;;  %v6971_v55 = vld [vmem:[#allocation4 + $0x84] sm:$0xf] }
 0x8fb   : > { %v6858_v59 = vrot.slane %v6856_v1, 7  ;;  %6786 = vrot.lane.b32.xlu0 %v6765_v14, %s15266_s26  ;;  %6830 = vst.msk [vmem:[#allocation4 + $0x40] sm:$0xf] %vm884_vm6, %v6822_v36  ;;  %v6671_v49 = vmul.f32 %v17176_v44, %v17084_v50  ;;  %v6679_v51 = vmul.f32 %v17176_v44, %v17087_v54  ;;  %v6672_v3 = vmul.f32 %v17179_v10, %v17114_v43 }
 0x8fc   : > { %v17237_v17 = vrot.slane %v6864_v22, 7  ;;  %6788 = vrot.lane.b32.xlu1 %v6774_v11, %s15266_s26  ;;  %v6686_v2 = vmax.f32 %v6670_v63, 0.0  ;;  %v6694_v37 = vmax.f32 %v6678_v46, 0.0  ;;  %v6680_v43 = vmul.f32 %v17179_v10, %v17117_v31 }
 0x8fd   : > { %v6861_v0 = vor.u32 %v6859_v24, %v6858_v59  ;;  %v6862_v8 = vrot.slane %v6858_v59, 4  ;;  %v6687_v41 = vmax.f32 %v6671_v49, 0.0  ;;  %v6695_v40 = vmax.f32 %v6679_v51, 0.0 }
 0x8fe   : > { %v6869_v61 = vor.u32 %v6867_v19, %v17237_v17  ;;  %v6688_v33 = vmax.f32 %v6672_v3, 0.0  ;;  %v13229_v7 = vpack.c.bf16 %v6686_v2, %v6686_v2  ;;  %v13230_v54 = vpack.c.bf16 %v6694_v37, %v6694_v37  ;;  %v7019_v19 = vld [vmem:[#allocation4 + $0x9c] sm:$0xf] }
 0x8ff   : > { %v6876_v50 = vsel %vm15716_vm10, %v6861_v0, %v6875_v4  ;;  %6834 = vrot.lane.b32.xlu0 %v6813_v27, %s15266_s26  ;;  %v14957_v44 = vld [vmem:[#allocation4 + $0xc] sm:$0xff]   ;;  %v13231_v47 = vpack.c.bf16 %v6687_v41, %v6687_v41  ;;  %v13232_v42 = vpack.c.bf16 %v6695_v40, %v6695_v40  ;;  %v6696_v27 = vmax.f32 %v6680_v43, 0.0  ;;  %v6831_v40 = vld [vmem:[#allocation4 + $0x44] sm:$0x1] }
 0x900   : > { %6877 = vst [vmem:[#allocation4 + $0x54] sm:$0xf] %v6876_v50  ;;  %v6870_v30 = vsel %vm15727_vm11, %v6862_v8, %v6869_v61  ;;  %v13233_v25 = vpack.c.bf16 %v6688_v33, %v6688_v33  ;;  %6836 = vrot.lane.b32.xlu1 %v6822_v36, %s15266_s26  ;;  %v6904_v6 = vshrl.u32 %v13229_v7, 16  ;;  %v6907_v23 = vshll.u32 %v13229_v7, 16  ;;  %13965 = vmatprep.mubr.msk.bf16.mxu1 %vm1449_vm12, %v14957_v44  ;;  %v6735_v8 = vld [vmem:[#allocation4 + $0x14] sm:$0x1] }
 0x901   : > { %6878 = vst.msk [vmem:[#allocation4 + $0x58] sm:$0xf] %vm884_vm6, %v6870_v30  ;;  %v6912_v29 = vshrl.u32 %v13230_v54, 16  ;;  %v6915_v35 = vshll.u32 %v13230_v54, 16  ;;  %v6952_v31 = vshrl.u32 %v13231_v47, 16  ;;  %v6955_v10 = vshll.u32 %v13231_v47, 16 }
 0x902   : > { %v6960_v57 = vshrl.u32 %v13232_v42, 16  ;;  %v6963_v39 = vshll.u32 %v13232_v42, 16  ;;  %v6906_v12 = vrot.slane %v6904_v6, 7  ;;  %v7000_v13 = vshrl.u32 %v13233_v25, 16  ;;  %v6783_v41 = vld [vmem:[#allocation4 + $0x2c] sm:$0x1] }
 0x903   : > { %v17257_v14 = vrot.slane %v6912_v29, 7  ;;  %v7003_v15 = vshll.u32 %v13233_v25, 16  ;;  %6882 = vrot.lane.b32.xlu0 %v6861_v0, %s15266_s26  ;;  %v6954_v16 = vrot.slane %v6952_v31, 7  ;;  %v6673_v26 = vmul.f32 %v17182_v28, %v17104_v56  ;;  %v6879_v33 = vld [vmem:[#allocation4 + $0x5c] sm:$0x1]  ;;  %v14983_v52 = vld [vmem:[#allocation4 + $0xc] sm:$0xff]  }
 0x904   : > { %v17260_v9 = vrot.slane %v6960_v57, 7  ;;  %6884 = vrot.lane.b32.xlu1 %v6870_v30, %s15266_s26  ;;  %v6909_v58 = vor.u32 %v6907_v23, %v6906_v12  ;;  %v6910_v11 = vrot.slane %v6906_v12, 4  ;;  %v7002_v1 = vrot.slane %v7000_v13, 7  ;;  %v6927_v44 = vld [vmem:[#allocation4 + $0x74] sm:$0x1] }
 0x905   : > { %v6917_v48 = vor.u32 %v6915_v35, %v17257_v14  ;;  %v6957_v21 = vor.u32 %v6955_v10, %v6954_v16  ;;  %v6958_v24 = vrot.slane %v6954_v16, 4  ;;  %v13234_v36 = vpack.c.bf16 %v6696_v27, %v6696_v27  ;;  %v6975_v35 = vld [vmem:[#allocation4 + $0x8c] sm:$0x1]  ;;  %v7023_v10 = vld [vmem:[#allocation4 + $0xa4] sm:$0x1] }
 0x906   : > { %v6965_v22 = vor.u32 %v6963_v39, %v17260_v9  ;;  %v6924_v59 = vsel %vm15716_vm10, %v6909_v58, %v6923_v20  ;;  %v7005_v63 = vor.u32 %v7003_v15, %v7002_v1  ;;  %v7006_v46 = vrot.slane %v7002_v1, 4  ;;  %v7067_v13 = vld [vmem:[#allocation4 + $0xb4] sm:$0xf] }
 0x907   : > { %v6918_v56 = vsel %vm15727_vm11, %v6910_v11, %v6917_v48  ;;  %6930 = vrot.lane.b32.xlu0 %v6909_v58, %s15266_s26  ;;  %6925 = vst [vmem:[#allocation4 + $0x6c] sm:$0xf] %v6924_v59  ;;  %v6972_v49 = vsel %vm15716_vm10, %v6957_v21, %v6971_v55  ;;  %v7008_v3 = vshrl.u32 %v13234_v36, 16  ;;  %v7011_v0 = vshll.u32 %v13234_v36, 16 }
 0x908   : > { %6926 = vst.msk [vmem:[#allocation4 + $0x70] sm:$0xf] %vm884_vm6, %v6918_v56  ;;  %v6966_v51 = vsel %vm15727_vm11, %v6958_v24, %v6965_v22  ;;  %6932 = vrot.lane.b32.xlu1 %v6918_v56, %s15266_s26  ;;  %6973 = vst [vmem:[#allocation4 + $0x84] sm:$0xf] %v6972_v49  ;;  %v7020_v2 = vsel %vm15716_vm10, %v7005_v63, %v7019_v19  ;;  %v6689_v37 = vmax.f32 %v6673_v26, 0.0  ;;  %v6727_v61 = vrot.slane %v17198_v60, 4 }
 0x909   : > { %6974 = vst.msk [vmem:[#allocation4 + $0x88] sm:$0xf] %vm884_vm6, %v6966_v51  ;;  %v6681_v4 = vmul.f32 %v17182_v28, %v17107_v45  ;;  %7021 = vst [vmem:[#allocation4 + $0x9c] sm:$0xf] %v7020_v2  ;;  %v7010_v50 = vrot.slane %v7008_v3, 7  ;;  %v6775_v7 = vrot.slane %v17203_v5, 4 }
 0x90a   : > { %v6823_v54 = vrot.slane %v17208_v38, 4  ;;  %v6871_v43 = vrot.slane %v17237_v17, 4  ;;  %v13235_v30 = vpack.c.bf16 %v6689_v37, %v6689_v37  ;;  %v6736_v42 = vsel %vm15801_vm14, %v6727_v61, %v6735_v8  ;;  %v7071_v26 = vld [vmem:[#allocation4 + $0xbc] sm:$0x1]  ;;  %v6795_v19 = vld [vmem:[#allocation4 + $0x30] sm:$0xf] }
 0x90b   : > { %v6697_v47 = vmax.f32 %v6681_v4, 0.0  ;;  %v6919_v45 = vrot.slane %v17257_v14, 4  ;;  %6978 = vrot.lane.b32.xlu0 %v6957_v21, %s15266_s26  ;;  %v7013_v28 = vor.u32 %v7011_v0, %v7010_v50  ;;  %6737 = vst [vmem:[#allocation4 + $0x14] sm:$0x1] %v6736_v42  ;;  %v6784_v60 = vsel %vm15801_vm14, %v6775_v7, %v6783_v41  ;;  %v14967_v49 = vld [vmem:[%s15356_s17 + $0x8] sm:$0xff]   ;;  %v14972_v41 = vld [vmem:[%s15356_s17 + $0x10] sm:$0xff]  }
 0x90c   : > { %v6832_v5 = vsel %vm15801_vm14, %v6823_v54, %v6831_v40  ;;  %v6880_v38 = vsel %vm15801_vm14, %v6871_v43, %v6879_v33  ;;  %6980 = vrot.lane.b32.xlu1 %v6966_v51, %s15266_s26  ;;  %v7048_v17 = vshrl.u32 %v13235_v30, 16  ;;  %6785 = vst [vmem:[#allocation4 + $0x2c] sm:$0x1] %v6784_v60  ;;  %v6967_v29 = vrot.slane %v17260_v9, 4  ;;  %v14964_v8 = vld [vmem:[#allocation4 + $0x24] sm:$0xff]  }
 0x90d   : > { %v13236_v25 = vpack.c.bf16 %v6697_v47, %v6697_v47  ;;  %6833 = vst [vmem:[#allocation4 + $0x44] sm:$0x1] %v6832_v5  ;;  %6881 = vst [vmem:[#allocation4 + $0x5c] sm:$0x1] %v6880_v38  ;;  %v6928_v6 = vsel %vm15801_vm14, %v6919_v45, %v6927_v44  ;;  %v7014_v23 = vsel %vm15727_vm11, %v7006_v46, %v7013_v28  ;;  %v7015_v31 = vrot.slane %v7010_v50, 4  ;;  %v14977_v50 = vld [vmem:[%s15356_s17 + $0x18] sm:$0xff]  }
 0x90e   : > { %6929 = vst [vmem:[#allocation4 + $0x74] sm:$0x1] %v6928_v6  ;;  %7022 = vst.msk [vmem:[#allocation4 + $0xa0] sm:$0xf] %vm884_vm6, %v7014_v23  ;;  %v7050_v57 = vrot.slane %v7048_v17, 7  ;;  %v7051_v39 = vshll.u32 %v13235_v30, 16  ;;  %v6976_v15 = vsel %vm15801_vm14, %v6967_v29, %v6975_v35 }
 0x90f   : > { %v7056_v12 = vshrl.u32 %v13236_v25, 16  ;;  %v7059_v14 = vshll.u32 %v13236_v25, 16  ;;  %7026 = vrot.lane.b32.xlu0 %v7005_v63, %s15266_s26  ;;  %v7024_v20 = vsel %vm15801_vm14, %v7015_v31, %v7023_v10  ;;  %6977 = vst [vmem:[#allocation4 + $0x8c] sm:$0x1] %v6976_v15  ;;  %v6843_v63 = vld [vmem:[#allocation4 + $0x48] sm:$0xf] }
 0x910   : > { %7028 = vrot.lane.b32.xlu1 %v7014_v23, %s15266_s26  ;;  %v7053_v16 = vor.u32 %v7051_v39, %v7050_v57  ;;  %v7054_v9 = vrot.slane %v7050_v57, 4  ;;  %7025 = vst [vmem:[#allocation4 + $0xa4] sm:$0x1] %v7024_v20  ;;  %v6891_v2 = vld [vmem:[#allocation4 + $0x60] sm:$0xf]  ;;  %v14969_v25 = vld [vmem:[#allocation4 + $0x54] sm:$0xff]  }
 0x911   : > { %v7058_v27 = vrot.slane %v7056_v12, 7  ;;  %v6939_v40 = vld [vmem:[#allocation4 + $0x78] sm:$0xf]  ;;  %v6987_v44 = vld [vmem:[#allocation4 + $0x90] sm:$0xf] }
 0x912   : > { %v7068_v58 = vsel %vm15716_vm10, %v7053_v16, %v7067_v13  ;;  %v7035_v28 = vld [vmem:[#allocation4 + $0xa8] sm:$0xf]  ;;  %v7083_v6 = vld [vmem:[#allocation4 + $0xc0] sm:$0xf]  ;;  %v6799_v57 = vld [vmem:[#allocation4 + $0x38] sm:$0x1] }
 0x913   : > { %v7061_v11 = vor.u32 %v7059_v14, %v7058_v27  ;;  %v7063_v48 = vrot.slane %v7058_v27, 4  ;;  %7074 = vrot.lane.b32.xlu0 %v7053_v16, %s15266_s26  ;;  %7069 = vst [vmem:[#allocation4 + $0xb4] sm:$0xf] %v7068_v58  ;;  %v14971_v13 = vld [vmem:[#allocation4 + $0x6c] sm:$0xff]   ;;  %v6943_v58 = vld [vmem:[#allocation4 + $0x80] sm:$0x1] }
 0x915   : > { %v7062_v55 = vsel %vm15727_vm11, %v7054_v9, %v7061_v11  ;;  %v7072_v1 = vsel %vm15801_vm14, %v7063_v48, %v7071_v26  ;;  %v6895_v9 = vld [vmem:[#allocation4 + $0x68] sm:$0x1] }
 0x916   : > { %7070 = vst.msk [vmem:[#allocation4 + $0xb8] sm:$0xf] %vm884_vm6, %v7062_v55  ;;  %7076 = vrot.lane.b32.xlu1 %v7062_v55, %s15266_s26  ;;  %7073 = vst [vmem:[#allocation4 + $0xbc] sm:$0x1] %v7072_v1  ;;  %v6991_v1 = vld [vmem:[#allocation4 + $0x98] sm:$0x1] }
 0x917   : > { %6742 = vrot.lane.b32.xlu0 %v6727_v61, %s15266_s26 }
 0x91a   : > { %6790 = vrot.lane.b32.xlu1 %v6775_v7, %s15266_s26 }
 0x91b   : > { %6838 = vrot.lane.b32.xlu0 %v6823_v54, %s15266_s26 }
 0x91e   : > { %6886 = vrot.lane.b32.xlu1 %v6871_v43, %s15266_s26  ;;  %v14966_v43 = vld [vmem:[#allocation4 + $0x3c] sm:$0xff]  }
 0x91f   : > { %6934 = vrot.lane.b32.xlu0 %v6919_v45, %s15266_s26  ;;  %v17353_v45 = vld [vmem:[%s15356_s17 + $0x40] sm:$0xff]  }
 0x922   : > { %6982 = vrot.lane.b32.xlu1 %v6967_v29, %s15266_s26 }
 0x923   : > { %7030 = vrot.lane.b32.xlu0 %v7015_v31, %s15266_s26  ;;  %v6751_v31 = vld [vmem:[#allocation4 + $0x20] sm:$0x1] }
 0x926   : > { %7078 = vrot.lane.b32.xlu1 %v7063_v48, %s15266_s26 }
 0x969   : > { %v6739_v21 = vpop.permute.xlu0 %6738 }
 0x96a   : > { %v6748_v24 = vsel %vm15716_vm10, %v6739_v21, %v6747_v18  ;;  %v6741_v22 = vpop.permute.xlu1 %6740  ;;  %v14974_v21 = vld [vmem:[#allocation4 + $0x84] sm:$0xff]  }
 0x96b   : > { %6749 = vst [vmem:[#allocation4 + $0x18] sm:$0xf] %v6748_v24  ;;  %6750 = vst.msk [vmem:[#allocation4 + $0x1c] sm:$0xf] %vm884_vm6, %v6741_v22  ;;  %v7039_v22 = vld [vmem:[#allocation4 + $0xb0] sm:$0x1] }
 0x96d   : > { %v6787_v36 = vpop.permute.xlu0 %6786 }
 0x96e   : > { %v6796_v59 = vsel %vm15716_vm10, %v6787_v36, %v6795_v19  ;;  %v6789_v56 = vpop.permute.xlu1 %6788 }
 0x96f   : > { %6797 = vst [vmem:[#allocation4 + $0x30] sm:$0xf] %v6796_v59  ;;  %6798 = vst.msk [vmem:[#allocation4 + $0x34] sm:$0xf] %vm884_vm6, %v6789_v56  ;;  %v7087_v59 = vld [vmem:[#allocation4 + $0xc8] sm:$0x1] }
 0x971   : > { %v6835_v46 = vpop.permute.xlu0 %6834 }
 0x972   : > { %v6844_v51 = vsel %vm15716_vm10, %v6835_v46, %v6843_v63  ;;  %v6837_v3 = vpop.permute.xlu1 %6836  ;;  %v14963_v0 = vld [vmem:[#allocation4 + $0x18] sm:$0xff]  }
 0x973   : > { %6845 = vst [vmem:[#allocation4 + $0x48] sm:$0xf] %v6844_v51  ;;  %6846 = vst.msk [vmem:[#allocation4 + $0x4c] sm:$0xf] %vm884_vm6, %v6837_v3  ;;  %13966 = vmatmul.mubr.msk.bf16.vlgmr.msra.gmra.mrb[0].mxu1 %vm1449_vm12, %v14963_v0  ;;  %v14979_v3 = vld [vmem:[#allocation4 + $0xb4] sm:$0xff]   ;;  %v14981_v0 = vld [vmem:[#allocation4] sm:$0xff]  }
 0x974   : > { %13998 = vmatpush3.bf16.msra.mxu1 %v17201_v62  ;;  %13969 = vmatprep.mubr.msk.bf16.mxu1 %vm1449_vm12, %v14964_v8 }
 0x975   : > { %v6883_v37 = vpop.permute.xlu0 %6882  ;;  %13999 = vmatprep.subr.bf16.mxu1 %v14967_v49 }
 0x976   : > { %v6892_v4 = vsel %vm15716_vm10, %v6883_v37, %v6891_v2  ;;  %v6885_v61 = vpop.permute.xlu1 %6884  ;;  %v14965_v54 = vld [vmem:[#allocation4 + $0x30] sm:$0xff]   ;;  %v14987_v2 = vld [vmem:[%s15356_s17 + $0x48] sm:$0xff]   ;;  %v14984_v37 = vld [vmem:[#allocation4 + $0x18] sm:$0xff]  }
 0x977   : > { %6893 = vst [vmem:[#allocation4 + $0x60] sm:$0xf] %v6892_v4  ;;  %6894 = vst.msk [vmem:[#allocation4 + $0x64] sm:$0xf] %vm884_vm6, %v6885_v61  ;;  %v14992_v4 = vld [vmem:[%s15356_s17 + $0x50] sm:$0xff]   ;;  %v14985_v61 = vld [vmem:[#allocation4 + $0x24] sm:$0xff]  }
 0x978   : > { %14000 = vmatpush3.bf16.msra.mxu1 %v14967_v49  ;;  %v14976_v49 = vld [vmem:[#allocation4 + $0x9c] sm:$0xff]  }
 0x979   : > { %v6931_v33 = vpop.permute.xlu0 %6930  ;;  %14001 = vmatprep.subr.bf16.mxu1 %v14972_v41 }
 0x97a   : > { %v6940_v7 = vsel %vm15716_vm10, %v6931_v33, %v6939_v40  ;;  %v6933_v62 = vpop.permute.xlu1 %6932  ;;  %v14968_v17 = vld [vmem:[#allocation4 + $0x48] sm:$0xff]   ;;  %v14986_v40 = vld [vmem:[#allocation4 + $0x30] sm:$0xff]   ;;  %v15002_v33 = vld [vmem:[%s15356_s17 + $0x60] sm:$0xff]  }
 0x97b   : > { %6941 = vst [vmem:[#allocation4 + $0x78] sm:$0xf] %v6940_v7  ;;  %6942 = vst.msk [vmem:[#allocation4 + $0x7c] sm:$0xf] %vm884_vm6, %v6933_v62  ;;  %13970 = vmatmul.mubr.msk.bf16.gmra.mrb[4].mxu1 %vm1449_vm12, %v14965_v54  ;;  %v14989_v7 = vld [vmem:[#allocation4 + $0x48] sm:$0xff]   ;;  %v14990_v62 = vld [vmem:[#allocation4 + $0x54] sm:$0xff]  }
 0x97c   : > { %13973 = vmatprep.mubr.msk.bf16.mxu1 %vm1449_vm12, %v14966_v43  ;;  %14002 = vmatpush3.bf16.msra.mxu1 %v14972_v41  ;;  %v14997_v41 = vld [vmem:[%s15356_s17 + $0x58] sm:$0xff]   ;;  %v14993_v43 = vld [vmem:[#allocation4 + $0x6c] sm:$0xff]  }
 0x97d   : > { %v6979_v30 = vpop.permute.xlu0 %6978  ;;  %14003 = vmatprep.subr.bf16.mxu1 %v14977_v50 }
 0x97e   : > { %v6988_v47 = vsel %vm15716_vm10, %v6979_v30, %v6987_v44  ;;  %v6981_v42 = vpop.permute.xlu1 %6980  ;;  %v14970_v12 = vld [vmem:[#allocation4 + $0x60] sm:$0xff]  }
 0x97f   : > { %6989 = vst [vmem:[#allocation4 + $0x90] sm:$0xf] %v6988_v47  ;;  %6990 = vst.msk [vmem:[#allocation4 + $0x94] sm:$0xf] %vm884_vm6, %v6981_v42  ;;  %v14991_v54 = vld [vmem:[#allocation4 + $0x60] sm:$0xff]  }
 0x980   : > { %14004 = vmatpush3.bf16.msra.mxu1 %v14977_v50  ;;  %v14988_v50 = vld [vmem:[#allocation4 + $0x3c] sm:$0xff]   ;;  %v14995_v30 = vld [vmem:[#allocation4 + $0x84] sm:$0xff]  }
 0x981   : > { %v7027_v60 = vpop.permute.xlu0 %7026  ;;  %14037 = vmatprep.subr.bf16.mxu1 %v17353_v45  ;;  %v14998_v42 = vld [vmem:[#allocation4 + $0x9c] sm:$0xff]  }
 0x982   : > { %v7036_v5 = vsel %vm15716_vm10, %v7027_v60, %v7035_v28  ;;  %v7029_v38 = vpop.permute.xlu1 %7028  ;;  %v14973_v55 = vld [vmem:[#allocation4 + $0x78] sm:$0xff]  }
 0x983   : > { %7037 = vst [vmem:[#allocation4 + $0xa8] sm:$0xf] %v7036_v5  ;;  %7038 = vst.msk [vmem:[#allocation4 + $0xac] sm:$0xf] %vm884_vm6, %v7029_v38  ;;  %13974 = vmatmul.mubr.msk.bf16.gmra.mrb[8].mxu1 %vm1449_vm12, %v14968_v17  ;;  %v14994_v44 = vld [vmem:[#allocation4 + $0x78] sm:$0xff]   ;;  %v15003_v5 = vld [vmem:[#allocation4 + $0x24] sm:$0xff]  }
 0x984   : > { %13977 = vmatprep.mubr.msk.bf16.mxu1 %vm1449_vm12, %v14969_v25  ;;  %v15000_v28 = vld [vmem:[#allocation4 + $0xb4] sm:$0xff]   ;;  %v15007_v38 = vld [vmem:[%s15356_s17 + $0x68] sm:$0xff]  }
 0x985   : > { %v7075_v23 = vpop.permute.xlu0 %7074  ;;  %v15001_v60 = vld [vmem:[#allocation4 + $0x18] sm:$0xff]   ;;  %v15004_v17 = vld [vmem:[#allocation4 + $0x30] sm:$0xff]  }
 0x986   : > { %v7084_v29 = vsel %vm15716_vm10, %v7075_v23, %v7083_v6  ;;  %v14975_v46 = vld [vmem:[#allocation4 + $0x90] sm:$0xff]   ;;  %v15005_v6 = vld [vmem:[#allocation4 + $0x3c] sm:$0xff]  }
 0x987   : > { %7085 = vst [vmem:[#allocation4 + $0xc0] sm:$0xf] %v7084_v29  ;;  %v14996_v47 = vld [vmem:[#allocation4 + $0x90] sm:$0xff]   ;;  %v15017_v23 = vld [vmem:[%s15356_s17 + $0x78] sm:$0xff]   ;;  %v15006_v29 = vld [vmem:[#allocation4 + $0x48] sm:$0xff]  }
 0x988   : > { %v7077_v35 = vpop.permute.xlu1 %7076  ;;  %v15012_v25 = vld [vmem:[%s15356_s17 + $0x70] sm:$0xff]  }
 0x989   : > { %7086 = vst.msk [vmem:[#allocation4 + $0xc4] sm:$0xf] %vm884_vm6, %v7077_v35  ;;  %v6743_v10 = vpop.permute.xlu0 %6742  ;;  %v17420_v35 = vld [vmem:[%s15356_s17 + $0x80] sm:$0xff]  }
 0x98a   : > { %v6752_v39 = vsel %vm15801_vm14, %v6743_v10, %v6751_v31  ;;  %v14978_v51 = vld [vmem:[#allocation4 + $0xa8] sm:$0xff]   ;;  %v15008_v31 = vld [vmem:[#allocation4 + $0x54] sm:$0xff]   ;;  %v15009_v10 = vld [vmem:[#allocation4 + $0x60] sm:$0xff]  }
 0x98b   : > { %6753 = vst [vmem:[#allocation4 + $0x20] sm:$0x1] %v6752_v39  ;;  %13978 = vmatmul.mubr.msk.bf16.gmra.mrb[12].mxu1 %vm1449_vm12, %v14970_v12  ;;  %v8184_v39 = vld [vmem:[#allocation4 + $0x4] sm:$0xf]  ;;  %v15010_v12 = vld [vmem:[#allocation4 + $0x6c] sm:$0xff]  }
 0x98c   : > { %v6791_v14 = vpop.permute.xlu1 %6790  ;;  %13981 = vmatprep.mubr.msk.bf16.mxu1 %vm1449_vm12, %v14971_v13 }
 0x98d   : > { %v6800_v15 = vsel %vm15801_vm14, %v6791_v14, %v6799_v57  ;;  %v6839_v20 = vpop.permute.xlu0 %6838  ;;  %v8183_v57 = vld [vmem:[#allocation4] sm:$0xf]  ;;  %v15011_v14 = vld [vmem:[#allocation4 + $0x78] sm:$0xff]  }
 0x98e   : > { %6801 = vst [vmem:[#allocation4 + $0x38] sm:$0x1] %v6800_v15  ;;  %v6848_v16 = vsel %vm15801_vm14, %v6839_v20, %v6847_v32  ;;  %v8232_v13 = vshrl.u32 %v8183_v57, 16  ;;  %v8235_v15 = vshll.u32 %v8183_v57, 16  ;;  %v8241_v32 = vshll.u32 %v8184_v39, 16 }
 0x98f   : > { %6849 = vst [vmem:[#allocation4 + $0x50] sm:$0x1] %v6848_v16  ;;  %v8245_v20 = vshrl.u32 %v8184_v39, 16  ;;  %v8185_v16 = vld [vmem:[#allocation4 + $0x8] sm:$0x1] }
 0x990   : > { %v6887_v27 = vpop.permute.xlu1 %6886  ;;  %v14980_v8 = vld [vmem:[#allocation4 + $0xc0] sm:$0xff]  }
 0x991   : > { %v6896_v26 = vsel %vm15801_vm14, %v6887_v27, %v6895_v9  ;;  %v6935_v11 = vpop.permute.xlu0 %6934  ;;  %v8234_v9 = vrot.slane %v8232_v13, 4  ;;  %v8237_v27 = vrot.slane %v8235_v15, 5  ;;  %v8198_v13 = vld [vmem:[#allocation4 + $0x3c] sm:$0xf] }
 0x992   : > { %6897 = vst [vmem:[#allocation4 + $0x68] sm:$0x1] %v6896_v26  ;;  %v6944_v48 = vsel %vm15801_vm14, %v6935_v11, %v6943_v58  ;;  %v17427_v26 = vrot.slane %v8241_v32, 5  ;;  %v8247_v58 = vrot.slane %v8245_v20, 4  ;;  %v8186_v11 = vld [vmem:[#allocation4 + $0xc] sm:$0xf] }
 0x993   : > { %6945 = vst [vmem:[#allocation4 + $0x80] sm:$0x1] %v6944_v48  ;;  %13982 = vmatmul.mubr.msk.bf16.gmra.mrb[16].mxu1 %vm1449_vm12, %v14973_v55  ;;  %v8187_v48 = vld [vmem:[#allocation4 + $0x10] sm:$0xf]  ;;  %v15013_v55 = vld [vmem:[#allocation4 + $0x84] sm:$0xff]  }
 0x994   : > { %v6983_v18 = vpop.permute.xlu1 %6982  ;;  %13985 = vmatprep.mubr.msk.bf16.mxu1 %vm1449_vm12, %v14974_v21  ;;  %v8189_v21 = vld [vmem:[#allocation4 + $0x18] sm:$0xf] }
 0x995   : > { %v6992_v24 = vsel %vm15801_vm14, %v6983_v18, %v6991_v1  ;;  %v7031_v19 = vpop.permute.xlu0 %7030  ;;  %v8251_v1 = vshll.u32 %v8185_v16, 16  ;;  %v8188_v18 = vld [vmem:[#allocation4 + $0x14] sm:$0x1] }
 0x996   : > { %6993 = vst [vmem:[#allocation4 + $0x98] sm:$0x1] %v6992_v24  ;;  %v7040_v36 = vsel %vm15801_vm14, %v7031_v19, %v7039_v22  ;;  %v8192_v24 = vld [vmem:[#allocation4 + $0x24] sm:$0xf]  ;;  %v15014_v22 = vld [vmem:[#allocation4 + $0x90] sm:$0xff]   ;;  %v8238_v19 = vor.u32 %v8237_v27, %v8234_v9 }
 0x997   : > { %7041 = vst [vmem:[#allocation4 + $0xb0] sm:$0x1] %v7040_v36  ;;  %v8256_v36 = vshrl.u32 %v8186_v11, 16  ;;  %v8194_v9 = vld [vmem:[#allocation4 + $0x2c] sm:$0x1] }
 0x998   : > { %v7079_v56 = vpop.permute.xlu1 %7078 }
 0x999   : > { %v7088_v63 = vsel %vm15801_vm14, %v7079_v56, %v7087_v59  ;;  %v8259_v59 = vshll.u32 %v8186_v11, 16  ;;  %v8265_v56 = vshll.u32 %v8187_v48, 16 }
 0x99a   : > { %7089 = vst [vmem:[#allocation4 + $0xc8] sm:$0x1] %v7088_v63  ;;  %v8193_v63 = vld [vmem:[#allocation4 + $0x28] sm:$0xf] }
 0x99b   : > { %13986 = vmatmul.mubr.msk.bf16.gmra.mrb[20].mxu1 %vm1449_vm12, %v14975_v46  ;;  %v8248_v46 = vor.u32 %v8247_v58, %v17427_v26 }
 0x99c   : > { %13989 = vmatprep.mubr.msk.bf16.mxu1 %vm1449_vm12, %v14976_v49  ;;  %v8269_v49 = vshrl.u32 %v8187_v48, 16  ;;  %v8199_v48 = vld [vmem:[#allocation4 + $0x40] sm:$0xf] }
 0x9a3   : > { %13990 = vmatmul.mubr.msk.bf16.gmra.mrb[24].mxu1 %vm1449_vm12, %v14978_v51  ;;  %v8190_v51 = vld [vmem:[#allocation4 + $0x1c] sm:$0xf] }
 0x9a4   : > { %13993 = vmatprep.mubr.msk.bf16.mxu1 %vm1449_vm12, %v14979_v3  ;;  %v8280_v3 = vshrl.u32 %v8189_v21, 16 }
 0x9ab   : > { %13994 = vmatmul.mubr.msk.bf16.gmra.mrb[28].mxu1 %vm1449_vm12, %v14980_v8  ;;  %v8304_v8 = vshrl.u32 %v8192_v24, 16 }
 0x9ac   : > { %14005 = vmatprep.mubr.msk.bf16.mxu1 %vm1449_vm12, %v14981_v0  ;;  %v8283_v0 = vshll.u32 %v8189_v21, 16  ;;  %v8352_v21 = vshrl.u32 %v8198_v13, 16 }
 0x9b3   : > { %14006 = vmatmul.mubr.msk.bf16.vlgmr.msra.gmra.mrb[0].mxu1 %vm1449_vm12, %v14983_v52  ;;  %v8307_v52 = vshll.u32 %v8192_v24, 16  ;;  %v8355_v24 = vshll.u32 %v8198_v13, 16 }
 0x9b4   : > { %14038 = vmatpush3.bf16.msra.mxu1 %v17353_v45  ;;  %14009 = vmatprep.mubr.msk.bf16.mxu1 %vm1449_vm12, %v14984_v37  ;;  %v14999_v45 = vld [vmem:[#allocation4 + $0xa8] sm:$0xff]   ;;  %v8275_v37 = vshll.u32 %v8188_v18, 16 }
 0x9b5   : > { %14039 = vmatprep.subr.bf16.mxu1 %v14987_v2 }
 0x9b8   : > { %14040 = vmatpush3.bf16.msra.mxu1 %v14987_v2  ;;  %v8253_v2 = vrot.slane %v8251_v1, 5 }
 0x9b9   : > { %14041 = vmatprep.subr.bf16.mxu1 %v14992_v4 }
 0x9bb   : > { %14010 = vmatmul.mubr.msk.bf16.gmra.mrb[4].mxu1 %vm1449_vm12, %v14985_v61  ;;  %v8317_v61 = vshrl.u32 %v8193_v63, 16 }
 0x9bc   : > { %14013 = vmatprep.mubr.msk.bf16.mxu1 %vm1449_vm12, %v14986_v40  ;;  %14042 = vmatpush3.bf16.msra.mxu1 %v14992_v4  ;;  %v8313_v4 = vshll.u32 %v8193_v63, 16  ;;  %v8258_v40 = vrot.slane %v8256_v36, 4 }
 0x9bd   : > { %14043 = vmatprep.subr.bf16.mxu1 %v14997_v41 }
 0x9c0   : > { %14044 = vmatpush3.bf16.msra.mxu1 %v14997_v41  ;;  %v8239_v41 = vrot.slane %v8238_v19, 4 }
 0x9c1   : > { %14077 = vmatprep.subr.bf16.mxu1 %v15002_v33 }
 0x9c2   : > { %v8244_v57 = vsel %vm15971_vm1, %v8239_v41, %v17427_v26  ;;  %v8354_v41 = vrot.slane %v8352_v21, 4 }
 0x9c3   : > { %14014 = vmatmul.mubr.msk.bf16.gmra.mrb[8].mxu1 %vm1449_vm12, %v14988_v50  ;;  %v17432_v50 = vrot.slane %v8265_v56, 5 }
 0x9c4   : > { %14017 = vmatprep.mubr.msk.bf16.mxu1 %vm1449_vm12, %v14989_v7  ;;  %v8195_v7 = vld [vmem:[#allocation4 + $0x30] sm:$0xf] }
 0x9cb   : > { %14018 = vmatmul.mubr.msk.bf16.gmra.mrb[12].mxu1 %vm1449_vm12, %v14990_v62  ;;  %v8249_v62 = vrot.slane %v8248_v46, 4  ;;  %v8361_v46 = vshll.u32 %v8199_v48, 16 }
 0x9cc   : > { %14021 = vmatprep.mubr.msk.bf16.mxu1 %vm1449_vm12, %v14991_v54  ;;  %v8271_v54 = vrot.slane %v8269_v49, 4  ;;  %v8365_v49 = vshrl.u32 %v8199_v48, 16 }
 0x9cd   : > { %v8254_v15 = vsel %vm15971_vm1, %v8249_v62, %v8253_v2 }
 0x9ce   : > { %v8272_v32 = vor.u32 %v8271_v54, %v17432_v50 }
 0x9d0   : > { %v8273_v56 = vrot.slane %v8272_v32, 4 }
 0x9d3   : > { %14022 = vmatmul.mubr.msk.bf16.gmra.mrb[16].mxu1 %vm1449_vm12, %v14993_v43  ;;  %v8289_v43 = vshll.u32 %v8190_v51, 16 }
 0x9d4   : > { %14025 = vmatprep.mubr.msk.bf16.mxu1 %vm1449_vm12, %v14994_v44  ;;  %v8293_v44 = vshrl.u32 %v8190_v51, 16  ;;  %v8201_v51 = vld [vmem:[#allocation4 + $0x48] sm:$0xf] }
 0x9d5   : > { %v8376_v62 = vshrl.u32 %v8201_v51, 16  ;;  %v8379_v54 = vshll.u32 %v8201_v51, 16 }
 0x9db   : > { %14026 = vmatmul.mubr.msk.bf16.gmra.mrb[20].mxu1 %vm1449_vm12, %v14995_v30  ;;  %v8196_v30 = vld [vmem:[#allocation4 + $0x34] sm:$0xf] }
 0x9dc   : > { %14029 = vmatprep.mubr.msk.bf16.mxu1 %vm1449_vm12, %v14996_v47  ;;  %v15015_v47 = vld [vmem:[#allocation4 + $0x9c] sm:$0xff]  }
 0x9e3   : > { %14030 = vmatmul.mubr.msk.bf16.gmra.mrb[24].mxu1 %vm1449_vm12, %v14998_v42  ;;  %v8282_v42 = vrot.slane %v8280_v3, 4  ;;  %v15018_v3 = vld [vmem:[#allocation4 + $0xb4] sm:$0xff]  }
 0x9e4   : > { %14033 = vmatprep.mubr.msk.bf16.mxu1 %vm1449_vm12, %v14999_v45  ;;  %v8285_v45 = vrot.slane %v8283_v0, 5 }
 0x9e6   : > { %v8286_v20 = vor.u32 %v8285_v45, %v8282_v42  ;;  %v8367_v42 = vrot.slane %v8365_v49, 4  ;;  %v8202_v45 = vld [vmem:[#allocation4 + $0x4c] sm:$0xf]  ;;  %v8211_v49 = vld [vmem:[#allocation4 + $0x70] sm:$0xf] }
 0x9e7   : > { %v8389_v32 = vshrl.u32 %v8202_v45, 16 }
 0x9e8   : > { %v8287_v0 = vrot.slane %v8286_v20, 4 }
 0x9eb   : > { %14034 = vmatmul.mubr.msk.bf16.gmra.mrb[28].mxu1 %vm1449_vm12, %v15000_v28  ;;  %v8306_v28 = vrot.slane %v8304_v8, 4 }
 0x9ec   : > { %14045 = vmatprep.mubr.msk.bf16.mxu1 %vm1449_vm12, %v15001_v60  ;;  %v8309_v60 = vrot.slane %v8307_v52, 5 }
 0x9ee   : > { %v8310_v27 = vor.u32 %v8309_v60, %v8306_v28 }
 0x9f0   : > { %v8311_v8 = vrot.slane %v8310_v27, 4 }
 0x9f3   : > { %14046 = vmatmul.mubr.msk.bf16.vlgmr.msra.gmra.mrb[0].mxu1 %vm1449_vm12, %v15003_v5  ;;  %v8191_v5 = vld [vmem:[#allocation4 + $0x20] sm:$0x1] }
 0x9f4   : > { %14078 = vmatpush3.bf16.msra.mxu1 %v15002_v33  ;;  %14049 = vmatprep.mubr.msk.bf16.mxu1 %vm1449_vm12, %v15004_v17  ;;  %v8261_v33 = vrot.slane %v8259_v59, 5  ;;  %v8319_v17 = vrot.slane %v8317_v61, 4  ;;  %v8299_v16 = vshll.u32 %v8191_v5, 16  ;;  %v8323_v59 = vshll.u32 %v8194_v9, 16 }
 0x9f5   : > { %14079 = vmatprep.subr.bf16.mxu1 %v15007_v38 }
 0x9f6   : > { %v8262_v39 = vor.u32 %v8261_v33, %v8258_v40  ;;  %v8301_v63 = vrot.slane %v8299_v16, 5  ;;  %v8357_v40 = vrot.slane %v8355_v24, 5 }
 0x9f8   : > { %14080 = vmatpush3.bf16.msra.mxu1 %v15007_v38  ;;  %v17434_v38 = vrot.slane %v8313_v4, 5  ;;  %v8263_v19 = vrot.slane %v8262_v39, 4  ;;  %v8378_v39 = vrot.slane %v8376_v62, 4 }
 0x9f9   : > { %14081 = vmatprep.subr.bf16.mxu1 %v15012_v25 }
 0x9fa   : > { %v8320_v58 = vor.u32 %v8319_v17, %v17434_v38  ;;  %v8204_v17 = vld [vmem:[#allocation4 + $0x54] sm:$0xf] }
 0x9fb   : > { %14050 = vmatmul.mubr.msk.bf16.gmra.mrb[4].mxu1 %vm1449_vm12, %v15005_v6  ;;  %v8331_v6 = vshll.u32 %v8195_v7, 16  ;;  %v8400_v20 = vshrl.u32 %v8204_v17, 16 }
 0x9fc   : > { %14053 = vmatprep.mubr.msk.bf16.mxu1 %vm1449_vm12, %v15006_v29  ;;  %14082 = vmatpush3.bf16.msra.mxu1 %v15012_v25  ;;  %v8328_v25 = vshrl.u32 %v8195_v7, 16  ;;  %v17436_v29 = vrot.slane %v8275_v37, 5  ;;  %v8321_v52 = vrot.slane %v8320_v58, 4  ;;  %v15019_v37 = vld [vmem:[#allocation4 + $0xc0] sm:$0xff]   ;;  %v8325_v7 = vrot.slane %v8323_v59, 5 }
 0x9fd   : > { %14083 = vmatprep.subr.bf16.mxu1 %v15017_v23  ;;  %v8333_v26 = vrot.slane %v8331_v6, 5  ;;  %v8210_v59 = vld [vmem:[#allocation4 + $0x6c] sm:$0xf] }
 0x9fe   : > { %v8330_v11 = vrot.slane %v8328_v25, 4  ;;  %v8326_v5 = vsel %vm15971_vm1, %v8321_v52, %v8325_v7  ;;  %v8213_v7 = vld [vmem:[#allocation4 + $0x78] sm:$0xf] }
 0xa00   : > { %14084 = vmatpush3.bf16.msra.mxu1 %v15017_v23  ;;  %v15016_v23 = vld [vmem:[#allocation4 + $0xa8] sm:$0xff]   ;;  %v8334_v4 = vor.u32 %v8333_v26, %v8330_v11 }
 0xa01   : > { %14117 = vmatprep.subr.bf16.mxu1 %v17420_v35 }
 0xa02   : > { %v8335_v25 = vrot.slane %v8334_v4, 4  ;;  %v8451_v4 = vshll.u32 %v8210_v59, 16 }
 0xa03   : > { %14054 = vmatmul.mubr.msk.bf16.gmra.mrb[8].mxu1 %vm1449_vm12, %v15008_v31  ;;  %v8337_v31 = vshll.u32 %v8196_v30, 16 }
 0xa04   : > { %14057 = vmatprep.mubr.msk.bf16.mxu1 %vm1449_vm12, %v15009_v10  ;;  %v8341_v10 = vshrl.u32 %v8196_v30, 16  ;;  %v8200_v30 = vld [vmem:[#allocation4 + $0x44] sm:$0x1] }
 0xa05   : > { %v17449_v1 = vrot.slane %v8337_v31, 5  ;;  %v8205_v31 = vld [vmem:[#allocation4 + $0x58] sm:$0xf] }
 0xa06   : > { %v8343_v18 = vrot.slane %v8341_v10, 4  ;;  %v15020_v10 = vld [vmem:[#allocation4 + $0xcc] sm:$0xff]   ;;  %v8409_v27 = vshll.u32 %v8205_v31, 16  ;;  %v8413_v58 = vshrl.u32 %v8205_v31, 16 }
 0xa07   : > { %v8340_v26 = vsel %vm15971_vm1, %v8335_v25, %v17449_v1  ;;  %v8453_v25 = vrot.slane %v8451_v4, 5 }
 0xa08   : > { %v8344_v61 = vor.u32 %v8343_v18, %v17449_v1  ;;  %v8207_v18 = vld [vmem:[#allocation4 + $0x60] sm:$0xf]  ;;  %v8391_v1 = vrot.slane %v8389_v32, 4  ;;  %v17494_v51 = vrot.slane %v8409_v27, 5  ;;  %v15023_v27 = vld [vmem:[%s15356_s17 + $0x90] sm:$0xff]  }
 0xa09   : > { %v8427_v52 = vshll.u32 %v8207_v18, 16 }
 0xa0a   : > { %v8345_v6 = vrot.slane %v8344_v61, 4 }
 0xa0b   : > { %14058 = vmatmul.mubr.msk.bf16.gmra.mrb[12].mxu1 %vm1449_vm12, %v15010_v12  ;;  %v17442_v12 = vrot.slane %v8289_v43, 5  ;;  %v8268_v43 = vsel %vm15971_vm1, %v8263_v19, %v17432_v50  ;;  %v8316_v50 = vsel %vm15971_vm1, %v8311_v8, %v17434_v38  ;;  %v8403_v38 = vshll.u32 %v8204_v17, 16 }
 0xa0c   : > { %14061 = vmatprep.mubr.msk.bf16.mxu1 %vm1449_vm12, %v15011_v14  ;;  %v8295_v14 = vrot.slane %v8293_v44, 4  ;;  %v8278_v44 = vsel %vm15971_vm1, %v8273_v56, %v17436_v29  ;;  %v8358_v29 = vor.u32 %v8357_v40, %v8354_v41  ;;  %v17476_v11 = vcombine.low %v8316_v50, %v8326_v5  ;;  %v8209_v5 = vld [vmem:[#allocation4 + $0x68] sm:$0x1] }
 0xa0d   : > { %v8292_v28 = vsel %vm15971_vm1, %v8287_v0, %v17442_v12  ;;  %v12896_v16 = vcombine.low %v8268_v43, %v8278_v44  ;;  %v8208_v0 = vld [vmem:[#allocation4 + $0x64] sm:$0xf]  ;;  %v8424_v8 = vshrl.u32 %v8207_v18, 16  ;;  %v8457_v40 = vshll.u32 %v8211_v49, 16 }
 0xa0e   : > { %v8296_v36 = vor.u32 %v8295_v14, %v17442_v12  ;;  %v8381_v12 = vrot.slane %v8379_v54, 5  ;;  %v8385_v14 = vshll.u32 %v8202_v45, 16  ;;  %v8433_v43 = vshll.u32 %v8208_v0, 16 }
 0xa0f   : > { %v8437_v44 = vshrl.u32 %v8208_v0, 16  ;;  %v8429_v50 = vrot.slane %v8427_v52, 5  ;;  %v15024_v52 = vld [vmem:[%s15356_s17 + $0x98] sm:$0xff]  }
 0xa10   : > { %v8297_v33 = vrot.slane %v8296_v36, 4  ;;  %v8382_v24 = vor.u32 %v8381_v12, %v8378_v39  ;;  %v17488_v19 = vrot.slane %v8385_v14, 5  ;;  %v8216_v39 = vld [vmem:[#allocation4 + $0x84] sm:$0xf] }
 0xa11   : > { %v8496_v18 = vshrl.u32 %v8216_v39, 16 }
 0xa12   : > { %v8302_v60 = vsel %vm15971_vm1, %v8297_v33, %v8301_v63  ;;  %v8402_v63 = vrot.slane %v8400_v20, 4  ;;  %v17502_v61 = vrot.slane %v8382_v24, 4  ;;  %v8461_v33 = vshrl.u32 %v8211_v49, 16 }
 0xa13   : > { %14062 = vmatmul.mubr.msk.bf16.gmra.mrb[16].mxu1 %vm1449_vm12, %v15013_v55  ;;  %v8197_v55 = vld [vmem:[#allocation4 + $0x38] sm:$0x1]  ;;  %v12897_v9 = vcombine.low %v8292_v28, %v8302_v60  ;;  %v8392_v54 = vor.u32 %v8391_v1, %v17488_v19  ;;  %v8426_v60 = vrot.slane %v8424_v8, 4  ;;  %v8217_v8 = vld [vmem:[#allocation4 + $0x88] sm:$0xf]  ;;  %v8498_v4 = vrot.slane %v8496_v18, 4 }
 0xa14   : > { %14065 = vmatprep.mubr.msk.bf16.mxu1 %vm1449_vm12, %v15014_v22  ;;  %v17451_v22 = vcombine.low %v8244_v57, %v8254_v15  ;;  %v8347_v2 = vshll.u32 %v8197_v55, 16  ;;  %v8371_v57 = vshll.u32 %v8200_v30, 16  ;;  %v8203_v15 = vld [vmem:[#allocation4 + $0x50] sm:$0x1]  ;;  %v17483_v55 = vrot.slane %v8358_v29, 4 }
 0xa15   : > { %v8395_v36 = vshll.u32 %v8203_v15, 16  ;;  %v8214_v30 = vld [vmem:[#allocation4 + $0x7c] sm:$0xf]  ;;  %v17514_v29 = vrot.slane %v8457_v40, 5  ;;  %v8463_v31 = vrot.slane %v8461_v33, 4  ;;  %v8393_v12 = vrot.slane %v8392_v54, 4 }
 0xa16   : > { %v17486_v21 = vrot.slane %v8371_v57, 5  ;;  %v8485_v57 = vshrl.u32 %v8214_v30, 16  ;;  %v8439_v15 = vrot.slane %v8437_v44, 4  ;;  %v8388_v54 = vsel %vm15971_vm1, %v17502_v61, %v17488_v19  ;;  %v8220_v19 = vld [vmem:[#allocation4 + $0x94] sm:$0xf] }
 0xa17   : > { %v17504_v41 = vrot.slane %v8395_v36, 5  ;;  %v8505_v44 = vshll.u32 %v8217_v8, 16 }
 0xa18   : > { %v8487_v36 = vrot.slane %v8485_v57, 4 }
 0xa1b   : > { %14066 = vmatmul.mubr.msk.bf16.gmra.mrb[20].mxu1 %vm1449_vm12, %v15015_v47  ;;  %v17463_v47 = vrot.slane %v8361_v46, 5  ;;  %v8405_v46 = vrot.slane %v8403_v38, 5  ;;  %v8430_v38 = vor.u32 %v8429_v50, %v8426_v60  ;;  %v17546_v60 = vld [vmem:[%s15356_s17 + $0xa0] sm:$0xff]  }
 0xa1c   : > { %14069 = vmatprep.mubr.msk.bf16.mxu1 %vm1449_vm12, %v15016_v23  ;;  %v8349_v23 = vrot.slane %v8347_v2, 5 }
 0xa1d   : > { %v8368_v13 = vor.u32 %v8367_v42, %v17463_v47  ;;  %v8206_v42 = vld [vmem:[#allocation4 + $0x5c] sm:$0x1]  ;;  %v8406_v45 = vor.u32 %v8405_v46, %v8402_v63 }
 0xa1e   : > { %v8350_v48 = vsel %vm15971_vm1, %v8345_v6, %v8349_v23  ;;  %v8472_v6 = vshrl.u32 %v8213_v7, 16  ;;  %v8475_v23 = vshll.u32 %v8213_v7, 16  ;;  %v8419_v14 = vshll.u32 %v8206_v42, 16 }
 0xa1f   : > { %v17492_v56 = vrot.slane %v8368_v13, 4  ;;  %v17496_v2 = vcombine.low %v8340_v26, %v8350_v48  ;;  %v17518_v13 = vrot.slane %v8433_v43, 5  ;;  %v8407_v32 = vrot.slane %v8406_v45, 4  ;;  %v8215_v26 = vld [vmem:[#allocation4 + $0x80] sm:$0x1] }
 0xa20   : > { %v8474_v48 = vrot.slane %v8472_v6, 4  ;;  %v8421_v1 = vrot.slane %v8419_v14, 5  ;;  %v8491_v0 = vshll.u32 %v8215_v26, 16  ;;  %v8223_v14 = vld [vmem:[#allocation4 + $0xa0] sm:$0xf] }
 0xa21   : > { %v8374_v62 = vsel %vm15971_vm1, %v17492_v56, %v17486_v21  ;;  %v8499_v21 = vshll.u32 %v8216_v39, 16  ;;  %v8398_v56 = vsel %vm15971_vm1, %v8393_v12, %v17504_v41  ;;  %v8440_v63 = vor.u32 %v8439_v15, %v17518_v13  ;;  %v8225_v26 = vld [vmem:[#allocation4 + $0xa8] sm:$0xf] }
 0xa22   : > { %v8412_v46 = vsel %vm15971_vm1, %v8407_v32, %v17494_v51  ;;  %v8431_v41 = vrot.slane %v8430_v38, 4  ;;  %v8493_v45 = vrot.slane %v8491_v0, 5  ;;  %v8529_v32 = vshll.u32 %v8220_v19, 16 }
 0xa23   : > { %14070 = vmatmul.mubr.msk.bf16.gmra.mrb[24].mxu1 %vm1449_vm12, %v15018_v3  ;;  %v8415_v3 = vrot.slane %v8413_v58, 4  ;;  %v8212_v58 = vld [vmem:[#allocation4 + $0x74] sm:$0x1]  ;;  %v8501_v40 = vrot.slane %v8499_v21, 5  ;;  %v8441_v43 = vrot.slane %v8440_v63, 4  ;;  %v8553_v18 = vshll.u32 %v8223_v14, 16 }
 0xa24   : > { %14073 = vmatprep.mubr.msk.bf16.mxu1 %vm1449_vm12, %v15019_v37  ;;  %v8448_v37 = vshrl.u32 %v8210_v59, 16  ;;  %v8436_v61 = vsel %vm15971_vm1, %v8431_v41, %v17518_v13  ;;  %v8557_v21 = vshrl.u32 %v8223_v14, 16  ;;  %v17577_v63 = vrot.slane %v8529_v32, 5 }
 0xa25   : > { %v8416_v28 = vor.u32 %v8415_v3, %v17494_v51  ;;  %v8467_v3 = vshll.u32 %v8212_v58, 16  ;;  %v8221_v58 = vld [vmem:[#allocation4 + $0x98] sm:$0x1] }
 0xa26   : > { %v8450_v17 = vrot.slane %v8448_v37, 4  ;;  %v8559_v41 = vrot.slane %v8557_v21, 4 }
 0xa27   : > { %v8417_v20 = vrot.slane %v8416_v28, 4  ;;  %v8469_v42 = vrot.slane %v8467_v3, 5  ;;  %v8219_v28 = vld [vmem:[#allocation4 + $0x90] sm:$0xf]  ;;  %v8571_v3 = vshll.u32 %v8225_v26, 16 }
 0xa28   : > { %v8520_v39 = vshrl.u32 %v8219_v28, 16  ;;  %v8523_v12 = vshll.u32 %v8219_v28, 16 }
 0xa2b   : > { %14074 = vmatmul.mubr.msk.bf16.gmra.mrb[28].mxu1 %vm1449_vm12, %v15020_v10  ;;  %v8481_v10 = vshll.u32 %v8214_v30, 16  ;;  %v8509_v30 = vshrl.u32 %v8217_v8, 16  ;;  %v8539_v8 = vshll.u32 %v8221_v58, 16 }
 0xa2c   : > { %14085 = vmatprep.mubr.msk.bf16.mxu1 %vm1449_vm12, %v17451_v22  ;;  %v8364_v22 = vsel %vm15971_vm1, %v17483_v55, %v17463_v47  ;;  %v15022_v47 = vld [vmem:[%s15356_s17 + $0x88] sm:$0xff]   ;;  %v8477_v55 = vrot.slane %v8475_v23, 5 }
 0xa2d   : > { %v17522_v24 = vrot.slane %v8481_v10, 5  ;;  %v12900_v59 = vcombine.low %v8364_v22, %v8374_v62  ;;  %v8422_v22 = vsel %vm15971_vm1, %v8417_v20, %v8421_v1  ;;  %v8218_v62 = vld [vmem:[#allocation4 + $0x8c] sm:$0x1]  ;;  %v17558_v10 = vrot.slane %v8505_v44, 5  ;;  %v8228_v1 = vld [vmem:[#allocation4 + $0xb4] sm:$0xf] }
 0xa2e   : > { %v8478_v37 = vor.u32 %v8477_v55, %v8474_v48  ;;  %v8511_v57 = vrot.slane %v8509_v30, 4  ;;  %v8533_v20 = vshrl.u32 %v8220_v19, 16 }
 0xa2f   : > { %v8488_v51 = vor.u32 %v8487_v36, %v17522_v24 }
 0xa30   : > { %v8479_v50 = vrot.slane %v8478_v37, 4  ;;  %v8512_v36 = vor.u32 %v8511_v57, %v17558_v10 }
 0xa31   : > { %v8489_v23 = vrot.slane %v8488_v51, 4  ;;  %v8592_v51 = vshrl.u32 %v8228_v1, 16 }
 0xa32   : > { %v8484_v38 = vsel %vm15971_vm1, %v8479_v50, %v17522_v24  ;;  %v8522_v24 = vrot.slane %v8520_v39, 4  ;;  %v17585_v44 = vrot.slane %v8512_v36, 4  ;;  %v8938_v50 = vld [vmem:[#allocation4 + $0x10] sm:$0xf]  ;;  %v8230_v36 = vld [vmem:[#allocation4 + $0xbc] sm:$0x1] }
 0xa33   : > { %14086 = vmatmul.mubr.msk.bf16.vlgmr.msra.gmra.mrb[0].mxu1 %vm1449_vm12, %v12896_v16  ;;  %v8443_v16 = vshll.u32 %v8209_v5, 16  ;;  %v8502_v5 = vor.u32 %v8501_v40, %v8498_v4  ;;  %v8494_v13 = vsel %vm15971_vm1, %v8489_v23, %v8493_v45  ;;  %v17583_v40 = vrot.slane %v8553_v18, 5 }
 0xa34   : > { %14118 = vmatpush3.bf16.msra.mxu1 %v17420_v35  ;;  %14089 = vmatprep.mubr.msk.bf16.mxu1 %vm1449_vm12, %v12897_v9  ;;  %v8454_v35 = vor.u32 %v8453_v25, %v8450_v17  ;;  %v8464_v9 = vor.u32 %v8463_v31, %v17514_v29  ;;  %v8515_v17 = vshll.u32 %v8218_v62, 16  ;;  %v8222_v31 = vld [vmem:[#allocation4 + $0x9c] sm:$0xf]  ;;  %v8595_v62 = vshll.u32 %v8228_v1, 16  ;;  %v8940_v1 = vld [vmem:[#allocation4 + $0x18] sm:$0xf] }
 0xa35   : > { %14119 = vmatprep.subr.bf16.mxu1 %v15022_v47  ;;  %v8445_v49 = vrot.slane %v8443_v16, 5  ;;  %v17568_v16 = vrot.slane %v8502_v5, 4  ;;  %v8544_v48 = vshrl.u32 %v8222_v31, 16  ;;  %v8547_v55 = vshll.u32 %v8222_v31, 16 }
 0xa36   : > { %v8455_v33 = vrot.slane %v8454_v35, 4  ;;  %v8465_v7 = vrot.slane %v8464_v9, 4  ;;  %v8226_v35 = vld [vmem:[#allocation4 + $0xac] sm:$0xf]  ;;  %v17574_v9 = vcombine.low %v8484_v38, %v8494_v13  ;;  %v8573_v45 = vrot.slane %v8571_v3, 5 }
 0xa37   : > { %v8508_v0 = vsel %vm15971_vm1, %v17568_v16, %v17558_v10  ;;  %v8546_v37 = vrot.slane %v8544_v48, 4  ;;  %v8549_v4 = vrot.slane %v8547_v55, 5  ;;  %v8594_v23 = vrot.slane %v8592_v51, 4 }
 0xa38   : > { %14120 = vmatpush3.bf16.msra.mxu1 %v15022_v47  ;;  %v17543_v47 = vcombine.low %v8412_v46, %v8422_v22  ;;  %v8460_v25 = vsel %vm15971_vm1, %v8455_v33, %v17514_v29  ;;  %v8470_v6 = vsel %vm15971_vm1, %v8465_v7, %v8469_v42  ;;  %v8535_v46 = vrot.slane %v8533_v20, 4  ;;  %v8937_v33 = vld [vmem:[#allocation4 + $0xc] sm:$0xf]  ;;  %v8227_v7 = vld [vmem:[#allocation4 + $0xb0] sm:$0x1] }
 0xa39   : > { %14121 = vmatprep.subr.bf16.mxu1 %v15023_v27  ;;  %v17563_v29 = vcombine.low %v8460_v25, %v8470_v6  ;;  %v8581_v22 = vshrl.u32 %v8226_v35, 16  ;;  %v8986_v5 = vshrl.u32 %v8937_v33, 16  ;;  %v8560_v25 = vor.u32 %v8559_v41, %v17583_v40  ;;  %v8939_v41 = vld [vmem:[#allocation4 + $0x14] sm:$0x1] }
 0xa3a   : > { %v8536_v19 = vor.u32 %v8535_v46, %v17577_v63  ;;  %v8587_v6 = vshll.u32 %v8227_v7, 16  ;;  %v8597_v31 = vrot.slane %v8595_v62, 5  ;;  %v8995_v13 = vshll.u32 %v8938_v50, 16 }
 0xa3b   : > { %14090 = vmatmul.mubr.msk.bf16.gmra.mrb[4].mxu1 %vm1449_vm12, %v17476_v11  ;;  %v12901_v11 = vcombine.low %v8388_v54, %v8398_v56  ;;  %v8525_v56 = vrot.slane %v8523_v12, 5  ;;  %v8541_v12 = vrot.slane %v8539_v8, 5  ;;  %v8999_v32 = vshrl.u32 %v8938_v50, 16 }
 0xa3c   : > { %14093 = vmatprep.mubr.msk.bf16.mxu1 %vm1449_vm12, %v17496_v2  ;;  %14122 = vmatpush3.bf16.msra.mxu1 %v15023_v27  ;;  %v8446_v2 = vsel %vm15971_vm1, %v8441_v43, %v8445_v49  ;;  %v17570_v27 = vrot.slane %v8515_v17, 5  ;;  %v8568_v49 = vshrl.u32 %v8225_v26, 16  ;;  %v8989_v17 = vshll.u32 %v8937_v33, 16  ;;  %v8941_v26 = vld [vmem:[#allocation4 + $0x1c] sm:$0xf] }
 0xa3d   : > { %14123 = vmatprep.subr.bf16.mxu1 %v15024_v52  ;;  %v12903_v15 = vcombine.low %v8436_v61, %v8446_v2  ;;  %v8526_v30 = vor.u32 %v8525_v56, %v8522_v24  ;;  %v8583_v2 = vrot.slane %v8581_v22, 4  ;;  %v8550_v61 = vor.u32 %v8549_v4, %v8546_v37 }
 0xa3e   : > { %v8570_v42 = vrot.slane %v8568_v49, 4  ;;  %v8988_v38 = vrot.slane %v8986_v5, 4  ;;  %v8991_v58 = vrot.slane %v8989_v17, 5  ;;  %v8537_v55 = vrot.slane %v8536_v19, 4 }
 0xa3f   : > { %v8527_v48 = vrot.slane %v8526_v30, 4  ;;  %v8551_v18 = vrot.slane %v8550_v61, 4  ;;  %v8561_v21 = vrot.slane %v8560_v25, 4  ;;  %v8598_v24 = vor.u32 %v8597_v31, %v8594_v23  ;;  %v8943_v61 = vld [vmem:[#allocation4 + $0x24] sm:$0xf] }
 0xa40   : > { %14124 = vmatpush3.bf16.msra.mxu1 %v15024_v52  ;;  %v8577_v52 = vshll.u32 %v8226_v35, 16  ;;  %v8574_v20 = vor.u32 %v8573_v45, %v8570_v42  ;;  %v8589_v35 = vrot.slane %v8587_v6, 5  ;;  %v17602_v46 = vrot.slane %v8995_v13, 5  ;;  %v8944_v31 = vld [vmem:[#allocation4 + $0x28] sm:$0xf] }
 0xa41   : > { %14157 = vmatprep.subr.bf16.mxu1 %v17546_v60  ;;  %v9001_v49 = vrot.slane %v8999_v32, 4  ;;  %v9019_v3 = vshll.u32 %v8941_v26, 16  ;;  %v8992_v37 = vor.u32 %v8991_v58, %v8988_v38  ;;  %v8611_v4 = vshll.u32 %v8230_v36, 16  ;;  %v8946_v13 = vld [vmem:[#allocation4 + $0x30] sm:$0xf] }
 0xa42   : > { %v17587_v28 = vrot.slane %v8577_v52, 5  ;;  %v8575_v52 = vrot.slane %v8574_v20, 4  ;;  %v9010_v33 = vshrl.u32 %v8940_v1, 16  ;;  %v9013_v7 = vshll.u32 %v8940_v1, 16  ;;  %v8947_v32 = vld [vmem:[#allocation4 + $0x34] sm:$0xf] }
 0xa43   : > { %14094 = vmatmul.mubr.msk.bf16.gmra.mrb[8].mxu1 %vm1449_vm12, %v12900_v59  ;;  %v8229_v59 = vld [vmem:[#allocation4 + $0xb8] sm:$0xf]  ;;  %v8556_v51 = vsel %vm15971_vm1, %v8551_v18, %v17583_v40  ;;  %v9002_v30 = vor.u32 %v9001_v49, %v17602_v46  ;;  %v8532_v40 = vsel %vm15971_vm1, %v8527_v48, %v17577_v63  ;;  %v17630_v45 = vrot.slane %v8992_v37, 4 }
 0xa44   : > { %14097 = vmatprep.mubr.msk.bf16.mxu1 %vm1449_vm12, %v12901_v11  ;;  %v8601_v54 = vshll.u32 %v8229_v59, 16  ;;  %v8605_v43 = vshrl.u32 %v8229_v59, 16  ;;  %v8224_v11 = vld [vmem:[#allocation4 + $0xa4] sm:$0x1]  ;;  %v9023_v59 = vshrl.u32 %v8941_v26, 16  ;;  %v8580_v42 = vsel %vm15971_vm1, %v8575_v52, %v17587_v28 }
 0xa45   : > { %v8563_v14 = vshll.u32 %v8224_v11, 16  ;;  %v17622_v11 = vrot.slane %v9019_v3, 5  ;;  %v8613_v50 = vrot.slane %v8611_v4, 5  ;;  %v9012_v5 = vrot.slane %v9010_v33, 4  ;;  %v8945_v4 = vld [vmem:[#allocation4 + $0x2c] sm:$0x1] }
 0xa46   : > { %v17594_v57 = vrot.slane %v8601_v54, 5  ;;  %v8607_v39 = vrot.slane %v8605_v43, 4  ;;  %v17617_v54 = vrot.slane %v8598_v24, 4  ;;  %v8942_v43 = vld [vmem:[#allocation4 + $0x20] sm:$0x1]  ;;  %v9015_v17 = vrot.slane %v9013_v7, 5 }
 0xa47   : > { %v8565_v8 = vrot.slane %v8563_v14, 5  ;;  %v9029_v19 = vshll.u32 %v8942_v43, 16  ;;  %v8998_v10 = vsel %vm15971_vm1, %v17630_v45, %v17602_v46  ;;  %v9037_v20 = vshll.u32 %v8943_v61, 16 }
 0xa48   : > { %v8608_v56 = vor.u32 %v8607_v39, %v17594_v57  ;;  %v9043_v58 = vshll.u32 %v8944_v31, 16  ;;  %v9047_v26 = vshrl.u32 %v8944_v31, 16  ;;  %v9058_v48 = vshrl.u32 %v8946_v13, 16  ;;  %v8954_v31 = vld [vmem:[#allocation4 + $0x50] sm:$0x1] }
 0xa49   : > { %v8566_v62 = vsel %vm15971_vm1, %v8561_v21, %v8565_v8  ;;  %v9031_v38 = vrot.slane %v9029_v19, 5  ;;  %v9067_v18 = vshll.u32 %v8947_v32, 16  ;;  %v9071_v21 = vshrl.u32 %v8947_v32, 16 }
 0xa4a   : > { %v12908_v63 = vcombine.low %v8556_v51, %v8566_v62  ;;  %v9039_v46 = vrot.slane %v9037_v20, 5  ;;  %v9049_v37 = vrot.slane %v9047_v26, 4  ;;  %v8948_v62 = vld [vmem:[#allocation4 + $0x38] sm:$0x1] }
 0xa4b   : > { %14098 = vmatmul.mubr.msk.bf16.gmra.mrb[12].mxu1 %vm1449_vm12, %v17543_v47  ;;  %v8584_v47 = vor.u32 %v8583_v2, %v17587_v28  ;;  %v9005_v2 = vshll.u32 %v8939_v41, 16  ;;  %v8604_v28 = vsel %vm15971_vm1, %v17617_v54, %v17594_v57  ;;  %v9016_v57 = vor.u32 %v9015_v17, %v9012_v5  ;;  %v8951_v17 = vld [vmem:[#allocation4 + $0x44] sm:$0x1] }
 0xa4c   : > { %14101 = vmatprep.mubr.msk.bf16.mxu1 %vm1449_vm12, %v12903_v15  ;;  %v8518_v15 = vsel %vm15971_vm1, %v17585_v44, %v17570_v27  ;;  %v8542_v27 = vsel %vm15971_vm1, %v8537_v55, %v8541_v12  ;;  %v17619_v44 = vrot.slane %v8608_v56, 4  ;;  %v9003_v12 = vrot.slane %v9002_v30, 4 }
 0xa4d   : > { %v8585_v22 = vrot.slane %v8584_v47, 4  ;;  %v12906_v25 = vcombine.low %v8508_v0, %v8518_v15  ;;  %v12907_v6 = vcombine.low %v8532_v40, %v8542_v27  ;;  %v9007_v16 = vrot.slane %v9005_v2, 5  ;;  %v8949_v47 = vld [vmem:[#allocation4 + $0x3c] sm:$0xf]  ;;  %v8950_v15 = vld [vmem:[#allocation4 + $0x40] sm:$0xf] }
 0xa4e   : > { %v8614_v39 = vsel %vm15971_vm1, %v17619_v44, %v8613_v50  ;;  %v9034_v0 = vshrl.u32 %v8943_v61, 16  ;;  %v9061_v55 = vshll.u32 %v8946_v13, 16  ;;  %v9082_v24 = vshrl.u32 %v8949_v47, 16  ;;  %v8952_v27 = vld [vmem:[#allocation4 + $0x48] sm:$0xf] }
 0xa4f   : > { %v9085_v56 = vshll.u32 %v8949_v47, 16  ;;  %v9091_v49 = vshll.u32 %v8950_v15, 16  ;;  %v9095_v3 = vshrl.u32 %v8950_v15, 16  ;;  %v9017_v8 = vrot.slane %v9016_v57, 4  ;;  %v8956_v13 = vld [vmem:[#allocation4 + $0x58] sm:$0xf] }
 0xa50   : > { %v9036_v1 = vrot.slane %v9034_v0, 4  ;;  %v9060_v41 = vrot.slane %v9058_v48, 4  ;;  %v9063_v33 = vrot.slane %v9061_v55, 5  ;;  %v17657_v7 = vrot.slane %v9067_v18, 5 }
 0xa51   : > { %v9073_v51 = vrot.slane %v9071_v21, 4  ;;  %v9087_v54 = vrot.slane %v9085_v56, 5  ;;  %v17659_v30 = vrot.slane %v9091_v49, 5  ;;  %v9106_v40 = vshrl.u32 %v8952_v27, 16  ;;  %v8958_v21 = vld [vmem:[#allocation4 + $0x60] sm:$0xf] }
 0xa52   : > { %v12910_v45 = vcombine.low %v8604_v28, %v8614_v39  ;;  %v9022_v50 = vsel %vm15971_vm1, %v9017_v8, %v17622_v11  ;;  %v9040_v5 = vor.u32 %v9039_v46, %v9036_v1  ;;  %v9125_v0 = vshll.u32 %v8954_v31, 16  ;;  %v8957_v49 = vld [vmem:[#allocation4 + $0x5c] sm:$0x1] }
 0xa53   : > { %14102 = vmatmul.mubr.msk.bf16.gmra.mrb[16].mxu1 %vm1449_vm12, %v17563_v29  ;;  %v8590_v29 = vsel %vm15971_vm1, %v8585_v22, %v8589_v35  ;;  %v9008_v35 = vsel %vm15971_vm1, %v9003_v12, %v9007_v16  ;;  %v17655_v22 = vrot.slane %v9043_v58, 5  ;;  %v8955_v12 = vld [vmem:[#allocation4 + $0x54] sm:$0xf]  ;;  %v9101_v16 = vshll.u32 %v8951_v17, 16 }
 0xa54   : > { %14105 = vmatprep.mubr.msk.bf16.mxu1 %vm1449_vm12, %v17574_v9  ;;  %v9025_v9 = vrot.slane %v9023_v59, 4  ;;  %v12909_v23 = vcombine.low %v8580_v42, %v8590_v29  ;;  %v8953_v59 = vld [vmem:[#allocation4 + $0x4c] sm:$0xf]  ;;  %v9084_v29 = vrot.slane %v9082_v24, 4  ;;  %v9109_v42 = vshll.u32 %v8952_v27, 16 }
 0xa55   : > { %v9115_v43 = vshll.u32 %v8953_v59, 16  ;;  %v9119_v44 = vshrl.u32 %v8953_v59, 16  ;;  %v12939_v2 = vcombine.low %v8998_v10, %v9008_v35  ;;  %v9050_v61 = vor.u32 %v9049_v37, %v17655_v22  ;;  %v8959_v37 = vld [vmem:[#allocation4 + $0x64] sm:$0xf] }
 0xa56   : > { %v9026_v14 = vor.u32 %v9025_v9, %v17622_v11  ;;  %v9097_v9 = vrot.slane %v9095_v3, 4  ;;  %v9088_v11 = vor.u32 %v9087_v54, %v9084_v29  ;;  %v9108_v10 = vrot.slane %v9106_v40, 4 }
 0xa57   : > { %v17670_v28 = vrot.slane %v9115_v43, 5  ;;  %v9121_v39 = vrot.slane %v9119_v44, 4  ;;  %v9130_v20 = vshrl.u32 %v8955_v12, 16  ;;  %v9133_v47 = vshll.u32 %v8955_v12, 16 }
 0xa58   : > { %v9027_v36 = vrot.slane %v9026_v14, 4  ;;  %v9064_v14 = vor.u32 %v9063_v33, %v9060_v41  ;;  %v9098_v32 = vor.u32 %v9097_v9, %v17659_v30  ;;  %v9041_v57 = vrot.slane %v9040_v5, 4  ;;  %v8962_v9 = vld [vmem:[#allocation4 + $0x70] sm:$0xf] }
 0xa59   : > { %v9139_v58 = vshll.u32 %v8956_v13, 16  ;;  %v9143_v26 = vshrl.u32 %v8956_v13, 16  ;;  %v9051_v15 = vrot.slane %v9050_v61, 4  ;;  %v9122_v18 = vor.u32 %v9121_v39, %v17670_v28 }
 0xa5a   : > { %v9032_v52 = vsel %vm15971_vm1, %v9027_v36, %v9031_v38  ;;  %v9065_v48 = vrot.slane %v9064_v14, 4  ;;  %v9089_v36 = vrot.slane %v9088_v11, 4  ;;  %v9099_v24 = vrot.slane %v9098_v32, 4  ;;  %v8964_v11 = vld [vmem:[#allocation4 + $0x78] sm:$0xf] }
 0xa5b   : > { %14106 = vmatmul.mubr.msk.bf16.gmra.mrb[20].mxu1 %vm1449_vm12, %v12906_v25  ;;  %v17666_v19 = vcombine.low %v9022_v50, %v9032_v52  ;;  %v9053_v25 = vshll.u32 %v8945_v4, 16  ;;  %v9103_v1 = vrot.slane %v9101_v16, 5  ;;  %v9127_v46 = vrot.slane %v9125_v0, 5  ;;  %v8967_v32 = vld [vmem:[#allocation4 + $0x84] sm:$0xf] }
 0xa5c   : > { %14109 = vmatprep.mubr.msk.bf16.mxu1 %vm1449_vm12, %v12907_v6  ;;  %v9077_v6 = vshll.u32 %v8948_v62, 16  ;;  %v9132_v3 = vrot.slane %v9130_v20, 4  ;;  %v9135_v59 = vrot.slane %v9133_v47, 5  ;;  %v17676_v8 = vrot.slane %v9139_v58, 5  ;;  %v8965_v20 = vld [vmem:[#allocation4 + $0x7c] sm:$0xf] }
 0xa5d   : > { %v9055_v38 = vrot.slane %v9053_v25, 5  ;;  %v9145_v52 = vrot.slane %v9143_v26, 4  ;;  %v9154_v27 = vshrl.u32 %v8958_v21, 16  ;;  %v9157_v4 = vshll.u32 %v8958_v21, 16  ;;  %v8960_v25 = vld [vmem:[#allocation4 + $0x68] sm:$0x1] }
 0xa5e   : > { %v9079_v55 = vrot.slane %v9077_v6, 5  ;;  %v9046_v41 = vsel %vm15971_vm1, %v9041_v57, %v17655_v22  ;;  %v9123_v62 = vrot.slane %v9122_v18, 4  ;;  %v9094_v54 = vsel %vm15971_vm1, %v9089_v36, %v17659_v30  ;;  %v8961_v22 = vld [vmem:[#allocation4 + $0x6c] sm:$0xf]  ;;  %v8968_v58 = vld [vmem:[#allocation4 + $0x88] sm:$0xf] }
 0xa5f   : > { %v9056_v33 = vsel %vm15971_vm1, %v9051_v15, %v9055_v38  ;;  %v9104_v43 = vsel %vm15971_vm1, %v9099_v24, %v9103_v1  ;;  %v9146_v50 = vor.u32 %v9145_v52, %v17676_v8  ;;  %v9156_v5 = vrot.slane %v9154_v27, 4  ;;  %v8963_v18 = vld [vmem:[#allocation4 + $0x74] sm:$0x1] }
 0xa60   : > { %v9128_v40 = vsel %vm15971_vm1, %v9123_v62, %v9127_v46  ;;  %v9159_v17 = vrot.slane %v9157_v4, 5  ;;  %v9167_v61 = vshrl.u32 %v8959_v37, 16  ;;  %v9178_v30 = vshrl.u32 %v8961_v22, 16  ;;  %v15028_v62 = vld [vmem:[%s15356_s17 + $0xb8] sm:$0xff]  }
 0xa61   : > { %v9181_v6 = vshll.u32 %v8961_v22, 16  ;;  %v9187_v31 = vshll.u32 %v8962_v9, 16  ;;  %v9191_v12 = vshrl.u32 %v8962_v9, 16  ;;  %v12941_v14 = vcombine.low %v9046_v41, %v9056_v33  ;;  %v8970_v33 = vld [vmem:[#allocation4 + $0x90] sm:$0xf] }
 0xa62   : > { %v12943_v39 = vcombine.low %v9094_v54, %v9104_v43  ;;  %v9147_v47 = vrot.slane %v9146_v50, 4  ;;  %v9160_v57 = vor.u32 %v9159_v17, %v9156_v5  ;;  %v9173_v38 = vshll.u32 %v8960_v25, 16 }
 0xa63   : > { %14110 = vmatmul.mubr.msk.bf16.gmra.mrb[24].mxu1 %vm1449_vm12, %v12908_v63  ;;  %v9074_v63 = vor.u32 %v9073_v51, %v17657_v7  ;;  %v9070_v51 = vsel %vm15971_vm1, %v9065_v48, %v17657_v7  ;;  %v9163_v7 = vshll.u32 %v8959_v37, 16  ;;  %v9180_v26 = vrot.slane %v9178_v30, 4 }
 0xa64   : > { %14113 = vmatprep.mubr.msk.bf16.mxu1 %vm1449_vm12, %v12909_v23  ;;  %v9111_v23 = vrot.slane %v9109_v42, 5  ;;  %v9136_v42 = vor.u32 %v9135_v59, %v9132_v3  ;;  %v17708_v15 = vrot.slane %v9187_v31, 5  ;;  %v9193_v48 = vrot.slane %v9191_v12, 4  ;;  %v17734_v31 = vld [vmem:[%s15356_s17 + $0xc0] sm:$0xff]  }
 0xa65   : > { %v9075_v35 = vrot.slane %v9074_v63, 4  ;;  %v17704_v0 = vrot.slane %v9163_v7, 5  ;;  %v9202_v21 = vshrl.u32 %v8964_v11, 16  ;;  %v9211_v36 = vshll.u32 %v8965_v20, 16  ;;  %v8969_v7 = vld [vmem:[#allocation4 + $0x8c] sm:$0x1] }
 0xa66   : > { %v9112_v56 = vor.u32 %v9111_v23, %v9108_v10  ;;  %v9137_v23 = vrot.slane %v9136_v42, 4  ;;  %v9215_v24 = vshrl.u32 %v8965_v20, 16  ;;  %v9235_v1 = vshll.u32 %v8968_v58, 16 }
 0xa67   : > { %v9080_v29 = vsel %vm15971_vm1, %v9075_v35, %v9079_v55  ;;  %v15027_v55 = vld [vmem:[%s15356_s17 + $0xb0] sm:$0xff]   ;;  %v9205_v35 = vshll.u32 %v8964_v11, 16  ;;  %v9239_v46 = vshrl.u32 %v8968_v58, 16  ;;  %v17714_v3 = vrot.slane %v9160_v57, 4 }
 0xa68   : > { %v9113_v44 = vrot.slane %v9112_v56, 4  ;;  %v12942_v63 = vcombine.low %v9070_v51, %v9080_v29  ;;  %v9229_v56 = vshll.u32 %v8967_v32, 16  ;;  %v17717_v52 = vrot.slane %v9173_v38, 5  ;;  %v8971_v51 = vld [vmem:[#allocation4 + $0x94] sm:$0xf] }
 0xa69   : > { %v9194_v4 = vor.u32 %v9193_v48, %v17708_v15  ;;  %v9197_v41 = vshll.u32 %v8963_v18, 16  ;;  %v9204_v29 = vrot.slane %v9202_v21, 4  ;;  %v9207_v54 = vrot.slane %v9205_v35, 5  ;;  %v8976_v35 = vld [vmem:[#allocation4 + $0xa8] sm:$0xf] }
 0xa6a   : > { %v9118_v13 = vsel %vm15971_vm1, %v9113_v44, %v17670_v28  ;;  %v9169_v28 = vrot.slane %v9167_v61, 4  ;;  %v9217_v43 = vrot.slane %v9215_v24, 4  ;;  %v8966_v44 = vld [vmem:[#allocation4 + $0x80] sm:$0x1]  ;;  %v9231_v9 = vrot.slane %v9229_v56, 5 }
 0xa6b   : > { %14114 = vmatmul.mubr.msk.bf16.gmra.mrb[28].mxu1 %vm1449_vm12, %v12910_v45  ;;  %v9149_v45 = vshll.u32 %v8957_v49, 16  ;;  %v17702_v10 = vcombine.low %v9118_v13, %v9128_v40  ;;  %v9142_v49 = vsel %vm15971_vm1, %v9137_v23, %v17676_v8  ;;  %v17723_v8 = vrot.slane %v9211_v36, 5  ;;  %v8974_v13 = vld [vmem:[#allocation4 + $0xa0] sm:$0xf] }
 0xa6c   : > { %14125 = vmatprep.mubr.msk.bf16.mxu1 %vm1449_vm12, %v12939_v2  ;;  %v15026_v2 = vld [vmem:[%s15356_s17 + $0xa8] sm:$0xff]   ;;  %v9170_v59 = vor.u32 %v9169_v28, %v17704_v0  ;;  %v17726_v40 = vrot.slane %v9235_v1, 5  ;;  %v9241_v42 = vrot.slane %v9239_v46, 4  ;;  %v9253_v50 = vshll.u32 %v8970_v33, 16  ;;  %v8972_v28 = vld [vmem:[#allocation4 + $0x98] sm:$0x1] }
 0xa6d   : > { %v9151_v16 = vrot.slane %v9149_v45, 5  ;;  %v9259_v5 = vshll.u32 %v8971_v51, 16  ;;  %v9166_v17 = vsel %vm15971_vm1, %v17714_v3, %v17704_v0  ;;  %v9199_v25 = vrot.slane %v9197_v41, 5  ;;  %v8977_v1 = vld [vmem:[#allocation4 + $0xac] sm:$0xf] }
 0xa6e   : > { %v9171_v61 = vrot.slane %v9170_v59, 4  ;;  %v9263_v30 = vshrl.u32 %v8971_v51, 16  ;;  %v9218_v11 = vor.u32 %v9217_v43, %v17723_v8  ;;  %v9242_v23 = vor.u32 %v9241_v42, %v17726_v40 }
 0xa6f   : > { %v9152_v37 = vsel %vm15971_vm1, %v9147_v47, %v9151_v16  ;;  %v9245_v16 = vshll.u32 %v8969_v7, 16  ;;  %v9255_v0 = vrot.slane %v9253_v50, 5  ;;  %v17738_v47 = vrot.slane %v9259_v5, 5  ;;  %v8980_v7 = vld [vmem:[#allocation4 + $0xb8] sm:$0xf] }
 0xa70   : > { %v12945_v45 = vcombine.low %v9142_v49, %v9152_v37  ;;  %v9265_v38 = vrot.slane %v9263_v30, 4  ;;  %v9176_v48 = vsel %vm15971_vm1, %v9171_v61, %v17717_v52  ;;  %v9219_v24 = vrot.slane %v9218_v11, 4 }
 0xa71   : > { %v9247_v56 = vrot.slane %v9245_v16, 5  ;;  %v9243_v46 = vrot.slane %v9242_v23, 4  ;;  %v9269_v3 = vshll.u32 %v8972_v28, 16  ;;  %v9298_v41 = vshrl.u32 %v8976_v35, 16  ;;  %v8983_v28 = vld [vmem:[#allocation4 + $0xc4] sm:$0xf] }
 0xa72   : > { %v9311_v51 = vshrl.u32 %v8977_v1, 16 }
 0xa73   : > { %14126 = vmatmul.mubr.msk.bf16.vlgmr.msra.gmra.mrb[0].mxu1 %vm1449_vm12, %v17666_v19  ;;  %v9183_v19 = vrot.slane %v9181_v6, 5  ;;  %v8973_v6 = vld [vmem:[#allocation4 + $0x9c] sm:$0xf]  ;;  %v9271_v42 = vrot.slane %v9269_v3, 5  ;;  %v9300_v61 = vrot.slane %v9298_v41, 4 }
 0xa74   : > { %14158 = vmatpush3.bf16.msra.mxu1 %v17546_v60  ;;  %14129 = vmatprep.mubr.msk.bf16.mxu1 %vm1449_vm12, %v12941_v14  ;;  %v9226_v60 = vshrl.u32 %v8967_v32, 16  ;;  %v9195_v14 = vrot.slane %v9194_v4, 4  ;;  %v9274_v57 = vshrl.u32 %v8973_v6, 16  ;;  %v9277_v58 = vshll.u32 %v8973_v6, 16  ;;  %v8975_v4 = vld [vmem:[#allocation4 + $0xa4] sm:$0x1] }
 0xa75   : > { %14159 = vmatprep.subr.bf16.mxu1 %v15026_v2  ;;  %v9184_v27 = vor.u32 %v9183_v19, %v9180_v26  ;;  %v9283_v26 = vshll.u32 %v8974_v13, 16  ;;  %v9287_v19 = vshrl.u32 %v8974_v13, 16  ;;  %v9313_v6 = vrot.slane %v9311_v51, 4 }
 0xa76   : > { %v9228_v22 = vrot.slane %v9226_v60, 4  ;;  %v9200_v18 = vsel %vm15971_vm1, %v9195_v14, %v9199_v25  ;;  %v9276_v59 = vrot.slane %v9274_v57, 4  ;;  %v9279_v52 = vrot.slane %v9277_v58, 5 }
 0xa77   : > { %v9185_v12 = vrot.slane %v9184_v27, 4  ;;  %v17753_v37 = vrot.slane %v9283_v26, 5  ;;  %v9289_v27 = vrot.slane %v9287_v19, 4 }
 0xa78   : > { %14160 = vmatpush3.bf16.msra.mxu1 %v15026_v2  ;;  %v9250_v2 = vshrl.u32 %v8970_v33, 16  ;;  %v9232_v32 = vor.u32 %v9231_v9, %v9228_v22  ;;  %v9307_v33 = vshll.u32 %v8977_v1, 16  ;;  %v9248_v22 = vsel %vm15971_vm1, %v9243_v46, %v9247_v56 }
 0xa79   : > { %14161 = vmatprep.subr.bf16.mxu1 %v15027_v55  ;;  %v9280_v50 = vor.u32 %v9279_v52, %v9276_v59  ;;  %v9290_v5 = vor.u32 %v9289_v27, %v17753_v37  ;;  %v9355_v56 = vshll.u32 %v8983_v28, 16  ;;  %v9359_v1 = vshrl.u32 %v8983_v28, 16 }
 0xa7a   : > { %v9252_v20 = vrot.slane %v9250_v2, 4  ;;  %v9233_v60 = vrot.slane %v9232_v32, 4  ;;  %v17766_v30 = vrot.slane %v9307_v33, 5 }
 0xa7b   : > { %14130 = vmatmul.mubr.msk.bf16.gmra.mrb[4].mxu1 %vm1449_vm12, %v12942_v63  ;;  %v9208_v63 = vor.u32 %v9207_v54, %v9204_v29 }
 0xa7c   : > { %14133 = vmatprep.mubr.msk.bf16.mxu1 %vm1449_vm12, %v12943_v39  ;;  %14162 = vmatpush3.bf16.msra.mxu1 %v15027_v55  ;;  %v9221_v39 = vshll.u32 %v8966_v44, 16  ;;  %v9190_v55 = vsel %vm15971_vm1, %v9185_v12, %v17708_v15  ;;  %v9256_v49 = vor.u32 %v9255_v0, %v9252_v20  ;;  %v9266_v15 = vor.u32 %v9265_v38, %v17738_v47 }
 0xa7d   : > { %14163 = vmatprep.subr.bf16.mxu1 %v15028_v62  ;;  %v9209_v36 = vrot.slane %v9208_v63, 4  ;;  %v12947_v29 = vcombine.low %v9190_v55, %v9200_v18  ;;  %v9238_v44 = vsel %vm15971_vm1, %v9233_v60, %v17726_v40  ;;  %v8978_v40 = vld [vmem:[#allocation4 + $0xb0] sm:$0x1]  ;;  %v9331_v63 = vshll.u32 %v8980_v7, 16  ;;  %v9692_v55 = vld [vmem:[#allocation4 + $0x1c] sm:$0xf] }
 0xa7e   : > { %v9223_v21 = vrot.slane %v9221_v39, 5  ;;  %v9257_v9 = vrot.slane %v9256_v49, 4  ;;  %v9267_v2 = vrot.slane %v9266_v15, 4  ;;  %v9335_v39 = vshrl.u32 %v8980_v7, 16 }
 0xa7f   : > { %v9214_v54 = vsel %vm15971_vm1, %v9209_v36, %v17723_v8  ;;  %v8982_v8 = vld [vmem:[#allocation4 + $0xc0] sm:$0xf]  ;;  %v12949_v11 = vcombine.low %v9238_v44, %v9248_v22  ;;  %v9281_v0 = vrot.slane %v9280_v50, 4  ;;  %v9291_v38 = vrot.slane %v9290_v5, 4 }
 0xa80   : > { %14164 = vmatpush3.bf16.msra.mxu1 %v15028_v62  ;;  %v12946_v62 = vcombine.low %v9166_v17, %v9176_v48  ;;  %v9224_v43 = vsel %vm15971_vm1, %v9219_v24, %v9223_v21  ;;  %v9293_v17 = vshll.u32 %v8975_v4, 16  ;;  %v9346_v32 = vshrl.u32 %v8982_v8, 16  ;;  %v9691_v48 = vld [vmem:[#allocation4 + $0x18] sm:$0xf]  ;;  %v8981_v24 = vld [vmem:[#allocation4 + $0xbc] sm:$0x1] }
 0xa81   : > { %14197 = vmatprep.subr.bf16.mxu1 %v17734_v31  ;;  %v12948_v13 = vcombine.low %v9214_v54, %v9224_v43  ;;  %v9349_v23 = vshll.u32 %v8982_v8, 16  ;;  %v9262_v16 = vsel %vm15971_vm1, %v9257_v9, %v17738_v47  ;;  %v9272_v20 = vsel %vm15971_vm1, %v9267_v2, %v9271_v42  ;;  %v8984_v4 = vld [vmem:[#allocation4 + $0xc8] sm:$0x1]  ;;  %v9693_v54 = vld [vmem:[#allocation4 + $0x20] sm:$0x1] }
 0xa82   : > { %v9295_v57 = vrot.slane %v9293_v17, 5  ;;  %v9314_v26 = vor.u32 %v9313_v6, %v17766_v30  ;;  %v9317_v19 = vshll.u32 %v8978_v40, 16  ;;  %v9337_v36 = vrot.slane %v9335_v39, 4  ;;  %v9695_v9 = vld [vmem:[#allocation4 + $0x28] sm:$0xf] }
 0xa83   : > { %14134 = vmatmul.mubr.msk.bf16.gmra.mrb[8].mxu1 %vm1449_vm12, %v17702_v10  ;;  %v9301_v10 = vshll.u32 %v8976_v35, 16  ;;  %v17776_v35 = vrot.slane %v9331_v63, 5  ;;  %v9348_v47 = vrot.slane %v9346_v32, 4  ;;  %v9351_v60 = vrot.slane %v9349_v23, 5 }
 0xa84   : > { %14137 = vmatprep.mubr.msk.bf16.mxu1 %vm1449_vm12, %v12945_v45  ;;  %v8979_v45 = vld [vmem:[#allocation4 + $0xb4] sm:$0xf]  ;;  %v12950_v46 = vcombine.low %v9262_v16, %v9272_v20  ;;  %v9740_v49 = vshrl.u32 %v9691_v48, 16  ;;  %v9749_v3 = vshll.u32 %v9692_v55, 16  ;;  %v9753_v59 = vshrl.u32 %v9692_v55, 16 }
 0xa85   : > { %v9303_v25 = vrot.slane %v9301_v10, 5  ;;  %v9322_v12 = vshrl.u32 %v8979_v45, 16  ;;  %v9325_v14 = vshll.u32 %v8979_v45, 16  ;;  %v9286_v15 = vsel %vm15971_vm1, %v9281_v0, %v17753_v37  ;;  %v9694_v10 = vld [vmem:[#allocation4 + $0x24] sm:$0xf] }
 0xa86   : > { %v9296_v52 = vsel %vm15971_vm1, %v9291_v38, %v9295_v57  ;;  %v9319_v27 = vrot.slane %v9317_v19, 5  ;;  %v9743_v41 = vshll.u32 %v9691_v48, 16  ;;  %v9315_v51 = vrot.slane %v9314_v26, 4  ;;  %v9698_v20 = vld [vmem:[#allocation4 + $0x34] sm:$0xf] }
 0xa87   : > { %v9304_v58 = vor.u32 %v9303_v25, %v9300_v61  ;;  %v9324_v18 = vrot.slane %v9322_v12, 4  ;;  %v9327_v21 = vrot.slane %v9325_v14, 5  ;;  %v9338_v43 = vor.u32 %v9337_v36, %v17776_v35 }
 0xa88   : > { %v9352_v44 = vor.u32 %v9351_v60, %v9348_v47  ;;  %v9357_v37 = vrot.slane %v9355_v56, 5  ;;  %v9361_v22 = vrot.slane %v9359_v1, 4  ;;  %v9365_v42 = vshll.u32 %v8984_v4, 16  ;;  %v9700_v1 = vld [vmem:[#allocation4 + $0x3c] sm:$0xf] }
 0xa89   : > { %v9305_v33 = vrot.slane %v9304_v58, 4  ;;  %v9742_v45 = vrot.slane %v9740_v49, 4  ;;  %v17786_v7 = vrot.slane %v9749_v3, 5  ;;  %v9755_v2 = vrot.slane %v9753_v59, 4 }
 0xa8a   : > { %v9745_v50 = vrot.slane %v9743_v41, 5  ;;  %v9759_v5 = vshll.u32 %v9693_v54, 16  ;;  %v9764_v17 = vshrl.u32 %v9694_v10, 16  ;;  %v9767_v8 = vshll.u32 %v9694_v10, 16  ;;  %v9703_v41 = vld [vmem:[#allocation4 + $0x48] sm:$0xf] }
 0xa8b   : > { %14138 = vmatmul.mubr.msk.bf16.gmra.mrb[12].mxu1 %vm1449_vm12, %v12946_v62  ;;  %v9328_v62 = vor.u32 %v9327_v21, %v9324_v18  ;;  %v12951_v61 = vcombine.low %v9286_v15, %v9296_v52  ;;  %v9310_v25 = vsel %vm15971_vm1, %v9305_v33, %v17766_v30  ;;  %v9773_v6 = vshll.u32 %v9695_v9, 16  ;;  %v9696_v30 = vld [vmem:[#allocation4 + $0x2c] sm:$0x1]  ;;  %v9701_v15 = vld [vmem:[#allocation4 + $0x40] sm:$0xf] }
 0xa8c   : > { %14141 = vmatprep.mubr.msk.bf16.mxu1 %vm1449_vm12, %v12947_v29  ;;  %v9341_v29 = vshll.u32 %v8981_v24, 16  ;;  %v9777_v40 = vshrl.u32 %v9695_v9, 16  ;;  %v9320_v12 = vsel %vm15971_vm1, %v9315_v51, %v9319_v27  ;;  %v9362_v39 = vor.u32 %v9361_v22, %v9357_v37 }
 0xa8d   : > { %v9329_v14 = vrot.slane %v9328_v62, 4  ;;  %v9353_v32 = vrot.slane %v9352_v44, 4  ;;  %v9367_v23 = vrot.slane %v9365_v42, 5  ;;  %v9756_v16 = vor.u32 %v9755_v2, %v17786_v7  ;;  %v9704_v42 = vld [vmem:[#allocation4 + $0x4c] sm:$0xf] }
 0xa8e   : > { %v9343_v63 = vrot.slane %v9341_v29, 5  ;;  %v9746_v0 = vor.u32 %v9745_v50, %v9742_v45  ;;  %v9761_v57 = vrot.slane %v9759_v5, 5  ;;  %v9766_v28 = vrot.slane %v9764_v17, 4 }
 0xa8f   : > { %v9769_v38 = vrot.slane %v9767_v8, 5  ;;  %v17795_v58 = vrot.slane %v9773_v6, 5  ;;  %v9779_v26 = vrot.slane %v9777_v40, 4  ;;  %v12952_v55 = vcombine.low %v9310_v25, %v9320_v12 }
 0xa90   : > { %v9363_v18 = vrot.slane %v9362_v39, 4  ;;  %v9797_v21 = vshll.u32 %v9698_v20, 16  ;;  %v9801_v36 = vshrl.u32 %v9698_v20, 16  ;;  %v9334_v24 = vsel %vm15971_vm1, %v9329_v14, %v17776_v35  ;;  %v9707_v14 = vld [vmem:[#allocation4 + $0x58] sm:$0xf] }
 0xa91   : > { %v9358_v60 = vsel %vm15971_vm1, %v9353_v32, %v9357_v37  ;;  %v9757_v56 = vrot.slane %v9756_v16, 4  ;;  %v9747_v49 = vrot.slane %v9746_v0, 4  ;;  %v9770_v3 = vor.u32 %v9769_v38, %v9766_v28  ;;  %v9705_v28 = vld [vmem:[#allocation4 + $0x50] sm:$0x1] }
 0xa92   : > { %v9783_v59 = vshll.u32 %v9696_v30, 16  ;;  %v9780_v35 = vor.u32 %v9779_v26, %v17795_v58  ;;  %v17810_v10 = vrot.slane %v9797_v21, 5  ;;  %v9803_v33 = vrot.slane %v9801_v36, 4 }
 0xa93   : > { %14142 = vmatmul.mubr.msk.bf16.gmra.mrb[16].mxu1 %vm1449_vm12, %v12948_v13  ;;  %v9697_v13 = vld [vmem:[#allocation4 + $0x30] sm:$0xf]  ;;  %v9762_v52 = vsel %vm15971_vm1, %v9757_v56, %v9761_v57  ;;  %v9812_v51 = vshrl.u32 %v9700_v1, 16  ;;  %v9815_v62 = vshll.u32 %v9700_v1, 16  ;;  %v9821_v44 = vshll.u32 %v9701_v15, 16 }
 0xa94   : > { %14145 = vmatprep.mubr.msk.bf16.mxu1 %vm1449_vm12, %v12949_v11  ;;  %v9339_v11 = vrot.slane %v9338_v43, 4  ;;  %v9788_v19 = vshrl.u32 %v9697_v13, 16  ;;  %v9791_v48 = vshll.u32 %v9697_v13, 16  ;;  %v9699_v43 = vld [vmem:[#allocation4 + $0x38] sm:$0x1]  ;;  %v9825_v37 = vshrl.u32 %v9701_v15, 16 }
 0xa95   : > { %v9752_v22 = vsel %vm15971_vm1, %v9747_v49, %v17786_v7  ;;  %v9785_v9 = vrot.slane %v9783_v59, 5  ;;  %v9836_v45 = vshrl.u32 %v9703_v41, 16  ;;  %v9839_v2 = vshll.u32 %v9703_v41, 16  ;;  %v9702_v7 = vld [vmem:[#allocation4 + $0x44] sm:$0x1] }
 0xa96   : > { %v9344_v47 = vsel %vm15971_vm1, %v9339_v11, %v9343_v63  ;;  %v9790_v27 = vrot.slane %v9788_v19, 4  ;;  %v9793_v4 = vrot.slane %v9791_v48, 5  ;;  %v12983_v50 = vcombine.low %v9752_v22, %v9762_v52  ;;  %v9708_v22 = vld [vmem:[#allocation4 + $0x5c] sm:$0x1] }
 0xa97   : > { %v12953_v29 = vcombine.low %v9334_v24, %v9344_v47  ;;  %v9771_v5 = vrot.slane %v9770_v3, 4  ;;  %v9781_v17 = vrot.slane %v9780_v35, 4  ;;  %v9804_v25 = vor.u32 %v9803_v33, %v17810_v10 }
 0xa98   : > { %v9794_v8 = vor.u32 %v9793_v4, %v9790_v27  ;;  %v9807_v6 = vshll.u32 %v9699_v43, 16  ;;  %v9814_v40 = vrot.slane %v9812_v51, 4  ;;  %v9817_v12 = vrot.slane %v9815_v62, 5  ;;  %v9712_v62 = vld [vmem:[#allocation4 + $0x6c] sm:$0xf] }
 0xa99   : > { %v17818_v63 = vrot.slane %v9821_v44, 5  ;;  %v9827_v39 = vrot.slane %v9825_v37, 4  ;;  %v9845_v13 = vshll.u32 %v9704_v42, 16  ;;  %v9849_v11 = vshrl.u32 %v9704_v42, 16  ;;  %v9713_v37 = vld [vmem:[#allocation4 + $0x70] sm:$0xf] }
 0xa9a   : > { %v9838_v32 = vrot.slane %v9836_v45, 4  ;;  %v9776_v0 = vsel %vm15971_vm1, %v9771_v5, %v17795_v58  ;;  %v9786_v57 = vsel %vm15971_vm1, %v9781_v17, %v9785_v9  ;;  %v9869_v38 = vshll.u32 %v9707_v14, 16  ;;  %v9711_v45 = vld [vmem:[#allocation4 + $0x68] sm:$0x1] }
 0xa9b   : > { %14146 = vmatmul.mubr.msk.bf16.gmra.mrb[20].mxu1 %vm1449_vm12, %v12950_v46  ;;  %v9368_v46 = vsel %vm15971_vm1, %v9363_v18, %v9367_v23  ;;  %v9841_v23 = vrot.slane %v9839_v2, 5  ;;  %v9873_v30 = vshrl.u32 %v9707_v14, 16  ;;  %v9795_v26 = vrot.slane %v9794_v8, 4  ;;  %v9709_v18 = vld [vmem:[#allocation4 + $0x60] sm:$0xf] }
 0xa9c   : > { %14149 = vmatprep.mubr.msk.bf16.mxu1 %vm1449_vm12, %v12951_v61  ;;  %v12954_v54 = vcombine.low %v9358_v60, %v9368_v46  ;;  %v9706_v61 = vld [vmem:[#allocation4 + $0x54] sm:$0xf]  ;;  %v9805_v19 = vrot.slane %v9804_v25, 4  ;;  %v9809_v48 = vrot.slane %v9807_v6, 5  ;;  %v9818_v21 = vor.u32 %v9817_v12, %v9814_v40  ;;  %v9710_v60 = vld [vmem:[#allocation4 + $0x64] sm:$0xf] }
 0xa9d   : > { %v9860_v16 = vshrl.u32 %v9706_v61, 16  ;;  %v9863_v20 = vshll.u32 %v9706_v61, 16  ;;  %v9828_v36 = vor.u32 %v9827_v39, %v17818_v63  ;;  %v17826_v24 = vrot.slane %v9845_v13, 5  ;;  %v15030_v6 = vld [vmem:[%s15356_s17 + $0xc8] sm:$0xff]  }
 0xa9e   : > { %v9851_v47 = vrot.slane %v9849_v11, 4  ;;  %v9842_v56 = vor.u32 %v9841_v23, %v9838_v32  ;;  %v9855_v58 = vshll.u32 %v9705_v28, 16  ;;  %v17829_v49 = vrot.slane %v9869_v38, 5  ;;  %v9716_v11 = vld [vmem:[#allocation4 + $0x7c] sm:$0xf] }
 0xa9f   : > { %v9862_v1 = vrot.slane %v9860_v16, 4  ;;  %v9865_v46 = vrot.slane %v9863_v20, 5  ;;  %v9875_v3 = vrot.slane %v9873_v30, 4  ;;  %v9884_v59 = vshrl.u32 %v9709_v18, 16 }
 0xaa0   : > { %v9887_v15 = vshll.u32 %v9709_v18, 16  ;;  %v12984_v52 = vcombine.low %v9776_v0, %v9786_v57  ;;  %v9893_v35 = vshll.u32 %v9710_v60, 16  ;;  %v9897_v27 = vshrl.u32 %v9710_v60, 16  ;;  %v9715_v0 = vld [vmem:[#allocation4 + $0x78] sm:$0xf] }
 0xaa1   : > { %v9800_v4 = vsel %vm15971_vm1, %v9795_v26, %v17810_v10  ;;  %v9810_v41 = vsel %vm15971_vm1, %v9805_v19, %v9809_v48  ;;  %v9852_v51 = vor.u32 %v9851_v47, %v17826_v24  ;;  %v9843_v43 = vrot.slane %v9842_v56, 4 }
 0xaa2   : > { %v9857_v44 = vrot.slane %v9855_v58, 5  ;;  %v9866_v9 = vor.u32 %v9865_v46, %v9862_v1  ;;  %v9876_v42 = vor.u32 %v9875_v3, %v17829_v49  ;;  %v9886_v2 = vrot.slane %v9884_v59, 4  ;;  %v9717_v58 = vld [vmem:[#allocation4 + $0x80] sm:$0x1] }
 0xaa3   : > { %14150 = vmatmul.mubr.msk.bf16.gmra.mrb[24].mxu1 %vm1449_vm12, %v12952_v55  ;;  %v9831_v55 = vshll.u32 %v9702_v7, 16  ;;  %v9889_v10 = vrot.slane %v9887_v15, 5  ;;  %v9899_v5 = vrot.slane %v9897_v27, 4  ;;  %v9908_v17 = vshrl.u32 %v9712_v62, 16  ;;  %v9718_v15 = vld [vmem:[#allocation4 + $0x84] sm:$0xf] }
 0xaa4   : > { %14153 = vmatprep.mubr.msk.bf16.mxu1 %vm1449_vm12, %v12953_v29  ;;  %v9819_v29 = vrot.slane %v9818_v21, 4  ;;  %v9911_v8 = vshll.u32 %v9712_v62, 16  ;;  %v12985_v61 = vcombine.low %v9800_v4, %v9810_v41  ;;  %v9853_v25 = vrot.slane %v9852_v51, 4  ;;  %v15032_v51 = vld [vmem:[%s15356_s17 + $0xd8] sm:$0xff]  }
 0xaa5   : > { %v9833_v33 = vrot.slane %v9831_v55, 5  ;;  %v9917_v40 = vshll.u32 %v9713_v37, 16  ;;  %v9921_v12 = vshrl.u32 %v9713_v37, 16  ;;  %v9879_v39 = vshll.u32 %v9708_v22, 16  ;;  %v15031_v55 = vld [vmem:[%s15356_s17 + $0xd0] sm:$0xff]  }
 0xaa6   : > { %v9824_v14 = vsel %vm15971_vm1, %v9819_v29, %v17818_v63  ;;  %v9903_v13 = vshll.u32 %v9711_v45, 16  ;;  %v9848_v32 = vsel %vm15971_vm1, %v9843_v43, %v17826_v24  ;;  %v9858_v23 = vsel %vm15971_vm1, %v9853_v25, %v9857_v44 }
 0xaa7   : > { %v9867_v16 = vrot.slane %v9866_v9, 4  ;;  %v9877_v20 = vrot.slane %v9876_v42, 4  ;;  %v9890_v63 = vor.u32 %v9889_v10, %v9886_v2  ;;  %v9910_v28 = vrot.slane %v9908_v17, 4 }
 0xaa8   : > { %v9913_v38 = vrot.slane %v9911_v8, 5  ;;  %v17856_v30 = vrot.slane %v9917_v40, 5  ;;  %v9923_v26 = vrot.slane %v9921_v12, 4  ;;  %v9941_v19 = vshll.u32 %v9716_v11, 16  ;;  %v9721_v8 = vld [vmem:[#allocation4 + $0x90] sm:$0xf] }
 0xaa9   : > { %v9945_v48 = vshrl.u32 %v9716_v11, 16  ;;  %v9881_v18 = vrot.slane %v9879_v39, 5  ;;  %v9905_v21 = vrot.slane %v9903_v13, 5  ;;  %v9932_v24 = vshrl.u32 %v9715_v0, 16 }
 0xaaa   : > { %v9935_v47 = vshll.u32 %v9715_v0, 16  ;;  %v12987_v60 = vcombine.low %v9848_v32, %v9858_v23  ;;  %v9872_v56 = vsel %vm15971_vm1, %v9867_v16, %v17829_v49  ;;  %v9891_v46 = vrot.slane %v9890_v63, 4 }
 0xaab   : > { %14154 = vmatmul.mubr.msk.bf16.gmra.mrb[28].mxu1 %vm1449_vm12, %v12954_v54  ;;  %v9829_v54 = vrot.slane %v9828_v36, 4  ;;  %v9714_v36 = vld [vmem:[#allocation4 + $0x74] sm:$0x1]  ;;  %v9882_v1 = vsel %vm15971_vm1, %v9877_v20, %v9881_v18  ;;  %v9914_v59 = vor.u32 %v9913_v38, %v9910_v28  ;;  %v17865_v4 = vrot.slane %v9941_v19, 5 }
 0xaac   : > { %14165 = vmatprep.mubr.msk.bf16.mxu1 %vm1449_vm12, %v12983_v50  ;;  %v17839_v50 = vrot.slane %v9893_v35, 5  ;;  %v9924_v35 = vor.u32 %v9923_v26, %v17856_v30  ;;  %v9927_v27 = vshll.u32 %v9714_v36, 16  ;;  %v9947_v41 = vrot.slane %v9945_v48, 4 }
 0xaad   : > { %v9834_v7 = vsel %vm15971_vm1, %v9829_v54, %v9833_v33  ;;  %v9722_v33 = vld [vmem:[#allocation4 + $0x94] sm:$0xf]  ;;  %v9934_v62 = vrot.slane %v9932_v24, 4  ;;  %v9937_v29 = vrot.slane %v9935_v47, 5  ;;  %v9951_v54 = vshll.u32 %v9717_v58, 16 }
 0xaae   : > { %v9900_v57 = vor.u32 %v9899_v5, %v17839_v50  ;;  %v9956_v43 = vshrl.u32 %v9718_v15, 16  ;;  %v9959_v44 = vshll.u32 %v9718_v15, 16  ;;  %v12988_v9 = vcombine.low %v9872_v56, %v9882_v1 }
 0xaaf   : > { %v9989_v42 = vshll.u32 %v9722_v33, 16  ;;  %v9993_v45 = vshrl.u32 %v9722_v33, 16  ;;  %v9896_v2 = vsel %vm15971_vm1, %v9891_v46, %v17839_v50  ;;  %v9915_v10 = vrot.slane %v9914_v59, 4  ;;  %v9720_v50 = vld [vmem:[#allocation4 + $0x8c] sm:$0x1] }
 0xab0   : > { %v9901_v3 = vrot.slane %v9900_v57, 4  ;;  %v9929_v5 = vrot.slane %v9927_v27, 5  ;;  %v9948_v17 = vor.u32 %v9947_v41, %v17865_v4  ;;  %v9938_v40 = vor.u32 %v9937_v29, %v9934_v62  ;;  %v9723_v57 = vld [vmem:[#allocation4 + $0x98] sm:$0x1] }
 0xab1   : > { %v9953_v12 = vrot.slane %v9951_v54, 5  ;;  %v9958_v39 = vrot.slane %v9956_v43, 4  ;;  %v9961_v13 = vrot.slane %v9959_v44, 5  ;;  %v9980_v23 = vshrl.u32 %v9721_v8, 16  ;;  %v9730_v44 = vld [vmem:[#allocation4 + $0xb4] sm:$0xf] }
 0xab2   : > { %v9906_v49 = vsel %vm15971_vm1, %v9901_v3, %v9905_v21  ;;  %v9983_v16 = vshll.u32 %v9721_v8, 16  ;;  %v17881_v20 = vrot.slane %v9989_v42, 5  ;;  %v9995_v0 = vrot.slane %v9993_v45, 4  ;;  %v9727_v21 = vld [vmem:[#allocation4 + $0xa8] sm:$0xf] }
 0xab3   : > { %14166 = vmatmul.mubr.msk.bf16.vlgmr.msra.gmra.mrb[0].mxu1 %vm1449_vm12, %v12984_v52  ;;  %v9719_v52 = vld [vmem:[#allocation4 + $0x88] sm:$0xf]  ;;  %v12989_v25 = vcombine.low %v9896_v2, %v9906_v49  ;;  %v9949_v63 = vrot.slane %v9948_v17, 4  ;;  %v9920_v19 = vsel %vm15971_vm1, %v9915_v10, %v17856_v30  ;;  %v9962_v24 = vor.u32 %v9961_v13, %v9958_v39  ;;  %v9726_v42 = vld [vmem:[#allocation4 + $0xa4] sm:$0x1] }
 0xab4   : > { %14198 = vmatpush3.bf16.msra.mxu1 %v17734_v31  ;;  %14169 = vmatprep.mubr.msk.bf16.mxu1 %vm1449_vm12, %v12985_v61  ;;  %v12986_v31 = vcombine.low %v9824_v14, %v9834_v7  ;;  %v9965_v37 = vshll.u32 %v9719_v52, 16  ;;  %v9969_v22 = vshrl.u32 %v9719_v52, 16  ;;  %v17877_v61 = vld [vmem:[%s15356_s17 + $0xe0] sm:$0xff]   ;;  %v9724_v14 = vld [vmem:[#allocation4 + $0x9c] sm:$0xf]  ;;  %v9982_v56 = vrot.slane %v9980_v23, 4 }
 0xab5   : > { %14199 = vmatprep.subr.bf16.mxu1 %v15030_v6  ;;  %v9725_v7 = vld [vmem:[#allocation4 + $0xa0] sm:$0xf]  ;;  %v10004_v28 = vshrl.u32 %v9724_v14, 16  ;;  %v10007_v38 = vshll.u32 %v9724_v14, 16  ;;  %v9954_v36 = vsel %vm15971_vm1, %v9949_v63, %v9953_v12  ;;  %v9985_v30 = vrot.slane %v9983_v16, 5 }
 0xab6   : > { %v17879_v11 = vrot.slane %v9965_v37, 5  ;;  %v9971_v32 = vrot.slane %v9969_v22, 4  ;;  %v10013_v26 = vshll.u32 %v9725_v7, 16  ;;  %v10017_v18 = vshrl.u32 %v9725_v7, 16  ;;  %v9731_v37 = vld [vmem:[#allocation4 + $0xb8] sm:$0xf] }
 0xab7   : > { %v9996_v58 = vor.u32 %v9995_v0, %v17881_v20  ;;  %v9999_v1 = vshll.u32 %v9723_v57, 16  ;;  %v10006_v46 = vrot.slane %v10004_v28, 4  ;;  %v10009_v3 = vrot.slane %v10007_v38, 5  ;;  %v9733_v57 = vld [vmem:[#allocation4 + $0xc0] sm:$0xf] }
 0xab8   : > { %14200 = vmatpush3.bf16.msra.mxu1 %v15030_v6  ;;  %v9925_v6 = vrot.slane %v9924_v35, 4  ;;  %v9972_v47 = vor.u32 %v9971_v32, %v17879_v11  ;;  %v17895_v59 = vrot.slane %v10013_v26, 5  ;;  %v10028_v15 = vshrl.u32 %v9727_v21, 16  ;;  %v17916_v28 = vld [vmem:[#allocation4 + $0xc4] sm:$0xf] }
 0xab9   : > { %14201 = vmatprep.subr.bf16.mxu1 %v15031_v55  ;;  %v10019_v52 = vrot.slane %v10017_v18, 4  ;;  %v10031_v35 = vshll.u32 %v9727_v21, 16  ;;  %v9963_v29 = vrot.slane %v9962_v24, 4  ;;  %v9986_v43 = vor.u32 %v9985_v30, %v9982_v56  ;;  %v9736_v21 = vld [vmem:[#allocation4 + $0xcc] sm:$0xf] }
 0xaba   : > { %v9930_v48 = vsel %vm15971_vm1, %v9925_v6, %v9929_v5  ;;  %v9973_v54 = vrot.slane %v9972_v47, 4  ;;  %v9997_v22 = vrot.slane %v9996_v58, 4  ;;  %v10010_v45 = vor.u32 %v10009_v3, %v10006_v46  ;;  %v17931_v3 = vld [vmem:[#allocation4 + $0xbc] sm:$0x1] }
 0xabb   : > { %14170 = vmatmul.mubr.msk.bf16.gmra.mrb[4].mxu1 %vm1449_vm12, %v12986_v31  ;;  %v9975_v31 = vshll.u32 %v9720_v50, 16  ;;  %v12990_v33 = vcombine.low %v9920_v19, %v9930_v48  ;;  %v10030_v2 = vrot.slane %v10028_v15, 4  ;;  %v10020_v10 = vor.u32 %v10019_v52, %v17895_v59 }
 0xabc   : > { %14173 = vmatprep.mubr.msk.bf16.mxu1 %vm1449_vm12, %v12987_v60  ;;  %14202 = vmatpush3.bf16.msra.mxu1 %v15031_v55  ;;  %v9939_v55 = vrot.slane %v9938_v40, 4  ;;  %v9728_v60 = vld [vmem:[#allocation4 + $0xac] sm:$0xf]  ;;  %v10033_v5 = vrot.slane %v10031_v35, 5  ;;  %v10055_v6 = vshll.u32 %v9730_v44, 16  ;;  %v10061_v40 = vshll.u32 %v9731_v37, 16 }
 0xabd   : > { %14203 = vmatprep.subr.bf16.mxu1 %v15032_v51  ;;  %v10037_v27 = vshll.u32 %v9728_v60, 16  ;;  %v10041_v41 = vshrl.u32 %v9728_v60, 16  ;;  %v9977_v49 = vrot.slane %v9975_v31, 5  ;;  %v10065_v12 = vshrl.u32 %v9731_v37, 16  ;;  %v17923_v60 = vld [vmem:[#allocation4 + $0xd0] sm:$0xf] }
 0xabe   : > { %v9987_v14 = vrot.slane %v9986_v43, 4  ;;  %v10023_v7 = vshll.u32 %v9726_v42, 16  ;;  %v9968_v39 = vsel %vm15971_vm1, %v9963_v29, %v17879_v11  ;;  %v10011_v50 = vrot.slane %v10010_v45, 4  ;;  %v17934_v35 = vld [vmem:[#allocation4 + $0xc8] sm:$0x1] }
 0xabf   : > { %v17901_v17 = vrot.slane %v10037_v27, 5  ;;  %v10043_v8 = vrot.slane %v10041_v41, 4  ;;  %v9978_v13 = vsel %vm15971_vm1, %v9973_v54, %v9977_v49  ;;  %v10021_v23 = vrot.slane %v10020_v10, 4 }
 0xac0   : > { %14204 = vmatpush3.bf16.msra.mxu1 %v15032_v51  ;;  %v9944_v51 = vsel %vm15971_vm1, %v9939_v55, %v17865_v4  ;;  %v17904_v4 = vld [vmem:[#allocation4 + $0xb0] sm:$0x1]  ;;  %v10034_v16 = vor.u32 %v10033_v5, %v10030_v2  ;;  %v10057_v26 = vrot.slane %v10055_v6, 5  ;;  %v10063_v19 = vrot.slane %v10061_v40, 5  ;;  %v17945_v6 = vld [vmem:[#allocation4 + $0xd4] sm:$0x1] }
 0xac1   : > { %14237 = vmatprep.subr.bf16.mxu1 %v17877_v61  ;;  %v12991_v62 = vcombine.low %v9944_v51, %v9954_v36  ;;  %v10044_v0 = vor.u32 %v10043_v8, %v17901_v17  ;;  %v10047_v63 = vshll.u32 %v17904_v4, 16  ;;  %v10067_v11 = vrot.slane %v10065_v12, 4 }
 0xac2   : > { %v12992_v48 = vcombine.low %v9968_v39, %v9978_v13  ;;  %v9992_v55 = vsel %vm15971_vm1, %v9987_v14, %v17881_v20  ;;  %v10025_v18 = vrot.slane %v10023_v7, 5  ;;  %v10076_v36 = vshrl.u32 %v9733_v57, 16 }
 0xac3   : > { %14174 = vmatmul.mubr.msk.bf16.gmra.mrb[8].mxu1 %vm1449_vm12, %v12988_v9  ;;  %v10001_v9 = vrot.slane %v9999_v1, 5  ;;  %v10079_v24 = vshll.u32 %v9733_v57, 16  ;;  %v10085_v47 = vshll.u32 %v17916_v28, 16  ;;  %v10089_v31 = vshrl.u32 %v17916_v28, 16 }
 0xac4   : > { %14177 = vmatprep.mubr.msk.bf16.mxu1 %vm1449_vm12, %v12989_v25  ;;  %v10052_v25 = vshrl.u32 %v9730_v44, 16  ;;  %v10016_v30 = vsel %vm15971_vm1, %v10011_v50, %v17895_v59  ;;  %v10026_v58 = vsel %vm15971_vm1, %v10021_v23, %v10025_v18  ;;  %v10049_v1 = vrot.slane %v10047_v63, 5  ;;  %v10445_v63 = vld [vmem:[#allocation4] sm:$0xe] }
 0xac5   : > { %v10002_v32 = vsel %vm15971_vm1, %v9997_v22, %v10001_v9  ;;  %v10035_v20 = vrot.slane %v10034_v16, 4  ;;  %v10045_v46 = vrot.slane %v10044_v0, 4  ;;  %v10068_v52 = vor.u32 %v10067_v11, %v10063_v19  ;;  %v15135_v16 = vld [vmem:[#allocation4 + $0x4] sm:$0xf] }
 0xac6   : > { %v10054_v38 = vrot.slane %v10052_v25, 4  ;;  %v12993_v56 = vcombine.low %v9992_v55, %v10002_v32  ;;  %v10100_v27 = vshrl.u32 %v9736_v21, 16  ;;  %v10103_v41 = vshll.u32 %v9736_v21, 16  ;;  %v15136_v21 = vld [vmem:[#allocation4 + $0x8] sm:$0x1] }
 0xac7   : > { %v10109_v59 = vshll.u32 %v17923_v60, 16  ;;  %v10078_v51 = vrot.slane %v10076_v36, 4  ;;  %v10081_v49 = vrot.slane %v10079_v24, 5  ;;  %v10091_v29 = vrot.slane %v10089_v31, 4 }
 0xac8   : > { %v10058_v15 = vor.u32 %v10057_v26, %v10054_v38  ;;  %v12994_v54 = vcombine.low %v10016_v30, %v10026_v58  ;;  %v10050_v43 = vsel %vm15971_vm1, %v10045_v46, %v10049_v1  ;;  %v10071_v37 = vshll.u32 %v17931_v3, 16  ;;  %v15137_v58 = vld [vmem:[#allocation4 + $0x10] sm:$0xf] }
 0xac9   : > { %v10095_v22 = vshll.u32 %v17934_v35, 16  ;;  %v10102_v9 = vrot.slane %v10100_v27, 4  ;;  %v10105_v42 = vrot.slane %v10103_v41, 5  ;;  %v10111_v45 = vrot.slane %v10109_v59, 5  ;;  %v10447_v59 = vld [vmem:[#allocation4 + $0x18] sm:$0xe] }
 0xaca   : > { %v10059_v44 = vrot.slane %v10058_v15, 4  ;;  %v10040_v10 = vsel %vm15971_vm1, %v10035_v20, %v17901_v17  ;;  %v10069_v5 = vrot.slane %v10068_v52, 4  ;;  %v10082_v8 = vor.u32 %v10081_v49, %v10078_v51  ;;  %v10446_v15 = vld [vmem:[#allocation4 + $0xc] sm:$0xe]  ;;  %v15138_v52 = vld [vmem:[#allocation4 + $0x1c] sm:$0xf] }
 0xacb   : > { %14178 = vmatmul.mubr.msk.bf16.gmra.mrb[12].mxu1 %vm1449_vm12, %v12990_v33  ;;  %v10113_v33 = vshrl.u32 %v17923_v60, 16  ;;  %v12995_v40 = vcombine.low %v10040_v10, %v10050_v43  ;;  %v10073_v12 = vrot.slane %v10071_v37, 5  ;;  %v10097_v14 = vrot.slane %v10095_v22, 5  ;;  %v15140_v49 = vld [vmem:[#allocation4 + $0x14] sm:$0x1] }
 0xacc   : > { %14181 = vmatprep.mubr.msk.bf16.mxu1 %vm1449_vm12, %v12991_v62  ;;  %v10087_v62 = vrot.slane %v10085_v47, 5  ;;  %v10064_v7 = vsel %vm15971_vm1, %v10059_v44, %v10063_v19  ;;  %v10106_v39 = vor.u32 %v10105_v42, %v10102_v9  ;;  %v10119_v32 = vshll.u32 %v17945_v6, 16  ;;  %v15141_v44 = vld [vmem:[#allocation4 + $0x28] sm:$0xf]  ;;  %v15142_v10 = vld [vmem:[#allocation4 + $0x34] sm:$0xf] }
 0xacd   : > { %v10115_v2 = vrot.slane %v10113_v33, 4  ;;  %v10074_v17 = vsel %vm15971_vm1, %v10069_v5, %v10073_v12  ;;  %v10083_v50 = vrot.slane %v10082_v8, 4  ;;  %v10511_v0 = vrot.slane %v15135_v16, 5  ;;  %v15139_v33 = vld [vmem:[#allocation4 + $0x20] sm:$0x1]  ;;  %v15034_v8 = vld [vmem:[%s15356_s17 + $0xe8] sm:$0xff]  }
 0xace   : > { %v10092_v25 = vor.u32 %v10091_v29, %v10087_v62  ;;  %v12996_v38 = vcombine.low %v10064_v7, %v10074_v17  ;;  %v10107_v26 = vrot.slane %v10106_v39, 4  ;;  %v13019_v55 = vrot.slane %v10445_v63, 9  ;;  %v10449_v12 = vld [vmem:[#allocation4 + $0x30] sm:$0xe] }
 0xacf   : > { %v10116_v13 = vor.u32 %v10115_v2, %v10111_v45  ;;  %v10088_v19 = vsel %vm15971_vm1, %v10083_v50, %v10087_v62  ;;  %v10513_v18 = vrot.slane %v10511_v0, 4  ;;  %v10514_v36 = vrot.slane %v15136_v21, 5  ;;  %v10448_v2 = vld [vmem:[#allocation4 + $0x24] sm:$0xe] }
 0xad0   : > { %v10093_v23 = vrot.slane %v10092_v25, 4  ;;  %v10112_v47 = vsel %vm15971_vm1, %v10107_v26, %v10111_v45  ;;  %v10518_v1 = vrot.slane %v15137_v58, 5  ;;  %v10525_v27 = vrot.slane %v15138_v52, 5 }
 0xad1   : > { %v10117_v11 = vrot.slane %v10116_v13, 4  ;;  %v10515_v30 = vsel %vm16582_vm7, %v10513_v18, %v10514_v36  ;;  %v10528_v53 = vrot.slane %v15139_v33, 5  ;;  %v13020_v51 = vrot.slane %v10446_v15, 9  ;;  %v15144_v13 = vld [vmem:[#allocation4 + $0x2c] sm:$0x1] }
 0xad2   : > { %v10098_v57 = vsel %vm15971_vm1, %v10093_v23, %v10097_v14  ;;  %v10520_v41 = vrot.slane %v10518_v1, 4  ;;  %v10521_v62 = vrot.slane %v15140_v49, 5  ;;  %v13021_v29 = vrot.slane %v10447_v59, 9  ;;  %v15143_v14 = vld [vmem:[#allocation4 + $0x38] sm:$0x1]  ;;  %v15035_v23 = vld [vmem:[%s15356_s17 + $0xf0] sm:$0xff]  }
 0xad3   : > { %14182 = vmatmul.mubr.msk.bf16.gmra.mrb[16].mxu1 %vm1449_vm12, %v12992_v48  ;;  %v10121_v48 = vrot.slane %v10119_v32, 5  ;;  %v12997_v24 = vcombine.low %v10088_v19, %v10098_v57  ;;  %v10532_v37 = vrot.slane %v15141_v44, 5  ;;  %v10519_v9 = vsel %vm16582_vm7, %v13020_v51, %v10518_v1  ;;  %v10451_v36 = vld [vmem:[#allocation4 + $0x48] sm:$0xe]  ;;  %v15149_v15 = vld [vmem:[#allocation4 + $0x58] sm:$0xf] }
 0xad4   : > { %14185 = vmatprep.mubr.msk.bf16.mxu1 %vm1449_vm12, %v12993_v56  ;;  %v10512_v56 = vsel %vm16582_vm7, %v13019_v55, %v10511_v0  ;;  %v10522_v43 = vsel %vm16582_vm7, %v10520_v41, %v10521_v62  ;;  %v10526_v45 = vsel %vm16582_vm7, %v13021_v29, %v10525_v27  ;;  %v10539_v5 = vrot.slane %v15142_v10, 5  ;;  %v15145_v0 = vld [vmem:[#allocation4 + $0x40] sm:$0xf]  ;;  %v15036_v55 = vld [vmem:[%s15356_s17 + $0xf8] sm:$0xff]   ;;  %v15150_v51 = vld [vmem:[#allocation4 + $0x64] sm:$0xf] }
 0xad5   : > { %v10122_v31 = vsel %vm15971_vm1, %v10117_v11, %v10121_v48  ;;  %v13043_v46 = vcombine.low %v10512_v56, %v10515_v30  ;;  %v13044_v42 = vcombine.low %v10519_v9, %v10522_v43  ;;  %v10542_v7 = vrot.slane %v15143_v14, 5  ;;  %v10450_v11 = vld [vmem:[#allocation4 + $0x3c] sm:$0xe]  ;;  %v15146_v48 = vld [vmem:[#allocation4 + $0x4c] sm:$0xf] }
 0xad6   : > { %v12998_v20 = vcombine.low %v10112_v47, %v10122_v31  ;;  %v13022_v39 = vrot.slane %v10448_v2, 9  ;;  %v10535_v32 = vrot.slane %v15144_v13, 5  ;;  %v13023_v17 = vrot.slane %v10449_v12, 9  ;;  %v15148_v56 = vld [vmem:[#allocation4 + $0x44] sm:$0x1] }
 0xad7   : > { %v10541_v50 = vrot.slane %v10539_v5, 4  ;;  %v10546_v63 = vrot.slane %v15145_v0, 5  ;;  %v10553_v19 = vrot.slane %v15146_v48, 5  ;;  %v13024_v31 = vrot.slane %v10450_v11, 9  ;;  %v15151_v43 = vld [vmem:[#allocation4 + $0x68] sm:$0x1] }
 0xad8   : > { %v10540_v26 = vsel %vm16582_vm7, %v13023_v17, %v10539_v5  ;;  %v10549_v30 = vrot.slane %v15148_v56, 5  ;;  %v13025_v58 = vrot.slane %v10451_v36, 9  ;;  %v10560_v52 = vrot.slane %v15149_v15, 5  ;;  %v15153_v10 = vld [vmem:[#allocation4 + $0x70] sm:$0xf] }
 0xad9   : > { %v10543_v57 = vsel %vm16582_vm7, %v10541_v50, %v10542_v7  ;;  %v10548_v21 = vrot.slane %v10546_v63, 4  ;;  %v10555_v1 = vrot.slane %v10553_v19, 4  ;;  %v10547_v41 = vsel %vm16582_vm7, %v13024_v31, %v10546_v63  ;;  %v10454_v14 = vld [vmem:[#allocation4 + $0x6c] sm:$0xe]  ;;  %v15154_v7 = vld [vmem:[#allocation4 + $0x7c] sm:$0xf] }
 0xada   : > { %v13047_v18 = vcombine.low %v10540_v26, %v10543_v57  ;;  %v10554_v33 = vsel %vm16582_vm7, %v13025_v58, %v10553_v19  ;;  %v10567_v49 = vrot.slane %v15150_v51, 5  ;;  %v10562_v29 = vrot.slane %v10560_v52, 4  ;;  %v10455_v17 = vld [vmem:[#allocation4 + $0x78] sm:$0xe]  ;;  %v15155_v50 = vld [vmem:[#allocation4 + $0x80] sm:$0x1] }
 0xadb   : > { %14186 = vmatmul.mubr.msk.bf16.gmra.mrb[20].mxu1 %vm1449_vm12, %v12994_v54  ;;  %v10527_v54 = vrot.slane %v10525_v27, 4  ;;  %v10570_v44 = vrot.slane %v15151_v43, 5  ;;  %v10574_v5 = vrot.slane %v15153_v10, 5  ;;  %v15156_v0 = vld [vmem:[#allocation4 + $0x74] sm:$0x1]  ;;  %v13029_v57 = vrot.slane %v10455_v17, 9 }
 0xadc   : > { %14189 = vmatprep.mubr.msk.bf16.mxu1 %vm1449_vm12, %v12995_v40  ;;  %v10534_v40 = vrot.slane %v10532_v37, 4  ;;  %v10577_v63 = vrot.slane %v15156_v0, 5  ;;  %v15157_v26 = vld [vmem:[#allocation4 + $0x88] sm:$0xf]  ;;  %v15158_v36 = vld [vmem:[#allocation4 + $0x94] sm:$0xf] }
 0xadd   : > { %v10529_v22 = vsel %vm16582_vm7, %v10527_v54, %v10528_v53  ;;  %v10452_v53 = vld [vmem:[#allocation4 + $0x54] sm:$0xe]  ;;  %v10453_v54 = vld [vmem:[#allocation4 + $0x60] sm:$0xe]  ;;  %v10588_v11 = vrot.slane %v15157_v26, 5 }
 0xade   : > { %v13045_v25 = vcombine.low %v10526_v45, %v10529_v22  ;;  %v10536_v16 = vsel %vm16582_vm7, %v10534_v40, %v10535_v32  ;;  %v15152_v22 = vld [vmem:[#allocation4 + $0x5c] sm:$0x1]  ;;  %v10569_v45 = vrot.slane %v10567_v49, 4  ;;  %v10576_v32 = vrot.slane %v10574_v5, 4  ;;  %v10457_v56 = vld [vmem:[#allocation4 + $0x90] sm:$0xe] }
 0xadf   : > { %v10563_v9 = vrot.slane %v15152_v22, 5  ;;  %v10590_v31 = vrot.slane %v10588_v11, 4  ;;  %v10459_v22 = vld [vmem:[#allocation4 + $0xa8] sm:$0xe]  ;;  %v10943_v0 = vld [vmem:[#allocation4 + $0xc] sm:$0xe] }
 0xae0   : > { %v13079_v26 = vrot.slane %v10943_v0, 9 }
 0xae1   : > { %v10564_v2 = vsel %vm16582_vm7, %v10562_v29, %v10563_v9  ;;  %v10458_v29 = vld [vmem:[#allocation4 + $0x9c] sm:$0xe]  ;;  %v15163_v9 = vld [vmem:[#allocation4 + $0xb0] sm:$0x1] }
 0xae3   : > { %14190 = vmatmul.mubr.msk.bf16.gmra.mrb[24].mxu1 %vm1449_vm12, %v12996_v38 }
 0xae4   : > { %14193 = vmatprep.mubr.msk.bf16.mxu1 %vm1449_vm12, %v12997_v24  ;;  %v15147_v24 = vld [vmem:[#allocation4 + $0x50] sm:$0x1] }
 0xae5   : > { %v10556_v47 = vrot.slane %v15147_v24, 5  ;;  %v10595_v24 = vrot.slane %v15158_v36, 5 }
 0xae7   : > { %v10557_v27 = vsel %vm16582_vm7, %v10555_v1, %v10556_v47 }
 0xae8   : > { %v13049_v62 = vcombine.low %v10554_v33, %v10557_v27  ;;  %v10597_v27 = vrot.slane %v10595_v24, 4 }
 0xaeb   : > { %14194 = vmatmul.mubr.msk.bf16.gmra.mrb[28].mxu1 %vm1449_vm12, %v12998_v20  ;;  %v17995_v20 = vld [vmem:[%s15356_s17 + $0x100] sm:$0xff]  }
 0xaec   : > { %14205 = vmatprep.mubr.msk.bf16.mxu1 %vm1449_vm12, %v13043_v46  ;;  %v10550_v46 = vsel %vm16582_vm7, %v10548_v21, %v10549_v30  ;;  %v10456_v21 = vld [vmem:[#allocation4 + $0x84] sm:$0xe]  ;;  %v15159_v30 = vld [vmem:[#allocation4 + $0x98] sm:$0x1] }
 0xaed   : > { %v13048_v59 = vcombine.low %v10547_v41, %v10550_v46  ;;  %v10598_v58 = vrot.slane %v15159_v30, 5  ;;  %v13030_v1 = vrot.slane %v10456_v21, 9  ;;  %v15160_v46 = vld [vmem:[#allocation4 + $0x8c] sm:$0x1]  ;;  %v10944_v30 = vld [vmem:[#allocation4 + $0x18] sm:$0xe] }
 0xaee   : > { %v10591_v15 = vrot.slane %v15160_v46, 5 }
 0xaef   : > { %v10589_v51 = vsel %vm16582_vm7, %v13030_v1, %v10588_v11  ;;  %v15168_v11 = vld [vmem:[#allocation4 + $0x14] sm:$0x1]  ;;  %v15171_v1 = vld [vmem:[#allocation4 + $0x20] sm:$0x1] }
 0xaf0   : > { %v10592_v41 = vsel %vm16582_vm7, %v10590_v31, %v10591_v15  ;;  %v11019_v46 = vrot.slane %v15171_v1, 5  ;;  %v10945_v15 = vld [vmem:[#allocation4 + $0x24] sm:$0xe] }
 0xaf1   : > { %v15182_v1 = vld [vmem:[#allocation4 + $0x64] sm:$0xf] }
 0xaf3   : > { %14206 = vmatmul.mubr.msk.bf16.vlgmr.msra.gmra.mrb[0].mxu1 %vm1449_vm12, %v13044_v42  ;;  %v13027_v42 = vrot.slane %v10453_v54, 9  ;;  %v15162_v54 = vld [vmem:[#allocation4 + $0xac] sm:$0xf] }
 0xaf4   : > { %14238 = vmatpush3.bf16.msra.mxu1 %v17877_v61  ;;  %14209 = vmatprep.mubr.msk.bf16.mxu1 %vm1449_vm12, %v13045_v25  ;;  %v10533_v61 = vsel %vm16582_vm7, %v13022_v39, %v10532_v37  ;;  %v13026_v37 = vrot.slane %v10452_v53, 9  ;;  %v10581_v39 = vrot.slane %v15154_v7, 5  ;;  %v10599_v53 = vsel %vm16582_vm7, %v10597_v27, %v10598_v58  ;;  %v15166_v7 = vld [vmem:[#allocation4 + $0x10] sm:$0xf] }
 0xaf5   : > { %14239 = vmatprep.subr.bf16.mxu1 %v15034_v8  ;;  %v13046_v38 = vcombine.low %v10533_v61, %v10536_v16  ;;  %v10568_v12 = vsel %vm16582_vm7, %v13027_v42, %v10567_v49  ;;  %v13028_v16 = vrot.slane %v10454_v14, 9  ;;  %v13054_v49 = vcombine.low %v10589_v51, %v10592_v41 }
 0xaf6   : > { %v10561_v25 = vsel %vm16582_vm7, %v13026_v37, %v10560_v52  ;;  %v10583_v61 = vrot.slane %v10581_v39, 4  ;;  %v13031_v52 = vrot.slane %v10457_v56, 9  ;;  %v10609_v43 = vrot.slane %v15162_v54, 5 }
 0xaf7   : > { %v13050_v40 = vcombine.low %v10561_v25, %v10564_v2  ;;  %v10575_v19 = vsel %vm16582_vm7, %v13028_v16, %v10574_v5  ;;  %v10612_v42 = vrot.slane %v15163_v9, 5  ;;  %v15164_v2 = vld [vmem:[#allocation4 + $0xa4] sm:$0x1]  ;;  %v13033_v5 = vrot.slane %v10459_v22, 9  ;;  %v10946_v9 = vld [vmem:[#allocation4 + $0x30] sm:$0xe] }
 0xaf8   : > { %14240 = vmatpush3.bf16.msra.mxu1 %v15034_v8  ;;  %v10571_v8 = vsel %vm16582_vm7, %v10569_v45, %v10570_v44  ;;  %v13032_v45 = vrot.slane %v10458_v29, 9  ;;  %v10605_v10 = vrot.slane %v15164_v2, 5  ;;  %v13080_v27 = vrot.slane %v10944_v30, 9  ;;  %v15175_v2 = vld [vmem:[#allocation4 + $0x38] sm:$0x1] }
 0xaf9   : > { %14241 = vmatprep.subr.bf16.mxu1 %v15035_v23  ;;  %v13051_v13 = vcombine.low %v10568_v12, %v10571_v8  ;;  %v10611_v8 = vrot.slane %v10609_v43, 4  ;;  %v10610_v17 = vsel %vm16582_vm7, %v13033_v5, %v10609_v43  ;;  %v15174_v43 = vld [vmem:[#allocation4 + $0x34] sm:$0xf]  ;;  %v10947_v5 = vld [vmem:[#allocation4 + $0x3c] sm:$0xe] }
 0xafb   : > { %14210 = vmatmul.mubr.msk.bf16.gmra.mrb[4].mxu1 %vm1449_vm12, %v13046_v38  ;;  %v10578_v38 = vsel %vm16582_vm7, %v10576_v32, %v10577_v63  ;;  %v10613_v14 = vsel %vm16582_vm7, %v10611_v8, %v10612_v42  ;;  %v15038_v42 = vld [vmem:[%s15356_s17 + $0x108] sm:$0xff]  }
 0xafc   : > { %14213 = vmatprep.mubr.msk.bf16.mxu1 %vm1449_vm12, %v13047_v18  ;;  %14242 = vmatpush3.bf16.msra.mxu1 %v15035_v23  ;;  %v10584_v23 = vrot.slane %v15155_v50, 5  ;;  %v10582_v18 = vsel %vm16582_vm7, %v13029_v57, %v10581_v39  ;;  %v11009_v39 = vrot.slane %v15166_v7, 5  ;;  %v10460_v50 = vld [vmem:[#allocation4 + $0xb4] sm:$0xe] }
 0xafd   : > { %14243 = vmatprep.subr.bf16.mxu1 %v15036_v55  ;;  %v13034_v57 = vrot.slane %v10460_v50, 9 }
 0xafe   : > { %v10585_v48 = vsel %vm16582_vm7, %v10583_v61, %v10584_v23  ;;  %v13057_v23 = vcombine.low %v10610_v17, %v10613_v14  ;;  %v11011_v63 = vrot.slane %v11009_v39, 4  ;;  %v15167_v61 = vld [vmem:[#allocation4 + $0xbc] sm:$0x1]  ;;  %v11010_v56 = vsel %vm16582_vm7, %v13079_v26, %v11009_v39  ;;  %v15176_v14 = vld [vmem:[#allocation4 + $0x44] sm:$0x1]  ;;  %v15039_v39 = vld [vmem:[%s15356_s17 + $0x110] sm:$0xff]  }
 0xaff   : > { %v13053_v47 = vcombine.low %v10582_v18, %v10585_v48  ;;  %v11012_v48 = vrot.slane %v15168_v11, 5  ;;  %v15169_v18 = vld [vmem:[#allocation4 + $0x28] sm:$0xf]  ;;  %v11040_v7 = vrot.slane %v15176_v14, 5  ;;  %v15177_v17 = vld [vmem:[#allocation4 + $0x58] sm:$0xf] }
 0xb00   : > { %14244 = vmatpush3.bf16.msra.mxu1 %v15036_v55  ;;  %v13052_v55 = vcombine.low %v10575_v19, %v10578_v38  ;;  %v10619_v38 = vrot.slane %v15167_v61, 5  ;;  %v11023_v21 = vrot.slane %v15169_v18, 5  ;;  %v11051_v50 = vrot.slane %v15177_v17, 5  ;;  %v15040_v61 = vld [vmem:[%s15356_s17 + $0x118] sm:$0xff]   ;;  %v15179_v26 = vld [vmem:[#allocation4 + $0x50] sm:$0x1] }
 0xb01   : > { %14277 = vmatprep.subr.bf16.mxu1 %v17995_v20  ;;  %v11047_v11 = vrot.slane %v15179_v26, 5  ;;  %v10953_v14 = vld [vmem:[#allocation4 + $0x84] sm:$0xe]  ;;  %v15188_v17 = vld [vmem:[#allocation4 + $0x8c] sm:$0x1] }
 0xb03   : > { %14214 = vmatmul.mubr.msk.bf16.gmra.mrb[8].mxu1 %vm1449_vm12, %v13048_v59  ;;  %v15161_v59 = vld [vmem:[#allocation4 + $0xa0] sm:$0xf] }
 0xb04   : > { %14217 = vmatprep.mubr.msk.bf16.mxu1 %vm1449_vm12, %v13049_v62  ;;  %v10602_v33 = vrot.slane %v15161_v59, 5  ;;  %v10596_v62 = vsel %vm16582_vm7, %v13031_v52, %v10595_v24  ;;  %v15170_v24 = vld [vmem:[#allocation4 + $0x1c] sm:$0xf]  ;;  %v11025_v52 = vrot.slane %v11023_v21, 4  ;;  %v13081_v59 = vrot.slane %v10945_v15, 9 }
 0xb05   : > { %v13055_v44 = vcombine.low %v10596_v62, %v10599_v53  ;;  %v15173_v62 = vld [vmem:[#allocation4 + $0x40] sm:$0xf] }
 0xb06   : > { %v10604_v37 = vrot.slane %v10602_v33, 4  ;;  %v11037_v29 = vrot.slane %v15173_v62, 5  ;;  %v11024_v22 = vsel %vm16582_vm7, %v13081_v59, %v11023_v21  ;;  %v15183_v59 = vld [vmem:[#allocation4 + $0x68] sm:$0x1] }
 0xb08   : > { %v10606_v25 = vsel %vm16582_vm7, %v10604_v37, %v10605_v10  ;;  %v11033_v10 = vrot.slane %v15175_v2, 5  ;;  %v11039_v8 = vrot.slane %v11037_v29, 4 }
 0xb0b   : > { %14218 = vmatmul.mubr.msk.bf16.gmra.mrb[12].mxu1 %vm1449_vm12, %v13050_v40  ;;  %v15165_v40 = vld [vmem:[#allocation4 + $0xb8] sm:$0xf] }
 0xb0c   : > { %14221 = vmatprep.mubr.msk.bf16.mxu1 %vm1449_vm12, %v13051_v13  ;;  %v10616_v12 = vrot.slane %v15165_v40, 5  ;;  %v10603_v13 = vsel %vm16582_vm7, %v13032_v45, %v10602_v33  ;;  %v15172_v33 = vld [vmem:[#allocation4 + $0x2c] sm:$0x1] }
 0xb0d   : > { %v13056_v32 = vcombine.low %v10603_v13, %v10606_v25  ;;  %v11026_v53 = vrot.slane %v15172_v33, 5  ;;  %v13082_v25 = vrot.slane %v10946_v9, 9  ;;  %v11061_v33 = vrot.slane %v15183_v59, 5 }
 0xb0e   : > { %v10618_v16 = vrot.slane %v10616_v12, 4  ;;  %v10617_v36 = vsel %vm16582_vm7, %v13034_v57, %v10616_v12  ;;  %v13083_v12 = vrot.slane %v10947_v5, 9  ;;  %v10948_v57 = vld [vmem:[#allocation4 + $0x48] sm:$0xe] }
 0xb10   : > { %v10620_v19 = vsel %vm16582_vm7, %v10618_v16, %v10619_v38 }
 0xb11   : > { %v13058_v31 = vcombine.low %v10617_v36, %v10620_v19  ;;  %v11053_v19 = vrot.slane %v11051_v50, 4  ;;  %v15180_v36 = vld [vmem:[#allocation4 + $0x5c] sm:$0x1] }
 0xb13   : > { %14222 = vmatmul.mubr.msk.bf16.gmra.mrb[16].mxu1 %vm1449_vm12, %v13052_v55  ;;  %v11013_v55 = vsel %vm16582_vm7, %v11011_v63, %v11012_v48  ;;  %v11038_v63 = vsel %vm16582_vm7, %v13083_v12, %v11037_v29  ;;  %v10949_v48 = vld [vmem:[#allocation4 + $0x54] sm:$0xe] }
 0xb14   : > { %14225 = vmatprep.mubr.msk.bf16.mxu1 %vm1449_vm12, %v13053_v47  ;;  %v11016_v47 = vrot.slane %v15170_v24, 5  ;;  %v13103_v58 = vcombine.low %v11010_v56, %v11013_v55  ;;  %v13084_v55 = vrot.slane %v10948_v57, 9  ;;  %v13085_v21 = vrot.slane %v10949_v48, 9  ;;  %v15181_v56 = vld [vmem:[#allocation4 + $0x70] sm:$0xf] }
 0xb15   : > { %v11054_v24 = vrot.slane %v15180_v36, 5  ;;  %v11065_v30 = vrot.slane %v15181_v56, 5  ;;  %v15190_v57 = vld [vmem:[#allocation4 + $0x94] sm:$0xf] }
 0xb16   : > { %v11018_v41 = vrot.slane %v11016_v47, 4  ;;  %v11017_v54 = vsel %vm16582_vm7, %v13080_v27, %v11016_v47  ;;  %v10950_v27 = vld [vmem:[#allocation4 + $0x60] sm:$0xe] }
 0xb18   : > { %v11020_v51 = vsel %vm16582_vm7, %v11018_v41, %v11019_v46  ;;  %v11058_v46 = vrot.slane %v15182_v1, 5  ;;  %v15193_v1 = vld [vmem:[#allocation4 + $0xb8] sm:$0xf] }
 0xb19   : > { %v13104_v37 = vcombine.low %v11017_v54, %v11020_v51  ;;  %v11067_v51 = vrot.slane %v11065_v30, 4  ;;  %v15184_v54 = vld [vmem:[#allocation4 + $0x74] sm:$0x1] }
 0xb1a   : > { %v11060_v62 = vrot.slane %v11058_v46, 4 }
 0xb1b   : > { %14226 = vmatmul.mubr.msk.bf16.gmra.mrb[20].mxu1 %vm1449_vm12, %v13054_v49  ;;  %v11027_v49 = vsel %vm16582_vm7, %v11025_v52, %v11026_v53  ;;  %v11052_v52 = vsel %vm16582_vm7, %v13085_v21, %v11051_v50  ;;  %v10951_v53 = vld [vmem:[#allocation4 + $0x6c] sm:$0xe]  ;;  %v11082_v50 = vrot.slane %v15188_v17, 5 }
 0xb1c   : > { %14229 = vmatprep.mubr.msk.bf16.mxu1 %vm1449_vm12, %v13055_v44  ;;  %v11030_v44 = vrot.slane %v15174_v43, 5  ;;  %v13105_v45 = vcombine.low %v11024_v22, %v11027_v49  ;;  %v13086_v49 = vrot.slane %v10950_v27, 9  ;;  %v13087_v29 = vrot.slane %v10951_v53, 9  ;;  %v15185_v22 = vld [vmem:[#allocation4 + $0x88] sm:$0xf] }
 0xb1d   : > { %v11068_v43 = vrot.slane %v15184_v54, 5  ;;  %v11079_v9 = vrot.slane %v15185_v22, 5 }
 0xb1e   : > { %v11032_v40 = vrot.slane %v11030_v44, 4  ;;  %v11066_v5 = vsel %vm16582_vm7, %v13087_v29, %v11065_v30 }
 0xb20   : > { %v11034_v13 = vsel %vm16582_vm7, %v11032_v40, %v11033_v10  ;;  %v15187_v40 = vld [vmem:[#allocation4 + $0x80] sm:$0x1] }
 0xb21   : > { %v11075_v12 = vrot.slane %v15187_v40, 5  ;;  %v15198_v40 = vld [vmem:[#allocation4 + $0x1c] sm:$0xf] }
 0xb23   : > { %14230 = vmatmul.mubr.msk.bf16.gmra.mrb[24].mxu1 %vm1449_vm12, %v13056_v32  ;;  %v11041_v32 = vsel %vm16582_vm7, %v11039_v8, %v11040_v7  ;;  %v10952_v8 = vld [vmem:[#allocation4 + $0x78] sm:$0xe]  ;;  %v11081_v7 = vrot.slane %v11079_v9, 4 }
 0xb24   : > { %14233 = vmatprep.mubr.msk.bf16.mxu1 %vm1449_vm12, %v13057_v23  ;;  %v15178_v23 = vld [vmem:[#allocation4 + $0x4c] sm:$0xf]  ;;  %v13107_v38 = vcombine.low %v11038_v63, %v11041_v32  ;;  %v13089_v32 = vrot.slane %v10953_v14, 9 }
 0xb25   : > { %v11044_v16 = vrot.slane %v15178_v23, 5  ;;  %v11083_v23 = vsel %vm16582_vm7, %v11081_v7, %v11082_v50  ;;  %v15199_v7 = vld [vmem:[#allocation4 + $0xc8] sm:$0x1] }
 0xb26   : > { %v11080_v26 = vsel %vm16582_vm7, %v13089_v32, %v11079_v9  ;;  %v15200_v32 = vld [vmem:[#allocation4 + $0x20] sm:$0x1] }
 0xb27   : > { %v11046_v18 = vrot.slane %v11044_v16, 4  ;;  %v13113_v48 = vcombine.low %v11080_v26, %v11083_v23  ;;  %v11510_v17 = vrot.slane %v15200_v32, 5 }
 0xb29   : > { %v11048_v47 = vsel %vm16582_vm7, %v11046_v18, %v11047_v11  ;;  %v10954_v11 = vld [vmem:[#allocation4 + $0x90] sm:$0xe]  ;;  %v10955_v18 = vld [vmem:[#allocation4 + $0x9c] sm:$0xe] }
 0xb2a   : > { %v13090_v36 = vrot.slane %v10954_v11, 9 }
 0xb2b   : > { %14234 = vmatmul.mubr.msk.bf16.gmra.mrb[28].mxu1 %vm1449_vm12, %v13058_v31  ;;  %v11055_v31 = vsel %vm16582_vm7, %v11053_v19, %v11054_v24  ;;  %v15191_v19 = vld [vmem:[#allocation4 + $0x98] sm:$0x1] }
 0xb2c   : > { %14245 = vmatprep.mubr.msk.bf16.mxu1 %vm1449_vm12, %v13103_v58  ;;  %v11045_v58 = vsel %vm16582_vm7, %v13084_v55, %v11044_v16  ;;  %v13109_v41 = vcombine.low %v11052_v52, %v11055_v31  ;;  %v15189_v16 = vld [vmem:[#allocation4 + $0xa0] sm:$0xf]  ;;  %v11089_v55 = vrot.slane %v15191_v19, 5  ;;  %v15192_v31 = vld [vmem:[#allocation4 + $0xa4] sm:$0x1] }
 0xb2d   : > { %v13108_v15 = vcombine.low %v11045_v58, %v11048_v47  ;;  %v13091_v47 = vrot.slane %v10955_v18, 9  ;;  %v11096_v56 = vrot.slane %v15192_v31, 5  ;;  %v15194_v52 = vld [vmem:[#allocation4 + $0xac] sm:$0xf]  ;;  %v15202_v19 = vld [vmem:[#allocation4 + $0x34] sm:$0xf] }
 0xb2e   : > { %v11100_v27 = vrot.slane %v15194_v52, 5 }
 0xb33   : > { %14246 = vmatmul.mubr.msk.bf16.vlgmr.msra.gmra.mrb[0].mxu1 %vm1449_vm12, %v13104_v37  ;;  %v11069_v37 = vsel %vm16582_vm7, %v11067_v51, %v11068_v43  ;;  %v15195_v51 = vld [vmem:[#allocation4 + $0xb0] sm:$0x1]  ;;  %v11102_v43 = vrot.slane %v11100_v27, 4 }
 0xb34   : > { %14278 = vmatpush3.bf16.msra.mxu1 %v17995_v20  ;;  %14249 = vmatprep.mubr.msk.bf16.mxu1 %vm1449_vm12, %v13105_v45  ;;  %v11031_v20 = vsel %vm16582_vm7, %v13082_v25, %v11030_v44  ;;  %v11062_v44 = vsel %vm16582_vm7, %v11060_v62, %v11061_v33  ;;  %v15186_v45 = vld [vmem:[#allocation4 + $0x7c] sm:$0xf]  ;;  %v13111_v25 = vcombine.low %v11066_v5, %v11069_v37  ;;  %v10956_v33 = vld [vmem:[#allocation4 + $0xa8] sm:$0xe]  ;;  %v10957_v62 = vld [vmem:[#allocation4 + $0xb4] sm:$0xe] }
 0xb35   : > { %14279 = vmatprep.subr.bf16.mxu1 %v15038_v42  ;;  %v13106_v0 = vcombine.low %v11031_v20, %v11034_v13  ;;  %v11072_v2 = vrot.slane %v15186_v45, 5  ;;  %v13092_v54 = vrot.slane %v10956_v33, 9  ;;  %v15196_v37 = vld [vmem:[#allocation4 + $0xbc] sm:$0x1] }
 0xb36   : > { %v11110_v22 = vrot.slane %v15196_v37, 5 }
 0xb37   : > { %v11074_v13 = vrot.slane %v11072_v2, 4  ;;  %v11101_v45 = vsel %vm16582_vm7, %v13092_v54, %v11100_v27  ;;  %v11445_v54 = vld [vmem:[#allocation4 + $0x48] sm:$0xe] }
 0xb38   : > { %14280 = vmatpush3.bf16.msra.mxu1 %v15038_v42  ;;  %v11059_v42 = vsel %vm16582_vm7, %v13086_v49, %v11058_v46  ;;  %v11107_v46 = vrot.slane %v15193_v1, 5  ;;  %v11103_v49 = vrot.slane %v15195_v51, 5  ;;  %v15206_v51 = vld [vmem:[#allocation4 + $0x4c] sm:$0xf] }
 0xb39   : > { %14281 = vmatprep.subr.bf16.mxu1 %v15039_v39  ;;  %v13110_v10 = vcombine.low %v11059_v42, %v11062_v44  ;;  %v11076_v20 = vsel %vm16582_vm7, %v11074_v13, %v11075_v12  ;;  %v13093_v44 = vrot.slane %v10957_v62, 9  ;;  %v11507_v12 = vrot.slane %v15198_v40, 5  ;;  %v11441_v13 = vld [vmem:[#allocation4 + $0x18] sm:$0xe] }
 0xb3a   : > { %v11109_v29 = vrot.slane %v11107_v46, 4  ;;  %v11104_v9 = vsel %vm16582_vm7, %v11102_v43, %v11103_v49  ;;  %v13139_v23 = vrot.slane %v11441_v13, 9  ;;  %v11535_v49 = vrot.slane %v15206_v51, 5  ;;  %v15207_v43 = vld [vmem:[#allocation4 + $0x50] sm:$0x1] }
 0xb3b   : > { %14250 = vmatmul.mubr.msk.bf16.gmra.mrb[4].mxu1 %vm1449_vm12, %v13106_v0  ;;  %v11093_v0 = vrot.slane %v15189_v16, 5  ;;  %v13116_v5 = vcombine.low %v11101_v45, %v11104_v9  ;;  %v11509_v16 = vrot.slane %v11507_v12, 4 }
 0xb3c   : > { %14253 = vmatprep.mubr.msk.bf16.mxu1 %vm1449_vm12, %v13107_v38  ;;  %14282 = vmatpush3.bf16.msra.mxu1 %v15039_v39  ;;  %v13088_v39 = vrot.slane %v10952_v8, 9  ;;  %v11111_v42 = vsel %vm16582_vm7, %v11109_v29, %v11110_v22  ;;  %v11108_v8 = vsel %vm16582_vm7, %v13093_v44, %v11107_v46  ;;  %v11508_v11 = vsel %vm16582_vm7, %v13139_v23, %v11507_v12  ;;  %v15208_v22 = vld [vmem:[#allocation4 + $0x44] sm:$0x1] }
 0xb3d   : > { %14283 = vmatprep.subr.bf16.mxu1 %v15040_v61  ;;  %v11095_v21 = vrot.slane %v11093_v0, 4  ;;  %v11094_v59 = vsel %vm16582_vm7, %v13091_v47, %v11093_v0  ;;  %v13117_v14 = vcombine.low %v11108_v8, %v11111_v42  ;;  %v11538_v44 = vrot.slane %v15207_v43, 5 }
 0xb3e   : > { %v11073_v63 = vsel %vm16582_vm7, %v13088_v39, %v11072_v2  ;;  %v15197_v2 = vld [vmem:[#allocation4 + $0xc4] sm:$0xf]  ;;  %v11117_v39 = vrot.slane %v15199_v7, 5  ;;  %v11531_v9 = vrot.slane %v15208_v22, 5  ;;  %v13143_v42 = vrot.slane %v11445_v54, 9 }
 0xb3f   : > { %v13112_v38 = vcombine.low %v11073_v63, %v11076_v20  ;;  %v11097_v58 = vsel %vm16582_vm7, %v11095_v21, %v11096_v56  ;;  %v15201_v63 = vld [vmem:[#allocation4 + $0x28] sm:$0xf]  ;;  %v15204_v56 = vld [vmem:[#allocation4 + $0x2c] sm:$0x1]  ;;  %v11537_v45 = vrot.slane %v11535_v49, 4 }
 0xb40   : > { %14284 = vmatpush3.bf16.msra.mxu1 %v15040_v61  ;;  %v11086_v61 = vrot.slane %v15190_v57, 5  ;;  %v13115_v53 = vcombine.low %v11094_v59, %v11097_v58  ;;  %v11514_v57 = vrot.slane %v15201_v63, 5  ;;  %v11536_v12 = vsel %vm16582_vm7, %v13143_v42, %v11535_v49  ;;  %v15210_v7 = vld [vmem:[#allocation4 + $0x64] sm:$0xf]  ;;  %v15219_v22 = vld [vmem:[#allocation4 + $0x98] sm:$0x1] }
 0xb41   : > { %v11539_v8 = vsel %vm16582_vm7, %v11537_v45, %v11538_v44  ;;  %v15220_v45 = vld [vmem:[#allocation4 + $0x8c] sm:$0x1] }
 0xb42   : > { %v11088_v24 = vrot.slane %v11086_v61, 4  ;;  %v11516_v21 = vrot.slane %v11514_v57, 4  ;;  %v13167_v13 = vcombine.low %v11536_v12, %v11539_v8 }
 0xb43   : > { %14254 = vmatmul.mubr.msk.bf16.gmra.mrb[8].mxu1 %vm1449_vm12, %v13108_v15  ;;  %v11087_v15 = vsel %vm16582_vm7, %v13090_v36, %v11086_v61  ;;  %v11511_v61 = vsel %vm16582_vm7, %v11509_v16, %v11510_v17  ;;  %v11443_v36 = vld [vmem:[#allocation4 + $0x30] sm:$0xe]  ;;  %v11447_v17 = vld [vmem:[#allocation4 + $0x60] sm:$0xe]  ;;  %v15212_v16 = vld [vmem:[#allocation4 + $0x5c] sm:$0x1] }
 0xb44   : > { %14257 = vmatprep.mubr.msk.bf16.mxu1 %vm1449_vm12, %v13109_v41  ;;  %v11090_v30 = vsel %vm16582_vm7, %v11088_v24, %v11089_v55  ;;  %v11521_v55 = vrot.slane %v15202_v19, 5  ;;  %v13163_v18 = vcombine.low %v11508_v11, %v11511_v61  ;;  %v15203_v24 = vld [vmem:[#allocation4 + $0x38] sm:$0x1]  ;;  %v13141_v58 = vrot.slane %v11443_v36, 9 }
 0xb45   : > { %v13114_v41 = vcombine.low %v11087_v15, %v11090_v30  ;;  %v11524_v47 = vrot.slane %v15203_v24, 5  ;;  %v11517_v30 = vrot.slane %v15204_v56, 5  ;;  %v15205_v15 = vld [vmem:[#allocation4 + $0x40] sm:$0xf]  ;;  %v13145_v63 = vrot.slane %v11447_v17, 9 }
 0xb46   : > { %v11523_v1 = vrot.slane %v11521_v55, 4  ;;  %v11528_v52 = vrot.slane %v15205_v15, 5  ;;  %v11522_v33 = vsel %vm16582_vm7, %v13141_v58, %v11521_v55  ;;  %v15215_v56 = vld [vmem:[#allocation4 + $0x80] sm:$0x1] }
 0xb47   : > { %v11518_v46 = vsel %vm16582_vm7, %v11516_v21, %v11517_v30  ;;  %v15214_v21 = vld [vmem:[#allocation4 + $0x7c] sm:$0xf]  ;;  %v11566_v30 = vrot.slane %v15215_v56, 5  ;;  %v11608_v56 = vrot.slane %v17934_v35, 5 }
 0xb48   : > { %v11525_v27 = vsel %vm16582_vm7, %v11523_v1, %v11524_v47  ;;  %v11530_v29 = vrot.slane %v11528_v52, 4  ;;  %v11563_v36 = vrot.slane %v15214_v21, 5  ;;  %v15216_v1 = vld [vmem:[#allocation4 + $0x74] sm:$0x1]  ;;  %v11454_v21 = vld [vmem:[#allocation4 + $0xb4] sm:$0xe] }
 0xb49   : > { %v13165_v62 = vcombine.low %v11522_v33, %v11525_v27 }
 0xb4b   : > { %14258 = vmatmul.mubr.msk.bf16.gmra.mrb[12].mxu1 %vm1449_vm12, %v13110_v10  ;;  %v11114_v10 = vrot.slane %v15197_v2, 5  ;;  %v11532_v2 = vsel %vm16582_vm7, %v11530_v29, %v11531_v9  ;;  %v15218_v29 = vld [vmem:[#allocation4 + $0x94] sm:$0xf]  ;;  %v11580_v9 = vrot.slane %v15219_v22, 5 }
 0xb4c   : > { %14261 = vmatprep.mubr.msk.bf16.mxu1 %vm1449_vm12, %v13111_v25  ;;  %v10958_v25 = vld [vmem:[#allocation4 + $0xc0] sm:$0xe]  ;;  %v11577_v54 = vrot.slane %v15218_v29, 5 }
 0xb4d   : > { %v13094_v50 = vrot.slane %v10958_v25, 9  ;;  %v11116_v20 = vrot.slane %v11114_v10, 4 }
 0xb4f   : > { %v11118_v0 = vsel %vm16582_vm7, %v11116_v20, %v11117_v39  ;;  %v11549_v39 = vrot.slane %v15210_v7, 5 }
 0xb51   : > { %v11550_v55 = vsel %vm16582_vm7, %v13145_v63, %v11549_v39  ;;  %v15223_v63 = vld [vmem:[#allocation4 + $0xa4] sm:$0x1] }
 0xb53   : > { %14262 = vmatmul.mubr.msk.bf16.gmra.mrb[16].mxu1 %vm1449_vm12, %v13112_v38  ;;  %v11115_v38 = vsel %vm16582_vm7, %v13094_v50, %v11114_v10  ;;  %v15209_v10 = vld [vmem:[#allocation4 + $0x58] sm:$0xf]  ;;  %v15211_v50 = vld [vmem:[#allocation4 + $0x68] sm:$0x1] }
 0xb54   : > { %14265 = vmatprep.mubr.msk.bf16.mxu1 %vm1449_vm12, %v13113_v48  ;;  %v13118_v26 = vcombine.low %v11115_v38, %v11118_v0  ;;  %v11442_v48 = vld [vmem:[#allocation4 + $0x24] sm:$0xe]  ;;  %v11552_v20 = vrot.slane %v15211_v50, 5  ;;  %v11545_v0 = vrot.slane %v15212_v16, 5  ;;  %v15213_v38 = vld [vmem:[#allocation4 + $0x70] sm:$0xf] }
 0xb55   : > { %v13140_v31 = vrot.slane %v11442_v48, 9  ;;  %v11594_v16 = vrot.slane %v17904_v4, 5 }
 0xb5b   : > { %14266 = vmatmul.mubr.msk.bf16.gmra.mrb[20].mxu1 %vm1449_vm12, %v13114_v41  ;;  %v11515_v41 = vsel %vm16582_vm7, %v13140_v31, %v11514_v57  ;;  %v11551_v57 = vrot.slane %v11549_v39, 4  ;;  %v11449_v31 = vld [vmem:[#allocation4 + $0x78] sm:$0xe] }
 0xb5c   : > { %14269 = vmatprep.mubr.msk.bf16.mxu1 %vm1449_vm12, %v13115_v53  ;;  %v13164_v59 = vcombine.low %v11515_v41, %v11518_v46  ;;  %v11444_v53 = vld [vmem:[#allocation4 + $0x3c] sm:$0xe]  ;;  %v11559_v46 = vrot.slane %v15216_v1, 5  ;;  %v13147_v15 = vrot.slane %v11449_v31, 9  ;;  %v15217_v41 = vld [vmem:[#allocation4 + $0x88] sm:$0xf] }
 0xb5d   : > { %v13142_v37 = vrot.slane %v11444_v53, 9  ;;  %v11553_v11 = vsel %vm16582_vm7, %v11551_v57, %v11552_v20  ;;  %v11587_v57 = vrot.slane %v15223_v63, 5  ;;  %v11455_v31 = vld [vmem:[#allocation4 + $0xc0] sm:$0xe]  ;;  %v11612_v1 = vrot.slane %v17923_v60, 5 }
 0xb5e   : > { %v13169_v24 = vcombine.low %v11550_v55, %v11553_v11  ;;  %v11564_v49 = vsel %vm16582_vm7, %v13147_v15, %v11563_v36  ;;  %v15224_v11 = vld [vmem:[#allocation4 + $0xb8] sm:$0xf] }
 0xb5f   : > { %v11529_v25 = vsel %vm16582_vm7, %v13142_v37, %v11528_v52  ;;  %v11565_v52 = vrot.slane %v11563_v36, 4  ;;  %v11451_v37 = vld [vmem:[#allocation4 + $0x90] sm:$0xe]  ;;  %v11605_v36 = vrot.slane %v17916_v28, 5 }
 0xb60   : > { %v13166_v40 = vcombine.low %v11529_v25, %v11532_v2  ;;  %v11573_v2 = vrot.slane %v15220_v45, 5  ;;  %v15221_v25 = vld [vmem:[#allocation4 + $0xa0] sm:$0xf] }
 0xb61   : > { %v11567_v33 = vsel %vm16582_vm7, %v11565_v52, %v11566_v30  ;;  %v13152_v30 = vrot.slane %v11454_v21, 9  ;;  %v11607_v15 = vrot.slane %v11605_v36, 4  ;;  %v11456_v52 = vld [vmem:[#allocation4 + $0xcc] sm:$0xe] }
 0xb62   : > { %v13171_v43 = vcombine.low %v11564_v49, %v11567_v33  ;;  %v11615_v33 = vrot.slane %v17945_v6, 5  ;;  %v18228_v6 = vld [vmem:[%s299_s11] ss:$0 sm:$0xff] }
 0xb63   : > { %14270 = vmatmul.mubr.msk.bf16.gmra.mrb[24].mxu1 %vm1449_vm12, %v13116_v5  ;;  %v11542_v5 = vrot.slane %v15209_v10, 5  ;;  %v13149_v10 = vrot.slane %v11451_v37, 9 }
 0xb64   : > { %14273 = vmatprep.mubr.msk.bf16.mxu1 %vm1449_vm12, %v13117_v14  ;;  %v11446_v14 = vld [vmem:[#allocation4 + $0x54] sm:$0xe] }
 0xb65   : > { %v11544_v32 = vrot.slane %v11542_v5, 4  ;;  %v13144_v23 = vrot.slane %v11446_v14, 9  ;;  %v11578_v39 = vsel %vm16582_vm7, %v13149_v10, %v11577_v54 }
 0xb67   : > { %v11546_v61 = vsel %vm16582_vm7, %v11544_v32, %v11545_v0  ;;  %v11543_v48 = vsel %vm16582_vm7, %v13144_v23, %v11542_v5  ;;  %v11579_v5 = vrot.slane %v11577_v54, 4  ;;  %v15222_v32 = vld [vmem:[#allocation4 + $0xac] sm:$0xf]  ;;  %v11453_v23 = vld [vmem:[#allocation4 + $0xa8] sm:$0xe] }
 0xb68   : > { %v13168_v19 = vcombine.low %v11543_v48, %v11546_v61  ;;  %v11591_v17 = vrot.slane %v15222_v32, 5  ;;  %v13151_v61 = vrot.slane %v11453_v23, 9  ;;  %v11598_v48 = vrot.slane %v15224_v11, 5 }
 0xb69   : > { %v11581_v12 = vsel %vm16582_vm7, %v11579_v5, %v11580_v9 }
 0xb6a   : > { %v13173_v50 = vcombine.low %v11578_v39, %v11581_v12  ;;  %v11592_v4 = vsel %vm16582_vm7, %v13151_v61, %v11591_v17  ;;  %v11599_v35 = vsel %vm16582_vm7, %v13152_v30, %v11598_v48 }
 0xb6b   : > { %14274 = vmatmul.mubr.msk.bf16.gmra.mrb[28].mxu1 %vm1449_vm12, %v13118_v26  ;;  %v11556_v26 = vrot.slane %v15213_v38, 5  ;;  %v11593_v38 = vrot.slane %v11591_v17, 4 }
 0xb6c   : > { %14285 = vmatprep.mubr.msk.bf16.mxu1 %vm1449_vm12, %v13163_v18  ;;  %v11448_v18 = vld [vmem:[#allocation4 + $0x6c] sm:$0xe] }
 0xb6d   : > { %v11558_v47 = vrot.slane %v11556_v26, 4  ;;  %v13146_v58 = vrot.slane %v11448_v18, 9 }
 0xb6f   : > { %v11560_v27 = vsel %vm16582_vm7, %v11558_v47, %v11559_v46  ;;  %v11557_v53 = vsel %vm16582_vm7, %v13146_v58, %v11556_v26  ;;  %v11600_v47 = vrot.slane %v11598_v48, 4  ;;  %v11601_v58 = vrot.slane %v17931_v3, 5 }
 0xb70   : > { %v13170_v51 = vcombine.low %v11557_v53, %v11560_v27  ;;  %v13153_v46 = vrot.slane %v11455_v31, 9  ;;  %v11609_v27 = vsel %vm16582_vm7, %v11607_v15, %v11608_v56 }
 0xb71   : > { %v11602_v28 = vsel %vm16582_vm7, %v11600_v47, %v11601_v58 }
 0xb72   : > { %v13176_v3 = vcombine.low %v11599_v35, %v11602_v28  ;;  %v11606_v60 = vsel %vm16582_vm7, %v13153_v46, %v11605_v36 }
 0xb73   : > { %14286 = vmatmul.mubr.msk.bf16.vlgmr.msra.gmra.mrb[0].mxu1 %vm1449_vm12, %v13164_v59  ;;  %v11570_v59 = vrot.slane %v15217_v41, 5  ;;  %v13154_v41 = vrot.slane %v11456_v52, 9  ;;  %v13177_v53 = vcombine.low %v11606_v60, %v11609_v27 }
 0xb74   : > { %14289 = vmatprep.mubr.msk.bf16.mxu1 %vm1449_vm12, %v13165_v62  ;;  %v11450_v62 = vld [vmem:[#allocation4 + $0x84] sm:$0xe] }
 0xb75   : > { %v11572_v44 = vrot.slane %v11570_v59, 4  ;;  %v13148_v42 = vrot.slane %v11450_v62, 9 }
 0xb77   : > { %v11574_v8 = vsel %vm16582_vm7, %v11572_v44, %v11573_v2  ;;  %v11571_v14 = vsel %vm16582_vm7, %v13148_v42, %v11570_v59  ;;  %v11614_v59 = vrot.slane %v11612_v1, 4 }
 0xb78   : > { %v13172_v7 = vcombine.low %v11571_v14, %v11574_v8 }
 0xb79   : > { %v11616_v49 = vsel %vm16582_vm7, %v11614_v59, %v11615_v33 }
 0xb7b   : > { %14290 = vmatmul.mubr.msk.bf16.gmra.mrb[4].mxu1 %vm1449_vm12, %v13166_v40  ;;  %v11584_v40 = vrot.slane %v15221_v25, 5 }
 0xb7c   : > { %14293 = vmatprep.mubr.msk.bf16.mxu1 %vm1449_vm12, %v13167_v13  ;;  %v11452_v13 = vld [vmem:[#allocation4 + $0x9c] sm:$0xe] }
 0xb7d   : > { %v11586_v20 = vrot.slane %v11584_v40, 4  ;;  %v13150_v0 = vrot.slane %v11452_v13, 9 }
 0xb7f   : > { %v11588_v26 = vsel %vm16582_vm7, %v11586_v20, %v11587_v57  ;;  %v11585_v55 = vsel %vm16582_vm7, %v13150_v0, %v11584_v40 }
 0xb80   : > { %v13174_v18 = vcombine.low %v11585_v55, %v11588_v26 }
 0xb83   : > { %14294 = vmatmul.mubr.msk.bf16.gmra.mrb[8].mxu1 %vm1449_vm12, %v13168_v19  ;;  %v11595_v19 = vsel %vm16582_vm7, %v11593_v38, %v11594_v16 }
 0xb84   : > { %14297 = vmatprep.mubr.msk.bf16.mxu1 %vm1449_vm12, %v13169_v24  ;;  %v13175_v24 = vcombine.low %v11592_v4, %v11595_v19 }
 0xb8b   : > { %14298 = vmatmul.mubr.msk.bf16.gmra.mrb[12].mxu1 %vm1449_vm12, %v13170_v51  ;;  %v11613_v51 = vsel %vm16582_vm7, %v13154_v41, %v11612_v1 }
 0xb8c   : > { %14301 = vmatprep.mubr.msk.bf16.mxu1 %vm1449_vm12, %v13171_v43  ;;  %v13178_v62 = vcombine.low %v11613_v51, %v11616_v49 }
 0xb93   : > { %14302 = vmatmul.mubr.msk.bf16.gmra.mrb[16].mxu1 %vm1449_vm12, %v13172_v7 }
 0xb94   : > { %14305 = vmatprep.mubr.msk.bf16.mxu1 %vm1449_vm12, %v13173_v50 }
 0xb9b   : > { %14306 = vmatmul.mubr.msk.bf16.gmra.mrb[20].mxu1 %vm1449_vm12, %v13174_v18 }
 0xb9c   : > { %14309 = vmatprep.mubr.msk.bf16.mxu1 %vm1449_vm12, %v13175_v24 }
 0xba3   : > { %14310 = vmatmul.mubr.msk.bf16.gmra.mrb[24].mxu1 %vm1449_vm12, %v13176_v3 }
 0xba4   : > { %14313 = vmatprep.mubr.msk.bf16.mxu1 %vm1449_vm12, %v13177_v53 }
 0xbab   : > { %14314 = vmatmul.mubr.msk.bf16.gmra.mrb[28].mxu1 %vm1449_vm12, %v13178_v62 }
 0xc46   : > { %v14287_v29 = vpop.f32.mrb[0].mxu1 }
 0xc47   : > { %v11948_v54 = vadd.f32 %v14287_v29, %v18228_v6  ;;  %v11780_v43 = vpop.f32.mrb[1].mxu1 }
 0xc48   : > { %v11946_v44 = vadd.f32 %v18228_v6, %v11780_v43  ;;  %v14288_v37 = vpop.f32.mrb[2].mxu1 }
 0xc49   : > { %v11949_v22 = vadd.f32 %v14288_v37, %v18228_v6  ;;  %11982 = vrot.lane.b32.xlu0 %v11948_v54, %s15266_s26  ;;  %v11783_v34 = vpop.f32.mrb[3].mxu1 }
 0xc4a   : > { %11978 = vst.msk [vmem:[#allocation3] sm:$0xff] %vm1449_vm12, %v11946_v44  ;;  %v11947_v9 = vadd.f32 %v18228_v6, %v11783_v34  ;;  %v12074_v44 = vld [vmem:[#allocation2] sm:$0xff] }
 0xc4b   : > { %11984 = vrot.lane.b32.xlu1 %v11949_v22, %s15266_s26  ;;  %v12082_v22 = vld [vmem:[#allocation2 + $0x40] sm:$0xff] }
 0xc4c   : > { %11979 = vst.msk [vmem:[#allocation3 + $0x40] sm:$0xff] %vm1449_vm12, %v11947_v9 }
 0xc4e   : > { %v14291_v42 = vpop.f32.mrb[4].mxu1 }
 0xc4f   : > { %v11952_v45 = vadd.f32 %v14291_v42, %v18228_v6  ;;  %v11796_v2 = vpop.f32.mrb[5].mxu1 }
 0xc50   : > { %v11950_v10 = vadd.f32 %v18228_v6, %v11796_v2  ;;  %v14292_v5 = vpop.f32.mrb[6].mxu1  ;;  %v12075_v2 = vld [vmem:[#allocation2 + $0x8] sm:$0xff] }
 0xc51   : > { %v11953_v8 = vadd.f32 %v14292_v5, %v18228_v6  ;;  %11994 = vrot.lane.b32.xlu0 %v11952_v45, %s15266_s26  ;;  %v11799_v25 = vpop.f32.mrb[7].mxu1  ;;  %v12083_v5 = vld [vmem:[#allocation2 + $0x48] sm:$0xff] }
 0xc52   : > { %11990 = vst.msk [vmem:[#allocation3 + $0x8] sm:$0xff] %vm1449_vm12, %v11950_v10  ;;  %v11951_v40 = vadd.f32 %v18228_v6, %v11799_v25 }
 0xc53   : > { %11996 = vrot.lane.b32.xlu1 %v11953_v8, %s15266_s26 }
 0xc54   : > { %11991 = vst.msk [vmem:[#allocation3 + $0x48] sm:$0xff] %vm1449_vm12, %v11951_v40 }
 0xc56   : > { %v14295_v12 = vpop.f32.mrb[8].mxu1 }
 0xc57   : > { %v11956_v14 = vadd.f32 %v14295_v12, %v18228_v6  ;;  %v11812_v7 = vpop.f32.mrb[9].mxu1 }
 0xc58   : > { %v11954_v39 = vadd.f32 %v18228_v6, %v11812_v7  ;;  %v14296_v13 = vpop.f32.mrb[10].mxu1  ;;  %v12076_v7 = vld [vmem:[#allocation2 + $0x10] sm:$0xff] }
 0xc59   : > { %v11957_v32 = vadd.f32 %v14296_v13, %v18228_v6  ;;  %12006 = vrot.lane.b32.xlu0 %v11956_v14, %s15266_s26  ;;  %v11815_v17 = vpop.f32.mrb[11].mxu1  ;;  %v12084_v13 = vld [vmem:[#allocation2 + $0x50] sm:$0xff] }
 0xc5a   : > { %12002 = vst.msk [vmem:[#allocation3 + $0x10] sm:$0xff] %vm1449_vm12, %v11954_v39  ;;  %v11955_v50 = vadd.f32 %v18228_v6, %v11815_v17 }
 0xc5b   : > { %12008 = vrot.lane.b32.xlu1 %v11957_v32, %s15266_s26 }
 0xc5c   : > { %12003 = vst.msk [vmem:[#allocation3 + $0x50] sm:$0xff] %vm1449_vm12, %v11955_v50 }
 0xc5e   : > { %v14299_v20 = vpop.f32.mrb[12].mxu1 }
 0xc5f   : > { %v11960_v23 = vadd.f32 %v14299_v20, %v18228_v6  ;;  %v11828_v16 = vpop.f32.mrb[13].mxu1 }
 0xc60   : > { %v11958_v0 = vadd.f32 %v18228_v6, %v11828_v16  ;;  %v14300_v63 = vpop.f32.mrb[14].mxu1  ;;  %v12077_v16 = vld [vmem:[#allocation2 + $0x18] sm:$0xff] }
 0xc61   : > { %v11961_v57 = vadd.f32 %v14300_v63, %v18228_v6  ;;  %12018 = vrot.lane.b32.xlu0 %v11960_v23, %s15266_s26  ;;  %v11831_v61 = vpop.f32.mrb[15].mxu1  ;;  %v12085_v63 = vld [vmem:[#allocation2 + $0x58] sm:$0xff] }
 0xc62   : > { %12014 = vst.msk [vmem:[#allocation3 + $0x18] sm:$0xff] %vm1449_vm12, %v11958_v0  ;;  %v11959_v38 = vadd.f32 %v18228_v6, %v11831_v61 }
 0xc63   : > { %12020 = vrot.lane.b32.xlu1 %v11961_v57, %s15266_s26 }
 0xc64   : > { %12015 = vst.msk [vmem:[#allocation3 + $0x58] sm:$0xff] %vm1449_vm12, %v11959_v38 }
 0xc66   : > { %v14303_v26 = vpop.f32.mrb[16].mxu1 }
 0xc67   : > { %v11964_v11 = vadd.f32 %v14303_v26, %v18228_v6  ;;  %v11844_v48 = vpop.f32.mrb[17].mxu1 }
 0xc68   : > { %v11962_v19 = vadd.f32 %v18228_v6, %v11844_v48  ;;  %v14304_v55 = vpop.f32.mrb[18].mxu1  ;;  %v12078_v48 = vld [vmem:[#allocation2 + $0x20] sm:$0xff] }
 0xc69   : > { %v11965_v18 = vadd.f32 %v14304_v55, %v18228_v6  ;;  %12030 = vrot.lane.b32.xlu0 %v11964_v11, %s15266_s26  ;;  %v11847_v4 = vpop.f32.mrb[19].mxu1  ;;  %v12086_v55 = vld [vmem:[#allocation2 + $0x60] sm:$0xff] }
 0xc6a   : > { %12026 = vst.msk [vmem:[#allocation3 + $0x20] sm:$0xff] %vm1449_vm12, %v11962_v19  ;;  %v11963_v21 = vadd.f32 %v18228_v6, %v11847_v4 }
 0xc6b   : > { %12032 = vrot.lane.b32.xlu1 %v11965_v18, %s15266_s26 }
 0xc6c   : > { %12027 = vst.msk [vmem:[#allocation3 + $0x60] sm:$0xff] %vm1449_vm12, %v11963_v21 }
 0xc6e   : > { %v14307_v36 = vpop.f32.mrb[20].mxu1 }
 0xc6f   : > { %v11968_v24 = vadd.f32 %v14307_v36, %v18228_v6  ;;  %v11860_v47 = vpop.f32.mrb[21].mxu1 }
 0xc70   : > { %v11966_v31 = vadd.f32 %v18228_v6, %v11860_v47  ;;  %v14308_v56 = vpop.f32.mrb[22].mxu1  ;;  %v12079_v47 = vld [vmem:[#allocation2 + $0x28] sm:$0xff] }
 0xc71   : > { %v11969_v30 = vadd.f32 %v14308_v56, %v18228_v6  ;;  %12042 = vrot.lane.b32.xlu0 %v11968_v24, %s15266_s26  ;;  %v11863_v58 = vpop.f32.mrb[23].mxu1  ;;  %v12087_v56 = vld [vmem:[#allocation2 + $0x68] sm:$0xff] }
 0xc72   : > { %12038 = vst.msk [vmem:[#allocation3 + $0x28] sm:$0xff] %vm1449_vm12, %v11966_v31  ;;  %v11967_v1 = vadd.f32 %v18228_v6, %v11863_v58 }
 0xc73   : > { %12044 = vrot.lane.b32.xlu1 %v11969_v30, %s15266_s26 }
 0xc74   : > { %12039 = vst.msk [vmem:[#allocation3 + $0x68] sm:$0xff] %vm1449_vm12, %v11967_v1 }
 0xc76   : > { %v14311_v46 = vpop.f32.mrb[24].mxu1 }
 0xc77   : > { %v11972_v15 = vadd.f32 %v14311_v46, %v18228_v6  ;;  %v11876_v52 = vpop.f32.mrb[25].mxu1 }
 0xc78   : > { %v11970_v28 = vadd.f32 %v18228_v6, %v11876_v52  ;;  %v14312_v27 = vpop.f32.mrb[26].mxu1  ;;  %v12080_v52 = vld [vmem:[#allocation2 + $0x30] sm:$0xff] }
 0xc79   : > { %v11973_v35 = vadd.f32 %v14312_v27, %v18228_v6  ;;  %12054 = vrot.lane.b32.xlu0 %v11972_v15, %s15266_s26  ;;  %v11879_v41 = vpop.f32.mrb[27].mxu1  ;;  %v12088_v27 = vld [vmem:[#allocation2 + $0x70] sm:$0xff] }
 0xc7a   : > { %12050 = vst.msk [vmem:[#allocation3 + $0x30] sm:$0xff] %vm1449_vm12, %v11970_v28  ;;  %v11971_v59 = vadd.f32 %v18228_v6, %v11879_v41 }
 0xc7b   : > { %12056 = vrot.lane.b32.xlu1 %v11973_v35, %s15266_s26 }
 0xc7c   : > { %12051 = vst.msk [vmem:[#allocation3 + $0x70] sm:$0xff] %vm1449_vm12, %v11971_v59 }
 0xc7e   : > { %v14315_v33 = vpop.f32.mrb[28].mxu1 }
 0xc7f   : > { %v11976_v3 = vadd.f32 %v14315_v33, %v18228_v6  ;;  %v11892_v60 = vpop.f32.mrb[29].mxu1 }
 0xc80   : > { %v11974_v53 = vadd.f32 %v18228_v6, %v11892_v60  ;;  %v14316_v51 = vpop.f32.mrb[30].mxu1  ;;  %v12081_v60 = vld [vmem:[#allocation2 + $0x38] sm:$0xff] }
 0xc81   : > { %v11977_v49 = vadd.f32 %v14316_v51, %v18228_v6  ;;  %12066 = vrot.lane.b32.xlu0 %v11976_v3, %s15266_s26  ;;  %v11895_v62 = vpop.f32.mrb[31].mxu1  ;;  %v12089_v51 = vld [vmem:[#allocation2 + $0x78] sm:$0xff] }
 0xc82   : > { %12062 = vst.msk [vmem:[#allocation3 + $0x38] sm:$0xff] %vm1449_vm12, %v11974_v53  ;;  %v11975_v29 = vadd.f32 %v18228_v6, %v11895_v62 }
 0xc83   : > { %12068 = vrot.lane.b32.xlu1 %v11977_v49, %s15266_s26 }
 0xc84   : > { %12063 = vst.msk [vmem:[#allocation3 + $0x78] sm:$0xff] %vm1449_vm12, %v11975_v29 }
 0xcbb   : > { %v11983_v54 = vpop.permute.xlu0 %11982 }
 0xcbc   : > { %11988 = vst.msk [vmem:[#allocation3] sm:$0xff] %vm6169_vm8, %v11983_v54 }
 0xcbd   : > { %v11985_v43 = vpop.permute.xlu1 %11984 }
 0xcbe   : > { %11989 = vst.msk [vmem:[#allocation3 + $0x40] sm:$0xff] %vm6169_vm8, %v11985_v43 }
 0xcc3   : > { %v12090_v37 = vld [vmem:[#allocation3] sm:$0xff]  ;;  %v11995_v34 = vpop.permute.xlu0 %11994 }
 0xcc4   : > { %v12106_v9 = vadd.f32 %v12090_v37, %v12074_v44  ;;  %12000 = vst.msk [vmem:[#allocation3 + $0x8] sm:$0xff] %vm6169_vm8, %v11995_v34 }
 0xcc5   : > { %v12098_v42 = vld [vmem:[#allocation3 + $0x40] sm:$0xff]  ;;  %v11997_v45 = vpop.permute.xlu1 %11996 }
 0xcc6   : > { %12122 = vst [vmem:[#allocation2] sm:$0xff] %v12106_v9  ;;  %v12114_v6 = vadd.f32 %v12098_v42, %v12082_v22  ;;  %12001 = vst.msk [vmem:[#allocation3 + $0x48] sm:$0xff] %vm6169_vm8, %v11997_v45 }
 0xcc8   : > { %12130 = vst [vmem:[#allocation2 + $0x40] sm:$0xff] %v12114_v6 }
 0xccb   : > { %v12091_v10 = vld [vmem:[#allocation3 + $0x8] sm:$0xff]  ;;  %v12007_v8 = vpop.permute.xlu0 %12006 }
 0xccc   : > { %v12107_v25 = vadd.f32 %v12091_v10, %v12075_v2  ;;  %12012 = vst.msk [vmem:[#allocation3 + $0x10] sm:$0xff] %vm6169_vm8, %v12007_v8 }
 0xccd   : > { %v12099_v40 = vld [vmem:[#allocation3 + $0x48] sm:$0xff]  ;;  %v12009_v12 = vpop.permute.xlu1 %12008  ;;  %v12142_v54 = vld [vmem:[#allocation2] sm:$0xff] (!%p13200_p8) }
 0xcce   : > { %12123 = vst [vmem:[#allocation2 + $0x8] sm:$0xff] %v12107_v25  ;;  %v12115_v14 = vadd.f32 %v12099_v40, %v12083_v5  ;;  %12013 = vst.msk [vmem:[#allocation3 + $0x50] sm:$0xff] %vm6169_vm8, %v12009_v12 }
 0xccf   : > { %12158 = vst [vmem:[%s15361_s28] sm:$0xff] (!%p13200_p8), %v12142_v54  ;;  %v12150_v45 = vld [vmem:[#allocation2 + $0x40] sm:$0xff] (!%p13200_p8) }
 0xcd0   : > { %12131 = vst [vmem:[#allocation2 + $0x48] sm:$0xff] %v12115_v14  ;;  %12166 = vst [vmem:[%s15361_s28 + $0x40] sm:$0xff] (!%p13200_p8), %v12150_v45 }
 0xcd3   : > { %v12092_v39 = vld [vmem:[#allocation3 + $0x10] sm:$0xff]  ;;  %v12019_v32 = vpop.permute.xlu0 %12018 }
 0xcd4   : > { %v12108_v17 = vadd.f32 %v12092_v39, %v12076_v7  ;;  %12024 = vst.msk [vmem:[#allocation3 + $0x18] sm:$0xff] %vm6169_vm8, %v12019_v32 }
 0xcd5   : > { %v12100_v50 = vld [vmem:[#allocation3 + $0x50] sm:$0xff]  ;;  %v12021_v20 = vpop.permute.xlu1 %12020  ;;  %v12143_v43 = vld [vmem:[#allocation2 + $0x8] sm:$0xff] (!%p13200_p8) }
 0xcd6   : > { %12124 = vst [vmem:[#allocation2 + $0x10] sm:$0xff] %v12108_v17  ;;  %v12116_v23 = vadd.f32 %v12100_v50, %v12084_v13  ;;  %12025 = vst.msk [vmem:[#allocation3 + $0x58] sm:$0xff] %vm6169_vm8, %v12021_v20 }
 0xcd7   : > { %12159 = vst [vmem:[%s15361_s28 + $0x8] sm:$0xff] (!%p13200_p8), %v12143_v43  ;;  %v12151_v6 = vld [vmem:[#allocation2 + $0x48] sm:$0xff] (!%p13200_p8) }
 0xcd8   : > { %12132 = vst [vmem:[#allocation2 + $0x50] sm:$0xff] %v12116_v23  ;;  %12167 = vst [vmem:[%s15361_s28 + $0x48] sm:$0xff] (!%p13200_p8), %v12151_v6 }
 0xcdb   : > { %v12093_v0 = vld [vmem:[#allocation3 + $0x18] sm:$0xff]  ;;  %v12031_v57 = vpop.permute.xlu0 %12030 }
 0xcdc   : > { %v12109_v61 = vadd.f32 %v12093_v0, %v12077_v16  ;;  %12036 = vst.msk [vmem:[#allocation3 + $0x20] sm:$0xff] %vm6169_vm8, %v12031_v57 }
 0xcdd   : > { %v12101_v38 = vld [vmem:[#allocation3 + $0x58] sm:$0xff]  ;;  %v12033_v26 = vpop.permute.xlu1 %12032  ;;  %v12144_v44 = vld [vmem:[#allocation2 + $0x10] sm:$0xff] (!%p13200_p8) }
 0xcde   : > { %12125 = vst [vmem:[#allocation2 + $0x18] sm:$0xff] %v12109_v61  ;;  %v12117_v11 = vadd.f32 %v12101_v38, %v12085_v63  ;;  %12037 = vst.msk [vmem:[#allocation3 + $0x60] sm:$0xff] %vm6169_vm8, %v12033_v26 }
 0xcdf   : > { %12160 = vst [vmem:[%s15361_s28 + $0x10] sm:$0xff] (!%p13200_p8), %v12144_v44  ;;  %v12152_v2 = vld [vmem:[#allocation2 + $0x50] sm:$0xff] (!%p13200_p8) }
 0xce0   : > { %12133 = vst [vmem:[#allocation2 + $0x58] sm:$0xff] %v12117_v11  ;;  %12168 = vst [vmem:[%s15361_s28 + $0x50] sm:$0xff] (!%p13200_p8), %v12152_v2 }
 0xce3   : > { %v12094_v19 = vld [vmem:[#allocation3 + $0x20] sm:$0xff]  ;;  %v12043_v18 = vpop.permute.xlu0 %12042 }
 0xce4   : > { %v12110_v4 = vadd.f32 %v12094_v19, %v12078_v48  ;;  %12048 = vst.msk [vmem:[#allocation3 + $0x28] sm:$0xff] %vm6169_vm8, %v12043_v18 }
 0xce5   : > { %v12102_v21 = vld [vmem:[#allocation3 + $0x60] sm:$0xff]  ;;  %v12045_v36 = vpop.permute.xlu1 %12044  ;;  %v12145_v37 = vld [vmem:[#allocation2 + $0x18] sm:$0xff] (!%p13200_p8) }
 0xce6   : > { %12126 = vst [vmem:[#allocation2 + $0x20] sm:$0xff] %v12110_v4  ;;  %v12118_v24 = vadd.f32 %v12102_v21, %v12086_v55  ;;  %12049 = vst.msk [vmem:[#allocation3 + $0x68] sm:$0xff] %vm6169_vm8, %v12045_v36 }
 0xce7   : > { %12161 = vst [vmem:[%s15361_s28 + $0x18] sm:$0xff] (!%p13200_p8), %v12145_v37  ;;  %v12153_v10 = vld [vmem:[#allocation2 + $0x58] sm:$0xff] (!%p13200_p8) }
 0xce8   : > { %12134 = vst [vmem:[#allocation2 + $0x60] sm:$0xff] %v12118_v24  ;;  %12169 = vst [vmem:[%s15361_s28 + $0x58] sm:$0xff] (!%p13200_p8), %v12153_v10 }
 0xceb   : > { %v12095_v31 = vld [vmem:[#allocation3 + $0x28] sm:$0xff]  ;;  %v12055_v30 = vpop.permute.xlu0 %12054 }
 0xcec   : > { %v12111_v58 = vadd.f32 %v12095_v31, %v12079_v47  ;;  %12060 = vst.msk [vmem:[#allocation3 + $0x30] sm:$0xff] %vm6169_vm8, %v12055_v30 }
 0xced   : > { %v12103_v1 = vld [vmem:[#allocation3 + $0x68] sm:$0xff]  ;;  %v12057_v46 = vpop.permute.xlu1 %12056  ;;  %v12146_v22 = vld [vmem:[#allocation2 + $0x20] sm:$0xff] (!%p13200_p8) }
 0xcee   : > { %12127 = vst [vmem:[#allocation2 + $0x28] sm:$0xff] %v12111_v58  ;;  %v12119_v15 = vadd.f32 %v12103_v1, %v12087_v56  ;;  %12061 = vst.msk [vmem:[#allocation3 + $0x70] sm:$0xff] %vm6169_vm8, %v12057_v46 }
 0xcef   : > { %12162 = vst [vmem:[%s15361_s28 + $0x20] sm:$0xff] (!%p13200_p8), %v12146_v22  ;;  %v12154_v5 = vld [vmem:[#allocation2 + $0x60] sm:$0xff] (!%p13200_p8) }
 0xcf0   : > { %12135 = vst [vmem:[#allocation2 + $0x68] sm:$0xff] %v12119_v15  ;;  %12170 = vst [vmem:[%s15361_s28 + $0x60] sm:$0xff] (!%p13200_p8), %v12154_v5 }
 0xcf3   : > { %v12096_v28 = vld [vmem:[#allocation3 + $0x30] sm:$0xff]  ;;  %v12067_v35 = vpop.permute.xlu0 %12066 }
 0xcf4   : > { %v12112_v41 = vadd.f32 %v12096_v28, %v12080_v52  ;;  %12072 = vst.msk [vmem:[#allocation3 + $0x38] sm:$0xff] %vm6169_vm8, %v12067_v35 }
 0xcf5   : > { %v12104_v59 = vld [vmem:[#allocation3 + $0x70] sm:$0xff]  ;;  %v12069_v33 = vpop.permute.xlu1 %12068  ;;  %v12147_v34 = vld [vmem:[#allocation2 + $0x28] sm:$0xff] (!%p13200_p8) }
 0xcf6   : > { %12128 = vst [vmem:[#allocation2 + $0x30] sm:$0xff] %v12112_v41  ;;  %v12120_v3 = vadd.f32 %v12104_v59, %v12088_v27  ;;  %12073 = vst.msk [vmem:[#allocation3 + $0x78] sm:$0xff] %vm6169_vm8, %v12069_v33 }
 0xcf7   : > { %12163 = vst [vmem:[%s15361_s28 + $0x28] sm:$0xff] (!%p13200_p8), %v12147_v34  ;;  %v12155_v8 = vld [vmem:[#allocation2 + $0x68] sm:$0xff] (!%p13200_p8) }
 0xcf8   : > { %12136 = vst [vmem:[#allocation2 + $0x70] sm:$0xff] %v12120_v3  ;;  %12171 = vst [vmem:[%s15361_s28 + $0x68] sm:$0xff] (!%p13200_p8), %v12155_v8 }
 0xcfa   : > { %12141 = sbr.rel (%p13200_p8) target bundleno = 3337 (0xd09), region = 48 }
 0xcfb   : > { %v12097_v53 = vld [vmem:[#allocation3 + $0x38] sm:$0xff] }
 0xcfc   : > { %v12113_v49 = vadd.f32 %v12097_v53, %v12081_v60 }
 0xcfd   : > { %v12105_v62 = vld [vmem:[#allocation3 + $0x78] sm:$0xff]  ;;  %v12148_v9 = vld [vmem:[#allocation2 + $0x30] sm:$0xff] (!%p13200_p8) }
 0xcfe   : > { %12129 = vst [vmem:[#allocation2 + $0x38] sm:$0xff] %v12113_v49  ;;  %v12121_v29 = vadd.f32 %v12105_v62, %v12089_v51  ;;  %12164 = vst [vmem:[%s15361_s28 + $0x30] sm:$0xff] (!%p13200_p8), %v12148_v9 }
 0xcff   : > { %v12156_v25 = vld [vmem:[#allocation2 + $0x70] sm:$0xff] (!%p13200_p8) }
 0xd00   : > { %12137 = vst [vmem:[#allocation2 + $0x78] sm:$0xff] %v12121_v29  ;;  %12172 = vst [vmem:[%s15361_s28 + $0x70] sm:$0xff] (!%p13200_p8), %v12156_v25 }
 0xd05   : > { %v12149_v42 = vld [vmem:[#allocation2 + $0x38] sm:$0xff] }
 0xd06   : > { %12165 = vst [vmem:[%s15361_s28 + $0x38] sm:$0xff] %v12149_v42 }
 0xd07   : > { %v12157_v40 = vld [vmem:[#allocation2 + $0x78] sm:$0xff] }
 0xd08   : > { %12173 = vst [vmem:[%s15361_s28 + $0x78] sm:$0xff] %v12157_v40 }
 0xd09 PF: > { %s15_s22 = sadd.s32 1, %s15263_s22   ;;  %s18362_s18 = smov %s15255_s20 }
 0xd0a   : > { %p12_p9 = scmp.ge.s32.totalorder %s15_s22, 10   ;;  %s18363_s19 = smov %s15259_s21 }
 0xd0b   : > { %s18364_s20 = smov %s18367_s23  ;;  %s18365_s21 = smov %s18371_s24 }
 0xd0c   :  { %14 = sbr.rel (!%p12_p9) target bundleno = 3 (0x3), region = 122 }

</bundles_post_ra>
